<compile_context>
chip_gen: v6e
topology: v6e:2x2x1
jax: 0.10.0
libtpu: 0.0.40
codegen_flags: <defaults>
</compile_context>

<pallas_src>
import math

import jax
import jax.numpy as jnp
from jax.experimental import pallas as pl
from jax.experimental.pallas import tpu as pltpu


# ----------------------------------------------------------------------------
# Fused kernel: full encoder (L bidirectional GRU layers) + decoder + Linear.
# All sizes are static Python ints; the time recurrences are unrolled.
# ----------------------------------------------------------------------------
def make_seq2seq_kernel(*, T, T_dec, Bp, H, O, L, Fin):
    Hd = 2 * H

    def kernel(x_ref, lens_ref,
               enc_wih_ref, enc_whh_ref, enc_bi_ref, enc_bhn_ref,
               dec_whh_ref, dec_bi_ref, dec_bhn_ref, dec_wout_ref, dec_bout_ref,
               enc_h_ref, dec_out_ref,
               seq_a, seq_b, dec_h):
        lens = lens_ref[...]                                     # (Bp, 1) float32

        # If the stacked input width exceeds 2H, the extra columns of the layer
        # buffers are never written -> zero them so the (zero) weight rows never
        # see uninitialized VMEM.
        if Fin > 2 * H and L > 1:
            seq_a[...] = jnp.zeros((T * Bp, Fin), jnp.float32)
            seq_b[...] = jnp.zeros((T * Bp, Fin), jnp.float32)

        def gru_direction(x_all, wih, whh, bi, bhn, *, reverse, out_buf, out_col):
            # Hoisted input projection: ONE MXU matmul for the whole sequence.
            gi_all = jnp.dot(x_all, wih, preferred_element_type=jnp.float32) + bi
            h = jnp.zeros((Bp, H), jnp.float32)
            steps = range(T - 1, -1, -1) if reverse else range(T)
            for t in steps:                                      # static unroll
                gi = gi_all[t * Bp:(t + 1) * Bp, :]
                gh = jnp.dot(h, whh, preferred_element_type=jnp.float32)
                r = jax.nn.sigmoid(gi[:, 0:H] + gh[:, 0:H])
                z = jax.nn.sigmoid(gi[:, H:2 * H] + gh[:, H:2 * H])
                n = jnp.tanh(gi[:, 2 * H:3 * H] + r * (gh[:, 2 * H:3 * H] + bhn))
                h_new = (1.0 - z) * n + z * h
                # pack_padded_sequence: freeze hidden once t >= seq_len[b]
                h = jnp.where(lens > t, h_new, h)
                if out_buf is not None:
                    out_buf[t * Bp:(t + 1) * Bp, out_col:out_col + H] = h
            return h

        # ------------------ Encoder: L bidirectional GRU layers ------------------
        layer_in = x_ref[...]                                    # (T*Bp, Fin)
        bufs = (seq_a, seq_b)
        h_f = h_b = None
        for l in range(L):
            out_buf = None if l == L - 1 else bufs[l % 2]        # last layer: only h_n needed
            h_f = gru_direction(layer_in, enc_wih_ref[2 * l + 0], enc_whh_ref[2 * l + 0],
                                enc_bi_ref[2 * l + 0], enc_bhn_ref[2 * l + 0],
                                reverse=False, out_buf=out_buf, out_col=0)
            h_b = gru_direction(layer_in, enc_wih_ref[2 * l + 1], enc_whh_ref[2 * l + 1],
                                enc_bi_ref[2 * l + 1], enc_bhn_ref[2 * l + 1],
                                reverse=True, out_buf=out_buf, out_col=H)
            if out_buf is not None:
                layer_in = out_buf[...]                          # (T*Bp, 2H[+pad])

        # encoder_hidden = cat(hidden[-2], hidden[-1]) -> (Bp, 2H)
        enc_h_ref[:, 0:H] = h_f
        enc_h_ref[:, H:2 * H] = h_b

        # ------------------ Decoder: zero-input GRU, fused output proj -----------
        dec_whh = dec_whh_ref[...]
        dec_bi = dec_bi_ref[...]                                 # gi for a zero input
        dec_bhn = dec_bhn_ref[...]
        h = enc_h_ref[...]                                       # (Bp, Hd)
        for t in range(T_dec):                                   # static unroll
            gh = jnp.dot(h, dec_whh, preferred_element_type=jnp.float32)
            r = jax.nn.sigmoid(gh[:, 0:Hd] + dec_bi[:, 0:Hd])
            z = jax.nn.sigmoid(gh[:, Hd:2 * Hd] + dec_bi[:, Hd:2 * Hd])
            n = jnp.tanh(dec_bi[:, 2 * Hd:3 * Hd] + r * (gh[:, 2 * Hd:3 * Hd] + dec_bhn))
            h = (1.0 - z) * n + z * h
            dec_h[t * Bp:(t + 1) * Bp, :] = h
        # one batched output projection instead of T_dec tiny matmuls
        y = jnp.dot(dec_h[...], dec_wout_ref[...],
                    preferred_element_type=jnp.float32) + dec_bout_ref[...]
        dec_out_ref[...] = y.astype(dec_out_ref.dtype)

    return kernel


# ----------------------------------------------------------------------------
# Parameters. PyTorch GRU weights are stored transposed: weight_ih (3H, in) ->
# (in, 3H), gate order [r, z, n]. Encoder weights for all layers/directions are
# stacked (layer-0 W_ih zero-padded to the common input width Fin). Biases are
# pre-summed for the r/z gates; b_hh[n] kept separate (needed inside r * (...)).
# ----------------------------------------------------------------------------
def init_params(key, en_input_size, en_hidden_size, output_size, en_num_layers):
    H = en_hidden_size
    Hd = 2 * H
    L = en_num_layers
    Fin = max(en_input_size, 2 * H)

    def u(k, shape, bound):
        return jax.random.uniform(k, shape, jnp.float32, -bound, bound)

    be = 1.0 / math.sqrt(H)
    enc_wih = jnp.zeros((2 * L, Fin, 3 * H), jnp.float32)
    enc_whh = jnp.zeros((2 * L, H, 3 * H), jnp.float32)
    enc_bi = jnp.zeros((2 * L, 1, 3 * H), jnp.float32)
    enc_bhn = jnp.zeros((2 * L, 1, H), jnp.float32)
    for l in range(L):
        in_sz = en_input_size if l == 0 else 2 * H
        for d in range(2):                       # 0 = forward, 1 = backward
            idx = 2 * l + d
            key, k1, k2, k3, k4 = jax.random.split(key, 5)
            wih = u(k1, (in_sz, 3 * H), be)
            whh = u(k2, (H, 3 * H), be)
            b_ih = u(k3, (1, 3 * H), be)
            b_hh = u(k4, (1, 3 * H), be)
            enc_wih = enc_wih.at[idx, :in_sz, :].set(wih)
            enc_whh = enc_whh.at[idx].set(whh)
            bi = jnp.concatenate(
                [b_ih[:, :2 * H] + b_hh[:, :2 * H], b_ih[:, 2 * H:]], axis=-1)
            enc_bi = enc_bi.at[idx].set(bi)
            enc_bhn = enc_bhn.at[idx].set(b_hh[:, 2 * H:])

    bd = 1.0 / math.sqrt(Hd)
    key, k1, k2, k3, k4, k5 = jax.random.split(key, 6)
    # Decoder GRU input weights are omitted: decoder inputs are all zeros
    # (teacher_force=False, fix_state=False), so W_ih @ 0 contributes nothing.
    dec_whh = u(k1, (Hd, 3 * Hd), bd)
    d_b_ih = u(k2, (1, 3 * Hd), bd)
    d_b_hh = u(k3, (1, 3 * Hd), bd)
    dec_bi = jnp.concatenate(
        [d_b_ih[:, :2 * Hd] + d_b_hh[:, :2 * Hd], d_b_ih[:, 2 * Hd:]], axis=-1)
    dec_bhn = d_b_hh[:, 2 * Hd:]
    dec_wout = u(k4, (Hd, output_size), bd)
    dec_bout = u(k5, (1, output_size), bd)

    return dict(
        H=H, Hd=Hd, L=L, Fin=Fin, I=en_input_size, O=output_size,
        enc_wih=enc_wih, enc_whh=enc_whh, enc_bi=enc_bi, enc_bhn=enc_bhn,
        dec_whh=dec_whh, dec_bi=dec_bi, dec_bhn=dec_bhn,
        dec_wout=dec_wout, dec_bout=dec_bout,
    )


def _full_spec(shape):
    n = len(shape)
    return pl.BlockSpec(shape, lambda i: (0,) * n)


# ----------------------------------------------------------------------------
# seq2seq.forward (default flags)
# ----------------------------------------------------------------------------
def seq2seq_forward(params, input_tensor, seq_len):
    # input_tensor: (B, T, en_input_size), batch_first like PyTorch
    B, T, I = input_tensor.shape
    H, L, O, Fin = params["H"], params["L"], params["O"], params["Fin"]
    Hd = 2 * H
    Bp = ((B + 7) // 8) * 8                      # pad batch to a full sublane tile
    T_dec = int(max(seq_len))

    lens = jnp.zeros((Bp, 1), jnp.float32).at[:B, 0].set(
        jnp.asarray(seq_len, jnp.float32))

    x = jnp.transpose(input_tensor.astype(jnp.float32), (1, 0, 2))       # (T, B, I)
    x_pad = jnp.zeros((T, Bp, Fin), jnp.float32).at[:, :B, :I].set(x)
    x2d = x_pad.reshape(T * Bp, Fin)                                     # time-major rows

    kernel = make_seq2seq_kernel(T=T, T_dec=T_dec, Bp=Bp, H=H, O=O, L=L, Fin=Fin)

    args = (x2d, lens,
            params["enc_wih"], params["enc_whh"], params["enc_bi"], params["enc_bhn"],
            params["dec_whh"], params["dec_bi"], params["dec_bhn"],
            params["dec_wout"], params["dec_bout"])

    enc_h, dec_out = pl.pallas_call(
        kernel,
        grid=(1,),
        in_specs=[_full_spec(a.shape) for a in args],
        out_specs=[_full_spec((Bp, 2 * H)), _full_spec((T_dec * Bp, O))],
        out_shape=[jax.ShapeDtypeStruct((Bp, 2 * H), jnp.float32),
                   jax.ShapeDtypeStruct((T_dec * Bp, O), jnp.float32)],
        scratch_shapes=[pltpu.VMEM((T * Bp, Fin), jnp.float32),
                        pltpu.VMEM((T * Bp, Fin), jnp.float32),
                        pltpu.VMEM((T_dec * Bp, Hd), jnp.float32)],
        compiler_params=pltpu.CompilerParams(dimension_semantics=("arbitrary",)),
    )(*args)

    encoder_hidden = enc_h[:B][None, :, :]                               # (1, B, 2H)
    decoder_output = jnp.transpose(
        dec_out.reshape(T_dec, Bp, O)[:, :B, :], (1, 0, 2))              # (B, T_dec, O)
    return encoder_hidden, decoder_output


if __name__ == "__main__":
    B, T = 2, 8
    en_input_size = 8
    en_hidden_size = 16
    output_size = 8            # decoder input/output feature size == en_input_size
    en_num_layers = 3
    seq_len = [8, 6]           # descending, as pack_padded_sequence expects

    key = jax.random.PRNGKey(0)
    kx, kp = jax.random.split(key)
    x = jax.random.normal(kx, (B, T, en_input_size), jnp.float32)
    pad = (jnp.arange(T)[None, :, None] < jnp.asarray(seq_len)[:, None, None]).astype(jnp.float32)
    x = x * pad                # padded positions are zeros, like pad_sequence

    params = init_params(kp, en_input_size, en_hidden_size, output_size, en_num_layers)

    enc_hidden, dec_output = seq2seq_forward(params, x, seq_len)
    enc_hidden, dec_output = jax.block_until_ready((enc_hidden, dec_output))

    assert enc_hidden.shape == (1, B, 2 * en_hidden_size)
    assert dec_output.shape == (B, max(seq_len), output_size)
    assert bool(jnp.all(jnp.isfinite(enc_hidden))) and bool(jnp.all(jnp.isfinite(dec_output)))
    print("KERNEL_OK")
</pallas_src>

<mosaic_0001>
module attributes {stable_mosaic.version = 11 : i64} {
  func.func @kernel(%arg0: i32, %arg1: memref<64x32xf32, #tpu.memory_space<vmem>>, %arg2: memref<8x1xf32, #tpu.memory_space<vmem>>, %arg3: memref<6x32x48xf32, #tpu.memory_space<vmem>>, %arg4: memref<6x16x48xf32, #tpu.memory_space<vmem>>, %arg5: memref<6x1x48xf32, #tpu.memory_space<vmem>>, %arg6: memref<6x1x16xf32, #tpu.memory_space<vmem>>, %arg7: memref<32x96xf32, #tpu.memory_space<vmem>>, %arg8: memref<1x96xf32, #tpu.memory_space<vmem>>, %arg9: memref<1x32xf32, #tpu.memory_space<vmem>>, %arg10: memref<32x8xf32, #tpu.memory_space<vmem>>, %arg11: memref<1x8xf32, #tpu.memory_space<vmem>>, %arg12: memref<8x32xf32, #tpu.memory_space<vmem>>, %arg13: memref<64x8xf32, #tpu.memory_space<vmem>>, %arg14: memref<64x32xf32, #tpu.memory_space<vmem>>, %arg15: memref<64x32xf32, #tpu.memory_space<vmem>>, %arg16: memref<64x32xf32, #tpu.memory_space<vmem>>) attributes {dimension_semantics = [#tpu.dimension_semantics<arbitrary>], iteration_bounds = array<i64: 1>, scalar_prefetch = 0 : i64, scratch_operands = 3 : i64, tpu.core_type = #tpu.core_type<tc>, window_params = [{pipeline_mode = #tpu.pipeline_mode<synchronous>, transform_indices = @transform_0, window_bounds = array<i64: 64, 32>}, {pipeline_mode = #tpu.pipeline_mode<synchronous>, transform_indices = @transform_1, window_bounds = array<i64: 8, 1>}, {pipeline_mode = #tpu.pipeline_mode<synchronous>, transform_indices = @transform_2, window_bounds = array<i64: 6, 32, 48>}, {pipeline_mode = #tpu.pipeline_mode<synchronous>, transform_indices = @transform_3, window_bounds = array<i64: 6, 16, 48>}, {pipeline_mode = #tpu.pipeline_mode<synchronous>, transform_indices = @transform_4, window_bounds = array<i64: 6, 1, 48>}, {pipeline_mode = #tpu.pipeline_mode<synchronous>, transform_indices = @transform_5, window_bounds = array<i64: 6, 1, 16>}, {pipeline_mode = #tpu.pipeline_mode<synchronous>, transform_indices = @transform_6, window_bounds = array<i64: 32, 96>}, {pipeline_mode = #tpu.pipeline_mode<synchronous>, transform_indices = @transform_7, window_bounds = array<i64: 1, 96>}, {pipeline_mode = #tpu.pipeline_mode<synchronous>, transform_indices = @transform_8, window_bounds = array<i64: 1, 32>}, {pipeline_mode = #tpu.pipeline_mode<synchronous>, transform_indices = @transform_9, window_bounds = array<i64: 32, 8>}, {pipeline_mode = #tpu.pipeline_mode<synchronous>, transform_indices = @transform_10, window_bounds = array<i64: 1, 8>}, {pipeline_mode = #tpu.pipeline_mode<synchronous>, transform_indices = @transform_11, window_bounds = array<i64: 8, 32>}, {pipeline_mode = #tpu.pipeline_mode<synchronous>, transform_indices = @transform_12, window_bounds = array<i64: 64, 8>}]} {
    %c0 = arith.constant 0 : index
    %c0_0 = arith.constant 0 : index
    %0 = vector.load %arg2[%c0, %c0_0] : memref<8x1xf32, #tpu.memory_space<vmem>>, vector<8x1xf32>
    %c0_1 = arith.constant 0 : index
    %c0_2 = arith.constant 0 : index
    %1 = vector.load %arg1[%c0_1, %c0_2] : memref<64x32xf32, #tpu.memory_space<vmem>>, vector<64x32xf32>
    %c0_3 = arith.constant 0 : index
    %c0_4 = arith.constant 0 : index
    %c0_5 = arith.constant 0 : index
    %2 = vector.load %arg3[%c0_3, %c0_4, %c0_5] : memref<6x32x48xf32, #tpu.memory_space<vmem>>, vector<1x32x48xf32>
    %3 = vector.shape_cast %2 : vector<1x32x48xf32> to vector<32x48xf32>
    %c0_6 = arith.constant 0 : index
    %c0_7 = arith.constant 0 : index
    %c0_8 = arith.constant 0 : index
    %4 = vector.load %arg4[%c0_6, %c0_7, %c0_8] : memref<6x16x48xf32, #tpu.memory_space<vmem>>, vector<1x16x48xf32>
    %5 = vector.shape_cast %4 : vector<1x16x48xf32> to vector<16x48xf32>
    %c0_9 = arith.constant 0 : index
    %c0_10 = arith.constant 0 : index
    %c0_11 = arith.constant 0 : index
    %6 = vector.load %arg5[%c0_9, %c0_10, %c0_11] : memref<6x1x48xf32, #tpu.memory_space<vmem>>, vector<1x1x48xf32>
    %7 = vector.shape_cast %6 : vector<1x1x48xf32> to vector<1x48xf32>
    %c0_12 = arith.constant 0 : index
    %c0_13 = arith.constant 0 : index
    %c0_14 = arith.constant 0 : index
    %8 = vector.load %arg6[%c0_12, %c0_13, %c0_14] : memref<6x1x16xf32, #tpu.memory_space<vmem>>, vector<1x1x16xf32>
    %9 = vector.shape_cast %8 : vector<1x1x16xf32> to vector<1x16xf32>
    %cst = arith.constant dense<0.000000e+00> : vector<64x48xf32>
    %10 = tpu.matmul %1, %3, %cst {dimension_numbers = #tpu.dot_dimension_numbers<[1], [0], [0], [1], [0, 0, 1, 1], [], []>} : vector<64x32xf32>, vector<32x48xf32>, vector<64x48xf32> -> vector<64x48xf32>
    %11 = vector.broadcast %7 : vector<1x48xf32> to vector<64x48xf32>
    %12 = arith.addf %10, %11 : vector<64x48xf32>
    %cst_15 = arith.constant 0.000000e+00 : f32
    %13 = vector.broadcast %cst_15 : f32 to vector<8x16xf32>
    %14 = vector.extract_strided_slice %12 {offsets = [0, 0], sizes = [8, 48], strides = [1, 1]} : vector<64x48xf32> to vector<8x48xf32>
    %cst_16 = arith.constant dense<0.000000e+00> : vector<8x48xf32>
    %15 = tpu.matmul %13, %5, %cst_16 {dimension_numbers = #tpu.dot_dimension_numbers<[1], [0], [0], [1], [0, 0, 1, 1], [], []>} : vector<8x16xf32>, vector<16x48xf32>, vector<8x48xf32> -> vector<8x48xf32>
    %16 = vector.extract_strided_slice %14 {offsets = [0, 0], sizes = [8, 16], strides = [1, 1]} : vector<8x48xf32> to vector<8x16xf32>
    %17 = vector.extract_strided_slice %15 {offsets = [0, 0], sizes = [8, 16], strides = [1, 1]} : vector<8x48xf32> to vector<8x16xf32>
    %18 = arith.addf %16, %17 : vector<8x16xf32>
    %19 = arith.negf %18 : vector<8x16xf32>
    %20 = math.exp %19 : vector<8x16xf32>
    %cst_17 = arith.constant 1.000000e+00 : f32
    %21 = vector.broadcast %cst_17 : f32 to vector<8x16xf32>
    %22 = arith.addf %21, %20 : vector<8x16xf32>
    %23 = arith.divf %21, %22 : vector<8x16xf32>
    %24 = vector.extract_strided_slice %14 {offsets = [0, 16], sizes = [8, 16], strides = [1, 1]} : vector<8x48xf32> to vector<8x16xf32>
    %25 = vector.extract_strided_slice %15 {offsets = [0, 16], sizes = [8, 16], strides = [1, 1]} : vector<8x48xf32> to vector<8x16xf32>
    %26 = arith.addf %24, %25 : vector<8x16xf32>
    %27 = arith.negf %26 : vector<8x16xf32>
    %28 = math.exp %27 : vector<8x16xf32>
    %cst_18 = arith.constant 1.000000e+00 : f32
    %29 = vector.broadcast %cst_18 : f32 to vector<8x16xf32>
    %30 = arith.addf %29, %28 : vector<8x16xf32>
    %31 = arith.divf %29, %30 : vector<8x16xf32>
    %32 = vector.extract_strided_slice %14 {offsets = [0, 32], sizes = [8, 16], strides = [1, 1]} : vector<8x48xf32> to vector<8x16xf32>
    %33 = vector.extract_strided_slice %15 {offsets = [0, 32], sizes = [8, 16], strides = [1, 1]} : vector<8x48xf32> to vector<8x16xf32>
    %34 = vector.broadcast %9 : vector<1x16xf32> to vector<8x16xf32>
    %35 = arith.addf %33, %34 : vector<8x16xf32>
    %36 = arith.mulf %23, %35 : vector<8x16xf32>
    %37 = arith.addf %32, %36 : vector<8x16xf32>
    %38 = math.tanh %37 : vector<8x16xf32>
    %cst_19 = arith.constant 1.000000e+00 : f32
    %39 = vector.broadcast %cst_19 : f32 to vector<8x16xf32>
    %40 = arith.subf %39, %31 : vector<8x16xf32>
    %41 = arith.mulf %40, %38 : vector<8x16xf32>
    %42 = arith.mulf %31, %13 : vector<8x16xf32>
    %43 = arith.addf %41, %42 : vector<8x16xf32>
    %cst_20 = arith.constant 0.000000e+00 : f32
    %44 = vector.broadcast %cst_20 : f32 to vector<8x1xf32>
    %45 = arith.cmpf ogt, %0, %44 : vector<8x1xf32>
    %46 = vector.shape_cast %45 : vector<8x1xi1> to vector<8x1xi1>
    %47 = vector.broadcast %46 : vector<8x1xi1> to vector<8x16xi1>
    %48 = arith.select %47, %43, %13 : vector<8x16xi1>, vector<8x16xf32>
    %c0_21 = arith.constant 0 : index
    %c0_22 = arith.constant 0 : index
    %49 = vector.load %arg14[%c0_21, %c0_22] : memref<64x32xf32, #tpu.memory_space<vmem>>, vector<8x16xf32>
    tpu.vector_store %arg14[%c0_21, %c0_22], %48 {strides = array<i32>} : memref<64x32xf32, #tpu.memory_space<vmem>>, vector<8x16xf32>,
    %50 = vector.extract_strided_slice %12 {offsets = [8, 0], sizes = [8, 48], strides = [1, 1]} : vector<64x48xf32> to vector<8x48xf32>
    %cst_23 = arith.constant dense<0.000000e+00> : vector<8x48xf32>
    %51 = tpu.matmul %48, %5, %cst_23 {dimension_numbers = #tpu.dot_dimension_numbers<[1], [0], [0], [1], [0, 0, 1, 1], [], []>} : vector<8x16xf32>, vector<16x48xf32>, vector<8x48xf32> -> vector<8x48xf32>
    %52 = vector.extract_strided_slice %50 {offsets = [0, 0], sizes = [8, 16], strides = [1, 1]} : vector<8x48xf32> to vector<8x16xf32>
    %53 = vector.extract_strided_slice %51 {offsets = [0, 0], sizes = [8, 16], strides = [1, 1]} : vector<8x48xf32> to vector<8x16xf32>
    %54 = arith.addf %52, %53 : vector<8x16xf32>
    %55 = arith.negf %54 : vector<8x16xf32>
    %56 = math.exp %55 : vector<8x16xf32>
    %cst_24 = arith.constant 1.000000e+00 : f32
    %57 = vector.broadcast %cst_24 : f32 to vector<8x16xf32>
    %58 = arith.addf %57, %56 : vector<8x16xf32>
    %59 = arith.divf %57, %58 : vector<8x16xf32>
    %60 = vector.extract_strided_slice %50 {offsets = [0, 16], sizes = [8, 16], strides = [1, 1]} : vector<8x48xf32> to vector<8x16xf32>
    %61 = vector.extract_strided_slice %51 {offsets = [0, 16], sizes = [8, 16], strides = [1, 1]} : vector<8x48xf32> to vector<8x16xf32>
    %62 = arith.addf %60, %61 : vector<8x16xf32>
    %63 = arith.negf %62 : vector<8x16xf32>
    %64 = math.exp %63 : vector<8x16xf32>
    %cst_25 = arith.constant 1.000000e+00 : f32
    %65 = vector.broadcast %cst_25 : f32 to vector<8x16xf32>
    %66 = arith.addf %65, %64 : vector<8x16xf32>
    %67 = arith.divf %65, %66 : vector<8x16xf32>
    %68 = vector.extract_strided_slice %50 {offsets = [0, 32], sizes = [8, 16], strides = [1, 1]} : vector<8x48xf32> to vector<8x16xf32>
    %69 = vector.extract_strided_slice %51 {offsets = [0, 32], sizes = [8, 16], strides = [1, 1]} : vector<8x48xf32> to vector<8x16xf32>
    %70 = vector.broadcast %9 : vector<1x16xf32> to vector<8x16xf32>
    %71 = arith.addf %69, %70 : vector<8x16xf32>
    %72 = arith.mulf %59, %71 : vector<8x16xf32>
    %73 = arith.addf %68, %72 : vector<8x16xf32>
    %74 = math.tanh %73 : vector<8x16xf32>
    %cst_26 = arith.constant 1.000000e+00 : f32
    %75 = vector.broadcast %cst_26 : f32 to vector<8x16xf32>
    %76 = arith.subf %75, %67 : vector<8x16xf32>
    %77 = arith.mulf %76, %74 : vector<8x16xf32>
    %78 = arith.mulf %67, %48 : vector<8x16xf32>
    %79 = arith.addf %77, %78 : vector<8x16xf32>
    %cst_27 = arith.constant 1.000000e+00 : f32
    %80 = vector.broadcast %cst_27 : f32 to vector<8x1xf32>
    %81 = arith.cmpf ogt, %0, %80 : vector<8x1xf32>
    %82 = vector.shape_cast %81 : vector<8x1xi1> to vector<8x1xi1>
    %83 = vector.broadcast %82 : vector<8x1xi1> to vector<8x16xi1>
    %84 = arith.select %83, %79, %48 : vector<8x16xi1>, vector<8x16xf32>
    %c8 = arith.constant 8 : index
    %c0_28 = arith.constant 0 : index
    %85 = vector.load %arg14[%c8, %c0_28] : memref<64x32xf32, #tpu.memory_space<vmem>>, vector<8x16xf32>
    tpu.vector_store %arg14[%c8, %c0_28], %84 {strides = array<i32>} : memref<64x32xf32, #tpu.memory_space<vmem>>, vector<8x16xf32>,
    %86 = vector.extract_strided_slice %12 {offsets = [16, 0], sizes = [8, 48], strides = [1, 1]} : vector<64x48xf32> to vector<8x48xf32>
    %cst_29 = arith.constant dense<0.000000e+00> : vector<8x48xf32>
    %87 = tpu.matmul %84, %5, %cst_29 {dimension_numbers = #tpu.dot_dimension_numbers<[1], [0], [0], [1], [0, 0, 1, 1], [], []>} : vector<8x16xf32>, vector<16x48xf32>, vector<8x48xf32> -> vector<8x48xf32>
    %88 = vector.extract_strided_slice %86 {offsets = [0, 0], sizes = [8, 16], strides = [1, 1]} : vector<8x48xf32> to vector<8x16xf32>
    %89 = vector.extract_strided_slice %87 {offsets = [0, 0], sizes = [8, 16], strides = [1, 1]} : vector<8x48xf32> to vector<8x16xf32>
    %90 = arith.addf %88, %89 : vector<8x16xf32>
    %91 = arith.negf %90 : vector<8x16xf32>
    %92 = math.exp %91 : vector<8x16xf32>
    %cst_30 = arith.constant 1.000000e+00 : f32
    %93 = vector.broadcast %cst_30 : f32 to vector<8x16xf32>
    %94 = arith.addf %93, %92 : vector<8x16xf32>
    %95 = arith.divf %93, %94 : vector<8x16xf32>
    %96 = vector.extract_strided_slice %86 {offsets = [0, 16], sizes = [8, 16], strides = [1, 1]} : vector<8x48xf32> to vector<8x16xf32>
    %97 = vector.extract_strided_slice %87 {offsets = [0, 16], sizes = [8, 16], strides = [1, 1]} : vector<8x48xf32> to vector<8x16xf32>
    %98 = arith.addf %96, %97 : vector<8x16xf32>
    %99 = arith.negf %98 : vector<8x16xf32>
    %100 = math.exp %99 : vector<8x16xf32>
    %cst_31 = arith.constant 1.000000e+00 : f32
    %101 = vector.broadcast %cst_31 : f32 to vector<8x16xf32>
    %102 = arith.addf %101, %100 : vector<8x16xf32>
    %103 = arith.divf %101, %102 : vector<8x16xf32>
    %104 = vector.extract_strided_slice %86 {offsets = [0, 32], sizes = [8, 16], strides = [1, 1]} : vector<8x48xf32> to vector<8x16xf32>
    %105 = vector.extract_strided_slice %87 {offsets = [0, 32], sizes = [8, 16], strides = [1, 1]} : vector<8x48xf32> to vector<8x16xf32>
    %106 = vector.broadcast %9 : vector<1x16xf32> to vector<8x16xf32>
    %107 = arith.addf %105, %106 : vector<8x16xf32>
    %108 = arith.mulf %95, %107 : vector<8x16xf32>
    %109 = arith.addf %104, %108 : vector<8x16xf32>
    %110 = math.tanh %109 : vector<8x16xf32>
    %cst_32 = arith.constant 1.000000e+00 : f32
    %111 = vector.broadcast %cst_32 : f32 to vector<8x16xf32>
    %112 = arith.subf %111, %103 : vector<8x16xf32>
    %113 = arith.mulf %112, %110 : vector<8x16xf32>
    %114 = arith.mulf %103, %84 : vector<8x16xf32>
    %115 = arith.addf %113, %114 : vector<8x16xf32>
    %cst_33 = arith.constant 2.000000e+00 : f32
    %116 = vector.broadcast %cst_33 : f32 to vector<8x1xf32>
    %117 = arith.cmpf ogt, %0, %116 : vector<8x1xf32>
    %118 = vector.shape_cast %117 : vector<8x1xi1> to vector<8x1xi1>
    %119 = vector.broadcast %118 : vector<8x1xi1> to vector<8x16xi1>
    %120 = arith.select %119, %115, %84 : vector<8x16xi1>, vector<8x16xf32>
    %c16 = arith.constant 16 : index
    %c0_34 = arith.constant 0 : index
    %121 = vector.load %arg14[%c16, %c0_34] : memref<64x32xf32, #tpu.memory_space<vmem>>, vector<8x16xf32>
    tpu.vector_store %arg14[%c16, %c0_34], %120 {strides = array<i32>} : memref<64x32xf32, #tpu.memory_space<vmem>>, vector<8x16xf32>,
    %122 = vector.extract_strided_slice %12 {offsets = [24, 0], sizes = [8, 48], strides = [1, 1]} : vector<64x48xf32> to vector<8x48xf32>
    %cst_35 = arith.constant dense<0.000000e+00> : vector<8x48xf32>
    %123 = tpu.matmul %120, %5, %cst_35 {dimension_numbers = #tpu.dot_dimension_numbers<[1], [0], [0], [1], [0, 0, 1, 1], [], []>} : vector<8x16xf32>, vector<16x48xf32>, vector<8x48xf32> -> vector<8x48xf32>
    %124 = vector.extract_strided_slice %122 {offsets = [0, 0], sizes = [8, 16], strides = [1, 1]} : vector<8x48xf32> to vector<8x16xf32>
    %125 = vector.extract_strided_slice %123 {offsets = [0, 0], sizes = [8, 16], strides = [1, 1]} : vector<8x48xf32> to vector<8x16xf32>
    %126 = arith.addf %124, %125 : vector<8x16xf32>
    %127 = arith.negf %126 : vector<8x16xf32>
    %128 = math.exp %127 : vector<8x16xf32>
    %cst_36 = arith.constant 1.000000e+00 : f32
    %129 = vector.broadcast %cst_36 : f32 to vector<8x16xf32>
    %130 = arith.addf %129, %128 : vector<8x16xf32>
    %131 = arith.divf %129, %130 : vector<8x16xf32>
    %132 = vector.extract_strided_slice %122 {offsets = [0, 16], sizes = [8, 16], strides = [1, 1]} : vector<8x48xf32> to vector<8x16xf32>
    %133 = vector.extract_strided_slice %123 {offsets = [0, 16], sizes = [8, 16], strides = [1, 1]} : vector<8x48xf32> to vector<8x16xf32>
    %134 = arith.addf %132, %133 : vector<8x16xf32>
    %135 = arith.negf %134 : vector<8x16xf32>
    %136 = math.exp %135 : vector<8x16xf32>
    %cst_37 = arith.constant 1.000000e+00 : f32
    %137 = vector.broadcast %cst_37 : f32 to vector<8x16xf32>
    %138 = arith.addf %137, %136 : vector<8x16xf32>
    %139 = arith.divf %137, %138 : vector<8x16xf32>
    %140 = vector.extract_strided_slice %122 {offsets = [0, 32], sizes = [8, 16], strides = [1, 1]} : vector<8x48xf32> to vector<8x16xf32>
    %141 = vector.extract_strided_slice %123 {offsets = [0, 32], sizes = [8, 16], strides = [1, 1]} : vector<8x48xf32> to vector<8x16xf32>
    %142 = vector.broadcast %9 : vector<1x16xf32> to vector<8x16xf32>
    %143 = arith.addf %141, %142 : vector<8x16xf32>
    %144 = arith.mulf %131, %143 : vector<8x16xf32>
    %145 = arith.addf %140, %144 : vector<8x16xf32>
    %146 = math.tanh %145 : vector<8x16xf32>
    %cst_38 = arith.constant 1.000000e+00 : f32
    %147 = vector.broadcast %cst_38 : f32 to vector<8x16xf32>
    %148 = arith.subf %147, %139 : vector<8x16xf32>
    %149 = arith.mulf %148, %146 : vector<8x16xf32>
    %150 = arith.mulf %139, %120 : vector<8x16xf32>
    %151 = arith.addf %149, %150 : vector<8x16xf32>
    %cst_39 = arith.constant 3.000000e+00 : f32
    %152 = vector.broadcast %cst_39 : f32 to vector<8x1xf32>
    %153 = arith.cmpf ogt, %0, %152 : vector<8x1xf32>
    %154 = vector.shape_cast %153 : vector<8x1xi1> to vector<8x1xi1>
    %155 = vector.broadcast %154 : vector<8x1xi1> to vector<8x16xi1>
    %156 = arith.select %155, %151, %120 : vector<8x16xi1>, vector<8x16xf32>
    %c24 = arith.constant 24 : index
    %c0_40 = arith.constant 0 : index
    %157 = vector.load %arg14[%c24, %c0_40] : memref<64x32xf32, #tpu.memory_space<vmem>>, vector<8x16xf32>
    tpu.vector_store %arg14[%c24, %c0_40], %156 {strides = array<i32>} : memref<64x32xf32, #tpu.memory_space<vmem>>, vector<8x16xf32>,
    %158 = vector.extract_strided_slice %12 {offsets = [32, 0], sizes = [8, 48], strides = [1, 1]} : vector<64x48xf32> to vector<8x48xf32>
    %cst_41 = arith.constant dense<0.000000e+00> : vector<8x48xf32>
    %159 = tpu.matmul %156, %5, %cst_41 {dimension_numbers = #tpu.dot_dimension_numbers<[1], [0], [0], [1], [0, 0, 1, 1], [], []>} : vector<8x16xf32>, vector<16x48xf32>, vector<8x48xf32> -> vector<8x48xf32>
    %160 = vector.extract_strided_slice %158 {offsets = [0, 0], sizes = [8, 16], strides = [1, 1]} : vector<8x48xf32> to vector<8x16xf32>
    %161 = vector.extract_strided_slice %159 {offsets = [0, 0], sizes = [8, 16], strides = [1, 1]} : vector<8x48xf32> to vector<8x16xf32>
    %162 = arith.addf %160, %161 : vector<8x16xf32>
    %163 = arith.negf %162 : vector<8x16xf32>
    %164 = math.exp %163 : vector<8x16xf32>
    %cst_42 = arith.constant 1.000000e+00 : f32
    %165 = vector.broadcast %cst_42 : f32 to vector<8x16xf32>
    %166 = arith.addf %165, %164 : vector<8x16xf32>
    %167 = arith.divf %165, %166 : vector<8x16xf32>
    %168 = vector.extract_strided_slice %158 {offsets = [0, 16], sizes = [8, 16], strides = [1, 1]} : vector<8x48xf32> to vector<8x16xf32>
    %169 = vector.extract_strided_slice %159 {offsets = [0, 16], sizes = [8, 16], strides = [1, 1]} : vector<8x48xf32> to vector<8x16xf32>
    %170 = arith.addf %168, %169 : vector<8x16xf32>
    %171 = arith.negf %170 : vector<8x16xf32>
    %172 = math.exp %171 : vector<8x16xf32>
    %cst_43 = arith.constant 1.000000e+00 : f32
    %173 = vector.broadcast %cst_43 : f32 to vector<8x16xf32>
    %174 = arith.addf %173, %172 : vector<8x16xf32>
    %175 = arith.divf %173, %174 : vector<8x16xf32>
    %176 = vector.extract_strided_slice %158 {offsets = [0, 32], sizes = [8, 16], strides = [1, 1]} : vector<8x48xf32> to vector<8x16xf32>
    %177 = vector.extract_strided_slice %159 {offsets = [0, 32], sizes = [8, 16], strides = [1, 1]} : vector<8x48xf32> to vector<8x16xf32>
    %178 = vector.broadcast %9 : vector<1x16xf32> to vector<8x16xf32>
    %179 = arith.addf %177, %178 : vector<8x16xf32>
    %180 = arith.mulf %167, %179 : vector<8x16xf32>
    %181 = arith.addf %176, %180 : vector<8x16xf32>
    %182 = math.tanh %181 : vector<8x16xf32>
    %cst_44 = arith.constant 1.000000e+00 : f32
    %183 = vector.broadcast %cst_44 : f32 to vector<8x16xf32>
    %184 = arith.subf %183, %175 : vector<8x16xf32>
    %185 = arith.mulf %184, %182 : vector<8x16xf32>
    %186 = arith.mulf %175, %156 : vector<8x16xf32>
    %187 = arith.addf %185, %186 : vector<8x16xf32>
    %cst_45 = arith.constant 4.000000e+00 : f32
    %188 = vector.broadcast %cst_45 : f32 to vector<8x1xf32>
    %189 = arith.cmpf ogt, %0, %188 : vector<8x1xf32>
    %190 = vector.shape_cast %189 : vector<8x1xi1> to vector<8x1xi1>
    %191 = vector.broadcast %190 : vector<8x1xi1> to vector<8x16xi1>
    %192 = arith.select %191, %187, %156 : vector<8x16xi1>, vector<8x16xf32>
    %c32 = arith.constant 32 : index
    %c0_46 = arith.constant 0 : index
    %193 = vector.load %arg14[%c32, %c0_46] : memref<64x32xf32, #tpu.memory_space<vmem>>, vector<8x16xf32>
    tpu.vector_store %arg14[%c32, %c0_46], %192 {strides = array<i32>} : memref<64x32xf32, #tpu.memory_space<vmem>>, vector<8x16xf32>,
    %194 = vector.extract_strided_slice %12 {offsets = [40, 0], sizes = [8, 48], strides = [1, 1]} : vector<64x48xf32> to vector<8x48xf32>
    %cst_47 = arith.constant dense<0.000000e+00> : vector<8x48xf32>
    %195 = tpu.matmul %192, %5, %cst_47 {dimension_numbers = #tpu.dot_dimension_numbers<[1], [0], [0], [1], [0, 0, 1, 1], [], []>} : vector<8x16xf32>, vector<16x48xf32>, vector<8x48xf32> -> vector<8x48xf32>
    %196 = vector.extract_strided_slice %194 {offsets = [0, 0], sizes = [8, 16], strides = [1, 1]} : vector<8x48xf32> to vector<8x16xf32>
    %197 = vector.extract_strided_slice %195 {offsets = [0, 0], sizes = [8, 16], strides = [1, 1]} : vector<8x48xf32> to vector<8x16xf32>
    %198 = arith.addf %196, %197 : vector<8x16xf32>
    %199 = arith.negf %198 : vector<8x16xf32>
    %200 = math.exp %199 : vector<8x16xf32>
    %cst_48 = arith.constant 1.000000e+00 : f32
    %201 = vector.broadcast %cst_48 : f32 to vector<8x16xf32>
    %202 = arith.addf %201, %200 : vector<8x16xf32>
    %203 = arith.divf %201, %202 : vector<8x16xf32>
    %204 = vector.extract_strided_slice %194 {offsets = [0, 16], sizes = [8, 16], strides = [1, 1]} : vector<8x48xf32> to vector<8x16xf32>
    %205 = vector.extract_strided_slice %195 {offsets = [0, 16], sizes = [8, 16], strides = [1, 1]} : vector<8x48xf32> to vector<8x16xf32>
    %206 = arith.addf %204, %205 : vector<8x16xf32>
    %207 = arith.negf %206 : vector<8x16xf32>
    %208 = math.exp %207 : vector<8x16xf32>
    %cst_49 = arith.constant 1.000000e+00 : f32
    %209 = vector.broadcast %cst_49 : f32 to vector<8x16xf32>
    %210 = arith.addf %209, %208 : vector<8x16xf32>
    %211 = arith.divf %209, %210 : vector<8x16xf32>
    %212 = vector.extract_strided_slice %194 {offsets = [0, 32], sizes = [8, 16], strides = [1, 1]} : vector<8x48xf32> to vector<8x16xf32>
    %213 = vector.extract_strided_slice %195 {offsets = [0, 32], sizes = [8, 16], strides = [1, 1]} : vector<8x48xf32> to vector<8x16xf32>
    %214 = vector.broadcast %9 : vector<1x16xf32> to vector<8x16xf32>
    %215 = arith.addf %213, %214 : vector<8x16xf32>
    %216 = arith.mulf %203, %215 : vector<8x16xf32>
    %217 = arith.addf %212, %216 : vector<8x16xf32>
    %218 = math.tanh %217 : vector<8x16xf32>
    %cst_50 = arith.constant 1.000000e+00 : f32
    %219 = vector.broadcast %cst_50 : f32 to vector<8x16xf32>
    %220 = arith.subf %219, %211 : vector<8x16xf32>
    %221 = arith.mulf %220, %218 : vector<8x16xf32>
    %222 = arith.mulf %211, %192 : vector<8x16xf32>
    %223 = arith.addf %221, %222 : vector<8x16xf32>
    %cst_51 = arith.constant 5.000000e+00 : f32
    %224 = vector.broadcast %cst_51 : f32 to vector<8x1xf32>
    %225 = arith.cmpf ogt, %0, %224 : vector<8x1xf32>
    %226 = vector.shape_cast %225 : vector<8x1xi1> to vector<8x1xi1>
    %227 = vector.broadcast %226 : vector<8x1xi1> to vector<8x16xi1>
    %228 = arith.select %227, %223, %192 : vector<8x16xi1>, vector<8x16xf32>
    %c40 = arith.constant 40 : index
    %c0_52 = arith.constant 0 : index
    %229 = vector.load %arg14[%c40, %c0_52] : memref<64x32xf32, #tpu.memory_space<vmem>>, vector<8x16xf32>
    tpu.vector_store %arg14[%c40, %c0_52], %228 {strides = array<i32>} : memref<64x32xf32, #tpu.memory_space<vmem>>, vector<8x16xf32>,
    %230 = vector.extract_strided_slice %12 {offsets = [48, 0], sizes = [8, 48], strides = [1, 1]} : vector<64x48xf32> to vector<8x48xf32>
    %cst_53 = arith.constant dense<0.000000e+00> : vector<8x48xf32>
    %231 = tpu.matmul %228, %5, %cst_53 {dimension_numbers = #tpu.dot_dimension_numbers<[1], [0], [0], [1], [0, 0, 1, 1], [], []>} : vector<8x16xf32>, vector<16x48xf32>, vector<8x48xf32> -> vector<8x48xf32>
    %232 = vector.extract_strided_slice %230 {offsets = [0, 0], sizes = [8, 16], strides = [1, 1]} : vector<8x48xf32> to vector<8x16xf32>
    %233 = vector.extract_strided_slice %231 {offsets = [0, 0], sizes = [8, 16], strides = [1, 1]} : vector<8x48xf32> to vector<8x16xf32>
    %234 = arith.addf %232, %233 : vector<8x16xf32>
    %235 = arith.negf %234 : vector<8x16xf32>
    %236 = math.exp %235 : vector<8x16xf32>
    %cst_54 = arith.constant 1.000000e+00 : f32
    %237 = vector.broadcast %cst_54 : f32 to vector<8x16xf32>
    %238 = arith.addf %237, %236 : vector<8x16xf32>
    %239 = arith.divf %237, %238 : vector<8x16xf32>
    %240 = vector.extract_strided_slice %230 {offsets = [0, 16], sizes = [8, 16], strides = [1, 1]} : vector<8x48xf32> to vector<8x16xf32>
    %241 = vector.extract_strided_slice %231 {offsets = [0, 16], sizes = [8, 16], strides = [1, 1]} : vector<8x48xf32> to vector<8x16xf32>
    %242 = arith.addf %240, %241 : vector<8x16xf32>
    %243 = arith.negf %242 : vector<8x16xf32>
    %244 = math.exp %243 : vector<8x16xf32>
    %cst_55 = arith.constant 1.000000e+00 : f32
    %245 = vector.broadcast %cst_55 : f32 to vector<8x16xf32>
    %246 = arith.addf %245, %244 : vector<8x16xf32>
    %247 = arith.divf %245, %246 : vector<8x16xf32>
    %248 = vector.extract_strided_slice %230 {offsets = [0, 32], sizes = [8, 16], strides = [1, 1]} : vector<8x48xf32> to vector<8x16xf32>
    %249 = vector.extract_strided_slice %231 {offsets = [0, 32], sizes = [8, 16], strides = [1, 1]} : vector<8x48xf32> to vector<8x16xf32>
    %250 = vector.broadcast %9 : vector<1x16xf32> to vector<8x16xf32>
    %251 = arith.addf %249, %250 : vector<8x16xf32>
    %252 = arith.mulf %239, %251 : vector<8x16xf32>
    %253 = arith.addf %248, %252 : vector<8x16xf32>
    %254 = math.tanh %253 : vector<8x16xf32>
    %cst_56 = arith.constant 1.000000e+00 : f32
    %255 = vector.broadcast %cst_56 : f32 to vector<8x16xf32>
    %256 = arith.subf %255, %247 : vector<8x16xf32>
    %257 = arith.mulf %256, %254 : vector<8x16xf32>
    %258 = arith.mulf %247, %228 : vector<8x16xf32>
    %259 = arith.addf %257, %258 : vector<8x16xf32>
    %cst_57 = arith.constant 6.000000e+00 : f32
    %260 = vector.broadcast %cst_57 : f32 to vector<8x1xf32>
    %261 = arith.cmpf ogt, %0, %260 : vector<8x1xf32>
    %262 = vector.shape_cast %261 : vector<8x1xi1> to vector<8x1xi1>
    %263 = vector.broadcast %262 : vector<8x1xi1> to vector<8x16xi1>
    %264 = arith.select %263, %259, %228 : vector<8x16xi1>, vector<8x16xf32>
    %c48 = arith.constant 48 : index
    %c0_58 = arith.constant 0 : index
    %265 = vector.load %arg14[%c48, %c0_58] : memref<64x32xf32, #tpu.memory_space<vmem>>, vector<8x16xf32>
    tpu.vector_store %arg14[%c48, %c0_58], %264 {strides = array<i32>} : memref<64x32xf32, #tpu.memory_space<vmem>>, vector<8x16xf32>,
    %266 = vector.extract_strided_slice %12 {offsets = [56, 0], sizes = [8, 48], strides = [1, 1]} : vector<64x48xf32> to vector<8x48xf32>
    %cst_59 = arith.constant dense<0.000000e+00> : vector<8x48xf32>
    %267 = tpu.matmul %264, %5, %cst_59 {dimension_numbers = #tpu.dot_dimension_numbers<[1], [0], [0], [1], [0, 0, 1, 1], [], []>} : vector<8x16xf32>, vector<16x48xf32>, vector<8x48xf32> -> vector<8x48xf32>
    %268 = vector.extract_strided_slice %266 {offsets = [0, 0], sizes = [8, 16], strides = [1, 1]} : vector<8x48xf32> to vector<8x16xf32>
    %269 = vector.extract_strided_slice %267 {offsets = [0, 0], sizes = [8, 16], strides = [1, 1]} : vector<8x48xf32> to vector<8x16xf32>
    %270 = arith.addf %268, %269 : vector<8x16xf32>
    %271 = arith.negf %270 : vector<8x16xf32>
    %272 = math.exp %271 : vector<8x16xf32>
    %cst_60 = arith.constant 1.000000e+00 : f32
    %273 = vector.broadcast %cst_60 : f32 to vector<8x16xf32>
    %274 = arith.addf %273, %272 : vector<8x16xf32>
    %275 = arith.divf %273, %274 : vector<8x16xf32>
    %276 = vector.extract_strided_slice %266 {offsets = [0, 16], sizes = [8, 16], strides = [1, 1]} : vector<8x48xf32> to vector<8x16xf32>
    %277 = vector.extract_strided_slice %267 {offsets = [0, 16], sizes = [8, 16], strides = [1, 1]} : vector<8x48xf32> to vector<8x16xf32>
    %278 = arith.addf %276, %277 : vector<8x16xf32>
    %279 = arith.negf %278 : vector<8x16xf32>
    %280 = math.exp %279 : vector<8x16xf32>
    %cst_61 = arith.constant 1.000000e+00 : f32
    %281 = vector.broadcast %cst_61 : f32 to vector<8x16xf32>
    %282 = arith.addf %281, %280 : vector<8x16xf32>
    %283 = arith.divf %281, %282 : vector<8x16xf32>
    %284 = vector.extract_strided_slice %266 {offsets = [0, 32], sizes = [8, 16], strides = [1, 1]} : vector<8x48xf32> to vector<8x16xf32>
    %285 = vector.extract_strided_slice %267 {offsets = [0, 32], sizes = [8, 16], strides = [1, 1]} : vector<8x48xf32> to vector<8x16xf32>
    %286 = vector.broadcast %9 : vector<1x16xf32> to vector<8x16xf32>
    %287 = arith.addf %285, %286 : vector<8x16xf32>
    %288 = arith.mulf %275, %287 : vector<8x16xf32>
    %289 = arith.addf %284, %288 : vector<8x16xf32>
    %290 = math.tanh %289 : vector<8x16xf32>
    %cst_62 = arith.constant 1.000000e+00 : f32
    %291 = vector.broadcast %cst_62 : f32 to vector<8x16xf32>
    %292 = arith.subf %291, %283 : vector<8x16xf32>
    %293 = arith.mulf %292, %290 : vector<8x16xf32>
    %294 = arith.mulf %283, %264 : vector<8x16xf32>
    %295 = arith.addf %293, %294 : vector<8x16xf32>
    %cst_63 = arith.constant 7.000000e+00 : f32
    %296 = vector.broadcast %cst_63 : f32 to vector<8x1xf32>
    %297 = arith.cmpf ogt, %0, %296 : vector<8x1xf32>
    %298 = vector.shape_cast %297 : vector<8x1xi1> to vector<8x1xi1>
    %299 = vector.broadcast %298 : vector<8x1xi1> to vector<8x16xi1>
    %300 = arith.select %299, %295, %264 : vector<8x16xi1>, vector<8x16xf32>
    %c56 = arith.constant 56 : index
    %c0_64 = arith.constant 0 : index
    %301 = vector.load %arg14[%c56, %c0_64] : memref<64x32xf32, #tpu.memory_space<vmem>>, vector<8x16xf32>
    tpu.vector_store %arg14[%c56, %c0_64], %300 {strides = array<i32>} : memref<64x32xf32, #tpu.memory_space<vmem>>, vector<8x16xf32>,
    %c1 = arith.constant 1 : index
    %c0_65 = arith.constant 0 : index
    %c0_66 = arith.constant 0 : index
    %302 = vector.load %arg3[%c1, %c0_65, %c0_66] : memref<6x32x48xf32, #tpu.memory_space<vmem>>, vector<1x32x48xf32>
    %303 = vector.shape_cast %302 : vector<1x32x48xf32> to vector<32x48xf32>
    %c1_67 = arith.constant 1 : index
    %c0_68 = arith.constant 0 : index
    %c0_69 = arith.constant 0 : index
    %304 = vector.load %arg4[%c1_67, %c0_68, %c0_69] : memref<6x16x48xf32, #tpu.memory_space<vmem>>, vector<1x16x48xf32>
    %305 = vector.shape_cast %304 : vector<1x16x48xf32> to vector<16x48xf32>
    %c1_70 = arith.constant 1 : index
    %c0_71 = arith.constant 0 : index
    %c0_72 = arith.constant 0 : index
    %306 = vector.load %arg5[%c1_70, %c0_71, %c0_72] : memref<6x1x48xf32, #tpu.memory_space<vmem>>, vector<1x1x48xf32>
    %307 = vector.shape_cast %306 : vector<1x1x48xf32> to vector<1x48xf32>
    %c1_73 = arith.constant 1 : index
    %c0_74 = arith.constant 0 : index
    %c0_75 = arith.constant 0 : index
    %308 = vector.load %arg6[%c1_73, %c0_74, %c0_75] : memref<6x1x16xf32, #tpu.memory_space<vmem>>, vector<1x1x16xf32>
    %309 = vector.shape_cast %308 : vector<1x1x16xf32> to vector<1x16xf32>
    %cst_76 = arith.constant dense<0.000000e+00> : vector<64x48xf32>
    %310 = tpu.matmul %1, %303, %cst_76 {dimension_numbers = #tpu.dot_dimension_numbers<[1], [0], [0], [1], [0, 0, 1, 1], [], []>} : vector<64x32xf32>, vector<32x48xf32>, vector<64x48xf32> -> vector<64x48xf32>
    %311 = vector.broadcast %307 : vector<1x48xf32> to vector<64x48xf32>
    %312 = arith.addf %310, %311 : vector<64x48xf32>
    %cst_77 = arith.constant 0.000000e+00 : f32
    %313 = vector.broadcast %cst_77 : f32 to vector<8x16xf32>
    %314 = vector.extract_strided_slice %312 {offsets = [56, 0], sizes = [8, 48], strides = [1, 1]} : vector<64x48xf32> to vector<8x48xf32>
    %cst_78 = arith.constant dense<0.000000e+00> : vector<8x48xf32>
    %315 = tpu.matmul %313, %305, %cst_78 {dimension_numbers = #tpu.dot_dimension_numbers<[1], [0], [0], [1], [0, 0, 1, 1], [], []>} : vector<8x16xf32>, vector<16x48xf32>, vector<8x48xf32> -> vector<8x48xf32>
    %316 = vector.extract_strided_slice %314 {offsets = [0, 0], sizes = [8, 16], strides = [1, 1]} : vector<8x48xf32> to vector<8x16xf32>
    %317 = vector.extract_strided_slice %315 {offsets = [0, 0], sizes = [8, 16], strides = [1, 1]} : vector<8x48xf32> to vector<8x16xf32>
    %318 = arith.addf %316, %317 : vector<8x16xf32>
    %319 = arith.negf %318 : vector<8x16xf32>
    %320 = math.exp %319 : vector<8x16xf32>
    %cst_79 = arith.constant 1.000000e+00 : f32
    %321 = vector.broadcast %cst_79 : f32 to vector<8x16xf32>
    %322 = arith.addf %321, %320 : vector<8x16xf32>
    %323 = arith.divf %321, %322 : vector<8x16xf32>
    %324 = vector.extract_strided_slice %314 {offsets = [0, 16], sizes = [8, 16], strides = [1, 1]} : vector<8x48xf32> to vector<8x16xf32>
    %325 = vector.extract_strided_slice %315 {offsets = [0, 16], sizes = [8, 16], strides = [1, 1]} : vector<8x48xf32> to vector<8x16xf32>
    %326 = arith.addf %324, %325 : vector<8x16xf32>
    %327 = arith.negf %326 : vector<8x16xf32>
    %328 = math.exp %327 : vector<8x16xf32>
    %cst_80 = arith.constant 1.000000e+00 : f32
    %329 = vector.broadcast %cst_80 : f32 to vector<8x16xf32>
    %330 = arith.addf %329, %328 : vector<8x16xf32>
    %331 = arith.divf %329, %330 : vector<8x16xf32>
    %332 = vector.extract_strided_slice %314 {offsets = [0, 32], sizes = [8, 16], strides = [1, 1]} : vector<8x48xf32> to vector<8x16xf32>
    %333 = vector.extract_strided_slice %315 {offsets = [0, 32], sizes = [8, 16], strides = [1, 1]} : vector<8x48xf32> to vector<8x16xf32>
    %334 = vector.broadcast %309 : vector<1x16xf32> to vector<8x16xf32>
    %335 = arith.addf %333, %334 : vector<8x16xf32>
    %336 = arith.mulf %323, %335 : vector<8x16xf32>
    %337 = arith.addf %332, %336 : vector<8x16xf32>
    %338 = math.tanh %337 : vector<8x16xf32>
    %cst_81 = arith.constant 1.000000e+00 : f32
    %339 = vector.broadcast %cst_81 : f32 to vector<8x16xf32>
    %340 = arith.subf %339, %331 : vector<8x16xf32>
    %341 = arith.mulf %340, %338 : vector<8x16xf32>
    %342 = arith.mulf %331, %313 : vector<8x16xf32>
    %343 = arith.addf %341, %342 : vector<8x16xf32>
    %cst_82 = arith.constant 7.000000e+00 : f32
    %344 = vector.broadcast %cst_82 : f32 to vector<8x1xf32>
    %345 = arith.cmpf ogt, %0, %344 : vector<8x1xf32>
    %346 = vector.shape_cast %345 : vector<8x1xi1> to vector<8x1xi1>
    %347 = vector.broadcast %346 : vector<8x1xi1> to vector<8x16xi1>
    %348 = arith.select %347, %343, %313 : vector<8x16xi1>, vector<8x16xf32>
    %c56_83 = arith.constant 56 : index
    %c16_84 = arith.constant 16 : index
    %349 = vector.load %arg14[%c56_83, %c16_84] : memref<64x32xf32, #tpu.memory_space<vmem>>, vector<8x16xf32>
    tpu.vector_store %arg14[%c56_83, %c16_84], %348 {strides = array<i32>} : memref<64x32xf32, #tpu.memory_space<vmem>>, vector<8x16xf32>,
    %350 = vector.extract_strided_slice %312 {offsets = [48, 0], sizes = [8, 48], strides = [1, 1]} : vector<64x48xf32> to vector<8x48xf32>
    %cst_85 = arith.constant dense<0.000000e+00> : vector<8x48xf32>
    %351 = tpu.matmul %348, %305, %cst_85 {dimension_numbers = #tpu.dot_dimension_numbers<[1], [0], [0], [1], [0, 0, 1, 1], [], []>} : vector<8x16xf32>, vector<16x48xf32>, vector<8x48xf32> -> vector<8x48xf32>
    %352 = vector.extract_strided_slice %350 {offsets = [0, 0], sizes = [8, 16], strides = [1, 1]} : vector<8x48xf32> to vector<8x16xf32>
    %353 = vector.extract_strided_slice %351 {offsets = [0, 0], sizes = [8, 16], strides = [1, 1]} : vector<8x48xf32> to vector<8x16xf32>
    %354 = arith.addf %352, %353 : vector<8x16xf32>
    %355 = arith.negf %354 : vector<8x16xf32>
    %356 = math.exp %355 : vector<8x16xf32>
    %cst_86 = arith.constant 1.000000e+00 : f32
    %357 = vector.broadcast %cst_86 : f32 to vector<8x16xf32>
    %358 = arith.addf %357, %356 : vector<8x16xf32>
    %359 = arith.divf %357, %358 : vector<8x16xf32>
    %360 = vector.extract_strided_slice %350 {offsets = [0, 16], sizes = [8, 16], strides = [1, 1]} : vector<8x48xf32> to vector<8x16xf32>
    %361 = vector.extract_strided_slice %351 {offsets = [0, 16], sizes = [8, 16], strides = [1, 1]} : vector<8x48xf32> to vector<8x16xf32>
    %362 = arith.addf %360, %361 : vector<8x16xf32>
    %363 = arith.negf %362 : vector<8x16xf32>
    %364 = math.exp %363 : vector<8x16xf32>
    %cst_87 = arith.constant 1.000000e+00 : f32
    %365 = vector.broadcast %cst_87 : f32 to vector<8x16xf32>
    %366 = arith.addf %365, %364 : vector<8x16xf32>
    %367 = arith.divf %365, %366 : vector<8x16xf32>
    %368 = vector.extract_strided_slice %350 {offsets = [0, 32], sizes = [8, 16], strides = [1, 1]} : vector<8x48xf32> to vector<8x16xf32>
    %369 = vector.extract_strided_slice %351 {offsets = [0, 32], sizes = [8, 16], strides = [1, 1]} : vector<8x48xf32> to vector<8x16xf32>
    %370 = vector.broadcast %309 : vector<1x16xf32> to vector<8x16xf32>
    %371 = arith.addf %369, %370 : vector<8x16xf32>
    %372 = arith.mulf %359, %371 : vector<8x16xf32>
    %373 = arith.addf %368, %372 : vector<8x16xf32>
    %374 = math.tanh %373 : vector<8x16xf32>
    %cst_88 = arith.constant 1.000000e+00 : f32
    %375 = vector.broadcast %cst_88 : f32 to vector<8x16xf32>
    %376 = arith.subf %375, %367 : vector<8x16xf32>
    %377 = arith.mulf %376, %374 : vector<8x16xf32>
    %378 = arith.mulf %367, %348 : vector<8x16xf32>
    %379 = arith.addf %377, %378 : vector<8x16xf32>
    %cst_89 = arith.constant 6.000000e+00 : f32
    %380 = vector.broadcast %cst_89 : f32 to vector<8x1xf32>
    %381 = arith.cmpf ogt, %0, %380 : vector<8x1xf32>
    %382 = vector.shape_cast %381 : vector<8x1xi1> to vector<8x1xi1>
    %383 = vector.broadcast %382 : vector<8x1xi1> to vector<8x16xi1>
    %384 = arith.select %383, %379, %348 : vector<8x16xi1>, vector<8x16xf32>
    %c48_90 = arith.constant 48 : index
    %c16_91 = arith.constant 16 : index
    %385 = vector.load %arg14[%c48_90, %c16_91] : memref<64x32xf32, #tpu.memory_space<vmem>>, vector<8x16xf32>
    tpu.vector_store %arg14[%c48_90, %c16_91], %384 {strides = array<i32>} : memref<64x32xf32, #tpu.memory_space<vmem>>, vector<8x16xf32>,
    %386 = vector.extract_strided_slice %312 {offsets = [40, 0], sizes = [8, 48], strides = [1, 1]} : vector<64x48xf32> to vector<8x48xf32>
    %cst_92 = arith.constant dense<0.000000e+00> : vector<8x48xf32>
    %387 = tpu.matmul %384, %305, %cst_92 {dimension_numbers = #tpu.dot_dimension_numbers<[1], [0], [0], [1], [0, 0, 1, 1], [], []>} : vector<8x16xf32>, vector<16x48xf32>, vector<8x48xf32> -> vector<8x48xf32>
    %388 = vector.extract_strided_slice %386 {offsets = [0, 0], sizes = [8, 16], strides = [1, 1]} : vector<8x48xf32> to vector<8x16xf32>
    %389 = vector.extract_strided_slice %387 {offsets = [0, 0], sizes = [8, 16], strides = [1, 1]} : vector<8x48xf32> to vector<8x16xf32>
    %390 = arith.addf %388, %389 : vector<8x16xf32>
    %391 = arith.negf %390 : vector<8x16xf32>
    %392 = math.exp %391 : vector<8x16xf32>
    %cst_93 = arith.constant 1.000000e+00 : f32
    %393 = vector.broadcast %cst_93 : f32 to vector<8x16xf32>
    %394 = arith.addf %393, %392 : vector<8x16xf32>
    %395 = arith.divf %393, %394 : vector<8x16xf32>
    %396 = vector.extract_strided_slice %386 {offsets = [0, 16], sizes = [8, 16], strides = [1, 1]} : vector<8x48xf32> to vector<8x16xf32>
    %397 = vector.extract_strided_slice %387 {offsets = [0, 16], sizes = [8, 16], strides = [1, 1]} : vector<8x48xf32> to vector<8x16xf32>
    %398 = arith.addf %396, %397 : vector<8x16xf32>
    %399 = arith.negf %398 : vector<8x16xf32>
    %400 = math.exp %399 : vector<8x16xf32>
    %cst_94 = arith.constant 1.000000e+00 : f32
    %401 = vector.broadcast %cst_94 : f32 to vector<8x16xf32>
    %402 = arith.addf %401, %400 : vector<8x16xf32>
    %403 = arith.divf %401, %402 : vector<8x16xf32>
    %404 = vector.extract_strided_slice %386 {offsets = [0, 32], sizes = [8, 16], strides = [1, 1]} : vector<8x48xf32> to vector<8x16xf32>
    %405 = vector.extract_strided_slice %387 {offsets = [0, 32], sizes = [8, 16], strides = [1, 1]} : vector<8x48xf32> to vector<8x16xf32>
    %406 = vector.broadcast %309 : vector<1x16xf32> to vector<8x16xf32>
    %407 = arith.addf %405, %406 : vector<8x16xf32>
    %408 = arith.mulf %395, %407 : vector<8x16xf32>
    %409 = arith.addf %404, %408 : vector<8x16xf32>
    %410 = math.tanh %409 : vector<8x16xf32>
    %cst_95 = arith.constant 1.000000e+00 : f32
    %411 = vector.broadcast %cst_95 : f32 to vector<8x16xf32>
    %412 = arith.subf %411, %403 : vector<8x16xf32>
    %413 = arith.mulf %412, %410 : vector<8x16xf32>
    %414 = arith.mulf %403, %384 : vector<8x16xf32>
    %415 = arith.addf %413, %414 : vector<8x16xf32>
    %cst_96 = arith.constant 5.000000e+00 : f32
    %416 = vector.broadcast %cst_96 : f32 to vector<8x1xf32>
    %417 = arith.cmpf ogt, %0, %416 : vector<8x1xf32>
    %418 = vector.shape_cast %417 : vector<8x1xi1> to vector<8x1xi1>
    %419 = vector.broadcast %418 : vector<8x1xi1> to vector<8x16xi1>
    %420 = arith.select %419, %415, %384 : vector<8x16xi1>, vector<8x16xf32>
    %c40_97 = arith.constant 40 : index
    %c16_98 = arith.constant 16 : index
    %421 = vector.load %arg14[%c40_97, %c16_98] : memref<64x32xf32, #tpu.memory_space<vmem>>, vector<8x16xf32>
    tpu.vector_store %arg14[%c40_97, %c16_98], %420 {strides = array<i32>} : memref<64x32xf32, #tpu.memory_space<vmem>>, vector<8x16xf32>,
    %422 = vector.extract_strided_slice %312 {offsets = [32, 0], sizes = [8, 48], strides = [1, 1]} : vector<64x48xf32> to vector<8x48xf32>
    %cst_99 = arith.constant dense<0.000000e+00> : vector<8x48xf32>
    %423 = tpu.matmul %420, %305, %cst_99 {dimension_numbers = #tpu.dot_dimension_numbers<[1], [0], [0], [1], [0, 0, 1, 1], [], []>} : vector<8x16xf32>, vector<16x48xf32>, vector<8x48xf32> -> vector<8x48xf32>
    %424 = vector.extract_strided_slice %422 {offsets = [0, 0], sizes = [8, 16], strides = [1, 1]} : vector<8x48xf32> to vector<8x16xf32>
    %425 = vector.extract_strided_slice %423 {offsets = [0, 0], sizes = [8, 16], strides = [1, 1]} : vector<8x48xf32> to vector<8x16xf32>
    %426 = arith.addf %424, %425 : vector<8x16xf32>
    %427 = arith.negf %426 : vector<8x16xf32>
    %428 = math.exp %427 : vector<8x16xf32>
    %cst_100 = arith.constant 1.000000e+00 : f32
    %429 = vector.broadcast %cst_100 : f32 to vector<8x16xf32>
    %430 = arith.addf %429, %428 : vector<8x16xf32>
    %431 = arith.divf %429, %430 : vector<8x16xf32>
    %432 = vector.extract_strided_slice %422 {offsets = [0, 16], sizes = [8, 16], strides = [1, 1]} : vector<8x48xf32> to vector<8x16xf32>
    %433 = vector.extract_strided_slice %423 {offsets = [0, 16], sizes = [8, 16], strides = [1, 1]} : vector<8x48xf32> to vector<8x16xf32>
    %434 = arith.addf %432, %433 : vector<8x16xf32>
    %435 = arith.negf %434 : vector<8x16xf32>
    %436 = math.exp %435 : vector<8x16xf32>
    %cst_101 = arith.constant 1.000000e+00 : f32
    %437 = vector.broadcast %cst_101 : f32 to vector<8x16xf32>
    %438 = arith.addf %437, %436 : vector<8x16xf32>
    %439 = arith.divf %437, %438 : vector<8x16xf32>
    %440 = vector.extract_strided_slice %422 {offsets = [0, 32], sizes = [8, 16], strides = [1, 1]} : vector<8x48xf32> to vector<8x16xf32>
    %441 = vector.extract_strided_slice %423 {offsets = [0, 32], sizes = [8, 16], strides = [1, 1]} : vector<8x48xf32> to vector<8x16xf32>
    %442 = vector.broadcast %309 : vector<1x16xf32> to vector<8x16xf32>
    %443 = arith.addf %441, %442 : vector<8x16xf32>
    %444 = arith.mulf %431, %443 : vector<8x16xf32>
    %445 = arith.addf %440, %444 : vector<8x16xf32>
    %446 = math.tanh %445 : vector<8x16xf32>
    %cst_102 = arith.constant 1.000000e+00 : f32
    %447 = vector.broadcast %cst_102 : f32 to vector<8x16xf32>
    %448 = arith.subf %447, %439 : vector<8x16xf32>
    %449 = arith.mulf %448, %446 : vector<8x16xf32>
    %450 = arith.mulf %439, %420 : vector<8x16xf32>
    %451 = arith.addf %449, %450 : vector<8x16xf32>
    %cst_103 = arith.constant 4.000000e+00 : f32
    %452 = vector.broadcast %cst_103 : f32 to vector<8x1xf32>
    %453 = arith.cmpf ogt, %0, %452 : vector<8x1xf32>
    %454 = vector.shape_cast %453 : vector<8x1xi1> to vector<8x1xi1>
    %455 = vector.broadcast %454 : vector<8x1xi1> to vector<8x16xi1>
    %456 = arith.select %455, %451, %420 : vector<8x16xi1>, vector<8x16xf32>
    %c32_104 = arith.constant 32 : index
    %c16_105 = arith.constant 16 : index
    %457 = vector.load %arg14[%c32_104, %c16_105] : memref<64x32xf32, #tpu.memory_space<vmem>>, vector<8x16xf32>
    tpu.vector_store %arg14[%c32_104, %c16_105], %456 {strides = array<i32>} : memref<64x32xf32, #tpu.memory_space<vmem>>, vector<8x16xf32>,
    %458 = vector.extract_strided_slice %312 {offsets = [24, 0], sizes = [8, 48], strides = [1, 1]} : vector<64x48xf32> to vector<8x48xf32>
    %cst_106 = arith.constant dense<0.000000e+00> : vector<8x48xf32>
    %459 = tpu.matmul %456, %305, %cst_106 {dimension_numbers = #tpu.dot_dimension_numbers<[1], [0], [0], [1], [0, 0, 1, 1], [], []>} : vector<8x16xf32>, vector<16x48xf32>, vector<8x48xf32> -> vector<8x48xf32>
    %460 = vector.extract_strided_slice %458 {offsets = [0, 0], sizes = [8, 16], strides = [1, 1]} : vector<8x48xf32> to vector<8x16xf32>
    %461 = vector.extract_strided_slice %459 {offsets = [0, 0], sizes = [8, 16], strides = [1, 1]} : vector<8x48xf32> to vector<8x16xf32>
    %462 = arith.addf %460, %461 : vector<8x16xf32>
    %463 = arith.negf %462 : vector<8x16xf32>
    %464 = math.exp %463 : vector<8x16xf32>
    %cst_107 = arith.constant 1.000000e+00 : f32
    %465 = vector.broadcast %cst_107 : f32 to vector<8x16xf32>
    %466 = arith.addf %465, %464 : vector<8x16xf32>
    %467 = arith.divf %465, %466 : vector<8x16xf32>
    %468 = vector.extract_strided_slice %458 {offsets = [0, 16], sizes = [8, 16], strides = [1, 1]} : vector<8x48xf32> to vector<8x16xf32>
    %469 = vector.extract_strided_slice %459 {offsets = [0, 16], sizes = [8, 16], strides = [1, 1]} : vector<8x48xf32> to vector<8x16xf32>
    %470 = arith.addf %468, %469 : vector<8x16xf32>
    %471 = arith.negf %470 : vector<8x16xf32>
    %472 = math.exp %471 : vector<8x16xf32>
    %cst_108 = arith.constant 1.000000e+00 : f32
    %473 = vector.broadcast %cst_108 : f32 to vector<8x16xf32>
    %474 = arith.addf %473, %472 : vector<8x16xf32>
    %475 = arith.divf %473, %474 : vector<8x16xf32>
    %476 = vector.extract_strided_slice %458 {offsets = [0, 32], sizes = [8, 16], strides = [1, 1]} : vector<8x48xf32> to vector<8x16xf32>
    %477 = vector.extract_strided_slice %459 {offsets = [0, 32], sizes = [8, 16], strides = [1, 1]} : vector<8x48xf32> to vector<8x16xf32>
    %478 = vector.broadcast %309 : vector<1x16xf32> to vector<8x16xf32>
    %479 = arith.addf %477, %478 : vector<8x16xf32>
    %480 = arith.mulf %467, %479 : vector<8x16xf32>
    %481 = arith.addf %476, %480 : vector<8x16xf32>
    %482 = math.tanh %481 : vector<8x16xf32>
    %cst_109 = arith.constant 1.000000e+00 : f32
    %483 = vector.broadcast %cst_109 : f32 to vector<8x16xf32>
    %484 = arith.subf %483, %475 : vector<8x16xf32>
    %485 = arith.mulf %484, %482 : vector<8x16xf32>
    %486 = arith.mulf %475, %456 : vector<8x16xf32>
    %487 = arith.addf %485, %486 : vector<8x16xf32>
    %cst_110 = arith.constant 3.000000e+00 : f32
    %488 = vector.broadcast %cst_110 : f32 to vector<8x1xf32>
    %489 = arith.cmpf ogt, %0, %488 : vector<8x1xf32>
    %490 = vector.shape_cast %489 : vector<8x1xi1> to vector<8x1xi1>
    %491 = vector.broadcast %490 : vector<8x1xi1> to vector<8x16xi1>
    %492 = arith.select %491, %487, %456 : vector<8x16xi1>, vector<8x16xf32>
    %c24_111 = arith.constant 24 : index
    %c16_112 = arith.constant 16 : index
    %493 = vector.load %arg14[%c24_111, %c16_112] : memref<64x32xf32, #tpu.memory_space<vmem>>, vector<8x16xf32>
    tpu.vector_store %arg14[%c24_111, %c16_112], %492 {strides = array<i32>} : memref<64x32xf32, #tpu.memory_space<vmem>>, vector<8x16xf32>,
    %494 = vector.extract_strided_slice %312 {offsets = [16, 0], sizes = [8, 48], strides = [1, 1]} : vector<64x48xf32> to vector<8x48xf32>
    %cst_113 = arith.constant dense<0.000000e+00> : vector<8x48xf32>
    %495 = tpu.matmul %492, %305, %cst_113 {dimension_numbers = #tpu.dot_dimension_numbers<[1], [0], [0], [1], [0, 0, 1, 1], [], []>} : vector<8x16xf32>, vector<16x48xf32>, vector<8x48xf32> -> vector<8x48xf32>
    %496 = vector.extract_strided_slice %494 {offsets = [0, 0], sizes = [8, 16], strides = [1, 1]} : vector<8x48xf32> to vector<8x16xf32>
    %497 = vector.extract_strided_slice %495 {offsets = [0, 0], sizes = [8, 16], strides = [1, 1]} : vector<8x48xf32> to vector<8x16xf32>
    %498 = arith.addf %496, %497 : vector<8x16xf32>
    %499 = arith.negf %498 : vector<8x16xf32>
    %500 = math.exp %499 : vector<8x16xf32>
    %cst_114 = arith.constant 1.000000e+00 : f32
    %501 = vector.broadcast %cst_114 : f32 to vector<8x16xf32>
    %502 = arith.addf %501, %500 : vector<8x16xf32>
    %503 = arith.divf %501, %502 : vector<8x16xf32>
    %504 = vector.extract_strided_slice %494 {offsets = [0, 16], sizes = [8, 16], strides = [1, 1]} : vector<8x48xf32> to vector<8x16xf32>
    %505 = vector.extract_strided_slice %495 {offsets = [0, 16], sizes = [8, 16], strides = [1, 1]} : vector<8x48xf32> to vector<8x16xf32>
    %506 = arith.addf %504, %505 : vector<8x16xf32>
    %507 = arith.negf %506 : vector<8x16xf32>
    %508 = math.exp %507 : vector<8x16xf32>
    %cst_115 = arith.constant 1.000000e+00 : f32
    %509 = vector.broadcast %cst_115 : f32 to vector<8x16xf32>
    %510 = arith.addf %509, %508 : vector<8x16xf32>
    %511 = arith.divf %509, %510 : vector<8x16xf32>
    %512 = vector.extract_strided_slice %494 {offsets = [0, 32], sizes = [8, 16], strides = [1, 1]} : vector<8x48xf32> to vector<8x16xf32>
    %513 = vector.extract_strided_slice %495 {offsets = [0, 32], sizes = [8, 16], strides = [1, 1]} : vector<8x48xf32> to vector<8x16xf32>
    %514 = vector.broadcast %309 : vector<1x16xf32> to vector<8x16xf32>
    %515 = arith.addf %513, %514 : vector<8x16xf32>
    %516 = arith.mulf %503, %515 : vector<8x16xf32>
    %517 = arith.addf %512, %516 : vector<8x16xf32>
    %518 = math.tanh %517 : vector<8x16xf32>
    %cst_116 = arith.constant 1.000000e+00 : f32
    %519 = vector.broadcast %cst_116 : f32 to vector<8x16xf32>
    %520 = arith.subf %519, %511 : vector<8x16xf32>
    %521 = arith.mulf %520, %518 : vector<8x16xf32>
    %522 = arith.mulf %511, %492 : vector<8x16xf32>
    %523 = arith.addf %521, %522 : vector<8x16xf32>
    %cst_117 = arith.constant 2.000000e+00 : f32
    %524 = vector.broadcast %cst_117 : f32 to vector<8x1xf32>
    %525 = arith.cmpf ogt, %0, %524 : vector<8x1xf32>
    %526 = vector.shape_cast %525 : vector<8x1xi1> to vector<8x1xi1>
    %527 = vector.broadcast %526 : vector<8x1xi1> to vector<8x16xi1>
    %528 = arith.select %527, %523, %492 : vector<8x16xi1>, vector<8x16xf32>
    %c16_118 = arith.constant 16 : index
    %c16_119 = arith.constant 16 : index
    %529 = vector.load %arg14[%c16_118, %c16_119] : memref<64x32xf32, #tpu.memory_space<vmem>>, vector<8x16xf32>
    tpu.vector_store %arg14[%c16_118, %c16_119], %528 {strides = array<i32>} : memref<64x32xf32, #tpu.memory_space<vmem>>, vector<8x16xf32>,
    %530 = vector.extract_strided_slice %312 {offsets = [8, 0], sizes = [8, 48], strides = [1, 1]} : vector<64x48xf32> to vector<8x48xf32>
    %cst_120 = arith.constant dense<0.000000e+00> : vector<8x48xf32>
    %531 = tpu.matmul %528, %305, %cst_120 {dimension_numbers = #tpu.dot_dimension_numbers<[1], [0], [0], [1], [0, 0, 1, 1], [], []>} : vector<8x16xf32>, vector<16x48xf32>, vector<8x48xf32> -> vector<8x48xf32>
    %532 = vector.extract_strided_slice %530 {offsets = [0, 0], sizes = [8, 16], strides = [1, 1]} : vector<8x48xf32> to vector<8x16xf32>
    %533 = vector.extract_strided_slice %531 {offsets = [0, 0], sizes = [8, 16], strides = [1, 1]} : vector<8x48xf32> to vector<8x16xf32>
    %534 = arith.addf %532, %533 : vector<8x16xf32>
    %535 = arith.negf %534 : vector<8x16xf32>
    %536 = math.exp %535 : vector<8x16xf32>
    %cst_121 = arith.constant 1.000000e+00 : f32
    %537 = vector.broadcast %cst_121 : f32 to vector<8x16xf32>
    %538 = arith.addf %537, %536 : vector<8x16xf32>
    %539 = arith.divf %537, %538 : vector<8x16xf32>
    %540 = vector.extract_strided_slice %530 {offsets = [0, 16], sizes = [8, 16], strides = [1, 1]} : vector<8x48xf32> to vector<8x16xf32>
    %541 = vector.extract_strided_slice %531 {offsets = [0, 16], sizes = [8, 16], strides = [1, 1]} : vector<8x48xf32> to vector<8x16xf32>
    %542 = arith.addf %540, %541 : vector<8x16xf32>
    %543 = arith.negf %542 : vector<8x16xf32>
    %544 = math.exp %543 : vector<8x16xf32>
    %cst_122 = arith.constant 1.000000e+00 : f32
    %545 = vector.broadcast %cst_122 : f32 to vector<8x16xf32>
    %546 = arith.addf %545, %544 : vector<8x16xf32>
    %547 = arith.divf %545, %546 : vector<8x16xf32>
    %548 = vector.extract_strided_slice %530 {offsets = [0, 32], sizes = [8, 16], strides = [1, 1]} : vector<8x48xf32> to vector<8x16xf32>
    %549 = vector.extract_strided_slice %531 {offsets = [0, 32], sizes = [8, 16], strides = [1, 1]} : vector<8x48xf32> to vector<8x16xf32>
    %550 = vector.broadcast %309 : vector<1x16xf32> to vector<8x16xf32>
    %551 = arith.addf %549, %550 : vector<8x16xf32>
    %552 = arith.mulf %539, %551 : vector<8x16xf32>
    %553 = arith.addf %548, %552 : vector<8x16xf32>
    %554 = math.tanh %553 : vector<8x16xf32>
    %cst_123 = arith.constant 1.000000e+00 : f32
    %555 = vector.broadcast %cst_123 : f32 to vector<8x16xf32>
    %556 = arith.subf %555, %547 : vector<8x16xf32>
    %557 = arith.mulf %556, %554 : vector<8x16xf32>
    %558 = arith.mulf %547, %528 : vector<8x16xf32>
    %559 = arith.addf %557, %558 : vector<8x16xf32>
    %cst_124 = arith.constant 1.000000e+00 : f32
    %560 = vector.broadcast %cst_124 : f32 to vector<8x1xf32>
    %561 = arith.cmpf ogt, %0, %560 : vector<8x1xf32>
    %562 = vector.shape_cast %561 : vector<8x1xi1> to vector<8x1xi1>
    %563 = vector.broadcast %562 : vector<8x1xi1> to vector<8x16xi1>
    %564 = arith.select %563, %559, %528 : vector<8x16xi1>, vector<8x16xf32>
    %c8_125 = arith.constant 8 : index
    %c16_126 = arith.constant 16 : index
    %565 = vector.load %arg14[%c8_125, %c16_126] : memref<64x32xf32, #tpu.memory_space<vmem>>, vector<8x16xf32>
    tpu.vector_store %arg14[%c8_125, %c16_126], %564 {strides = array<i32>} : memref<64x32xf32, #tpu.memory_space<vmem>>, vector<8x16xf32>,
    %566 = vector.extract_strided_slice %312 {offsets = [0, 0], sizes = [8, 48], strides = [1, 1]} : vector<64x48xf32> to vector<8x48xf32>
    %cst_127 = arith.constant dense<0.000000e+00> : vector<8x48xf32>
    %567 = tpu.matmul %564, %305, %cst_127 {dimension_numbers = #tpu.dot_dimension_numbers<[1], [0], [0], [1], [0, 0, 1, 1], [], []>} : vector<8x16xf32>, vector<16x48xf32>, vector<8x48xf32> -> vector<8x48xf32>
    %568 = vector.extract_strided_slice %566 {offsets = [0, 0], sizes = [8, 16], strides = [1, 1]} : vector<8x48xf32> to vector<8x16xf32>
    %569 = vector.extract_strided_slice %567 {offsets = [0, 0], sizes = [8, 16], strides = [1, 1]} : vector<8x48xf32> to vector<8x16xf32>
    %570 = arith.addf %568, %569 : vector<8x16xf32>
    %571 = arith.negf %570 : vector<8x16xf32>
    %572 = math.exp %571 : vector<8x16xf32>
    %cst_128 = arith.constant 1.000000e+00 : f32
    %573 = vector.broadcast %cst_128 : f32 to vector<8x16xf32>
    %574 = arith.addf %573, %572 : vector<8x16xf32>
    %575 = arith.divf %573, %574 : vector<8x16xf32>
    %576 = vector.extract_strided_slice %566 {offsets = [0, 16], sizes = [8, 16], strides = [1, 1]} : vector<8x48xf32> to vector<8x16xf32>
    %577 = vector.extract_strided_slice %567 {offsets = [0, 16], sizes = [8, 16], strides = [1, 1]} : vector<8x48xf32> to vector<8x16xf32>
    %578 = arith.addf %576, %577 : vector<8x16xf32>
    %579 = arith.negf %578 : vector<8x16xf32>
    %580 = math.exp %579 : vector<8x16xf32>
    %cst_129 = arith.constant 1.000000e+00 : f32
    %581 = vector.broadcast %cst_129 : f32 to vector<8x16xf32>
    %582 = arith.addf %581, %580 : vector<8x16xf32>
    %583 = arith.divf %581, %582 : vector<8x16xf32>
    %584 = vector.extract_strided_slice %566 {offsets = [0, 32], sizes = [8, 16], strides = [1, 1]} : vector<8x48xf32> to vector<8x16xf32>
    %585 = vector.extract_strided_slice %567 {offsets = [0, 32], sizes = [8, 16], strides = [1, 1]} : vector<8x48xf32> to vector<8x16xf32>
    %586 = vector.broadcast %309 : vector<1x16xf32> to vector<8x16xf32>
    %587 = arith.addf %585, %586 : vector<8x16xf32>
    %588 = arith.mulf %575, %587 : vector<8x16xf32>
    %589 = arith.addf %584, %588 : vector<8x16xf32>
    %590 = math.tanh %589 : vector<8x16xf32>
    %cst_130 = arith.constant 1.000000e+00 : f32
    %591 = vector.broadcast %cst_130 : f32 to vector<8x16xf32>
    %592 = arith.subf %591, %583 : vector<8x16xf32>
    %593 = arith.mulf %592, %590 : vector<8x16xf32>
    %594 = arith.mulf %583, %564 : vector<8x16xf32>
    %595 = arith.addf %593, %594 : vector<8x16xf32>
    %cst_131 = arith.constant 0.000000e+00 : f32
    %596 = vector.broadcast %cst_131 : f32 to vector<8x1xf32>
    %597 = arith.cmpf ogt, %0, %596 : vector<8x1xf32>
    %598 = vector.shape_cast %597 : vector<8x1xi1> to vector<8x1xi1>
    %599 = vector.broadcast %598 : vector<8x1xi1> to vector<8x16xi1>
    %600 = arith.select %599, %595, %564 : vector<8x16xi1>, vector<8x16xf32>
    %c0_132 = arith.constant 0 : index
    %c16_133 = arith.constant 16 : index
    %601 = vector.load %arg14[%c0_132, %c16_133] : memref<64x32xf32, #tpu.memory_space<vmem>>, vector<8x16xf32>
    tpu.vector_store %arg14[%c0_132, %c16_133], %600 {strides = array<i32>} : memref<64x32xf32, #tpu.memory_space<vmem>>, vector<8x16xf32>,
    %c0_134 = arith.constant 0 : index
    %c0_135 = arith.constant 0 : index
    %602 = vector.load %arg14[%c0_134, %c0_135] : memref<64x32xf32, #tpu.memory_space<vmem>>, vector<64x32xf32>
    %c2 = arith.constant 2 : index
    %c0_136 = arith.constant 0 : index
    %c0_137 = arith.constant 0 : index
    %603 = vector.load %arg3[%c2, %c0_136, %c0_137] : memref<6x32x48xf32, #tpu.memory_space<vmem>>, vector<1x32x48xf32>
    %604 = vector.shape_cast %603 : vector<1x32x48xf32> to vector<32x48xf32>
    %c2_138 = arith.constant 2 : index
    %c0_139 = arith.constant 0 : index
    %c0_140 = arith.constant 0 : index
    %605 = vector.load %arg4[%c2_138, %c0_139, %c0_140] : memref<6x16x48xf32, #tpu.memory_space<vmem>>, vector<1x16x48xf32>
    %606 = vector.shape_cast %605 : vector<1x16x48xf32> to vector<16x48xf32>
    %c2_141 = arith.constant 2 : index
    %c0_142 = arith.constant 0 : index
    %c0_143 = arith.constant 0 : index
    %607 = vector.load %arg5[%c2_141, %c0_142, %c0_143] : memref<6x1x48xf32, #tpu.memory_space<vmem>>, vector<1x1x48xf32>
    %608 = vector.shape_cast %607 : vector<1x1x48xf32> to vector<1x48xf32>
    %c2_144 = arith.constant 2 : index
    %c0_145 = arith.constant 0 : index
    %c0_146 = arith.constant 0 : index
    %609 = vector.load %arg6[%c2_144, %c0_145, %c0_146] : memref<6x1x16xf32, #tpu.memory_space<vmem>>, vector<1x1x16xf32>
    %610 = vector.shape_cast %609 : vector<1x1x16xf32> to vector<1x16xf32>
    %cst_147 = arith.constant dense<0.000000e+00> : vector<64x48xf32>
    %611 = tpu.matmul %602, %604, %cst_147 {dimension_numbers = #tpu.dot_dimension_numbers<[1], [0], [0], [1], [0, 0, 1, 1], [], []>} : vector<64x32xf32>, vector<32x48xf32>, vector<64x48xf32> -> vector<64x48xf32>
    %612 = vector.broadcast %608 : vector<1x48xf32> to vector<64x48xf32>
    %613 = arith.addf %611, %612 : vector<64x48xf32>
    %cst_148 = arith.constant 0.000000e+00 : f32
    %614 = vector.broadcast %cst_148 : f32 to vector<8x16xf32>
    %615 = vector.extract_strided_slice %613 {offsets = [0, 0], sizes = [8, 48], strides = [1, 1]} : vector<64x48xf32> to vector<8x48xf32>
    %cst_149 = arith.constant dense<0.000000e+00> : vector<8x48xf32>
    %616 = tpu.matmul %614, %606, %cst_149 {dimension_numbers = #tpu.dot_dimension_numbers<[1], [0], [0], [1], [0, 0, 1, 1], [], []>} : vector<8x16xf32>, vector<16x48xf32>, vector<8x48xf32> -> vector<8x48xf32>
    %617 = vector.extract_strided_slice %615 {offsets = [0, 0], sizes = [8, 16], strides = [1, 1]} : vector<8x48xf32> to vector<8x16xf32>
    %618 = vector.extract_strided_slice %616 {offsets = [0, 0], sizes = [8, 16], strides = [1, 1]} : vector<8x48xf32> to vector<8x16xf32>
    %619 = arith.addf %617, %618 : vector<8x16xf32>
    %620 = arith.negf %619 : vector<8x16xf32>
    %621 = math.exp %620 : vector<8x16xf32>
    %cst_150 = arith.constant 1.000000e+00 : f32
    %622 = vector.broadcast %cst_150 : f32 to vector<8x16xf32>
    %623 = arith.addf %622, %621 : vector<8x16xf32>
    %624 = arith.divf %622, %623 : vector<8x16xf32>
    %625 = vector.extract_strided_slice %615 {offsets = [0, 16], sizes = [8, 16], strides = [1, 1]} : vector<8x48xf32> to vector<8x16xf32>
    %626 = vector.extract_strided_slice %616 {offsets = [0, 16], sizes = [8, 16], strides = [1, 1]} : vector<8x48xf32> to vector<8x16xf32>
    %627 = arith.addf %625, %626 : vector<8x16xf32>
    %628 = arith.negf %627 : vector<8x16xf32>
    %629 = math.exp %628 : vector<8x16xf32>
    %cst_151 = arith.constant 1.000000e+00 : f32
    %630 = vector.broadcast %cst_151 : f32 to vector<8x16xf32>
    %631 = arith.addf %630, %629 : vector<8x16xf32>
    %632 = arith.divf %630, %631 : vector<8x16xf32>
    %633 = vector.extract_strided_slice %615 {offsets = [0, 32], sizes = [8, 16], strides = [1, 1]} : vector<8x48xf32> to vector<8x16xf32>
    %634 = vector.extract_strided_slice %616 {offsets = [0, 32], sizes = [8, 16], strides = [1, 1]} : vector<8x48xf32> to vector<8x16xf32>
    %635 = vector.broadcast %610 : vector<1x16xf32> to vector<8x16xf32>
    %636 = arith.addf %634, %635 : vector<8x16xf32>
    %637 = arith.mulf %624, %636 : vector<8x16xf32>
    %638 = arith.addf %633, %637 : vector<8x16xf32>
    %639 = math.tanh %638 : vector<8x16xf32>
    %cst_152 = arith.constant 1.000000e+00 : f32
    %640 = vector.broadcast %cst_152 : f32 to vector<8x16xf32>
    %641 = arith.subf %640, %632 : vector<8x16xf32>
    %642 = arith.mulf %641, %639 : vector<8x16xf32>
    %643 = arith.mulf %632, %614 : vector<8x16xf32>
    %644 = arith.addf %642, %643 : vector<8x16xf32>
    %cst_153 = arith.constant 0.000000e+00 : f32
    %645 = vector.broadcast %cst_153 : f32 to vector<8x1xf32>
    %646 = arith.cmpf ogt, %0, %645 : vector<8x1xf32>
    %647 = vector.shape_cast %646 : vector<8x1xi1> to vector<8x1xi1>
    %648 = vector.broadcast %647 : vector<8x1xi1> to vector<8x16xi1>
    %649 = arith.select %648, %644, %614 : vector<8x16xi1>, vector<8x16xf32>
    %c0_154 = arith.constant 0 : index
    %c0_155 = arith.constant 0 : index
    %650 = vector.load %arg15[%c0_154, %c0_155] : memref<64x32xf32, #tpu.memory_space<vmem>>, vector<8x16xf32>
    tpu.vector_store %arg15[%c0_154, %c0_155], %649 {strides = array<i32>} : memref<64x32xf32, #tpu.memory_space<vmem>>, vector<8x16xf32>,
    %651 = vector.extract_strided_slice %613 {offsets = [8, 0], sizes = [8, 48], strides = [1, 1]} : vector<64x48xf32> to vector<8x48xf32>
    %cst_156 = arith.constant dense<0.000000e+00> : vector<8x48xf32>
    %652 = tpu.matmul %649, %606, %cst_156 {dimension_numbers = #tpu.dot_dimension_numbers<[1], [0], [0], [1], [0, 0, 1, 1], [], []>} : vector<8x16xf32>, vector<16x48xf32>, vector<8x48xf32> -> vector<8x48xf32>
    %653 = vector.extract_strided_slice %651 {offsets = [0, 0], sizes = [8, 16], strides = [1, 1]} : vector<8x48xf32> to vector<8x16xf32>
    %654 = vector.extract_strided_slice %652 {offsets = [0, 0], sizes = [8, 16], strides = [1, 1]} : vector<8x48xf32> to vector<8x16xf32>
    %655 = arith.addf %653, %654 : vector<8x16xf32>
    %656 = arith.negf %655 : vector<8x16xf32>
    %657 = math.exp %656 : vector<8x16xf32>
    %cst_157 = arith.constant 1.000000e+00 : f32
    %658 = vector.broadcast %cst_157 : f32 to vector<8x16xf32>
    %659 = arith.addf %658, %657 : vector<8x16xf32>
    %660 = arith.divf %658, %659 : vector<8x16xf32>
    %661 = vector.extract_strided_slice %651 {offsets = [0, 16], sizes = [8, 16], strides = [1, 1]} : vector<8x48xf32> to vector<8x16xf32>
    %662 = vector.extract_strided_slice %652 {offsets = [0, 16], sizes = [8, 16], strides = [1, 1]} : vector<8x48xf32> to vector<8x16xf32>
    %663 = arith.addf %661, %662 : vector<8x16xf32>
    %664 = arith.negf %663 : vector<8x16xf32>
    %665 = math.exp %664 : vector<8x16xf32>
    %cst_158 = arith.constant 1.000000e+00 : f32
    %666 = vector.broadcast %cst_158 : f32 to vector<8x16xf32>
    %667 = arith.addf %666, %665 : vector<8x16xf32>
    %668 = arith.divf %666, %667 : vector<8x16xf32>
    %669 = vector.extract_strided_slice %651 {offsets = [0, 32], sizes = [8, 16], strides = [1, 1]} : vector<8x48xf32> to vector<8x16xf32>
    %670 = vector.extract_strided_slice %652 {offsets = [0, 32], sizes = [8, 16], strides = [1, 1]} : vector<8x48xf32> to vector<8x16xf32>
    %671 = vector.broadcast %610 : vector<1x16xf32> to vector<8x16xf32>
    %672 = arith.addf %670, %671 : vector<8x16xf32>
    %673 = arith.mulf %660, %672 : vector<8x16xf32>
    %674 = arith.addf %669, %673 : vector<8x16xf32>
    %675 = math.tanh %674 : vector<8x16xf32>
    %cst_159 = arith.constant 1.000000e+00 : f32
    %676 = vector.broadcast %cst_159 : f32 to vector<8x16xf32>
    %677 = arith.subf %676, %668 : vector<8x16xf32>
    %678 = arith.mulf %677, %675 : vector<8x16xf32>
    %679 = arith.mulf %668, %649 : vector<8x16xf32>
    %680 = arith.addf %678, %679 : vector<8x16xf32>
    %cst_160 = arith.constant 1.000000e+00 : f32
    %681 = vector.broadcast %cst_160 : f32 to vector<8x1xf32>
    %682 = arith.cmpf ogt, %0, %681 : vector<8x1xf32>
    %683 = vector.shape_cast %682 : vector<8x1xi1> to vector<8x1xi1>
    %684 = vector.broadcast %683 : vector<8x1xi1> to vector<8x16xi1>
    %685 = arith.select %684, %680, %649 : vector<8x16xi1>, vector<8x16xf32>
    %c8_161 = arith.constant 8 : index
    %c0_162 = arith.constant 0 : index
    %686 = vector.load %arg15[%c8_161, %c0_162] : memref<64x32xf32, #tpu.memory_space<vmem>>, vector<8x16xf32>
    tpu.vector_store %arg15[%c8_161, %c0_162], %685 {strides = array<i32>} : memref<64x32xf32, #tpu.memory_space<vmem>>, vector<8x16xf32>,
    %687 = vector.extract_strided_slice %613 {offsets = [16, 0], sizes = [8, 48], strides = [1, 1]} : vector<64x48xf32> to vector<8x48xf32>
    %cst_163 = arith.constant dense<0.000000e+00> : vector<8x48xf32>
    %688 = tpu.matmul %685, %606, %cst_163 {dimension_numbers = #tpu.dot_dimension_numbers<[1], [0], [0], [1], [0, 0, 1, 1], [], []>} : vector<8x16xf32>, vector<16x48xf32>, vector<8x48xf32> -> vector<8x48xf32>
    %689 = vector.extract_strided_slice %687 {offsets = [0, 0], sizes = [8, 16], strides = [1, 1]} : vector<8x48xf32> to vector<8x16xf32>
    %690 = vector.extract_strided_slice %688 {offsets = [0, 0], sizes = [8, 16], strides = [1, 1]} : vector<8x48xf32> to vector<8x16xf32>
    %691 = arith.addf %689, %690 : vector<8x16xf32>
    %692 = arith.negf %691 : vector<8x16xf32>
    %693 = math.exp %692 : vector<8x16xf32>
    %cst_164 = arith.constant 1.000000e+00 : f32
    %694 = vector.broadcast %cst_164 : f32 to vector<8x16xf32>
    %695 = arith.addf %694, %693 : vector<8x16xf32>
    %696 = arith.divf %694, %695 : vector<8x16xf32>
    %697 = vector.extract_strided_slice %687 {offsets = [0, 16], sizes = [8, 16], strides = [1, 1]} : vector<8x48xf32> to vector<8x16xf32>
    %698 = vector.extract_strided_slice %688 {offsets = [0, 16], sizes = [8, 16], strides = [1, 1]} : vector<8x48xf32> to vector<8x16xf32>
    %699 = arith.addf %697, %698 : vector<8x16xf32>
    %700 = arith.negf %699 : vector<8x16xf32>
    %701 = math.exp %700 : vector<8x16xf32>
    %cst_165 = arith.constant 1.000000e+00 : f32
    %702 = vector.broadcast %cst_165 : f32 to vector<8x16xf32>
    %703 = arith.addf %702, %701 : vector<8x16xf32>
    %704 = arith.divf %702, %703 : vector<8x16xf32>
    %705 = vector.extract_strided_slice %687 {offsets = [0, 32], sizes = [8, 16], strides = [1, 1]} : vector<8x48xf32> to vector<8x16xf32>
    %706 = vector.extract_strided_slice %688 {offsets = [0, 32], sizes = [8, 16], strides = [1, 1]} : vector<8x48xf32> to vector<8x16xf32>
    %707 = vector.broadcast %610 : vector<1x16xf32> to vector<8x16xf32>
    %708 = arith.addf %706, %707 : vector<8x16xf32>
    %709 = arith.mulf %696, %708 : vector<8x16xf32>
    %710 = arith.addf %705, %709 : vector<8x16xf32>
    %711 = math.tanh %710 : vector<8x16xf32>
    %cst_166 = arith.constant 1.000000e+00 : f32
    %712 = vector.broadcast %cst_166 : f32 to vector<8x16xf32>
    %713 = arith.subf %712, %704 : vector<8x16xf32>
    %714 = arith.mulf %713, %711 : vector<8x16xf32>
    %715 = arith.mulf %704, %685 : vector<8x16xf32>
    %716 = arith.addf %714, %715 : vector<8x16xf32>
    %cst_167 = arith.constant 2.000000e+00 : f32
    %717 = vector.broadcast %cst_167 : f32 to vector<8x1xf32>
    %718 = arith.cmpf ogt, %0, %717 : vector<8x1xf32>
    %719 = vector.shape_cast %718 : vector<8x1xi1> to vector<8x1xi1>
    %720 = vector.broadcast %719 : vector<8x1xi1> to vector<8x16xi1>
    %721 = arith.select %720, %716, %685 : vector<8x16xi1>, vector<8x16xf32>
    %c16_168 = arith.constant 16 : index
    %c0_169 = arith.constant 0 : index
    %722 = vector.load %arg15[%c16_168, %c0_169] : memref<64x32xf32, #tpu.memory_space<vmem>>, vector<8x16xf32>
    tpu.vector_store %arg15[%c16_168, %c0_169], %721 {strides = array<i32>} : memref<64x32xf32, #tpu.memory_space<vmem>>, vector<8x16xf32>,
    %723 = vector.extract_strided_slice %613 {offsets = [24, 0], sizes = [8, 48], strides = [1, 1]} : vector<64x48xf32> to vector<8x48xf32>
    %cst_170 = arith.constant dense<0.000000e+00> : vector<8x48xf32>
    %724 = tpu.matmul %721, %606, %cst_170 {dimension_numbers = #tpu.dot_dimension_numbers<[1], [0], [0], [1], [0, 0, 1, 1], [], []>} : vector<8x16xf32>, vector<16x48xf32>, vector<8x48xf32> -> vector<8x48xf32>
    %725 = vector.extract_strided_slice %723 {offsets = [0, 0], sizes = [8, 16], strides = [1, 1]} : vector<8x48xf32> to vector<8x16xf32>
    %726 = vector.extract_strided_slice %724 {offsets = [0, 0], sizes = [8, 16], strides = [1, 1]} : vector<8x48xf32> to vector<8x16xf32>
    %727 = arith.addf %725, %726 : vector<8x16xf32>
    %728 = arith.negf %727 : vector<8x16xf32>
    %729 = math.exp %728 : vector<8x16xf32>
    %cst_171 = arith.constant 1.000000e+00 : f32
    %730 = vector.broadcast %cst_171 : f32 to vector<8x16xf32>
    %731 = arith.addf %730, %729 : vector<8x16xf32>
    %732 = arith.divf %730, %731 : vector<8x16xf32>
    %733 = vector.extract_strided_slice %723 {offsets = [0, 16], sizes = [8, 16], strides = [1, 1]} : vector<8x48xf32> to vector<8x16xf32>
    %734 = vector.extract_strided_slice %724 {offsets = [0, 16], sizes = [8, 16], strides = [1, 1]} : vector<8x48xf32> to vector<8x16xf32>
    %735 = arith.addf %733, %734 : vector<8x16xf32>
    %736 = arith.negf %735 : vector<8x16xf32>
    %737 = math.exp %736 : vector<8x16xf32>
    %cst_172 = arith.constant 1.000000e+00 : f32
    %738 = vector.broadcast %cst_172 : f32 to vector<8x16xf32>
    %739 = arith.addf %738, %737 : vector<8x16xf32>
    %740 = arith.divf %738, %739 : vector<8x16xf32>
    %741 = vector.extract_strided_slice %723 {offsets = [0, 32], sizes = [8, 16], strides = [1, 1]} : vector<8x48xf32> to vector<8x16xf32>
    %742 = vector.extract_strided_slice %724 {offsets = [0, 32], sizes = [8, 16], strides = [1, 1]} : vector<8x48xf32> to vector<8x16xf32>
    %743 = vector.broadcast %610 : vector<1x16xf32> to vector<8x16xf32>
    %744 = arith.addf %742, %743 : vector<8x16xf32>
    %745 = arith.mulf %732, %744 : vector<8x16xf32>
    %746 = arith.addf %741, %745 : vector<8x16xf32>
    %747 = math.tanh %746 : vector<8x16xf32>
    %cst_173 = arith.constant 1.000000e+00 : f32
    %748 = vector.broadcast %cst_173 : f32 to vector<8x16xf32>
    %749 = arith.subf %748, %740 : vector<8x16xf32>
    %750 = arith.mulf %749, %747 : vector<8x16xf32>
    %751 = arith.mulf %740, %721 : vector<8x16xf32>
    %752 = arith.addf %750, %751 : vector<8x16xf32>
    %cst_174 = arith.constant 3.000000e+00 : f32
    %753 = vector.broadcast %cst_174 : f32 to vector<8x1xf32>
    %754 = arith.cmpf ogt, %0, %753 : vector<8x1xf32>
    %755 = vector.shape_cast %754 : vector<8x1xi1> to vector<8x1xi1>
    %756 = vector.broadcast %755 : vector<8x1xi1> to vector<8x16xi1>
    %757 = arith.select %756, %752, %721 : vector<8x16xi1>, vector<8x16xf32>
    %c24_175 = arith.constant 24 : index
    %c0_176 = arith.constant 0 : index
    %758 = vector.load %arg15[%c24_175, %c0_176] : memref<64x32xf32, #tpu.memory_space<vmem>>, vector<8x16xf32>
    tpu.vector_store %arg15[%c24_175, %c0_176], %757 {strides = array<i32>} : memref<64x32xf32, #tpu.memory_space<vmem>>, vector<8x16xf32>,
    %759 = vector.extract_strided_slice %613 {offsets = [32, 0], sizes = [8, 48], strides = [1, 1]} : vector<64x48xf32> to vector<8x48xf32>
    %cst_177 = arith.constant dense<0.000000e+00> : vector<8x48xf32>
    %760 = tpu.matmul %757, %606, %cst_177 {dimension_numbers = #tpu.dot_dimension_numbers<[1], [0], [0], [1], [0, 0, 1, 1], [], []>} : vector<8x16xf32>, vector<16x48xf32>, vector<8x48xf32> -> vector<8x48xf32>
    %761 = vector.extract_strided_slice %759 {offsets = [0, 0], sizes = [8, 16], strides = [1, 1]} : vector<8x48xf32> to vector<8x16xf32>
    %762 = vector.extract_strided_slice %760 {offsets = [0, 0], sizes = [8, 16], strides = [1, 1]} : vector<8x48xf32> to vector<8x16xf32>
    %763 = arith.addf %761, %762 : vector<8x16xf32>
    %764 = arith.negf %763 : vector<8x16xf32>
    %765 = math.exp %764 : vector<8x16xf32>
    %cst_178 = arith.constant 1.000000e+00 : f32
    %766 = vector.broadcast %cst_178 : f32 to vector<8x16xf32>
    %767 = arith.addf %766, %765 : vector<8x16xf32>
    %768 = arith.divf %766, %767 : vector<8x16xf32>
    %769 = vector.extract_strided_slice %759 {offsets = [0, 16], sizes = [8, 16], strides = [1, 1]} : vector<8x48xf32> to vector<8x16xf32>
    %770 = vector.extract_strided_slice %760 {offsets = [0, 16], sizes = [8, 16], strides = [1, 1]} : vector<8x48xf32> to vector<8x16xf32>
    %771 = arith.addf %769, %770 : vector<8x16xf32>
    %772 = arith.negf %771 : vector<8x16xf32>
    %773 = math.exp %772 : vector<8x16xf32>
    %cst_179 = arith.constant 1.000000e+00 : f32
    %774 = vector.broadcast %cst_179 : f32 to vector<8x16xf32>
    %775 = arith.addf %774, %773 : vector<8x16xf32>
    %776 = arith.divf %774, %775 : vector<8x16xf32>
    %777 = vector.extract_strided_slice %759 {offsets = [0, 32], sizes = [8, 16], strides = [1, 1]} : vector<8x48xf32> to vector<8x16xf32>
    %778 = vector.extract_strided_slice %760 {offsets = [0, 32], sizes = [8, 16], strides = [1, 1]} : vector<8x48xf32> to vector<8x16xf32>
    %779 = vector.broadcast %610 : vector<1x16xf32> to vector<8x16xf32>
    %780 = arith.addf %778, %779 : vector<8x16xf32>
    %781 = arith.mulf %768, %780 : vector<8x16xf32>
    %782 = arith.addf %777, %781 : vector<8x16xf32>
    %783 = math.tanh %782 : vector<8x16xf32>
    %cst_180 = arith.constant 1.000000e+00 : f32
    %784 = vector.broadcast %cst_180 : f32 to vector<8x16xf32>
    %785 = arith.subf %784, %776 : vector<8x16xf32>
    %786 = arith.mulf %785, %783 : vector<8x16xf32>
    %787 = arith.mulf %776, %757 : vector<8x16xf32>
    %788 = arith.addf %786, %787 : vector<8x16xf32>
    %cst_181 = arith.constant 4.000000e+00 : f32
    %789 = vector.broadcast %cst_181 : f32 to vector<8x1xf32>
    %790 = arith.cmpf ogt, %0, %789 : vector<8x1xf32>
    %791 = vector.shape_cast %790 : vector<8x1xi1> to vector<8x1xi1>
    %792 = vector.broadcast %791 : vector<8x1xi1> to vector<8x16xi1>
    %793 = arith.select %792, %788, %757 : vector<8x16xi1>, vector<8x16xf32>
    %c32_182 = arith.constant 32 : index
    %c0_183 = arith.constant 0 : index
    %794 = vector.load %arg15[%c32_182, %c0_183] : memref<64x32xf32, #tpu.memory_space<vmem>>, vector<8x16xf32>
    tpu.vector_store %arg15[%c32_182, %c0_183], %793 {strides = array<i32>} : memref<64x32xf32, #tpu.memory_space<vmem>>, vector<8x16xf32>,
    %795 = vector.extract_strided_slice %613 {offsets = [40, 0], sizes = [8, 48], strides = [1, 1]} : vector<64x48xf32> to vector<8x48xf32>
    %cst_184 = arith.constant dense<0.000000e+00> : vector<8x48xf32>
    %796 = tpu.matmul %793, %606, %cst_184 {dimension_numbers = #tpu.dot_dimension_numbers<[1], [0], [0], [1], [0, 0, 1, 1], [], []>} : vector<8x16xf32>, vector<16x48xf32>, vector<8x48xf32> -> vector<8x48xf32>
    %797 = vector.extract_strided_slice %795 {offsets = [0, 0], sizes = [8, 16], strides = [1, 1]} : vector<8x48xf32> to vector<8x16xf32>
    %798 = vector.extract_strided_slice %796 {offsets = [0, 0], sizes = [8, 16], strides = [1, 1]} : vector<8x48xf32> to vector<8x16xf32>
    %799 = arith.addf %797, %798 : vector<8x16xf32>
    %800 = arith.negf %799 : vector<8x16xf32>
    %801 = math.exp %800 : vector<8x16xf32>
    %cst_185 = arith.constant 1.000000e+00 : f32
    %802 = vector.broadcast %cst_185 : f32 to vector<8x16xf32>
    %803 = arith.addf %802, %801 : vector<8x16xf32>
    %804 = arith.divf %802, %803 : vector<8x16xf32>
    %805 = vector.extract_strided_slice %795 {offsets = [0, 16], sizes = [8, 16], strides = [1, 1]} : vector<8x48xf32> to vector<8x16xf32>
    %806 = vector.extract_strided_slice %796 {offsets = [0, 16], sizes = [8, 16], strides = [1, 1]} : vector<8x48xf32> to vector<8x16xf32>
    %807 = arith.addf %805, %806 : vector<8x16xf32>
    %808 = arith.negf %807 : vector<8x16xf32>
    %809 = math.exp %808 : vector<8x16xf32>
    %cst_186 = arith.constant 1.000000e+00 : f32
    %810 = vector.broadcast %cst_186 : f32 to vector<8x16xf32>
    %811 = arith.addf %810, %809 : vector<8x16xf32>
    %812 = arith.divf %810, %811 : vector<8x16xf32>
    %813 = vector.extract_strided_slice %795 {offsets = [0, 32], sizes = [8, 16], strides = [1, 1]} : vector<8x48xf32> to vector<8x16xf32>
    %814 = vector.extract_strided_slice %796 {offsets = [0, 32], sizes = [8, 16], strides = [1, 1]} : vector<8x48xf32> to vector<8x16xf32>
    %815 = vector.broadcast %610 : vector<1x16xf32> to vector<8x16xf32>
    %816 = arith.addf %814, %815 : vector<8x16xf32>
    %817 = arith.mulf %804, %816 : vector<8x16xf32>
    %818 = arith.addf %813, %817 : vector<8x16xf32>
    %819 = math.tanh %818 : vector<8x16xf32>
    %cst_187 = arith.constant 1.000000e+00 : f32
    %820 = vector.broadcast %cst_187 : f32 to vector<8x16xf32>
    %821 = arith.subf %820, %812 : vector<8x16xf32>
    %822 = arith.mulf %821, %819 : vector<8x16xf32>
    %823 = arith.mulf %812, %793 : vector<8x16xf32>
    %824 = arith.addf %822, %823 : vector<8x16xf32>
    %cst_188 = arith.constant 5.000000e+00 : f32
    %825 = vector.broadcast %cst_188 : f32 to vector<8x1xf32>
    %826 = arith.cmpf ogt, %0, %825 : vector<8x1xf32>
    %827 = vector.shape_cast %826 : vector<8x1xi1> to vector<8x1xi1>
    %828 = vector.broadcast %827 : vector<8x1xi1> to vector<8x16xi1>
    %829 = arith.select %828, %824, %793 : vector<8x16xi1>, vector<8x16xf32>
    %c40_189 = arith.constant 40 : index
    %c0_190 = arith.constant 0 : index
    %830 = vector.load %arg15[%c40_189, %c0_190] : memref<64x32xf32, #tpu.memory_space<vmem>>, vector<8x16xf32>
    tpu.vector_store %arg15[%c40_189, %c0_190], %829 {strides = array<i32>} : memref<64x32xf32, #tpu.memory_space<vmem>>, vector<8x16xf32>,
    %831 = vector.extract_strided_slice %613 {offsets = [48, 0], sizes = [8, 48], strides = [1, 1]} : vector<64x48xf32> to vector<8x48xf32>
    %cst_191 = arith.constant dense<0.000000e+00> : vector<8x48xf32>
    %832 = tpu.matmul %829, %606, %cst_191 {dimension_numbers = #tpu.dot_dimension_numbers<[1], [0], [0], [1], [0, 0, 1, 1], [], []>} : vector<8x16xf32>, vector<16x48xf32>, vector<8x48xf32> -> vector<8x48xf32>
    %833 = vector.extract_strided_slice %831 {offsets = [0, 0], sizes = [8, 16], strides = [1, 1]} : vector<8x48xf32> to vector<8x16xf32>
    %834 = vector.extract_strided_slice %832 {offsets = [0, 0], sizes = [8, 16], strides = [1, 1]} : vector<8x48xf32> to vector<8x16xf32>
    %835 = arith.addf %833, %834 : vector<8x16xf32>
    %836 = arith.negf %835 : vector<8x16xf32>
    %837 = math.exp %836 : vector<8x16xf32>
    %cst_192 = arith.constant 1.000000e+00 : f32
    %838 = vector.broadcast %cst_192 : f32 to vector<8x16xf32>
    %839 = arith.addf %838, %837 : vector<8x16xf32>
    %840 = arith.divf %838, %839 : vector<8x16xf32>
    %841 = vector.extract_strided_slice %831 {offsets = [0, 16], sizes = [8, 16], strides = [1, 1]} : vector<8x48xf32> to vector<8x16xf32>
    %842 = vector.extract_strided_slice %832 {offsets = [0, 16], sizes = [8, 16], strides = [1, 1]} : vector<8x48xf32> to vector<8x16xf32>
    %843 = arith.addf %841, %842 : vector<8x16xf32>
    %844 = arith.negf %843 : vector<8x16xf32>
    %845 = math.exp %844 : vector<8x16xf32>
    %cst_193 = arith.constant 1.000000e+00 : f32
    %846 = vector.broadcast %cst_193 : f32 to vector<8x16xf32>
    %847 = arith.addf %846, %845 : vector<8x16xf32>
    %848 = arith.divf %846, %847 : vector<8x16xf32>
    %849 = vector.extract_strided_slice %831 {offsets = [0, 32], sizes = [8, 16], strides = [1, 1]} : vector<8x48xf32> to vector<8x16xf32>
    %850 = vector.extract_strided_slice %832 {offsets = [0, 32], sizes = [8, 16], strides = [1, 1]} : vector<8x48xf32> to vector<8x16xf32>
    %851 = vector.broadcast %610 : vector<1x16xf32> to vector<8x16xf32>
    %852 = arith.addf %850, %851 : vector<8x16xf32>
    %853 = arith.mulf %840, %852 : vector<8x16xf32>
    %854 = arith.addf %849, %853 : vector<8x16xf32>
    %855 = math.tanh %854 : vector<8x16xf32>
    %cst_194 = arith.constant 1.000000e+00 : f32
    %856 = vector.broadcast %cst_194 : f32 to vector<8x16xf32>
    %857 = arith.subf %856, %848 : vector<8x16xf32>
    %858 = arith.mulf %857, %855 : vector<8x16xf32>
    %859 = arith.mulf %848, %829 : vector<8x16xf32>
    %860 = arith.addf %858, %859 : vector<8x16xf32>
    %cst_195 = arith.constant 6.000000e+00 : f32
    %861 = vector.broadcast %cst_195 : f32 to vector<8x1xf32>
    %862 = arith.cmpf ogt, %0, %861 : vector<8x1xf32>
    %863 = vector.shape_cast %862 : vector<8x1xi1> to vector<8x1xi1>
    %864 = vector.broadcast %863 : vector<8x1xi1> to vector<8x16xi1>
    %865 = arith.select %864, %860, %829 : vector<8x16xi1>, vector<8x16xf32>
    %c48_196 = arith.constant 48 : index
    %c0_197 = arith.constant 0 : index
    %866 = vector.load %arg15[%c48_196, %c0_197] : memref<64x32xf32, #tpu.memory_space<vmem>>, vector<8x16xf32>
    tpu.vector_store %arg15[%c48_196, %c0_197], %865 {strides = array<i32>} : memref<64x32xf32, #tpu.memory_space<vmem>>, vector<8x16xf32>,
    %867 = vector.extract_strided_slice %613 {offsets = [56, 0], sizes = [8, 48], strides = [1, 1]} : vector<64x48xf32> to vector<8x48xf32>
    %cst_198 = arith.constant dense<0.000000e+00> : vector<8x48xf32>
    %868 = tpu.matmul %865, %606, %cst_198 {dimension_numbers = #tpu.dot_dimension_numbers<[1], [0], [0], [1], [0, 0, 1, 1], [], []>} : vector<8x16xf32>, vector<16x48xf32>, vector<8x48xf32> -> vector<8x48xf32>
    %869 = vector.extract_strided_slice %867 {offsets = [0, 0], sizes = [8, 16], strides = [1, 1]} : vector<8x48xf32> to vector<8x16xf32>
    %870 = vector.extract_strided_slice %868 {offsets = [0, 0], sizes = [8, 16], strides = [1, 1]} : vector<8x48xf32> to vector<8x16xf32>
    %871 = arith.addf %869, %870 : vector<8x16xf32>
    %872 = arith.negf %871 : vector<8x16xf32>
    %873 = math.exp %872 : vector<8x16xf32>
    %cst_199 = arith.constant 1.000000e+00 : f32
    %874 = vector.broadcast %cst_199 : f32 to vector<8x16xf32>
    %875 = arith.addf %874, %873 : vector<8x16xf32>
    %876 = arith.divf %874, %875 : vector<8x16xf32>
    %877 = vector.extract_strided_slice %867 {offsets = [0, 16], sizes = [8, 16], strides = [1, 1]} : vector<8x48xf32> to vector<8x16xf32>
    %878 = vector.extract_strided_slice %868 {offsets = [0, 16], sizes = [8, 16], strides = [1, 1]} : vector<8x48xf32> to vector<8x16xf32>
    %879 = arith.addf %877, %878 : vector<8x16xf32>
    %880 = arith.negf %879 : vector<8x16xf32>
    %881 = math.exp %880 : vector<8x16xf32>
    %cst_200 = arith.constant 1.000000e+00 : f32
    %882 = vector.broadcast %cst_200 : f32 to vector<8x16xf32>
    %883 = arith.addf %882, %881 : vector<8x16xf32>
    %884 = arith.divf %882, %883 : vector<8x16xf32>
    %885 = vector.extract_strided_slice %867 {offsets = [0, 32], sizes = [8, 16], strides = [1, 1]} : vector<8x48xf32> to vector<8x16xf32>
    %886 = vector.extract_strided_slice %868 {offsets = [0, 32], sizes = [8, 16], strides = [1, 1]} : vector<8x48xf32> to vector<8x16xf32>
    %887 = vector.broadcast %610 : vector<1x16xf32> to vector<8x16xf32>
    %888 = arith.addf %886, %887 : vector<8x16xf32>
    %889 = arith.mulf %876, %888 : vector<8x16xf32>
    %890 = arith.addf %885, %889 : vector<8x16xf32>
    %891 = math.tanh %890 : vector<8x16xf32>
    %cst_201 = arith.constant 1.000000e+00 : f32
    %892 = vector.broadcast %cst_201 : f32 to vector<8x16xf32>
    %893 = arith.subf %892, %884 : vector<8x16xf32>
    %894 = arith.mulf %893, %891 : vector<8x16xf32>
    %895 = arith.mulf %884, %865 : vector<8x16xf32>
    %896 = arith.addf %894, %895 : vector<8x16xf32>
    %cst_202 = arith.constant 7.000000e+00 : f32
    %897 = vector.broadcast %cst_202 : f32 to vector<8x1xf32>
    %898 = arith.cmpf ogt, %0, %897 : vector<8x1xf32>
    %899 = vector.shape_cast %898 : vector<8x1xi1> to vector<8x1xi1>
    %900 = vector.broadcast %899 : vector<8x1xi1> to vector<8x16xi1>
    %901 = arith.select %900, %896, %865 : vector<8x16xi1>, vector<8x16xf32>
    %c56_203 = arith.constant 56 : index
    %c0_204 = arith.constant 0 : index
    %902 = vector.load %arg15[%c56_203, %c0_204] : memref<64x32xf32, #tpu.memory_space<vmem>>, vector<8x16xf32>
    tpu.vector_store %arg15[%c56_203, %c0_204], %901 {strides = array<i32>} : memref<64x32xf32, #tpu.memory_space<vmem>>, vector<8x16xf32>,
    %c3 = arith.constant 3 : index
    %c0_205 = arith.constant 0 : index
    %c0_206 = arith.constant 0 : index
    %903 = vector.load %arg3[%c3, %c0_205, %c0_206] : memref<6x32x48xf32, #tpu.memory_space<vmem>>, vector<1x32x48xf32>
    %904 = vector.shape_cast %903 : vector<1x32x48xf32> to vector<32x48xf32>
    %c3_207 = arith.constant 3 : index
    %c0_208 = arith.constant 0 : index
    %c0_209 = arith.constant 0 : index
    %905 = vector.load %arg4[%c3_207, %c0_208, %c0_209] : memref<6x16x48xf32, #tpu.memory_space<vmem>>, vector<1x16x48xf32>
    %906 = vector.shape_cast %905 : vector<1x16x48xf32> to vector<16x48xf32>
    %c3_210 = arith.constant 3 : index
    %c0_211 = arith.constant 0 : index
    %c0_212 = arith.constant 0 : index
    %907 = vector.load %arg5[%c3_210, %c0_211, %c0_212] : memref<6x1x48xf32, #tpu.memory_space<vmem>>, vector<1x1x48xf32>
    %908 = vector.shape_cast %907 : vector<1x1x48xf32> to vector<1x48xf32>
    %c3_213 = arith.constant 3 : index
    %c0_214 = arith.constant 0 : index
    %c0_215 = arith.constant 0 : index
    %909 = vector.load %arg6[%c3_213, %c0_214, %c0_215] : memref<6x1x16xf32, #tpu.memory_space<vmem>>, vector<1x1x16xf32>
    %910 = vector.shape_cast %909 : vector<1x1x16xf32> to vector<1x16xf32>
    %cst_216 = arith.constant dense<0.000000e+00> : vector<64x48xf32>
    %911 = tpu.matmul %602, %904, %cst_216 {dimension_numbers = #tpu.dot_dimension_numbers<[1], [0], [0], [1], [0, 0, 1, 1], [], []>} : vector<64x32xf32>, vector<32x48xf32>, vector<64x48xf32> -> vector<64x48xf32>
    %912 = vector.broadcast %908 : vector<1x48xf32> to vector<64x48xf32>
    %913 = arith.addf %911, %912 : vector<64x48xf32>
    %cst_217 = arith.constant 0.000000e+00 : f32
    %914 = vector.broadcast %cst_217 : f32 to vector<8x16xf32>
    %915 = vector.extract_strided_slice %913 {offsets = [56, 0], sizes = [8, 48], strides = [1, 1]} : vector<64x48xf32> to vector<8x48xf32>
    %cst_218 = arith.constant dense<0.000000e+00> : vector<8x48xf32>
    %916 = tpu.matmul %914, %906, %cst_218 {dimension_numbers = #tpu.dot_dimension_numbers<[1], [0], [0], [1], [0, 0, 1, 1], [], []>} : vector<8x16xf32>, vector<16x48xf32>, vector<8x48xf32> -> vector<8x48xf32>
    %917 = vector.extract_strided_slice %915 {offsets = [0, 0], sizes = [8, 16], strides = [1, 1]} : vector<8x48xf32> to vector<8x16xf32>
    %918 = vector.extract_strided_slice %916 {offsets = [0, 0], sizes = [8, 16], strides = [1, 1]} : vector<8x48xf32> to vector<8x16xf32>
    %919 = arith.addf %917, %918 : vector<8x16xf32>
    %920 = arith.negf %919 : vector<8x16xf32>
    %921 = math.exp %920 : vector<8x16xf32>
    %cst_219 = arith.constant 1.000000e+00 : f32
    %922 = vector.broadcast %cst_219 : f32 to vector<8x16xf32>
    %923 = arith.addf %922, %921 : vector<8x16xf32>
    %924 = arith.divf %922, %923 : vector<8x16xf32>
    %925 = vector.extract_strided_slice %915 {offsets = [0, 16], sizes = [8, 16], strides = [1, 1]} : vector<8x48xf32> to vector<8x16xf32>
    %926 = vector.extract_strided_slice %916 {offsets = [0, 16], sizes = [8, 16], strides = [1, 1]} : vector<8x48xf32> to vector<8x16xf32>
    %927 = arith.addf %925, %926 : vector<8x16xf32>
    %928 = arith.negf %927 : vector<8x16xf32>
    %929 = math.exp %928 : vector<8x16xf32>
    %cst_220 = arith.constant 1.000000e+00 : f32
    %930 = vector.broadcast %cst_220 : f32 to vector<8x16xf32>
    %931 = arith.addf %930, %929 : vector<8x16xf32>
    %932 = arith.divf %930, %931 : vector<8x16xf32>
    %933 = vector.extract_strided_slice %915 {offsets = [0, 32], sizes = [8, 16], strides = [1, 1]} : vector<8x48xf32> to vector<8x16xf32>
    %934 = vector.extract_strided_slice %916 {offsets = [0, 32], sizes = [8, 16], strides = [1, 1]} : vector<8x48xf32> to vector<8x16xf32>
    %935 = vector.broadcast %910 : vector<1x16xf32> to vector<8x16xf32>
    %936 = arith.addf %934, %935 : vector<8x16xf32>
    %937 = arith.mulf %924, %936 : vector<8x16xf32>
    %938 = arith.addf %933, %937 : vector<8x16xf32>
    %939 = math.tanh %938 : vector<8x16xf32>
    %cst_221 = arith.constant 1.000000e+00 : f32
    %940 = vector.broadcast %cst_221 : f32 to vector<8x16xf32>
    %941 = arith.subf %940, %932 : vector<8x16xf32>
    %942 = arith.mulf %941, %939 : vector<8x16xf32>
    %943 = arith.mulf %932, %914 : vector<8x16xf32>
    %944 = arith.addf %942, %943 : vector<8x16xf32>
    %cst_222 = arith.constant 7.000000e+00 : f32
    %945 = vector.broadcast %cst_222 : f32 to vector<8x1xf32>
    %946 = arith.cmpf ogt, %0, %945 : vector<8x1xf32>
    %947 = vector.shape_cast %946 : vector<8x1xi1> to vector<8x1xi1>
    %948 = vector.broadcast %947 : vector<8x1xi1> to vector<8x16xi1>
    %949 = arith.select %948, %944, %914 : vector<8x16xi1>, vector<8x16xf32>
    %c56_223 = arith.constant 56 : index
    %c16_224 = arith.constant 16 : index
    %950 = vector.load %arg15[%c56_223, %c16_224] : memref<64x32xf32, #tpu.memory_space<vmem>>, vector<8x16xf32>
    tpu.vector_store %arg15[%c56_223, %c16_224], %949 {strides = array<i32>} : memref<64x32xf32, #tpu.memory_space<vmem>>, vector<8x16xf32>,
    %951 = vector.extract_strided_slice %913 {offsets = [48, 0], sizes = [8, 48], strides = [1, 1]} : vector<64x48xf32> to vector<8x48xf32>
    %cst_225 = arith.constant dense<0.000000e+00> : vector<8x48xf32>
    %952 = tpu.matmul %949, %906, %cst_225 {dimension_numbers = #tpu.dot_dimension_numbers<[1], [0], [0], [1], [0, 0, 1, 1], [], []>} : vector<8x16xf32>, vector<16x48xf32>, vector<8x48xf32> -> vector<8x48xf32>
    %953 = vector.extract_strided_slice %951 {offsets = [0, 0], sizes = [8, 16], strides = [1, 1]} : vector<8x48xf32> to vector<8x16xf32>
    %954 = vector.extract_strided_slice %952 {offsets = [0, 0], sizes = [8, 16], strides = [1, 1]} : vector<8x48xf32> to vector<8x16xf32>
    %955 = arith.addf %953, %954 : vector<8x16xf32>
    %956 = arith.negf %955 : vector<8x16xf32>
    %957 = math.exp %956 : vector<8x16xf32>
    %cst_226 = arith.constant 1.000000e+00 : f32
    %958 = vector.broadcast %cst_226 : f32 to vector<8x16xf32>
    %959 = arith.addf %958, %957 : vector<8x16xf32>
    %960 = arith.divf %958, %959 : vector<8x16xf32>
    %961 = vector.extract_strided_slice %951 {offsets = [0, 16], sizes = [8, 16], strides = [1, 1]} : vector<8x48xf32> to vector<8x16xf32>
    %962 = vector.extract_strided_slice %952 {offsets = [0, 16], sizes = [8, 16], strides = [1, 1]} : vector<8x48xf32> to vector<8x16xf32>
    %963 = arith.addf %961, %962 : vector<8x16xf32>
    %964 = arith.negf %963 : vector<8x16xf32>
    %965 = math.exp %964 : vector<8x16xf32>
    %cst_227 = arith.constant 1.000000e+00 : f32
    %966 = vector.broadcast %cst_227 : f32 to vector<8x16xf32>
    %967 = arith.addf %966, %965 : vector<8x16xf32>
    %968 = arith.divf %966, %967 : vector<8x16xf32>
    %969 = vector.extract_strided_slice %951 {offsets = [0, 32], sizes = [8, 16], strides = [1, 1]} : vector<8x48xf32> to vector<8x16xf32>
    %970 = vector.extract_strided_slice %952 {offsets = [0, 32], sizes = [8, 16], strides = [1, 1]} : vector<8x48xf32> to vector<8x16xf32>
    %971 = vector.broadcast %910 : vector<1x16xf32> to vector<8x16xf32>
    %972 = arith.addf %970, %971 : vector<8x16xf32>
    %973 = arith.mulf %960, %972 : vector<8x16xf32>
    %974 = arith.addf %969, %973 : vector<8x16xf32>
    %975 = math.tanh %974 : vector<8x16xf32>
    %cst_228 = arith.constant 1.000000e+00 : f32
    %976 = vector.broadcast %cst_228 : f32 to vector<8x16xf32>
    %977 = arith.subf %976, %968 : vector<8x16xf32>
    %978 = arith.mulf %977, %975 : vector<8x16xf32>
    %979 = arith.mulf %968, %949 : vector<8x16xf32>
    %980 = arith.addf %978, %979 : vector<8x16xf32>
    %cst_229 = arith.constant 6.000000e+00 : f32
    %981 = vector.broadcast %cst_229 : f32 to vector<8x1xf32>
    %982 = arith.cmpf ogt, %0, %981 : vector<8x1xf32>
    %983 = vector.shape_cast %982 : vector<8x1xi1> to vector<8x1xi1>
    %984 = vector.broadcast %983 : vector<8x1xi1> to vector<8x16xi1>
    %985 = arith.select %984, %980, %949 : vector<8x16xi1>, vector<8x16xf32>
    %c48_230 = arith.constant 48 : index
    %c16_231 = arith.constant 16 : index
    %986 = vector.load %arg15[%c48_230, %c16_231] : memref<64x32xf32, #tpu.memory_space<vmem>>, vector<8x16xf32>
    tpu.vector_store %arg15[%c48_230, %c16_231], %985 {strides = array<i32>} : memref<64x32xf32, #tpu.memory_space<vmem>>, vector<8x16xf32>,
    %987 = vector.extract_strided_slice %913 {offsets = [40, 0], sizes = [8, 48], strides = [1, 1]} : vector<64x48xf32> to vector<8x48xf32>
    %cst_232 = arith.constant dense<0.000000e+00> : vector<8x48xf32>
    %988 = tpu.matmul %985, %906, %cst_232 {dimension_numbers = #tpu.dot_dimension_numbers<[1], [0], [0], [1], [0, 0, 1, 1], [], []>} : vector<8x16xf32>, vector<16x48xf32>, vector<8x48xf32> -> vector<8x48xf32>
    %989 = vector.extract_strided_slice %987 {offsets = [0, 0], sizes = [8, 16], strides = [1, 1]} : vector<8x48xf32> to vector<8x16xf32>
    %990 = vector.extract_strided_slice %988 {offsets = [0, 0], sizes = [8, 16], strides = [1, 1]} : vector<8x48xf32> to vector<8x16xf32>
    %991 = arith.addf %989, %990 : vector<8x16xf32>
    %992 = arith.negf %991 : vector<8x16xf32>
    %993 = math.exp %992 : vector<8x16xf32>
    %cst_233 = arith.constant 1.000000e+00 : f32
    %994 = vector.broadcast %cst_233 : f32 to vector<8x16xf32>
    %995 = arith.addf %994, %993 : vector<8x16xf32>
    %996 = arith.divf %994, %995 : vector<8x16xf32>
    %997 = vector.extract_strided_slice %987 {offsets = [0, 16], sizes = [8, 16], strides = [1, 1]} : vector<8x48xf32> to vector<8x16xf32>
    %998 = vector.extract_strided_slice %988 {offsets = [0, 16], sizes = [8, 16], strides = [1, 1]} : vector<8x48xf32> to vector<8x16xf32>
    %999 = arith.addf %997, %998 : vector<8x16xf32>
    %1000 = arith.negf %999 : vector<8x16xf32>
    %1001 = math.exp %1000 : vector<8x16xf32>
    %cst_234 = arith.constant 1.000000e+00 : f32
    %1002 = vector.broadcast %cst_234 : f32 to vector<8x16xf32>
    %1003 = arith.addf %1002, %1001 : vector<8x16xf32>
    %1004 = arith.divf %1002, %1003 : vector<8x16xf32>
    %1005 = vector.extract_strided_slice %987 {offsets = [0, 32], sizes = [8, 16], strides = [1, 1]} : vector<8x48xf32> to vector<8x16xf32>
    %1006 = vector.extract_strided_slice %988 {offsets = [0, 32], sizes = [8, 16], strides = [1, 1]} : vector<8x48xf32> to vector<8x16xf32>
    %1007 = vector.broadcast %910 : vector<1x16xf32> to vector<8x16xf32>
    %1008 = arith.addf %1006, %1007 : vector<8x16xf32>
    %1009 = arith.mulf %996, %1008 : vector<8x16xf32>
    %1010 = arith.addf %1005, %1009 : vector<8x16xf32>
    %1011 = math.tanh %1010 : vector<8x16xf32>
    %cst_235 = arith.constant 1.000000e+00 : f32
    %1012 = vector.broadcast %cst_235 : f32 to vector<8x16xf32>
    %1013 = arith.subf %1012, %1004 : vector<8x16xf32>
    %1014 = arith.mulf %1013, %1011 : vector<8x16xf32>
    %1015 = arith.mulf %1004, %985 : vector<8x16xf32>
    %1016 = arith.addf %1014, %1015 : vector<8x16xf32>
    %cst_236 = arith.constant 5.000000e+00 : f32
    %1017 = vector.broadcast %cst_236 : f32 to vector<8x1xf32>
    %1018 = arith.cmpf ogt, %0, %1017 : vector<8x1xf32>
    %1019 = vector.shape_cast %1018 : vector<8x1xi1> to vector<8x1xi1>
    %1020 = vector.broadcast %1019 : vector<8x1xi1> to vector<8x16xi1>
    %1021 = arith.select %1020, %1016, %985 : vector<8x16xi1>, vector<8x16xf32>
    %c40_237 = arith.constant 40 : index
    %c16_238 = arith.constant 16 : index
    %1022 = vector.load %arg15[%c40_237, %c16_238] : memref<64x32xf32, #tpu.memory_space<vmem>>, vector<8x16xf32>
    tpu.vector_store %arg15[%c40_237, %c16_238], %1021 {strides = array<i32>} : memref<64x32xf32, #tpu.memory_space<vmem>>, vector<8x16xf32>,
    %1023 = vector.extract_strided_slice %913 {offsets = [32, 0], sizes = [8, 48], strides = [1, 1]} : vector<64x48xf32> to vector<8x48xf32>
    %cst_239 = arith.constant dense<0.000000e+00> : vector<8x48xf32>
    %1024 = tpu.matmul %1021, %906, %cst_239 {dimension_numbers = #tpu.dot_dimension_numbers<[1], [0], [0], [1], [0, 0, 1, 1], [], []>} : vector<8x16xf32>, vector<16x48xf32>, vector<8x48xf32> -> vector<8x48xf32>
    %1025 = vector.extract_strided_slice %1023 {offsets = [0, 0], sizes = [8, 16], strides = [1, 1]} : vector<8x48xf32> to vector<8x16xf32>
    %1026 = vector.extract_strided_slice %1024 {offsets = [0, 0], sizes = [8, 16], strides = [1, 1]} : vector<8x48xf32> to vector<8x16xf32>
    %1027 = arith.addf %1025, %1026 : vector<8x16xf32>
    %1028 = arith.negf %1027 : vector<8x16xf32>
    %1029 = math.exp %1028 : vector<8x16xf32>
    %cst_240 = arith.constant 1.000000e+00 : f32
    %1030 = vector.broadcast %cst_240 : f32 to vector<8x16xf32>
    %1031 = arith.addf %1030, %1029 : vector<8x16xf32>
    %1032 = arith.divf %1030, %1031 : vector<8x16xf32>
    %1033 = vector.extract_strided_slice %1023 {offsets = [0, 16], sizes = [8, 16], strides = [1, 1]} : vector<8x48xf32> to vector<8x16xf32>
    %1034 = vector.extract_strided_slice %1024 {offsets = [0, 16], sizes = [8, 16], strides = [1, 1]} : vector<8x48xf32> to vector<8x16xf32>
    %1035 = arith.addf %1033, %1034 : vector<8x16xf32>
    %1036 = arith.negf %1035 : vector<8x16xf32>
    %1037 = math.exp %1036 : vector<8x16xf32>
    %cst_241 = arith.constant 1.000000e+00 : f32
    %1038 = vector.broadcast %cst_241 : f32 to vector<8x16xf32>
    %1039 = arith.addf %1038, %1037 : vector<8x16xf32>
    %1040 = arith.divf %1038, %1039 : vector<8x16xf32>
    %1041 = vector.extract_strided_slice %1023 {offsets = [0, 32], sizes = [8, 16], strides = [1, 1]} : vector<8x48xf32> to vector<8x16xf32>
    %1042 = vector.extract_strided_slice %1024 {offsets = [0, 32], sizes = [8, 16], strides = [1, 1]} : vector<8x48xf32> to vector<8x16xf32>
    %1043 = vector.broadcast %910 : vector<1x16xf32> to vector<8x16xf32>
    %1044 = arith.addf %1042, %1043 : vector<8x16xf32>
    %1045 = arith.mulf %1032, %1044 : vector<8x16xf32>
    %1046 = arith.addf %1041, %1045 : vector<8x16xf32>
    %1047 = math.tanh %1046 : vector<8x16xf32>
    %cst_242 = arith.constant 1.000000e+00 : f32
    %1048 = vector.broadcast %cst_242 : f32 to vector<8x16xf32>
    %1049 = arith.subf %1048, %1040 : vector<8x16xf32>
    %1050 = arith.mulf %1049, %1047 : vector<8x16xf32>
    %1051 = arith.mulf %1040, %1021 : vector<8x16xf32>
    %1052 = arith.addf %1050, %1051 : vector<8x16xf32>
    %cst_243 = arith.constant 4.000000e+00 : f32
    %1053 = vector.broadcast %cst_243 : f32 to vector<8x1xf32>
    %1054 = arith.cmpf ogt, %0, %1053 : vector<8x1xf32>
    %1055 = vector.shape_cast %1054 : vector<8x1xi1> to vector<8x1xi1>
    %1056 = vector.broadcast %1055 : vector<8x1xi1> to vector<8x16xi1>
    %1057 = arith.select %1056, %1052, %1021 : vector<8x16xi1>, vector<8x16xf32>
    %c32_244 = arith.constant 32 : index
    %c16_245 = arith.constant 16 : index
    %1058 = vector.load %arg15[%c32_244, %c16_245] : memref<64x32xf32, #tpu.memory_space<vmem>>, vector<8x16xf32>
    tpu.vector_store %arg15[%c32_244, %c16_245], %1057 {strides = array<i32>} : memref<64x32xf32, #tpu.memory_space<vmem>>, vector<8x16xf32>,
    %1059 = vector.extract_strided_slice %913 {offsets = [24, 0], sizes = [8, 48], strides = [1, 1]} : vector<64x48xf32> to vector<8x48xf32>
    %cst_246 = arith.constant dense<0.000000e+00> : vector<8x48xf32>
    %1060 = tpu.matmul %1057, %906, %cst_246 {dimension_numbers = #tpu.dot_dimension_numbers<[1], [0], [0], [1], [0, 0, 1, 1], [], []>} : vector<8x16xf32>, vector<16x48xf32>, vector<8x48xf32> -> vector<8x48xf32>
    %1061 = vector.extract_strided_slice %1059 {offsets = [0, 0], sizes = [8, 16], strides = [1, 1]} : vector<8x48xf32> to vector<8x16xf32>
    %1062 = vector.extract_strided_slice %1060 {offsets = [0, 0], sizes = [8, 16], strides = [1, 1]} : vector<8x48xf32> to vector<8x16xf32>
    %1063 = arith.addf %1061, %1062 : vector<8x16xf32>
    %1064 = arith.negf %1063 : vector<8x16xf32>
    %1065 = math.exp %1064 : vector<8x16xf32>
    %cst_247 = arith.constant 1.000000e+00 : f32
    %1066 = vector.broadcast %cst_247 : f32 to vector<8x16xf32>
    %1067 = arith.addf %1066, %1065 : vector<8x16xf32>
    %1068 = arith.divf %1066, %1067 : vector<8x16xf32>
    %1069 = vector.extract_strided_slice %1059 {offsets = [0, 16], sizes = [8, 16], strides = [1, 1]} : vector<8x48xf32> to vector<8x16xf32>
    %1070 = vector.extract_strided_slice %1060 {offsets = [0, 16], sizes = [8, 16], strides = [1, 1]} : vector<8x48xf32> to vector<8x16xf32>
    %1071 = arith.addf %1069, %1070 : vector<8x16xf32>
    %1072 = arith.negf %1071 : vector<8x16xf32>
    %1073 = math.exp %1072 : vector<8x16xf32>
    %cst_248 = arith.constant 1.000000e+00 : f32
    %1074 = vector.broadcast %cst_248 : f32 to vector<8x16xf32>
    %1075 = arith.addf %1074, %1073 : vector<8x16xf32>
    %1076 = arith.divf %1074, %1075 : vector<8x16xf32>
    %1077 = vector.extract_strided_slice %1059 {offsets = [0, 32], sizes = [8, 16], strides = [1, 1]} : vector<8x48xf32> to vector<8x16xf32>
    %1078 = vector.extract_strided_slice %1060 {offsets = [0, 32], sizes = [8, 16], strides = [1, 1]} : vector<8x48xf32> to vector<8x16xf32>
    %1079 = vector.broadcast %910 : vector<1x16xf32> to vector<8x16xf32>
    %1080 = arith.addf %1078, %1079 : vector<8x16xf32>
    %1081 = arith.mulf %1068, %1080 : vector<8x16xf32>
    %1082 = arith.addf %1077, %1081 : vector<8x16xf32>
    %1083 = math.tanh %1082 : vector<8x16xf32>
    %cst_249 = arith.constant 1.000000e+00 : f32
    %1084 = vector.broadcast %cst_249 : f32 to vector<8x16xf32>
    %1085 = arith.subf %1084, %1076 : vector<8x16xf32>
    %1086 = arith.mulf %1085, %1083 : vector<8x16xf32>
    %1087 = arith.mulf %1076, %1057 : vector<8x16xf32>
    %1088 = arith.addf %1086, %1087 : vector<8x16xf32>
    %cst_250 = arith.constant 3.000000e+00 : f32
    %1089 = vector.broadcast %cst_250 : f32 to vector<8x1xf32>
    %1090 = arith.cmpf ogt, %0, %1089 : vector<8x1xf32>
    %1091 = vector.shape_cast %1090 : vector<8x1xi1> to vector<8x1xi1>
    %1092 = vector.broadcast %1091 : vector<8x1xi1> to vector<8x16xi1>
    %1093 = arith.select %1092, %1088, %1057 : vector<8x16xi1>, vector<8x16xf32>
    %c24_251 = arith.constant 24 : index
    %c16_252 = arith.constant 16 : index
    %1094 = vector.load %arg15[%c24_251, %c16_252] : memref<64x32xf32, #tpu.memory_space<vmem>>, vector<8x16xf32>
    tpu.vector_store %arg15[%c24_251, %c16_252], %1093 {strides = array<i32>} : memref<64x32xf32, #tpu.memory_space<vmem>>, vector<8x16xf32>,
    %1095 = vector.extract_strided_slice %913 {offsets = [16, 0], sizes = [8, 48], strides = [1, 1]} : vector<64x48xf32> to vector<8x48xf32>
    %cst_253 = arith.constant dense<0.000000e+00> : vector<8x48xf32>
    %1096 = tpu.matmul %1093, %906, %cst_253 {dimension_numbers = #tpu.dot_dimension_numbers<[1], [0], [0], [1], [0, 0, 1, 1], [], []>} : vector<8x16xf32>, vector<16x48xf32>, vector<8x48xf32> -> vector<8x48xf32>
    %1097 = vector.extract_strided_slice %1095 {offsets = [0, 0], sizes = [8, 16], strides = [1, 1]} : vector<8x48xf32> to vector<8x16xf32>
    %1098 = vector.extract_strided_slice %1096 {offsets = [0, 0], sizes = [8, 16], strides = [1, 1]} : vector<8x48xf32> to vector<8x16xf32>
    %1099 = arith.addf %1097, %1098 : vector<8x16xf32>
    %1100 = arith.negf %1099 : vector<8x16xf32>
    %1101 = math.exp %1100 : vector<8x16xf32>
    %cst_254 = arith.constant 1.000000e+00 : f32
    %1102 = vector.broadcast %cst_254 : f32 to vector<8x16xf32>
    %1103 = arith.addf %1102, %1101 : vector<8x16xf32>
    %1104 = arith.divf %1102, %1103 : vector<8x16xf32>
    %1105 = vector.extract_strided_slice %1095 {offsets = [0, 16], sizes = [8, 16], strides = [1, 1]} : vector<8x48xf32> to vector<8x16xf32>
    %1106 = vector.extract_strided_slice %1096 {offsets = [0, 16], sizes = [8, 16], strides = [1, 1]} : vector<8x48xf32> to vector<8x16xf32>
    %1107 = arith.addf %1105, %1106 : vector<8x16xf32>
    %1108 = arith.negf %1107 : vector<8x16xf32>
    %1109 = math.exp %1108 : vector<8x16xf32>
    %cst_255 = arith.constant 1.000000e+00 : f32
    %1110 = vector.broadcast %cst_255 : f32 to vector<8x16xf32>
    %1111 = arith.addf %1110, %1109 : vector<8x16xf32>
    %1112 = arith.divf %1110, %1111 : vector<8x16xf32>
    %1113 = vector.extract_strided_slice %1095 {offsets = [0, 32], sizes = [8, 16], strides = [1, 1]} : vector<8x48xf32> to vector<8x16xf32>
    %1114 = vector.extract_strided_slice %1096 {offsets = [0, 32], sizes = [8, 16], strides = [1, 1]} : vector<8x48xf32> to vector<8x16xf32>
    %1115 = vector.broadcast %910 : vector<1x16xf32> to vector<8x16xf32>
    %1116 = arith.addf %1114, %1115 : vector<8x16xf32>
    %1117 = arith.mulf %1104, %1116 : vector<8x16xf32>
    %1118 = arith.addf %1113, %1117 : vector<8x16xf32>
    %1119 = math.tanh %1118 : vector<8x16xf32>
    %cst_256 = arith.constant 1.000000e+00 : f32
    %1120 = vector.broadcast %cst_256 : f32 to vector<8x16xf32>
    %1121 = arith.subf %1120, %1112 : vector<8x16xf32>
    %1122 = arith.mulf %1121, %1119 : vector<8x16xf32>
    %1123 = arith.mulf %1112, %1093 : vector<8x16xf32>
    %1124 = arith.addf %1122, %1123 : vector<8x16xf32>
    %cst_257 = arith.constant 2.000000e+00 : f32
    %1125 = vector.broadcast %cst_257 : f32 to vector<8x1xf32>
    %1126 = arith.cmpf ogt, %0, %1125 : vector<8x1xf32>
    %1127 = vector.shape_cast %1126 : vector<8x1xi1> to vector<8x1xi1>
    %1128 = vector.broadcast %1127 : vector<8x1xi1> to vector<8x16xi1>
    %1129 = arith.select %1128, %1124, %1093 : vector<8x16xi1>, vector<8x16xf32>
    %c16_258 = arith.constant 16 : index
    %c16_259 = arith.constant 16 : index
    %1130 = vector.load %arg15[%c16_258, %c16_259] : memref<64x32xf32, #tpu.memory_space<vmem>>, vector<8x16xf32>
    tpu.vector_store %arg15[%c16_258, %c16_259], %1129 {strides = array<i32>} : memref<64x32xf32, #tpu.memory_space<vmem>>, vector<8x16xf32>,
    %1131 = vector.extract_strided_slice %913 {offsets = [8, 0], sizes = [8, 48], strides = [1, 1]} : vector<64x48xf32> to vector<8x48xf32>
    %cst_260 = arith.constant dense<0.000000e+00> : vector<8x48xf32>
    %1132 = tpu.matmul %1129, %906, %cst_260 {dimension_numbers = #tpu.dot_dimension_numbers<[1], [0], [0], [1], [0, 0, 1, 1], [], []>} : vector<8x16xf32>, vector<16x48xf32>, vector<8x48xf32> -> vector<8x48xf32>
    %1133 = vector.extract_strided_slice %1131 {offsets = [0, 0], sizes = [8, 16], strides = [1, 1]} : vector<8x48xf32> to vector<8x16xf32>
    %1134 = vector.extract_strided_slice %1132 {offsets = [0, 0], sizes = [8, 16], strides = [1, 1]} : vector<8x48xf32> to vector<8x16xf32>
    %1135 = arith.addf %1133, %1134 : vector<8x16xf32>
    %1136 = arith.negf %1135 : vector<8x16xf32>
    %1137 = math.exp %1136 : vector<8x16xf32>
    %cst_261 = arith.constant 1.000000e+00 : f32
    %1138 = vector.broadcast %cst_261 : f32 to vector<8x16xf32>
    %1139 = arith.addf %1138, %1137 : vector<8x16xf32>
    %1140 = arith.divf %1138, %1139 : vector<8x16xf32>
    %1141 = vector.extract_strided_slice %1131 {offsets = [0, 16], sizes = [8, 16], strides = [1, 1]} : vector<8x48xf32> to vector<8x16xf32>
    %1142 = vector.extract_strided_slice %1132 {offsets = [0, 16], sizes = [8, 16], strides = [1, 1]} : vector<8x48xf32> to vector<8x16xf32>
    %1143 = arith.addf %1141, %1142 : vector<8x16xf32>
    %1144 = arith.negf %1143 : vector<8x16xf32>
    %1145 = math.exp %1144 : vector<8x16xf32>
    %cst_262 = arith.constant 1.000000e+00 : f32
    %1146 = vector.broadcast %cst_262 : f32 to vector<8x16xf32>
    %1147 = arith.addf %1146, %1145 : vector<8x16xf32>
    %1148 = arith.divf %1146, %1147 : vector<8x16xf32>
    %1149 = vector.extract_strided_slice %1131 {offsets = [0, 32], sizes = [8, 16], strides = [1, 1]} : vector<8x48xf32> to vector<8x16xf32>
    %1150 = vector.extract_strided_slice %1132 {offsets = [0, 32], sizes = [8, 16], strides = [1, 1]} : vector<8x48xf32> to vector<8x16xf32>
    %1151 = vector.broadcast %910 : vector<1x16xf32> to vector<8x16xf32>
    %1152 = arith.addf %1150, %1151 : vector<8x16xf32>
    %1153 = arith.mulf %1140, %1152 : vector<8x16xf32>
    %1154 = arith.addf %1149, %1153 : vector<8x16xf32>
    %1155 = math.tanh %1154 : vector<8x16xf32>
    %cst_263 = arith.constant 1.000000e+00 : f32
    %1156 = vector.broadcast %cst_263 : f32 to vector<8x16xf32>
    %1157 = arith.subf %1156, %1148 : vector<8x16xf32>
    %1158 = arith.mulf %1157, %1155 : vector<8x16xf32>
    %1159 = arith.mulf %1148, %1129 : vector<8x16xf32>
    %1160 = arith.addf %1158, %1159 : vector<8x16xf32>
    %cst_264 = arith.constant 1.000000e+00 : f32
    %1161 = vector.broadcast %cst_264 : f32 to vector<8x1xf32>
    %1162 = arith.cmpf ogt, %0, %1161 : vector<8x1xf32>
    %1163 = vector.shape_cast %1162 : vector<8x1xi1> to vector<8x1xi1>
    %1164 = vector.broadcast %1163 : vector<8x1xi1> to vector<8x16xi1>
    %1165 = arith.select %1164, %1160, %1129 : vector<8x16xi1>, vector<8x16xf32>
    %c8_265 = arith.constant 8 : index
    %c16_266 = arith.constant 16 : index
    %1166 = vector.load %arg15[%c8_265, %c16_266] : memref<64x32xf32, #tpu.memory_space<vmem>>, vector<8x16xf32>
    tpu.vector_store %arg15[%c8_265, %c16_266], %1165 {strides = array<i32>} : memref<64x32xf32, #tpu.memory_space<vmem>>, vector<8x16xf32>,
    %1167 = vector.extract_strided_slice %913 {offsets = [0, 0], sizes = [8, 48], strides = [1, 1]} : vector<64x48xf32> to vector<8x48xf32>
    %cst_267 = arith.constant dense<0.000000e+00> : vector<8x48xf32>
    %1168 = tpu.matmul %1165, %906, %cst_267 {dimension_numbers = #tpu.dot_dimension_numbers<[1], [0], [0], [1], [0, 0, 1, 1], [], []>} : vector<8x16xf32>, vector<16x48xf32>, vector<8x48xf32> -> vector<8x48xf32>
    %1169 = vector.extract_strided_slice %1167 {offsets = [0, 0], sizes = [8, 16], strides = [1, 1]} : vector<8x48xf32> to vector<8x16xf32>
    %1170 = vector.extract_strided_slice %1168 {offsets = [0, 0], sizes = [8, 16], strides = [1, 1]} : vector<8x48xf32> to vector<8x16xf32>
    %1171 = arith.addf %1169, %1170 : vector<8x16xf32>
    %1172 = arith.negf %1171 : vector<8x16xf32>
    %1173 = math.exp %1172 : vector<8x16xf32>
    %cst_268 = arith.constant 1.000000e+00 : f32
    %1174 = vector.broadcast %cst_268 : f32 to vector<8x16xf32>
    %1175 = arith.addf %1174, %1173 : vector<8x16xf32>
    %1176 = arith.divf %1174, %1175 : vector<8x16xf32>
    %1177 = vector.extract_strided_slice %1167 {offsets = [0, 16], sizes = [8, 16], strides = [1, 1]} : vector<8x48xf32> to vector<8x16xf32>
    %1178 = vector.extract_strided_slice %1168 {offsets = [0, 16], sizes = [8, 16], strides = [1, 1]} : vector<8x48xf32> to vector<8x16xf32>
    %1179 = arith.addf %1177, %1178 : vector<8x16xf32>
    %1180 = arith.negf %1179 : vector<8x16xf32>
    %1181 = math.exp %1180 : vector<8x16xf32>
    %cst_269 = arith.constant 1.000000e+00 : f32
    %1182 = vector.broadcast %cst_269 : f32 to vector<8x16xf32>
    %1183 = arith.addf %1182, %1181 : vector<8x16xf32>
    %1184 = arith.divf %1182, %1183 : vector<8x16xf32>
    %1185 = vector.extract_strided_slice %1167 {offsets = [0, 32], sizes = [8, 16], strides = [1, 1]} : vector<8x48xf32> to vector<8x16xf32>
    %1186 = vector.extract_strided_slice %1168 {offsets = [0, 32], sizes = [8, 16], strides = [1, 1]} : vector<8x48xf32> to vector<8x16xf32>
    %1187 = vector.broadcast %910 : vector<1x16xf32> to vector<8x16xf32>
    %1188 = arith.addf %1186, %1187 : vector<8x16xf32>
    %1189 = arith.mulf %1176, %1188 : vector<8x16xf32>
    %1190 = arith.addf %1185, %1189 : vector<8x16xf32>
    %1191 = math.tanh %1190 : vector<8x16xf32>
    %cst_270 = arith.constant 1.000000e+00 : f32
    %1192 = vector.broadcast %cst_270 : f32 to vector<8x16xf32>
    %1193 = arith.subf %1192, %1184 : vector<8x16xf32>
    %1194 = arith.mulf %1193, %1191 : vector<8x16xf32>
    %1195 = arith.mulf %1184, %1165 : vector<8x16xf32>
    %1196 = arith.addf %1194, %1195 : vector<8x16xf32>
    %cst_271 = arith.constant 0.000000e+00 : f32
    %1197 = vector.broadcast %cst_271 : f32 to vector<8x1xf32>
    %1198 = arith.cmpf ogt, %0, %1197 : vector<8x1xf32>
    %1199 = vector.shape_cast %1198 : vector<8x1xi1> to vector<8x1xi1>
    %1200 = vector.broadcast %1199 : vector<8x1xi1> to vector<8x16xi1>
    %1201 = arith.select %1200, %1196, %1165 : vector<8x16xi1>, vector<8x16xf32>
    %c0_272 = arith.constant 0 : index
    %c16_273 = arith.constant 16 : index
    %1202 = vector.load %arg15[%c0_272, %c16_273] : memref<64x32xf32, #tpu.memory_space<vmem>>, vector<8x16xf32>
    tpu.vector_store %arg15[%c0_272, %c16_273], %1201 {strides = array<i32>} : memref<64x32xf32, #tpu.memory_space<vmem>>, vector<8x16xf32>,
    %c0_274 = arith.constant 0 : index
    %c0_275 = arith.constant 0 : index
    %1203 = vector.load %arg15[%c0_274, %c0_275] : memref<64x32xf32, #tpu.memory_space<vmem>>, vector<64x32xf32>
    %c4 = arith.constant 4 : index
    %c0_276 = arith.constant 0 : index
    %c0_277 = arith.constant 0 : index
    %1204 = vector.load %arg3[%c4, %c0_276, %c0_277] : memref<6x32x48xf32, #tpu.memory_space<vmem>>, vector<1x32x48xf32>
    %1205 = vector.shape_cast %1204 : vector<1x32x48xf32> to vector<32x48xf32>
    %c4_278 = arith.constant 4 : index
    %c0_279 = arith.constant 0 : index
    %c0_280 = arith.constant 0 : index
    %1206 = vector.load %arg4[%c4_278, %c0_279, %c0_280] : memref<6x16x48xf32, #tpu.memory_space<vmem>>, vector<1x16x48xf32>
    %1207 = vector.shape_cast %1206 : vector<1x16x48xf32> to vector<16x48xf32>
    %c4_281 = arith.constant 4 : index
    %c0_282 = arith.constant 0 : index
    %c0_283 = arith.constant 0 : index
    %1208 = vector.load %arg5[%c4_281, %c0_282, %c0_283] : memref<6x1x48xf32, #tpu.memory_space<vmem>>, vector<1x1x48xf32>
    %1209 = vector.shape_cast %1208 : vector<1x1x48xf32> to vector<1x48xf32>
    %c4_284 = arith.constant 4 : index
    %c0_285 = arith.constant 0 : index
    %c0_286 = arith.constant 0 : index
    %1210 = vector.load %arg6[%c4_284, %c0_285, %c0_286] : memref<6x1x16xf32, #tpu.memory_space<vmem>>, vector<1x1x16xf32>
    %1211 = vector.shape_cast %1210 : vector<1x1x16xf32> to vector<1x16xf32>
    %cst_287 = arith.constant dense<0.000000e+00> : vector<64x48xf32>
    %1212 = tpu.matmul %1203, %1205, %cst_287 {dimension_numbers = #tpu.dot_dimension_numbers<[1], [0], [0], [1], [0, 0, 1, 1], [], []>} : vector<64x32xf32>, vector<32x48xf32>, vector<64x48xf32> -> vector<64x48xf32>
    %1213 = vector.broadcast %1209 : vector<1x48xf32> to vector<64x48xf32>
    %1214 = arith.addf %1212, %1213 : vector<64x48xf32>
    %cst_288 = arith.constant 0.000000e+00 : f32
    %1215 = vector.broadcast %cst_288 : f32 to vector<8x16xf32>
    %1216 = vector.extract_strided_slice %1214 {offsets = [0, 0], sizes = [8, 48], strides = [1, 1]} : vector<64x48xf32> to vector<8x48xf32>
    %cst_289 = arith.constant dense<0.000000e+00> : vector<8x48xf32>
    %1217 = tpu.matmul %1215, %1207, %cst_289 {dimension_numbers = #tpu.dot_dimension_numbers<[1], [0], [0], [1], [0, 0, 1, 1], [], []>} : vector<8x16xf32>, vector<16x48xf32>, vector<8x48xf32> -> vector<8x48xf32>
    %1218 = vector.extract_strided_slice %1216 {offsets = [0, 0], sizes = [8, 16], strides = [1, 1]} : vector<8x48xf32> to vector<8x16xf32>
    %1219 = vector.extract_strided_slice %1217 {offsets = [0, 0], sizes = [8, 16], strides = [1, 1]} : vector<8x48xf32> to vector<8x16xf32>
    %1220 = arith.addf %1218, %1219 : vector<8x16xf32>
    %1221 = arith.negf %1220 : vector<8x16xf32>
    %1222 = math.exp %1221 : vector<8x16xf32>
    %cst_290 = arith.constant 1.000000e+00 : f32
    %1223 = vector.broadcast %cst_290 : f32 to vector<8x16xf32>
    %1224 = arith.addf %1223, %1222 : vector<8x16xf32>
    %1225 = arith.divf %1223, %1224 : vector<8x16xf32>
    %1226 = vector.extract_strided_slice %1216 {offsets = [0, 16], sizes = [8, 16], strides = [1, 1]} : vector<8x48xf32> to vector<8x16xf32>
    %1227 = vector.extract_strided_slice %1217 {offsets = [0, 16], sizes = [8, 16], strides = [1, 1]} : vector<8x48xf32> to vector<8x16xf32>
    %1228 = arith.addf %1226, %1227 : vector<8x16xf32>
    %1229 = arith.negf %1228 : vector<8x16xf32>
    %1230 = math.exp %1229 : vector<8x16xf32>
    %cst_291 = arith.constant 1.000000e+00 : f32
    %1231 = vector.broadcast %cst_291 : f32 to vector<8x16xf32>
    %1232 = arith.addf %1231, %1230 : vector<8x16xf32>
    %1233 = arith.divf %1231, %1232 : vector<8x16xf32>
    %1234 = vector.extract_strided_slice %1216 {offsets = [0, 32], sizes = [8, 16], strides = [1, 1]} : vector<8x48xf32> to vector<8x16xf32>
    %1235 = vector.extract_strided_slice %1217 {offsets = [0, 32], sizes = [8, 16], strides = [1, 1]} : vector<8x48xf32> to vector<8x16xf32>
    %1236 = vector.broadcast %1211 : vector<1x16xf32> to vector<8x16xf32>
    %1237 = arith.addf %1235, %1236 : vector<8x16xf32>
    %1238 = arith.mulf %1225, %1237 : vector<8x16xf32>
    %1239 = arith.addf %1234, %1238 : vector<8x16xf32>
    %1240 = math.tanh %1239 : vector<8x16xf32>
    %cst_292 = arith.constant 1.000000e+00 : f32
    %1241 = vector.broadcast %cst_292 : f32 to vector<8x16xf32>
    %1242 = arith.subf %1241, %1233 : vector<8x16xf32>
    %1243 = arith.mulf %1242, %1240 : vector<8x16xf32>
    %1244 = arith.mulf %1233, %1215 : vector<8x16xf32>
    %1245 = arith.addf %1243, %1244 : vector<8x16xf32>
    %cst_293 = arith.constant 0.000000e+00 : f32
    %1246 = vector.broadcast %cst_293 : f32 to vector<8x1xf32>
    %1247 = arith.cmpf ogt, %0, %1246 : vector<8x1xf32>
    %1248 = vector.shape_cast %1247 : vector<8x1xi1> to vector<8x1xi1>
    %1249 = vector.broadcast %1248 : vector<8x1xi1> to vector<8x16xi1>
    %1250 = arith.select %1249, %1245, %1215 : vector<8x16xi1>, vector<8x16xf32>
    %1251 = vector.extract_strided_slice %1214 {offsets = [8, 0], sizes = [8, 48], strides = [1, 1]} : vector<64x48xf32> to vector<8x48xf32>
    %cst_294 = arith.constant dense<0.000000e+00> : vector<8x48xf32>
    %1252 = tpu.matmul %1250, %1207, %cst_294 {dimension_numbers = #tpu.dot_dimension_numbers<[1], [0], [0], [1], [0, 0, 1, 1], [], []>} : vector<8x16xf32>, vector<16x48xf32>, vector<8x48xf32> -> vector<8x48xf32>
    %1253 = vector.extract_strided_slice %1251 {offsets = [0, 0], sizes = [8, 16], strides = [1, 1]} : vector<8x48xf32> to vector<8x16xf32>
    %1254 = vector.extract_strided_slice %1252 {offsets = [0, 0], sizes = [8, 16], strides = [1, 1]} : vector<8x48xf32> to vector<8x16xf32>
    %1255 = arith.addf %1253, %1254 : vector<8x16xf32>
    %1256 = arith.negf %1255 : vector<8x16xf32>
    %1257 = math.exp %1256 : vector<8x16xf32>
    %cst_295 = arith.constant 1.000000e+00 : f32
    %1258 = vector.broadcast %cst_295 : f32 to vector<8x16xf32>
    %1259 = arith.addf %1258, %1257 : vector<8x16xf32>
    %1260 = arith.divf %1258, %1259 : vector<8x16xf32>
    %1261 = vector.extract_strided_slice %1251 {offsets = [0, 16], sizes = [8, 16], strides = [1, 1]} : vector<8x48xf32> to vector<8x16xf32>
    %1262 = vector.extract_strided_slice %1252 {offsets = [0, 16], sizes = [8, 16], strides = [1, 1]} : vector<8x48xf32> to vector<8x16xf32>
    %1263 = arith.addf %1261, %1262 : vector<8x16xf32>
    %1264 = arith.negf %1263 : vector<8x16xf32>
    %1265 = math.exp %1264 : vector<8x16xf32>
    %cst_296 = arith.constant 1.000000e+00 : f32
    %1266 = vector.broadcast %cst_296 : f32 to vector<8x16xf32>
    %1267 = arith.addf %1266, %1265 : vector<8x16xf32>
    %1268 = arith.divf %1266, %1267 : vector<8x16xf32>
    %1269 = vector.extract_strided_slice %1251 {offsets = [0, 32], sizes = [8, 16], strides = [1, 1]} : vector<8x48xf32> to vector<8x16xf32>
    %1270 = vector.extract_strided_slice %1252 {offsets = [0, 32], sizes = [8, 16], strides = [1, 1]} : vector<8x48xf32> to vector<8x16xf32>
    %1271 = vector.broadcast %1211 : vector<1x16xf32> to vector<8x16xf32>
    %1272 = arith.addf %1270, %1271 : vector<8x16xf32>
    %1273 = arith.mulf %1260, %1272 : vector<8x16xf32>
    %1274 = arith.addf %1269, %1273 : vector<8x16xf32>
    %1275 = math.tanh %1274 : vector<8x16xf32>
    %cst_297 = arith.constant 1.000000e+00 : f32
    %1276 = vector.broadcast %cst_297 : f32 to vector<8x16xf32>
    %1277 = arith.subf %1276, %1268 : vector<8x16xf32>
    %1278 = arith.mulf %1277, %1275 : vector<8x16xf32>
    %1279 = arith.mulf %1268, %1250 : vector<8x16xf32>
    %1280 = arith.addf %1278, %1279 : vector<8x16xf32>
    %cst_298 = arith.constant 1.000000e+00 : f32
    %1281 = vector.broadcast %cst_298 : f32 to vector<8x1xf32>
    %1282 = arith.cmpf ogt, %0, %1281 : vector<8x1xf32>
    %1283 = vector.shape_cast %1282 : vector<8x1xi1> to vector<8x1xi1>
    %1284 = vector.broadcast %1283 : vector<8x1xi1> to vector<8x16xi1>
    %1285 = arith.select %1284, %1280, %1250 : vector<8x16xi1>, vector<8x16xf32>
    %1286 = vector.extract_strided_slice %1214 {offsets = [16, 0], sizes = [8, 48], strides = [1, 1]} : vector<64x48xf32> to vector<8x48xf32>
    %cst_299 = arith.constant dense<0.000000e+00> : vector<8x48xf32>
    %1287 = tpu.matmul %1285, %1207, %cst_299 {dimension_numbers = #tpu.dot_dimension_numbers<[1], [0], [0], [1], [0, 0, 1, 1], [], []>} : vector<8x16xf32>, vector<16x48xf32>, vector<8x48xf32> -> vector<8x48xf32>
    %1288 = vector.extract_strided_slice %1286 {offsets = [0, 0], sizes = [8, 16], strides = [1, 1]} : vector<8x48xf32> to vector<8x16xf32>
    %1289 = vector.extract_strided_slice %1287 {offsets = [0, 0], sizes = [8, 16], strides = [1, 1]} : vector<8x48xf32> to vector<8x16xf32>
    %1290 = arith.addf %1288, %1289 : vector<8x16xf32>
    %1291 = arith.negf %1290 : vector<8x16xf32>
    %1292 = math.exp %1291 : vector<8x16xf32>
    %cst_300 = arith.constant 1.000000e+00 : f32
    %1293 = vector.broadcast %cst_300 : f32 to vector<8x16xf32>
    %1294 = arith.addf %1293, %1292 : vector<8x16xf32>
    %1295 = arith.divf %1293, %1294 : vector<8x16xf32>
    %1296 = vector.extract_strided_slice %1286 {offsets = [0, 16], sizes = [8, 16], strides = [1, 1]} : vector<8x48xf32> to vector<8x16xf32>
    %1297 = vector.extract_strided_slice %1287 {offsets = [0, 16], sizes = [8, 16], strides = [1, 1]} : vector<8x48xf32> to vector<8x16xf32>
    %1298 = arith.addf %1296, %1297 : vector<8x16xf32>
    %1299 = arith.negf %1298 : vector<8x16xf32>
    %1300 = math.exp %1299 : vector<8x16xf32>
    %cst_301 = arith.constant 1.000000e+00 : f32
    %1301 = vector.broadcast %cst_301 : f32 to vector<8x16xf32>
    %1302 = arith.addf %1301, %1300 : vector<8x16xf32>
    %1303 = arith.divf %1301, %1302 : vector<8x16xf32>
    %1304 = vector.extract_strided_slice %1286 {offsets = [0, 32], sizes = [8, 16], strides = [1, 1]} : vector<8x48xf32> to vector<8x16xf32>
    %1305 = vector.extract_strided_slice %1287 {offsets = [0, 32], sizes = [8, 16], strides = [1, 1]} : vector<8x48xf32> to vector<8x16xf32>
    %1306 = vector.broadcast %1211 : vector<1x16xf32> to vector<8x16xf32>
    %1307 = arith.addf %1305, %1306 : vector<8x16xf32>
    %1308 = arith.mulf %1295, %1307 : vector<8x16xf32>
    %1309 = arith.addf %1304, %1308 : vector<8x16xf32>
    %1310 = math.tanh %1309 : vector<8x16xf32>
    %cst_302 = arith.constant 1.000000e+00 : f32
    %1311 = vector.broadcast %cst_302 : f32 to vector<8x16xf32>
    %1312 = arith.subf %1311, %1303 : vector<8x16xf32>
    %1313 = arith.mulf %1312, %1310 : vector<8x16xf32>
    %1314 = arith.mulf %1303, %1285 : vector<8x16xf32>
    %1315 = arith.addf %1313, %1314 : vector<8x16xf32>
    %cst_303 = arith.constant 2.000000e+00 : f32
    %1316 = vector.broadcast %cst_303 : f32 to vector<8x1xf32>
    %1317 = arith.cmpf ogt, %0, %1316 : vector<8x1xf32>
    %1318 = vector.shape_cast %1317 : vector<8x1xi1> to vector<8x1xi1>
    %1319 = vector.broadcast %1318 : vector<8x1xi1> to vector<8x16xi1>
    %1320 = arith.select %1319, %1315, %1285 : vector<8x16xi1>, vector<8x16xf32>
    %1321 = vector.extract_strided_slice %1214 {offsets = [24, 0], sizes = [8, 48], strides = [1, 1]} : vector<64x48xf32> to vector<8x48xf32>
    %cst_304 = arith.constant dense<0.000000e+00> : vector<8x48xf32>
    %1322 = tpu.matmul %1320, %1207, %cst_304 {dimension_numbers = #tpu.dot_dimension_numbers<[1], [0], [0], [1], [0, 0, 1, 1], [], []>} : vector<8x16xf32>, vector<16x48xf32>, vector<8x48xf32> -> vector<8x48xf32>
    %1323 = vector.extract_strided_slice %1321 {offsets = [0, 0], sizes = [8, 16], strides = [1, 1]} : vector<8x48xf32> to vector<8x16xf32>
    %1324 = vector.extract_strided_slice %1322 {offsets = [0, 0], sizes = [8, 16], strides = [1, 1]} : vector<8x48xf32> to vector<8x16xf32>
    %1325 = arith.addf %1323, %1324 : vector<8x16xf32>
    %1326 = arith.negf %1325 : vector<8x16xf32>
    %1327 = math.exp %1326 : vector<8x16xf32>
    %cst_305 = arith.constant 1.000000e+00 : f32
    %1328 = vector.broadcast %cst_305 : f32 to vector<8x16xf32>
    %1329 = arith.addf %1328, %1327 : vector<8x16xf32>
    %1330 = arith.divf %1328, %1329 : vector<8x16xf32>
    %1331 = vector.extract_strided_slice %1321 {offsets = [0, 16], sizes = [8, 16], strides = [1, 1]} : vector<8x48xf32> to vector<8x16xf32>
    %1332 = vector.extract_strided_slice %1322 {offsets = [0, 16], sizes = [8, 16], strides = [1, 1]} : vector<8x48xf32> to vector<8x16xf32>
    %1333 = arith.addf %1331, %1332 : vector<8x16xf32>
    %1334 = arith.negf %1333 : vector<8x16xf32>
    %1335 = math.exp %1334 : vector<8x16xf32>
    %cst_306 = arith.constant 1.000000e+00 : f32
    %1336 = vector.broadcast %cst_306 : f32 to vector<8x16xf32>
    %1337 = arith.addf %1336, %1335 : vector<8x16xf32>
    %1338 = arith.divf %1336, %1337 : vector<8x16xf32>
    %1339 = vector.extract_strided_slice %1321 {offsets = [0, 32], sizes = [8, 16], strides = [1, 1]} : vector<8x48xf32> to vector<8x16xf32>
    %1340 = vector.extract_strided_slice %1322 {offsets = [0, 32], sizes = [8, 16], strides = [1, 1]} : vector<8x48xf32> to vector<8x16xf32>
    %1341 = vector.broadcast %1211 : vector<1x16xf32> to vector<8x16xf32>
    %1342 = arith.addf %1340, %1341 : vector<8x16xf32>
    %1343 = arith.mulf %1330, %1342 : vector<8x16xf32>
    %1344 = arith.addf %1339, %1343 : vector<8x16xf32>
    %1345 = math.tanh %1344 : vector<8x16xf32>
    %cst_307 = arith.constant 1.000000e+00 : f32
    %1346 = vector.broadcast %cst_307 : f32 to vector<8x16xf32>
    %1347 = arith.subf %1346, %1338 : vector<8x16xf32>
    %1348 = arith.mulf %1347, %1345 : vector<8x16xf32>
    %1349 = arith.mulf %1338, %1320 : vector<8x16xf32>
    %1350 = arith.addf %1348, %1349 : vector<8x16xf32>
    %cst_308 = arith.constant 3.000000e+00 : f32
    %1351 = vector.broadcast %cst_308 : f32 to vector<8x1xf32>
    %1352 = arith.cmpf ogt, %0, %1351 : vector<8x1xf32>
    %1353 = vector.shape_cast %1352 : vector<8x1xi1> to vector<8x1xi1>
    %1354 = vector.broadcast %1353 : vector<8x1xi1> to vector<8x16xi1>
    %1355 = arith.select %1354, %1350, %1320 : vector<8x16xi1>, vector<8x16xf32>
    %1356 = vector.extract_strided_slice %1214 {offsets = [32, 0], sizes = [8, 48], strides = [1, 1]} : vector<64x48xf32> to vector<8x48xf32>
    %cst_309 = arith.constant dense<0.000000e+00> : vector<8x48xf32>
    %1357 = tpu.matmul %1355, %1207, %cst_309 {dimension_numbers = #tpu.dot_dimension_numbers<[1], [0], [0], [1], [0, 0, 1, 1], [], []>} : vector<8x16xf32>, vector<16x48xf32>, vector<8x48xf32> -> vector<8x48xf32>
    %1358 = vector.extract_strided_slice %1356 {offsets = [0, 0], sizes = [8, 16], strides = [1, 1]} : vector<8x48xf32> to vector<8x16xf32>
    %1359 = vector.extract_strided_slice %1357 {offsets = [0, 0], sizes = [8, 16], strides = [1, 1]} : vector<8x48xf32> to vector<8x16xf32>
    %1360 = arith.addf %1358, %1359 : vector<8x16xf32>
    %1361 = arith.negf %1360 : vector<8x16xf32>
    %1362 = math.exp %1361 : vector<8x16xf32>
    %cst_310 = arith.constant 1.000000e+00 : f32
    %1363 = vector.broadcast %cst_310 : f32 to vector<8x16xf32>
    %1364 = arith.addf %1363, %1362 : vector<8x16xf32>
    %1365 = arith.divf %1363, %1364 : vector<8x16xf32>
    %1366 = vector.extract_strided_slice %1356 {offsets = [0, 16], sizes = [8, 16], strides = [1, 1]} : vector<8x48xf32> to vector<8x16xf32>
    %1367 = vector.extract_strided_slice %1357 {offsets = [0, 16], sizes = [8, 16], strides = [1, 1]} : vector<8x48xf32> to vector<8x16xf32>
    %1368 = arith.addf %1366, %1367 : vector<8x16xf32>
    %1369 = arith.negf %1368 : vector<8x16xf32>
    %1370 = math.exp %1369 : vector<8x16xf32>
    %cst_311 = arith.constant 1.000000e+00 : f32
    %1371 = vector.broadcast %cst_311 : f32 to vector<8x16xf32>
    %1372 = arith.addf %1371, %1370 : vector<8x16xf32>
    %1373 = arith.divf %1371, %1372 : vector<8x16xf32>
    %1374 = vector.extract_strided_slice %1356 {offsets = [0, 32], sizes = [8, 16], strides = [1, 1]} : vector<8x48xf32> to vector<8x16xf32>
    %1375 = vector.extract_strided_slice %1357 {offsets = [0, 32], sizes = [8, 16], strides = [1, 1]} : vector<8x48xf32> to vector<8x16xf32>
    %1376 = vector.broadcast %1211 : vector<1x16xf32> to vector<8x16xf32>
    %1377 = arith.addf %1375, %1376 : vector<8x16xf32>
    %1378 = arith.mulf %1365, %1377 : vector<8x16xf32>
    %1379 = arith.addf %1374, %1378 : vector<8x16xf32>
    %1380 = math.tanh %1379 : vector<8x16xf32>
    %cst_312 = arith.constant 1.000000e+00 : f32
    %1381 = vector.broadcast %cst_312 : f32 to vector<8x16xf32>
    %1382 = arith.subf %1381, %1373 : vector<8x16xf32>
    %1383 = arith.mulf %1382, %1380 : vector<8x16xf32>
    %1384 = arith.mulf %1373, %1355 : vector<8x16xf32>
    %1385 = arith.addf %1383, %1384 : vector<8x16xf32>
    %cst_313 = arith.constant 4.000000e+00 : f32
    %1386 = vector.broadcast %cst_313 : f32 to vector<8x1xf32>
    %1387 = arith.cmpf ogt, %0, %1386 : vector<8x1xf32>
    %1388 = vector.shape_cast %1387 : vector<8x1xi1> to vector<8x1xi1>
    %1389 = vector.broadcast %1388 : vector<8x1xi1> to vector<8x16xi1>
    %1390 = arith.select %1389, %1385, %1355 : vector<8x16xi1>, vector<8x16xf32>
    %1391 = vector.extract_strided_slice %1214 {offsets = [40, 0], sizes = [8, 48], strides = [1, 1]} : vector<64x48xf32> to vector<8x48xf32>
    %cst_314 = arith.constant dense<0.000000e+00> : vector<8x48xf32>
    %1392 = tpu.matmul %1390, %1207, %cst_314 {dimension_numbers = #tpu.dot_dimension_numbers<[1], [0], [0], [1], [0, 0, 1, 1], [], []>} : vector<8x16xf32>, vector<16x48xf32>, vector<8x48xf32> -> vector<8x48xf32>
    %1393 = vector.extract_strided_slice %1391 {offsets = [0, 0], sizes = [8, 16], strides = [1, 1]} : vector<8x48xf32> to vector<8x16xf32>
    %1394 = vector.extract_strided_slice %1392 {offsets = [0, 0], sizes = [8, 16], strides = [1, 1]} : vector<8x48xf32> to vector<8x16xf32>
    %1395 = arith.addf %1393, %1394 : vector<8x16xf32>
    %1396 = arith.negf %1395 : vector<8x16xf32>
    %1397 = math.exp %1396 : vector<8x16xf32>
    %cst_315 = arith.constant 1.000000e+00 : f32
    %1398 = vector.broadcast %cst_315 : f32 to vector<8x16xf32>
    %1399 = arith.addf %1398, %1397 : vector<8x16xf32>
    %1400 = arith.divf %1398, %1399 : vector<8x16xf32>
    %1401 = vector.extract_strided_slice %1391 {offsets = [0, 16], sizes = [8, 16], strides = [1, 1]} : vector<8x48xf32> to vector<8x16xf32>
    %1402 = vector.extract_strided_slice %1392 {offsets = [0, 16], sizes = [8, 16], strides = [1, 1]} : vector<8x48xf32> to vector<8x16xf32>
    %1403 = arith.addf %1401, %1402 : vector<8x16xf32>
    %1404 = arith.negf %1403 : vector<8x16xf32>
    %1405 = math.exp %1404 : vector<8x16xf32>
    %cst_316 = arith.constant 1.000000e+00 : f32
    %1406 = vector.broadcast %cst_316 : f32 to vector<8x16xf32>
    %1407 = arith.addf %1406, %1405 : vector<8x16xf32>
    %1408 = arith.divf %1406, %1407 : vector<8x16xf32>
    %1409 = vector.extract_strided_slice %1391 {offsets = [0, 32], sizes = [8, 16], strides = [1, 1]} : vector<8x48xf32> to vector<8x16xf32>
    %1410 = vector.extract_strided_slice %1392 {offsets = [0, 32], sizes = [8, 16], strides = [1, 1]} : vector<8x48xf32> to vector<8x16xf32>
    %1411 = vector.broadcast %1211 : vector<1x16xf32> to vector<8x16xf32>
    %1412 = arith.addf %1410, %1411 : vector<8x16xf32>
    %1413 = arith.mulf %1400, %1412 : vector<8x16xf32>
    %1414 = arith.addf %1409, %1413 : vector<8x16xf32>
    %1415 = math.tanh %1414 : vector<8x16xf32>
    %cst_317 = arith.constant 1.000000e+00 : f32
    %1416 = vector.broadcast %cst_317 : f32 to vector<8x16xf32>
    %1417 = arith.subf %1416, %1408 : vector<8x16xf32>
    %1418 = arith.mulf %1417, %1415 : vector<8x16xf32>
    %1419 = arith.mulf %1408, %1390 : vector<8x16xf32>
    %1420 = arith.addf %1418, %1419 : vector<8x16xf32>
    %cst_318 = arith.constant 5.000000e+00 : f32
    %1421 = vector.broadcast %cst_318 : f32 to vector<8x1xf32>
    %1422 = arith.cmpf ogt, %0, %1421 : vector<8x1xf32>
    %1423 = vector.shape_cast %1422 : vector<8x1xi1> to vector<8x1xi1>
    %1424 = vector.broadcast %1423 : vector<8x1xi1> to vector<8x16xi1>
    %1425 = arith.select %1424, %1420, %1390 : vector<8x16xi1>, vector<8x16xf32>
    %1426 = vector.extract_strided_slice %1214 {offsets = [48, 0], sizes = [8, 48], strides = [1, 1]} : vector<64x48xf32> to vector<8x48xf32>
    %cst_319 = arith.constant dense<0.000000e+00> : vector<8x48xf32>
    %1427 = tpu.matmul %1425, %1207, %cst_319 {dimension_numbers = #tpu.dot_dimension_numbers<[1], [0], [0], [1], [0, 0, 1, 1], [], []>} : vector<8x16xf32>, vector<16x48xf32>, vector<8x48xf32> -> vector<8x48xf32>
    %1428 = vector.extract_strided_slice %1426 {offsets = [0, 0], sizes = [8, 16], strides = [1, 1]} : vector<8x48xf32> to vector<8x16xf32>
    %1429 = vector.extract_strided_slice %1427 {offsets = [0, 0], sizes = [8, 16], strides = [1, 1]} : vector<8x48xf32> to vector<8x16xf32>
    %1430 = arith.addf %1428, %1429 : vector<8x16xf32>
    %1431 = arith.negf %1430 : vector<8x16xf32>
    %1432 = math.exp %1431 : vector<8x16xf32>
    %cst_320 = arith.constant 1.000000e+00 : f32
    %1433 = vector.broadcast %cst_320 : f32 to vector<8x16xf32>
    %1434 = arith.addf %1433, %1432 : vector<8x16xf32>
    %1435 = arith.divf %1433, %1434 : vector<8x16xf32>
    %1436 = vector.extract_strided_slice %1426 {offsets = [0, 16], sizes = [8, 16], strides = [1, 1]} : vector<8x48xf32> to vector<8x16xf32>
    %1437 = vector.extract_strided_slice %1427 {offsets = [0, 16], sizes = [8, 16], strides = [1, 1]} : vector<8x48xf32> to vector<8x16xf32>
    %1438 = arith.addf %1436, %1437 : vector<8x16xf32>
    %1439 = arith.negf %1438 : vector<8x16xf32>
    %1440 = math.exp %1439 : vector<8x16xf32>
    %cst_321 = arith.constant 1.000000e+00 : f32
    %1441 = vector.broadcast %cst_321 : f32 to vector<8x16xf32>
    %1442 = arith.addf %1441, %1440 : vector<8x16xf32>
    %1443 = arith.divf %1441, %1442 : vector<8x16xf32>
    %1444 = vector.extract_strided_slice %1426 {offsets = [0, 32], sizes = [8, 16], strides = [1, 1]} : vector<8x48xf32> to vector<8x16xf32>
    %1445 = vector.extract_strided_slice %1427 {offsets = [0, 32], sizes = [8, 16], strides = [1, 1]} : vector<8x48xf32> to vector<8x16xf32>
    %1446 = vector.broadcast %1211 : vector<1x16xf32> to vector<8x16xf32>
    %1447 = arith.addf %1445, %1446 : vector<8x16xf32>
    %1448 = arith.mulf %1435, %1447 : vector<8x16xf32>
    %1449 = arith.addf %1444, %1448 : vector<8x16xf32>
    %1450 = math.tanh %1449 : vector<8x16xf32>
    %cst_322 = arith.constant 1.000000e+00 : f32
    %1451 = vector.broadcast %cst_322 : f32 to vector<8x16xf32>
    %1452 = arith.subf %1451, %1443 : vector<8x16xf32>
    %1453 = arith.mulf %1452, %1450 : vector<8x16xf32>
    %1454 = arith.mulf %1443, %1425 : vector<8x16xf32>
    %1455 = arith.addf %1453, %1454 : vector<8x16xf32>
    %cst_323 = arith.constant 6.000000e+00 : f32
    %1456 = vector.broadcast %cst_323 : f32 to vector<8x1xf32>
    %1457 = arith.cmpf ogt, %0, %1456 : vector<8x1xf32>
    %1458 = vector.shape_cast %1457 : vector<8x1xi1> to vector<8x1xi1>
    %1459 = vector.broadcast %1458 : vector<8x1xi1> to vector<8x16xi1>
    %1460 = arith.select %1459, %1455, %1425 : vector<8x16xi1>, vector<8x16xf32>
    %1461 = vector.extract_strided_slice %1214 {offsets = [56, 0], sizes = [8, 48], strides = [1, 1]} : vector<64x48xf32> to vector<8x48xf32>
    %cst_324 = arith.constant dense<0.000000e+00> : vector<8x48xf32>
    %1462 = tpu.matmul %1460, %1207, %cst_324 {dimension_numbers = #tpu.dot_dimension_numbers<[1], [0], [0], [1], [0, 0, 1, 1], [], []>} : vector<8x16xf32>, vector<16x48xf32>, vector<8x48xf32> -> vector<8x48xf32>
    %1463 = vector.extract_strided_slice %1461 {offsets = [0, 0], sizes = [8, 16], strides = [1, 1]} : vector<8x48xf32> to vector<8x16xf32>
    %1464 = vector.extract_strided_slice %1462 {offsets = [0, 0], sizes = [8, 16], strides = [1, 1]} : vector<8x48xf32> to vector<8x16xf32>
    %1465 = arith.addf %1463, %1464 : vector<8x16xf32>
    %1466 = arith.negf %1465 : vector<8x16xf32>
    %1467 = math.exp %1466 : vector<8x16xf32>
    %cst_325 = arith.constant 1.000000e+00 : f32
    %1468 = vector.broadcast %cst_325 : f32 to vector<8x16xf32>
    %1469 = arith.addf %1468, %1467 : vector<8x16xf32>
    %1470 = arith.divf %1468, %1469 : vector<8x16xf32>
    %1471 = vector.extract_strided_slice %1461 {offsets = [0, 16], sizes = [8, 16], strides = [1, 1]} : vector<8x48xf32> to vector<8x16xf32>
    %1472 = vector.extract_strided_slice %1462 {offsets = [0, 16], sizes = [8, 16], strides = [1, 1]} : vector<8x48xf32> to vector<8x16xf32>
    %1473 = arith.addf %1471, %1472 : vector<8x16xf32>
    %1474 = arith.negf %1473 : vector<8x16xf32>
    %1475 = math.exp %1474 : vector<8x16xf32>
    %cst_326 = arith.constant 1.000000e+00 : f32
    %1476 = vector.broadcast %cst_326 : f32 to vector<8x16xf32>
    %1477 = arith.addf %1476, %1475 : vector<8x16xf32>
    %1478 = arith.divf %1476, %1477 : vector<8x16xf32>
    %1479 = vector.extract_strided_slice %1461 {offsets = [0, 32], sizes = [8, 16], strides = [1, 1]} : vector<8x48xf32> to vector<8x16xf32>
    %1480 = vector.extract_strided_slice %1462 {offsets = [0, 32], sizes = [8, 16], strides = [1, 1]} : vector<8x48xf32> to vector<8x16xf32>
    %1481 = vector.broadcast %1211 : vector<1x16xf32> to vector<8x16xf32>
    %1482 = arith.addf %1480, %1481 : vector<8x16xf32>
    %1483 = arith.mulf %1470, %1482 : vector<8x16xf32>
    %1484 = arith.addf %1479, %1483 : vector<8x16xf32>
    %1485 = math.tanh %1484 : vector<8x16xf32>
    %cst_327 = arith.constant 1.000000e+00 : f32
    %1486 = vector.broadcast %cst_327 : f32 to vector<8x16xf32>
    %1487 = arith.subf %1486, %1478 : vector<8x16xf32>
    %1488 = arith.mulf %1487, %1485 : vector<8x16xf32>
    %1489 = arith.mulf %1478, %1460 : vector<8x16xf32>
    %1490 = arith.addf %1488, %1489 : vector<8x16xf32>
    %cst_328 = arith.constant 7.000000e+00 : f32
    %1491 = vector.broadcast %cst_328 : f32 to vector<8x1xf32>
    %1492 = arith.cmpf ogt, %0, %1491 : vector<8x1xf32>
    %1493 = vector.shape_cast %1492 : vector<8x1xi1> to vector<8x1xi1>
    %1494 = vector.broadcast %1493 : vector<8x1xi1> to vector<8x16xi1>
    %1495 = arith.select %1494, %1490, %1460 : vector<8x16xi1>, vector<8x16xf32>
    %c5 = arith.constant 5 : index
    %c0_329 = arith.constant 0 : index
    %c0_330 = arith.constant 0 : index
    %1496 = vector.load %arg3[%c5, %c0_329, %c0_330] : memref<6x32x48xf32, #tpu.memory_space<vmem>>, vector<1x32x48xf32>
    %1497 = vector.shape_cast %1496 : vector<1x32x48xf32> to vector<32x48xf32>
    %c5_331 = arith.constant 5 : index
    %c0_332 = arith.constant 0 : index
    %c0_333 = arith.constant 0 : index
    %1498 = vector.load %arg4[%c5_331, %c0_332, %c0_333] : memref<6x16x48xf32, #tpu.memory_space<vmem>>, vector<1x16x48xf32>
    %1499 = vector.shape_cast %1498 : vector<1x16x48xf32> to vector<16x48xf32>
    %c5_334 = arith.constant 5 : index
    %c0_335 = arith.constant 0 : index
    %c0_336 = arith.constant 0 : index
    %1500 = vector.load %arg5[%c5_334, %c0_335, %c0_336] : memref<6x1x48xf32, #tpu.memory_space<vmem>>, vector<1x1x48xf32>
    %1501 = vector.shape_cast %1500 : vector<1x1x48xf32> to vector<1x48xf32>
    %c5_337 = arith.constant 5 : index
    %c0_338 = arith.constant 0 : index
    %c0_339 = arith.constant 0 : index
    %1502 = vector.load %arg6[%c5_337, %c0_338, %c0_339] : memref<6x1x16xf32, #tpu.memory_space<vmem>>, vector<1x1x16xf32>
    %1503 = vector.shape_cast %1502 : vector<1x1x16xf32> to vector<1x16xf32>
    %cst_340 = arith.constant dense<0.000000e+00> : vector<64x48xf32>
    %1504 = tpu.matmul %1203, %1497, %cst_340 {dimension_numbers = #tpu.dot_dimension_numbers<[1], [0], [0], [1], [0, 0, 1, 1], [], []>} : vector<64x32xf32>, vector<32x48xf32>, vector<64x48xf32> -> vector<64x48xf32>
    %1505 = vector.broadcast %1501 : vector<1x48xf32> to vector<64x48xf32>
    %1506 = arith.addf %1504, %1505 : vector<64x48xf32>
    %cst_341 = arith.constant 0.000000e+00 : f32
    %1507 = vector.broadcast %cst_341 : f32 to vector<8x16xf32>
    %1508 = vector.extract_strided_slice %1506 {offsets = [56, 0], sizes = [8, 48], strides = [1, 1]} : vector<64x48xf32> to vector<8x48xf32>
    %cst_342 = arith.constant dense<0.000000e+00> : vector<8x48xf32>
    %1509 = tpu.matmul %1507, %1499, %cst_342 {dimension_numbers = #tpu.dot_dimension_numbers<[1], [0], [0], [1], [0, 0, 1, 1], [], []>} : vector<8x16xf32>, vector<16x48xf32>, vector<8x48xf32> -> vector<8x48xf32>
    %1510 = vector.extract_strided_slice %1508 {offsets = [0, 0], sizes = [8, 16], strides = [1, 1]} : vector<8x48xf32> to vector<8x16xf32>
    %1511 = vector.extract_strided_slice %1509 {offsets = [0, 0], sizes = [8, 16], strides = [1, 1]} : vector<8x48xf32> to vector<8x16xf32>
    %1512 = arith.addf %1510, %1511 : vector<8x16xf32>
    %1513 = arith.negf %1512 : vector<8x16xf32>
    %1514 = math.exp %1513 : vector<8x16xf32>
    %cst_343 = arith.constant 1.000000e+00 : f32
    %1515 = vector.broadcast %cst_343 : f32 to vector<8x16xf32>
    %1516 = arith.addf %1515, %1514 : vector<8x16xf32>
    %1517 = arith.divf %1515, %1516 : vector<8x16xf32>
    %1518 = vector.extract_strided_slice %1508 {offsets = [0, 16], sizes = [8, 16], strides = [1, 1]} : vector<8x48xf32> to vector<8x16xf32>
    %1519 = vector.extract_strided_slice %1509 {offsets = [0, 16], sizes = [8, 16], strides = [1, 1]} : vector<8x48xf32> to vector<8x16xf32>
    %1520 = arith.addf %1518, %1519 : vector<8x16xf32>
    %1521 = arith.negf %1520 : vector<8x16xf32>
    %1522 = math.exp %1521 : vector<8x16xf32>
    %cst_344 = arith.constant 1.000000e+00 : f32
    %1523 = vector.broadcast %cst_344 : f32 to vector<8x16xf32>
    %1524 = arith.addf %1523, %1522 : vector<8x16xf32>
    %1525 = arith.divf %1523, %1524 : vector<8x16xf32>
    %1526 = vector.extract_strided_slice %1508 {offsets = [0, 32], sizes = [8, 16], strides = [1, 1]} : vector<8x48xf32> to vector<8x16xf32>
    %1527 = vector.extract_strided_slice %1509 {offsets = [0, 32], sizes = [8, 16], strides = [1, 1]} : vector<8x48xf32> to vector<8x16xf32>
    %1528 = vector.broadcast %1503 : vector<1x16xf32> to vector<8x16xf32>
    %1529 = arith.addf %1527, %1528 : vector<8x16xf32>
    %1530 = arith.mulf %1517, %1529 : vector<8x16xf32>
    %1531 = arith.addf %1526, %1530 : vector<8x16xf32>
    %1532 = math.tanh %1531 : vector<8x16xf32>
    %cst_345 = arith.constant 1.000000e+00 : f32
    %1533 = vector.broadcast %cst_345 : f32 to vector<8x16xf32>
    %1534 = arith.subf %1533, %1525 : vector<8x16xf32>
    %1535 = arith.mulf %1534, %1532 : vector<8x16xf32>
    %1536 = arith.mulf %1525, %1507 : vector<8x16xf32>
    %1537 = arith.addf %1535, %1536 : vector<8x16xf32>
    %cst_346 = arith.constant 7.000000e+00 : f32
    %1538 = vector.broadcast %cst_346 : f32 to vector<8x1xf32>
    %1539 = arith.cmpf ogt, %0, %1538 : vector<8x1xf32>
    %1540 = vector.shape_cast %1539 : vector<8x1xi1> to vector<8x1xi1>
    %1541 = vector.broadcast %1540 : vector<8x1xi1> to vector<8x16xi1>
    %1542 = arith.select %1541, %1537, %1507 : vector<8x16xi1>, vector<8x16xf32>
    %1543 = vector.extract_strided_slice %1506 {offsets = [48, 0], sizes = [8, 48], strides = [1, 1]} : vector<64x48xf32> to vector<8x48xf32>
    %cst_347 = arith.constant dense<0.000000e+00> : vector<8x48xf32>
    %1544 = tpu.matmul %1542, %1499, %cst_347 {dimension_numbers = #tpu.dot_dimension_numbers<[1], [0], [0], [1], [0, 0, 1, 1], [], []>} : vector<8x16xf32>, vector<16x48xf32>, vector<8x48xf32> -> vector<8x48xf32>
    %1545 = vector.extract_strided_slice %1543 {offsets = [0, 0], sizes = [8, 16], strides = [1, 1]} : vector<8x48xf32> to vector<8x16xf32>
    %1546 = vector.extract_strided_slice %1544 {offsets = [0, 0], sizes = [8, 16], strides = [1, 1]} : vector<8x48xf32> to vector<8x16xf32>
    %1547 = arith.addf %1545, %1546 : vector<8x16xf32>
    %1548 = arith.negf %1547 : vector<8x16xf32>
    %1549 = math.exp %1548 : vector<8x16xf32>
    %cst_348 = arith.constant 1.000000e+00 : f32
    %1550 = vector.broadcast %cst_348 : f32 to vector<8x16xf32>
    %1551 = arith.addf %1550, %1549 : vector<8x16xf32>
    %1552 = arith.divf %1550, %1551 : vector<8x16xf32>
    %1553 = vector.extract_strided_slice %1543 {offsets = [0, 16], sizes = [8, 16], strides = [1, 1]} : vector<8x48xf32> to vector<8x16xf32>
    %1554 = vector.extract_strided_slice %1544 {offsets = [0, 16], sizes = [8, 16], strides = [1, 1]} : vector<8x48xf32> to vector<8x16xf32>
    %1555 = arith.addf %1553, %1554 : vector<8x16xf32>
    %1556 = arith.negf %1555 : vector<8x16xf32>
    %1557 = math.exp %1556 : vector<8x16xf32>
    %cst_349 = arith.constant 1.000000e+00 : f32
    %1558 = vector.broadcast %cst_349 : f32 to vector<8x16xf32>
    %1559 = arith.addf %1558, %1557 : vector<8x16xf32>
    %1560 = arith.divf %1558, %1559 : vector<8x16xf32>
    %1561 = vector.extract_strided_slice %1543 {offsets = [0, 32], sizes = [8, 16], strides = [1, 1]} : vector<8x48xf32> to vector<8x16xf32>
    %1562 = vector.extract_strided_slice %1544 {offsets = [0, 32], sizes = [8, 16], strides = [1, 1]} : vector<8x48xf32> to vector<8x16xf32>
    %1563 = vector.broadcast %1503 : vector<1x16xf32> to vector<8x16xf32>
    %1564 = arith.addf %1562, %1563 : vector<8x16xf32>
    %1565 = arith.mulf %1552, %1564 : vector<8x16xf32>
    %1566 = arith.addf %1561, %1565 : vector<8x16xf32>
    %1567 = math.tanh %1566 : vector<8x16xf32>
    %cst_350 = arith.constant 1.000000e+00 : f32
    %1568 = vector.broadcast %cst_350 : f32 to vector<8x16xf32>
    %1569 = arith.subf %1568, %1560 : vector<8x16xf32>
    %1570 = arith.mulf %1569, %1567 : vector<8x16xf32>
    %1571 = arith.mulf %1560, %1542 : vector<8x16xf32>
    %1572 = arith.addf %1570, %1571 : vector<8x16xf32>
    %cst_351 = arith.constant 6.000000e+00 : f32
    %1573 = vector.broadcast %cst_351 : f32 to vector<8x1xf32>
    %1574 = arith.cmpf ogt, %0, %1573 : vector<8x1xf32>
    %1575 = vector.shape_cast %1574 : vector<8x1xi1> to vector<8x1xi1>
    %1576 = vector.broadcast %1575 : vector<8x1xi1> to vector<8x16xi1>
    %1577 = arith.select %1576, %1572, %1542 : vector<8x16xi1>, vector<8x16xf32>
    %1578 = vector.extract_strided_slice %1506 {offsets = [40, 0], sizes = [8, 48], strides = [1, 1]} : vector<64x48xf32> to vector<8x48xf32>
    %cst_352 = arith.constant dense<0.000000e+00> : vector<8x48xf32>
    %1579 = tpu.matmul %1577, %1499, %cst_352 {dimension_numbers = #tpu.dot_dimension_numbers<[1], [0], [0], [1], [0, 0, 1, 1], [], []>} : vector<8x16xf32>, vector<16x48xf32>, vector<8x48xf32> -> vector<8x48xf32>
    %1580 = vector.extract_strided_slice %1578 {offsets = [0, 0], sizes = [8, 16], strides = [1, 1]} : vector<8x48xf32> to vector<8x16xf32>
    %1581 = vector.extract_strided_slice %1579 {offsets = [0, 0], sizes = [8, 16], strides = [1, 1]} : vector<8x48xf32> to vector<8x16xf32>
    %1582 = arith.addf %1580, %1581 : vector<8x16xf32>
    %1583 = arith.negf %1582 : vector<8x16xf32>
    %1584 = math.exp %1583 : vector<8x16xf32>
    %cst_353 = arith.constant 1.000000e+00 : f32
    %1585 = vector.broadcast %cst_353 : f32 to vector<8x16xf32>
    %1586 = arith.addf %1585, %1584 : vector<8x16xf32>
    %1587 = arith.divf %1585, %1586 : vector<8x16xf32>
    %1588 = vector.extract_strided_slice %1578 {offsets = [0, 16], sizes = [8, 16], strides = [1, 1]} : vector<8x48xf32> to vector<8x16xf32>
    %1589 = vector.extract_strided_slice %1579 {offsets = [0, 16], sizes = [8, 16], strides = [1, 1]} : vector<8x48xf32> to vector<8x16xf32>
    %1590 = arith.addf %1588, %1589 : vector<8x16xf32>
    %1591 = arith.negf %1590 : vector<8x16xf32>
    %1592 = math.exp %1591 : vector<8x16xf32>
    %cst_354 = arith.constant 1.000000e+00 : f32
    %1593 = vector.broadcast %cst_354 : f32 to vector<8x16xf32>
    %1594 = arith.addf %1593, %1592 : vector<8x16xf32>
    %1595 = arith.divf %1593, %1594 : vector<8x16xf32>
    %1596 = vector.extract_strided_slice %1578 {offsets = [0, 32], sizes = [8, 16], strides = [1, 1]} : vector<8x48xf32> to vector<8x16xf32>
    %1597 = vector.extract_strided_slice %1579 {offsets = [0, 32], sizes = [8, 16], strides = [1, 1]} : vector<8x48xf32> to vector<8x16xf32>
    %1598 = vector.broadcast %1503 : vector<1x16xf32> to vector<8x16xf32>
    %1599 = arith.addf %1597, %1598 : vector<8x16xf32>
    %1600 = arith.mulf %1587, %1599 : vector<8x16xf32>
    %1601 = arith.addf %1596, %1600 : vector<8x16xf32>
    %1602 = math.tanh %1601 : vector<8x16xf32>
    %cst_355 = arith.constant 1.000000e+00 : f32
    %1603 = vector.broadcast %cst_355 : f32 to vector<8x16xf32>
    %1604 = arith.subf %1603, %1595 : vector<8x16xf32>
    %1605 = arith.mulf %1604, %1602 : vector<8x16xf32>
    %1606 = arith.mulf %1595, %1577 : vector<8x16xf32>
    %1607 = arith.addf %1605, %1606 : vector<8x16xf32>
    %cst_356 = arith.constant 5.000000e+00 : f32
    %1608 = vector.broadcast %cst_356 : f32 to vector<8x1xf32>
    %1609 = arith.cmpf ogt, %0, %1608 : vector<8x1xf32>
    %1610 = vector.shape_cast %1609 : vector<8x1xi1> to vector<8x1xi1>
    %1611 = vector.broadcast %1610 : vector<8x1xi1> to vector<8x16xi1>
    %1612 = arith.select %1611, %1607, %1577 : vector<8x16xi1>, vector<8x16xf32>
    %1613 = vector.extract_strided_slice %1506 {offsets = [32, 0], sizes = [8, 48], strides = [1, 1]} : vector<64x48xf32> to vector<8x48xf32>
    %cst_357 = arith.constant dense<0.000000e+00> : vector<8x48xf32>
    %1614 = tpu.matmul %1612, %1499, %cst_357 {dimension_numbers = #tpu.dot_dimension_numbers<[1], [0], [0], [1], [0, 0, 1, 1], [], []>} : vector<8x16xf32>, vector<16x48xf32>, vector<8x48xf32> -> vector<8x48xf32>
    %1615 = vector.extract_strided_slice %1613 {offsets = [0, 0], sizes = [8, 16], strides = [1, 1]} : vector<8x48xf32> to vector<8x16xf32>
    %1616 = vector.extract_strided_slice %1614 {offsets = [0, 0], sizes = [8, 16], strides = [1, 1]} : vector<8x48xf32> to vector<8x16xf32>
    %1617 = arith.addf %1615, %1616 : vector<8x16xf32>
    %1618 = arith.negf %1617 : vector<8x16xf32>
    %1619 = math.exp %1618 : vector<8x16xf32>
    %cst_358 = arith.constant 1.000000e+00 : f32
    %1620 = vector.broadcast %cst_358 : f32 to vector<8x16xf32>
    %1621 = arith.addf %1620, %1619 : vector<8x16xf32>
    %1622 = arith.divf %1620, %1621 : vector<8x16xf32>
    %1623 = vector.extract_strided_slice %1613 {offsets = [0, 16], sizes = [8, 16], strides = [1, 1]} : vector<8x48xf32> to vector<8x16xf32>
    %1624 = vector.extract_strided_slice %1614 {offsets = [0, 16], sizes = [8, 16], strides = [1, 1]} : vector<8x48xf32> to vector<8x16xf32>
    %1625 = arith.addf %1623, %1624 : vector<8x16xf32>
    %1626 = arith.negf %1625 : vector<8x16xf32>
    %1627 = math.exp %1626 : vector<8x16xf32>
    %cst_359 = arith.constant 1.000000e+00 : f32
    %1628 = vector.broadcast %cst_359 : f32 to vector<8x16xf32>
    %1629 = arith.addf %1628, %1627 : vector<8x16xf32>
    %1630 = arith.divf %1628, %1629 : vector<8x16xf32>
    %1631 = vector.extract_strided_slice %1613 {offsets = [0, 32], sizes = [8, 16], strides = [1, 1]} : vector<8x48xf32> to vector<8x16xf32>
    %1632 = vector.extract_strided_slice %1614 {offsets = [0, 32], sizes = [8, 16], strides = [1, 1]} : vector<8x48xf32> to vector<8x16xf32>
    %1633 = vector.broadcast %1503 : vector<1x16xf32> to vector<8x16xf32>
    %1634 = arith.addf %1632, %1633 : vector<8x16xf32>
    %1635 = arith.mulf %1622, %1634 : vector<8x16xf32>
    %1636 = arith.addf %1631, %1635 : vector<8x16xf32>
    %1637 = math.tanh %1636 : vector<8x16xf32>
    %cst_360 = arith.constant 1.000000e+00 : f32
    %1638 = vector.broadcast %cst_360 : f32 to vector<8x16xf32>
    %1639 = arith.subf %1638, %1630 : vector<8x16xf32>
    %1640 = arith.mulf %1639, %1637 : vector<8x16xf32>
    %1641 = arith.mulf %1630, %1612 : vector<8x16xf32>
    %1642 = arith.addf %1640, %1641 : vector<8x16xf32>
    %cst_361 = arith.constant 4.000000e+00 : f32
    %1643 = vector.broadcast %cst_361 : f32 to vector<8x1xf32>
    %1644 = arith.cmpf ogt, %0, %1643 : vector<8x1xf32>
    %1645 = vector.shape_cast %1644 : vector<8x1xi1> to vector<8x1xi1>
    %1646 = vector.broadcast %1645 : vector<8x1xi1> to vector<8x16xi1>
    %1647 = arith.select %1646, %1642, %1612 : vector<8x16xi1>, vector<8x16xf32>
    %1648 = vector.extract_strided_slice %1506 {offsets = [24, 0], sizes = [8, 48], strides = [1, 1]} : vector<64x48xf32> to vector<8x48xf32>
    %cst_362 = arith.constant dense<0.000000e+00> : vector<8x48xf32>
    %1649 = tpu.matmul %1647, %1499, %cst_362 {dimension_numbers = #tpu.dot_dimension_numbers<[1], [0], [0], [1], [0, 0, 1, 1], [], []>} : vector<8x16xf32>, vector<16x48xf32>, vector<8x48xf32> -> vector<8x48xf32>
    %1650 = vector.extract_strided_slice %1648 {offsets = [0, 0], sizes = [8, 16], strides = [1, 1]} : vector<8x48xf32> to vector<8x16xf32>
    %1651 = vector.extract_strided_slice %1649 {offsets = [0, 0], sizes = [8, 16], strides = [1, 1]} : vector<8x48xf32> to vector<8x16xf32>
    %1652 = arith.addf %1650, %1651 : vector<8x16xf32>
    %1653 = arith.negf %1652 : vector<8x16xf32>
    %1654 = math.exp %1653 : vector<8x16xf32>
    %cst_363 = arith.constant 1.000000e+00 : f32
    %1655 = vector.broadcast %cst_363 : f32 to vector<8x16xf32>
    %1656 = arith.addf %1655, %1654 : vector<8x16xf32>
    %1657 = arith.divf %1655, %1656 : vector<8x16xf32>
    %1658 = vector.extract_strided_slice %1648 {offsets = [0, 16], sizes = [8, 16], strides = [1, 1]} : vector<8x48xf32> to vector<8x16xf32>
    %1659 = vector.extract_strided_slice %1649 {offsets = [0, 16], sizes = [8, 16], strides = [1, 1]} : vector<8x48xf32> to vector<8x16xf32>
    %1660 = arith.addf %1658, %1659 : vector<8x16xf32>
    %1661 = arith.negf %1660 : vector<8x16xf32>
    %1662 = math.exp %1661 : vector<8x16xf32>
    %cst_364 = arith.constant 1.000000e+00 : f32
    %1663 = vector.broadcast %cst_364 : f32 to vector<8x16xf32>
    %1664 = arith.addf %1663, %1662 : vector<8x16xf32>
    %1665 = arith.divf %1663, %1664 : vector<8x16xf32>
    %1666 = vector.extract_strided_slice %1648 {offsets = [0, 32], sizes = [8, 16], strides = [1, 1]} : vector<8x48xf32> to vector<8x16xf32>
    %1667 = vector.extract_strided_slice %1649 {offsets = [0, 32], sizes = [8, 16], strides = [1, 1]} : vector<8x48xf32> to vector<8x16xf32>
    %1668 = vector.broadcast %1503 : vector<1x16xf32> to vector<8x16xf32>
    %1669 = arith.addf %1667, %1668 : vector<8x16xf32>
    %1670 = arith.mulf %1657, %1669 : vector<8x16xf32>
    %1671 = arith.addf %1666, %1670 : vector<8x16xf32>
    %1672 = math.tanh %1671 : vector<8x16xf32>
    %cst_365 = arith.constant 1.000000e+00 : f32
    %1673 = vector.broadcast %cst_365 : f32 to vector<8x16xf32>
    %1674 = arith.subf %1673, %1665 : vector<8x16xf32>
    %1675 = arith.mulf %1674, %1672 : vector<8x16xf32>
    %1676 = arith.mulf %1665, %1647 : vector<8x16xf32>
    %1677 = arith.addf %1675, %1676 : vector<8x16xf32>
    %cst_366 = arith.constant 3.000000e+00 : f32
    %1678 = vector.broadcast %cst_366 : f32 to vector<8x1xf32>
    %1679 = arith.cmpf ogt, %0, %1678 : vector<8x1xf32>
    %1680 = vector.shape_cast %1679 : vector<8x1xi1> to vector<8x1xi1>
    %1681 = vector.broadcast %1680 : vector<8x1xi1> to vector<8x16xi1>
    %1682 = arith.select %1681, %1677, %1647 : vector<8x16xi1>, vector<8x16xf32>
    %1683 = vector.extract_strided_slice %1506 {offsets = [16, 0], sizes = [8, 48], strides = [1, 1]} : vector<64x48xf32> to vector<8x48xf32>
    %cst_367 = arith.constant dense<0.000000e+00> : vector<8x48xf32>
    %1684 = tpu.matmul %1682, %1499, %cst_367 {dimension_numbers = #tpu.dot_dimension_numbers<[1], [0], [0], [1], [0, 0, 1, 1], [], []>} : vector<8x16xf32>, vector<16x48xf32>, vector<8x48xf32> -> vector<8x48xf32>
    %1685 = vector.extract_strided_slice %1683 {offsets = [0, 0], sizes = [8, 16], strides = [1, 1]} : vector<8x48xf32> to vector<8x16xf32>
    %1686 = vector.extract_strided_slice %1684 {offsets = [0, 0], sizes = [8, 16], strides = [1, 1]} : vector<8x48xf32> to vector<8x16xf32>
    %1687 = arith.addf %1685, %1686 : vector<8x16xf32>
    %1688 = arith.negf %1687 : vector<8x16xf32>
    %1689 = math.exp %1688 : vector<8x16xf32>
    %cst_368 = arith.constant 1.000000e+00 : f32
    %1690 = vector.broadcast %cst_368 : f32 to vector<8x16xf32>
    %1691 = arith.addf %1690, %1689 : vector<8x16xf32>
    %1692 = arith.divf %1690, %1691 : vector<8x16xf32>
    %1693 = vector.extract_strided_slice %1683 {offsets = [0, 16], sizes = [8, 16], strides = [1, 1]} : vector<8x48xf32> to vector<8x16xf32>
    %1694 = vector.extract_strided_slice %1684 {offsets = [0, 16], sizes = [8, 16], strides = [1, 1]} : vector<8x48xf32> to vector<8x16xf32>
    %1695 = arith.addf %1693, %1694 : vector<8x16xf32>
    %1696 = arith.negf %1695 : vector<8x16xf32>
    %1697 = math.exp %1696 : vector<8x16xf32>
    %cst_369 = arith.constant 1.000000e+00 : f32
    %1698 = vector.broadcast %cst_369 : f32 to vector<8x16xf32>
    %1699 = arith.addf %1698, %1697 : vector<8x16xf32>
    %1700 = arith.divf %1698, %1699 : vector<8x16xf32>
    %1701 = vector.extract_strided_slice %1683 {offsets = [0, 32], sizes = [8, 16], strides = [1, 1]} : vector<8x48xf32> to vector<8x16xf32>
    %1702 = vector.extract_strided_slice %1684 {offsets = [0, 32], sizes = [8, 16], strides = [1, 1]} : vector<8x48xf32> to vector<8x16xf32>
    %1703 = vector.broadcast %1503 : vector<1x16xf32> to vector<8x16xf32>
    %1704 = arith.addf %1702, %1703 : vector<8x16xf32>
    %1705 = arith.mulf %1692, %1704 : vector<8x16xf32>
    %1706 = arith.addf %1701, %1705 : vector<8x16xf32>
    %1707 = math.tanh %1706 : vector<8x16xf32>
    %cst_370 = arith.constant 1.000000e+00 : f32
    %1708 = vector.broadcast %cst_370 : f32 to vector<8x16xf32>
    %1709 = arith.subf %1708, %1700 : vector<8x16xf32>
    %1710 = arith.mulf %1709, %1707 : vector<8x16xf32>
    %1711 = arith.mulf %1700, %1682 : vector<8x16xf32>
    %1712 = arith.addf %1710, %1711 : vector<8x16xf32>
    %cst_371 = arith.constant 2.000000e+00 : f32
    %1713 = vector.broadcast %cst_371 : f32 to vector<8x1xf32>
    %1714 = arith.cmpf ogt, %0, %1713 : vector<8x1xf32>
    %1715 = vector.shape_cast %1714 : vector<8x1xi1> to vector<8x1xi1>
    %1716 = vector.broadcast %1715 : vector<8x1xi1> to vector<8x16xi1>
    %1717 = arith.select %1716, %1712, %1682 : vector<8x16xi1>, vector<8x16xf32>
    %1718 = vector.extract_strided_slice %1506 {offsets = [8, 0], sizes = [8, 48], strides = [1, 1]} : vector<64x48xf32> to vector<8x48xf32>
    %cst_372 = arith.constant dense<0.000000e+00> : vector<8x48xf32>
    %1719 = tpu.matmul %1717, %1499, %cst_372 {dimension_numbers = #tpu.dot_dimension_numbers<[1], [0], [0], [1], [0, 0, 1, 1], [], []>} : vector<8x16xf32>, vector<16x48xf32>, vector<8x48xf32> -> vector<8x48xf32>
    %1720 = vector.extract_strided_slice %1718 {offsets = [0, 0], sizes = [8, 16], strides = [1, 1]} : vector<8x48xf32> to vector<8x16xf32>
    %1721 = vector.extract_strided_slice %1719 {offsets = [0, 0], sizes = [8, 16], strides = [1, 1]} : vector<8x48xf32> to vector<8x16xf32>
    %1722 = arith.addf %1720, %1721 : vector<8x16xf32>
    %1723 = arith.negf %1722 : vector<8x16xf32>
    %1724 = math.exp %1723 : vector<8x16xf32>
    %cst_373 = arith.constant 1.000000e+00 : f32
    %1725 = vector.broadcast %cst_373 : f32 to vector<8x16xf32>
    %1726 = arith.addf %1725, %1724 : vector<8x16xf32>
    %1727 = arith.divf %1725, %1726 : vector<8x16xf32>
    %1728 = vector.extract_strided_slice %1718 {offsets = [0, 16], sizes = [8, 16], strides = [1, 1]} : vector<8x48xf32> to vector<8x16xf32>
    %1729 = vector.extract_strided_slice %1719 {offsets = [0, 16], sizes = [8, 16], strides = [1, 1]} : vector<8x48xf32> to vector<8x16xf32>
    %1730 = arith.addf %1728, %1729 : vector<8x16xf32>
    %1731 = arith.negf %1730 : vector<8x16xf32>
    %1732 = math.exp %1731 : vector<8x16xf32>
    %cst_374 = arith.constant 1.000000e+00 : f32
    %1733 = vector.broadcast %cst_374 : f32 to vector<8x16xf32>
    %1734 = arith.addf %1733, %1732 : vector<8x16xf32>
    %1735 = arith.divf %1733, %1734 : vector<8x16xf32>
    %1736 = vector.extract_strided_slice %1718 {offsets = [0, 32], sizes = [8, 16], strides = [1, 1]} : vector<8x48xf32> to vector<8x16xf32>
    %1737 = vector.extract_strided_slice %1719 {offsets = [0, 32], sizes = [8, 16], strides = [1, 1]} : vector<8x48xf32> to vector<8x16xf32>
    %1738 = vector.broadcast %1503 : vector<1x16xf32> to vector<8x16xf32>
    %1739 = arith.addf %1737, %1738 : vector<8x16xf32>
    %1740 = arith.mulf %1727, %1739 : vector<8x16xf32>
    %1741 = arith.addf %1736, %1740 : vector<8x16xf32>
    %1742 = math.tanh %1741 : vector<8x16xf32>
    %cst_375 = arith.constant 1.000000e+00 : f32
    %1743 = vector.broadcast %cst_375 : f32 to vector<8x16xf32>
    %1744 = arith.subf %1743, %1735 : vector<8x16xf32>
    %1745 = arith.mulf %1744, %1742 : vector<8x16xf32>
    %1746 = arith.mulf %1735, %1717 : vector<8x16xf32>
    %1747 = arith.addf %1745, %1746 : vector<8x16xf32>
    %cst_376 = arith.constant 1.000000e+00 : f32
    %1748 = vector.broadcast %cst_376 : f32 to vector<8x1xf32>
    %1749 = arith.cmpf ogt, %0, %1748 : vector<8x1xf32>
    %1750 = vector.shape_cast %1749 : vector<8x1xi1> to vector<8x1xi1>
    %1751 = vector.broadcast %1750 : vector<8x1xi1> to vector<8x16xi1>
    %1752 = arith.select %1751, %1747, %1717 : vector<8x16xi1>, vector<8x16xf32>
    %1753 = vector.extract_strided_slice %1506 {offsets = [0, 0], sizes = [8, 48], strides = [1, 1]} : vector<64x48xf32> to vector<8x48xf32>
    %cst_377 = arith.constant dense<0.000000e+00> : vector<8x48xf32>
    %1754 = tpu.matmul %1752, %1499, %cst_377 {dimension_numbers = #tpu.dot_dimension_numbers<[1], [0], [0], [1], [0, 0, 1, 1], [], []>} : vector<8x16xf32>, vector<16x48xf32>, vector<8x48xf32> -> vector<8x48xf32>
    %1755 = vector.extract_strided_slice %1753 {offsets = [0, 0], sizes = [8, 16], strides = [1, 1]} : vector<8x48xf32> to vector<8x16xf32>
    %1756 = vector.extract_strided_slice %1754 {offsets = [0, 0], sizes = [8, 16], strides = [1, 1]} : vector<8x48xf32> to vector<8x16xf32>
    %1757 = arith.addf %1755, %1756 : vector<8x16xf32>
    %1758 = arith.negf %1757 : vector<8x16xf32>
    %1759 = math.exp %1758 : vector<8x16xf32>
    %cst_378 = arith.constant 1.000000e+00 : f32
    %1760 = vector.broadcast %cst_378 : f32 to vector<8x16xf32>
    %1761 = arith.addf %1760, %1759 : vector<8x16xf32>
    %1762 = arith.divf %1760, %1761 : vector<8x16xf32>
    %1763 = vector.extract_strided_slice %1753 {offsets = [0, 16], sizes = [8, 16], strides = [1, 1]} : vector<8x48xf32> to vector<8x16xf32>
    %1764 = vector.extract_strided_slice %1754 {offsets = [0, 16], sizes = [8, 16], strides = [1, 1]} : vector<8x48xf32> to vector<8x16xf32>
    %1765 = arith.addf %1763, %1764 : vector<8x16xf32>
    %1766 = arith.negf %1765 : vector<8x16xf32>
    %1767 = math.exp %1766 : vector<8x16xf32>
    %cst_379 = arith.constant 1.000000e+00 : f32
    %1768 = vector.broadcast %cst_379 : f32 to vector<8x16xf32>
    %1769 = arith.addf %1768, %1767 : vector<8x16xf32>
    %1770 = arith.divf %1768, %1769 : vector<8x16xf32>
    %1771 = vector.extract_strided_slice %1753 {offsets = [0, 32], sizes = [8, 16], strides = [1, 1]} : vector<8x48xf32> to vector<8x16xf32>
    %1772 = vector.extract_strided_slice %1754 {offsets = [0, 32], sizes = [8, 16], strides = [1, 1]} : vector<8x48xf32> to vector<8x16xf32>
    %1773 = vector.broadcast %1503 : vector<1x16xf32> to vector<8x16xf32>
    %1774 = arith.addf %1772, %1773 : vector<8x16xf32>
    %1775 = arith.mulf %1762, %1774 : vector<8x16xf32>
    %1776 = arith.addf %1771, %1775 : vector<8x16xf32>
    %1777 = math.tanh %1776 : vector<8x16xf32>
    %cst_380 = arith.constant 1.000000e+00 : f32
    %1778 = vector.broadcast %cst_380 : f32 to vector<8x16xf32>
    %1779 = arith.subf %1778, %1770 : vector<8x16xf32>
    %1780 = arith.mulf %1779, %1777 : vector<8x16xf32>
    %1781 = arith.mulf %1770, %1752 : vector<8x16xf32>
    %1782 = arith.addf %1780, %1781 : vector<8x16xf32>
    %cst_381 = arith.constant 0.000000e+00 : f32
    %1783 = vector.broadcast %cst_381 : f32 to vector<8x1xf32>
    %1784 = arith.cmpf ogt, %0, %1783 : vector<8x1xf32>
    %1785 = vector.shape_cast %1784 : vector<8x1xi1> to vector<8x1xi1>
    %1786 = vector.broadcast %1785 : vector<8x1xi1> to vector<8x16xi1>
    %1787 = arith.select %1786, %1782, %1752 : vector<8x16xi1>, vector<8x16xf32>
    %c0_382 = arith.constant 0 : index
    %c0_383 = arith.constant 0 : index
    %1788 = vector.load %arg12[%c0_382, %c0_383] : memref<8x32xf32, #tpu.memory_space<vmem>>, vector<8x16xf32>
    tpu.vector_store %arg12[%c0_382, %c0_383], %1495 {strides = array<i32>} : memref<8x32xf32, #tpu.memory_space<vmem>>, vector<8x16xf32>,
    %c0_384 = arith.constant 0 : index
    %c16_385 = arith.constant 16 : index
    %1789 = vector.load %arg12[%c0_384, %c16_385] : memref<8x32xf32, #tpu.memory_space<vmem>>, vector<8x16xf32>
    tpu.vector_store %arg12[%c0_384, %c16_385], %1787 {strides = array<i32>} : memref<8x32xf32, #tpu.memory_space<vmem>>, vector<8x16xf32>,
    %c0_386 = arith.constant 0 : index
    %c0_387 = arith.constant 0 : index
    %1790 = vector.load %arg7[%c0_386, %c0_387] : memref<32x96xf32, #tpu.memory_space<vmem>>, vector<32x96xf32>
    %c0_388 = arith.constant 0 : index
    %c0_389 = arith.constant 0 : index
    %1791 = vector.load %arg8[%c0_388, %c0_389] : memref<1x96xf32, #tpu.memory_space<vmem>>, vector<1x96xf32>
    %c0_390 = arith.constant 0 : index
    %c0_391 = arith.constant 0 : index
    %1792 = vector.load %arg9[%c0_390, %c0_391] : memref<1x32xf32, #tpu.memory_space<vmem>>, vector<1x32xf32>
    %c0_392 = arith.constant 0 : index
    %c0_393 = arith.constant 0 : index
    %1793 = vector.load %arg12[%c0_392, %c0_393] : memref<8x32xf32, #tpu.memory_space<vmem>>, vector<8x32xf32>
    %cst_394 = arith.constant dense<0.000000e+00> : vector<8x96xf32>
    %1794 = tpu.matmul %1793, %1790, %cst_394 {dimension_numbers = #tpu.dot_dimension_numbers<[1], [0], [0], [1], [0, 0, 1, 1], [], []>} : vector<8x32xf32>, vector<32x96xf32>, vector<8x96xf32> -> vector<8x96xf32>
    %1795 = vector.extract_strided_slice %1794 {offsets = [0, 0], sizes = [8, 32], strides = [1, 1]} : vector<8x96xf32> to vector<8x32xf32>
    %1796 = vector.extract_strided_slice %1791 {offsets = [0, 0], sizes = [1, 32], strides = [1, 1]} : vector<1x96xf32> to vector<1x32xf32>
    %1797 = vector.broadcast %1796 : vector<1x32xf32> to vector<8x32xf32>
    %1798 = arith.addf %1795, %1797 : vector<8x32xf32>
    %1799 = arith.negf %1798 : vector<8x32xf32>
    %1800 = math.exp %1799 : vector<8x32xf32>
    %cst_395 = arith.constant 1.000000e+00 : f32
    %1801 = vector.broadcast %cst_395 : f32 to vector<8x32xf32>
    %1802 = arith.addf %1801, %1800 : vector<8x32xf32>
    %1803 = arith.divf %1801, %1802 : vector<8x32xf32>
    %1804 = vector.extract_strided_slice %1794 {offsets = [0, 32], sizes = [8, 32], strides = [1, 1]} : vector<8x96xf32> to vector<8x32xf32>
    %1805 = vector.extract_strided_slice %1791 {offsets = [0, 32], sizes = [1, 32], strides = [1, 1]} : vector<1x96xf32> to vector<1x32xf32>
    %1806 = vector.broadcast %1805 : vector<1x32xf32> to vector<8x32xf32>
    %1807 = arith.addf %1804, %1806 : vector<8x32xf32>
    %1808 = arith.negf %1807 : vector<8x32xf32>
    %1809 = math.exp %1808 : vector<8x32xf32>
    %cst_396 = arith.constant 1.000000e+00 : f32
    %1810 = vector.broadcast %cst_396 : f32 to vector<8x32xf32>
    %1811 = arith.addf %1810, %1809 : vector<8x32xf32>
    %1812 = arith.divf %1810, %1811 : vector<8x32xf32>
    %1813 = vector.extract_strided_slice %1791 {offsets = [0, 64], sizes = [1, 32], strides = [1, 1]} : vector<1x96xf32> to vector<1x32xf32>
    %1814 = vector.extract_strided_slice %1794 {offsets = [0, 64], sizes = [8, 32], strides = [1, 1]} : vector<8x96xf32> to vector<8x32xf32>
    %1815 = vector.broadcast %1792 : vector<1x32xf32> to vector<8x32xf32>
    %1816 = arith.addf %1814, %1815 : vector<8x32xf32>
    %1817 = arith.mulf %1803, %1816 : vector<8x32xf32>
    %1818 = vector.broadcast %1813 : vector<1x32xf32> to vector<8x32xf32>
    %1819 = arith.addf %1818, %1817 : vector<8x32xf32>
    %1820 = math.tanh %1819 : vector<8x32xf32>
    %cst_397 = arith.constant 1.000000e+00 : f32
    %1821 = vector.broadcast %cst_397 : f32 to vector<8x32xf32>
    %1822 = arith.subf %1821, %1812 : vector<8x32xf32>
    %1823 = arith.mulf %1822, %1820 : vector<8x32xf32>
    %1824 = arith.mulf %1812, %1793 : vector<8x32xf32>
    %1825 = arith.addf %1823, %1824 : vector<8x32xf32>
    %c0_398 = arith.constant 0 : index
    %c0_399 = arith.constant 0 : index
    %1826 = vector.load %arg16[%c0_398, %c0_399] : memref<64x32xf32, #tpu.memory_space<vmem>>, vector<8x32xf32>
    tpu.vector_store %arg16[%c0_398, %c0_399], %1825 {strides = array<i32>} : memref<64x32xf32, #tpu.memory_space<vmem>>, vector<8x32xf32>,
    %cst_400 = arith.constant dense<0.000000e+00> : vector<8x96xf32>
    %1827 = tpu.matmul %1825, %1790, %cst_400 {dimension_numbers = #tpu.dot_dimension_numbers<[1], [0], [0], [1], [0, 0, 1, 1], [], []>} : vector<8x32xf32>, vector<32x96xf32>, vector<8x96xf32> -> vector<8x96xf32>
    %1828 = vector.extract_strided_slice %1827 {offsets = [0, 0], sizes = [8, 32], strides = [1, 1]} : vector<8x96xf32> to vector<8x32xf32>
    %1829 = vector.extract_strided_slice %1791 {offsets = [0, 0], sizes = [1, 32], strides = [1, 1]} : vector<1x96xf32> to vector<1x32xf32>
    %1830 = vector.broadcast %1829 : vector<1x32xf32> to vector<8x32xf32>
    %1831 = arith.addf %1828, %1830 : vector<8x32xf32>
    %1832 = arith.negf %1831 : vector<8x32xf32>
    %1833 = math.exp %1832 : vector<8x32xf32>
    %cst_401 = arith.constant 1.000000e+00 : f32
    %1834 = vector.broadcast %cst_401 : f32 to vector<8x32xf32>
    %1835 = arith.addf %1834, %1833 : vector<8x32xf32>
    %1836 = arith.divf %1834, %1835 : vector<8x32xf32>
    %1837 = vector.extract_strided_slice %1827 {offsets = [0, 32], sizes = [8, 32], strides = [1, 1]} : vector<8x96xf32> to vector<8x32xf32>
    %1838 = vector.extract_strided_slice %1791 {offsets = [0, 32], sizes = [1, 32], strides = [1, 1]} : vector<1x96xf32> to vector<1x32xf32>
    %1839 = vector.broadcast %1838 : vector<1x32xf32> to vector<8x32xf32>
    %1840 = arith.addf %1837, %1839 : vector<8x32xf32>
    %1841 = arith.negf %1840 : vector<8x32xf32>
    %1842 = math.exp %1841 : vector<8x32xf32>
    %cst_402 = arith.constant 1.000000e+00 : f32
    %1843 = vector.broadcast %cst_402 : f32 to vector<8x32xf32>
    %1844 = arith.addf %1843, %1842 : vector<8x32xf32>
    %1845 = arith.divf %1843, %1844 : vector<8x32xf32>
    %1846 = vector.extract_strided_slice %1791 {offsets = [0, 64], sizes = [1, 32], strides = [1, 1]} : vector<1x96xf32> to vector<1x32xf32>
    %1847 = vector.extract_strided_slice %1827 {offsets = [0, 64], sizes = [8, 32], strides = [1, 1]} : vector<8x96xf32> to vector<8x32xf32>
    %1848 = vector.broadcast %1792 : vector<1x32xf32> to vector<8x32xf32>
    %1849 = arith.addf %1847, %1848 : vector<8x32xf32>
    %1850 = arith.mulf %1836, %1849 : vector<8x32xf32>
    %1851 = vector.broadcast %1846 : vector<1x32xf32> to vector<8x32xf32>
    %1852 = arith.addf %1851, %1850 : vector<8x32xf32>
    %1853 = math.tanh %1852 : vector<8x32xf32>
    %cst_403 = arith.constant 1.000000e+00 : f32
    %1854 = vector.broadcast %cst_403 : f32 to vector<8x32xf32>
    %1855 = arith.subf %1854, %1845 : vector<8x32xf32>
    %1856 = arith.mulf %1855, %1853 : vector<8x32xf32>
    %1857 = arith.mulf %1845, %1825 : vector<8x32xf32>
    %1858 = arith.addf %1856, %1857 : vector<8x32xf32>
    %c8_404 = arith.constant 8 : index
    %c0_405 = arith.constant 0 : index
    %1859 = vector.load %arg16[%c8_404, %c0_405] : memref<64x32xf32, #tpu.memory_space<vmem>>, vector<8x32xf32>
    tpu.vector_store %arg16[%c8_404, %c0_405], %1858 {strides = array<i32>} : memref<64x32xf32, #tpu.memory_space<vmem>>, vector<8x32xf32>,
    %cst_406 = arith.constant dense<0.000000e+00> : vector<8x96xf32>
    %1860 = tpu.matmul %1858, %1790, %cst_406 {dimension_numbers = #tpu.dot_dimension_numbers<[1], [0], [0], [1], [0, 0, 1, 1], [], []>} : vector<8x32xf32>, vector<32x96xf32>, vector<8x96xf32> -> vector<8x96xf32>
    %1861 = vector.extract_strided_slice %1860 {offsets = [0, 0], sizes = [8, 32], strides = [1, 1]} : vector<8x96xf32> to vector<8x32xf32>
    %1862 = vector.extract_strided_slice %1791 {offsets = [0, 0], sizes = [1, 32], strides = [1, 1]} : vector<1x96xf32> to vector<1x32xf32>
    %1863 = vector.broadcast %1862 : vector<1x32xf32> to vector<8x32xf32>
    %1864 = arith.addf %1861, %1863 : vector<8x32xf32>
    %1865 = arith.negf %1864 : vector<8x32xf32>
    %1866 = math.exp %1865 : vector<8x32xf32>
    %cst_407 = arith.constant 1.000000e+00 : f32
    %1867 = vector.broadcast %cst_407 : f32 to vector<8x32xf32>
    %1868 = arith.addf %1867, %1866 : vector<8x32xf32>
    %1869 = arith.divf %1867, %1868 : vector<8x32xf32>
    %1870 = vector.extract_strided_slice %1860 {offsets = [0, 32], sizes = [8, 32], strides = [1, 1]} : vector<8x96xf32> to vector<8x32xf32>
    %1871 = vector.extract_strided_slice %1791 {offsets = [0, 32], sizes = [1, 32], strides = [1, 1]} : vector<1x96xf32> to vector<1x32xf32>
    %1872 = vector.broadcast %1871 : vector<1x32xf32> to vector<8x32xf32>
    %1873 = arith.addf %1870, %1872 : vector<8x32xf32>
    %1874 = arith.negf %1873 : vector<8x32xf32>
    %1875 = math.exp %1874 : vector<8x32xf32>
    %cst_408 = arith.constant 1.000000e+00 : f32
    %1876 = vector.broadcast %cst_408 : f32 to vector<8x32xf32>
    %1877 = arith.addf %1876, %1875 : vector<8x32xf32>
    %1878 = arith.divf %1876, %1877 : vector<8x32xf32>
    %1879 = vector.extract_strided_slice %1791 {offsets = [0, 64], sizes = [1, 32], strides = [1, 1]} : vector<1x96xf32> to vector<1x32xf32>
    %1880 = vector.extract_strided_slice %1860 {offsets = [0, 64], sizes = [8, 32], strides = [1, 1]} : vector<8x96xf32> to vector<8x32xf32>
    %1881 = vector.broadcast %1792 : vector<1x32xf32> to vector<8x32xf32>
    %1882 = arith.addf %1880, %1881 : vector<8x32xf32>
    %1883 = arith.mulf %1869, %1882 : vector<8x32xf32>
    %1884 = vector.broadcast %1879 : vector<1x32xf32> to vector<8x32xf32>
    %1885 = arith.addf %1884, %1883 : vector<8x32xf32>
    %1886 = math.tanh %1885 : vector<8x32xf32>
    %cst_409 = arith.constant 1.000000e+00 : f32
    %1887 = vector.broadcast %cst_409 : f32 to vector<8x32xf32>
    %1888 = arith.subf %1887, %1878 : vector<8x32xf32>
    %1889 = arith.mulf %1888, %1886 : vector<8x32xf32>
    %1890 = arith.mulf %1878, %1858 : vector<8x32xf32>
    %1891 = arith.addf %1889, %1890 : vector<8x32xf32>
    %c16_410 = arith.constant 16 : index
    %c0_411 = arith.constant 0 : index
    %1892 = vector.load %arg16[%c16_410, %c0_411] : memref<64x32xf32, #tpu.memory_space<vmem>>, vector<8x32xf32>
    tpu.vector_store %arg16[%c16_410, %c0_411], %1891 {strides = array<i32>} : memref<64x32xf32, #tpu.memory_space<vmem>>, vector<8x32xf32>,
    %cst_412 = arith.constant dense<0.000000e+00> : vector<8x96xf32>
    %1893 = tpu.matmul %1891, %1790, %cst_412 {dimension_numbers = #tpu.dot_dimension_numbers<[1], [0], [0], [1], [0, 0, 1, 1], [], []>} : vector<8x32xf32>, vector<32x96xf32>, vector<8x96xf32> -> vector<8x96xf32>
    %1894 = vector.extract_strided_slice %1893 {offsets = [0, 0], sizes = [8, 32], strides = [1, 1]} : vector<8x96xf32> to vector<8x32xf32>
    %1895 = vector.extract_strided_slice %1791 {offsets = [0, 0], sizes = [1, 32], strides = [1, 1]} : vector<1x96xf32> to vector<1x32xf32>
    %1896 = vector.broadcast %1895 : vector<1x32xf32> to vector<8x32xf32>
    %1897 = arith.addf %1894, %1896 : vector<8x32xf32>
    %1898 = arith.negf %1897 : vector<8x32xf32>
    %1899 = math.exp %1898 : vector<8x32xf32>
    %cst_413 = arith.constant 1.000000e+00 : f32
    %1900 = vector.broadcast %cst_413 : f32 to vector<8x32xf32>
    %1901 = arith.addf %1900, %1899 : vector<8x32xf32>
    %1902 = arith.divf %1900, %1901 : vector<8x32xf32>
    %1903 = vector.extract_strided_slice %1893 {offsets = [0, 32], sizes = [8, 32], strides = [1, 1]} : vector<8x96xf32> to vector<8x32xf32>
    %1904 = vector.extract_strided_slice %1791 {offsets = [0, 32], sizes = [1, 32], strides = [1, 1]} : vector<1x96xf32> to vector<1x32xf32>
    %1905 = vector.broadcast %1904 : vector<1x32xf32> to vector<8x32xf32>
    %1906 = arith.addf %1903, %1905 : vector<8x32xf32>
    %1907 = arith.negf %1906 : vector<8x32xf32>
    %1908 = math.exp %1907 : vector<8x32xf32>
    %cst_414 = arith.constant 1.000000e+00 : f32
    %1909 = vector.broadcast %cst_414 : f32 to vector<8x32xf32>
    %1910 = arith.addf %1909, %1908 : vector<8x32xf32>
    %1911 = arith.divf %1909, %1910 : vector<8x32xf32>
    %1912 = vector.extract_strided_slice %1791 {offsets = [0, 64], sizes = [1, 32], strides = [1, 1]} : vector<1x96xf32> to vector<1x32xf32>
    %1913 = vector.extract_strided_slice %1893 {offsets = [0, 64], sizes = [8, 32], strides = [1, 1]} : vector<8x96xf32> to vector<8x32xf32>
    %1914 = vector.broadcast %1792 : vector<1x32xf32> to vector<8x32xf32>
    %1915 = arith.addf %1913, %1914 : vector<8x32xf32>
    %1916 = arith.mulf %1902, %1915 : vector<8x32xf32>
    %1917 = vector.broadcast %1912 : vector<1x32xf32> to vector<8x32xf32>
    %1918 = arith.addf %1917, %1916 : vector<8x32xf32>
    %1919 = math.tanh %1918 : vector<8x32xf32>
    %cst_415 = arith.constant 1.000000e+00 : f32
    %1920 = vector.broadcast %cst_415 : f32 to vector<8x32xf32>
    %1921 = arith.subf %1920, %1911 : vector<8x32xf32>
    %1922 = arith.mulf %1921, %1919 : vector<8x32xf32>
    %1923 = arith.mulf %1911, %1891 : vector<8x32xf32>
    %1924 = arith.addf %1922, %1923 : vector<8x32xf32>
    %c24_416 = arith.constant 24 : index
    %c0_417 = arith.constant 0 : index
    %1925 = vector.load %arg16[%c24_416, %c0_417] : memref<64x32xf32, #tpu.memory_space<vmem>>, vector<8x32xf32>
    tpu.vector_store %arg16[%c24_416, %c0_417], %1924 {strides = array<i32>} : memref<64x32xf32, #tpu.memory_space<vmem>>, vector<8x32xf32>,
    %cst_418 = arith.constant dense<0.000000e+00> : vector<8x96xf32>
    %1926 = tpu.matmul %1924, %1790, %cst_418 {dimension_numbers = #tpu.dot_dimension_numbers<[1], [0], [0], [1], [0, 0, 1, 1], [], []>} : vector<8x32xf32>, vector<32x96xf32>, vector<8x96xf32> -> vector<8x96xf32>
    %1927 = vector.extract_strided_slice %1926 {offsets = [0, 0], sizes = [8, 32], strides = [1, 1]} : vector<8x96xf32> to vector<8x32xf32>
    %1928 = vector.extract_strided_slice %1791 {offsets = [0, 0], sizes = [1, 32], strides = [1, 1]} : vector<1x96xf32> to vector<1x32xf32>
    %1929 = vector.broadcast %1928 : vector<1x32xf32> to vector<8x32xf32>
    %1930 = arith.addf %1927, %1929 : vector<8x32xf32>
    %1931 = arith.negf %1930 : vector<8x32xf32>
    %1932 = math.exp %1931 : vector<8x32xf32>
    %cst_419 = arith.constant 1.000000e+00 : f32
    %1933 = vector.broadcast %cst_419 : f32 to vector<8x32xf32>
    %1934 = arith.addf %1933, %1932 : vector<8x32xf32>
    %1935 = arith.divf %1933, %1934 : vector<8x32xf32>
    %1936 = vector.extract_strided_slice %1926 {offsets = [0, 32], sizes = [8, 32], strides = [1, 1]} : vector<8x96xf32> to vector<8x32xf32>
    %1937 = vector.extract_strided_slice %1791 {offsets = [0, 32], sizes = [1, 32], strides = [1, 1]} : vector<1x96xf32> to vector<1x32xf32>
    %1938 = vector.broadcast %1937 : vector<1x32xf32> to vector<8x32xf32>
    %1939 = arith.addf %1936, %1938 : vector<8x32xf32>
    %1940 = arith.negf %1939 : vector<8x32xf32>
    %1941 = math.exp %1940 : vector<8x32xf32>
    %cst_420 = arith.constant 1.000000e+00 : f32
    %1942 = vector.broadcast %cst_420 : f32 to vector<8x32xf32>
    %1943 = arith.addf %1942, %1941 : vector<8x32xf32>
    %1944 = arith.divf %1942, %1943 : vector<8x32xf32>
    %1945 = vector.extract_strided_slice %1791 {offsets = [0, 64], sizes = [1, 32], strides = [1, 1]} : vector<1x96xf32> to vector<1x32xf32>
    %1946 = vector.extract_strided_slice %1926 {offsets = [0, 64], sizes = [8, 32], strides = [1, 1]} : vector<8x96xf32> to vector<8x32xf32>
    %1947 = vector.broadcast %1792 : vector<1x32xf32> to vector<8x32xf32>
    %1948 = arith.addf %1946, %1947 : vector<8x32xf32>
    %1949 = arith.mulf %1935, %1948 : vector<8x32xf32>
    %1950 = vector.broadcast %1945 : vector<1x32xf32> to vector<8x32xf32>
    %1951 = arith.addf %1950, %1949 : vector<8x32xf32>
    %1952 = math.tanh %1951 : vector<8x32xf32>
    %cst_421 = arith.constant 1.000000e+00 : f32
    %1953 = vector.broadcast %cst_421 : f32 to vector<8x32xf32>
    %1954 = arith.subf %1953, %1944 : vector<8x32xf32>
    %1955 = arith.mulf %1954, %1952 : vector<8x32xf32>
    %1956 = arith.mulf %1944, %1924 : vector<8x32xf32>
    %1957 = arith.addf %1955, %1956 : vector<8x32xf32>
    %c32_422 = arith.constant 32 : index
    %c0_423 = arith.constant 0 : index
    %1958 = vector.load %arg16[%c32_422, %c0_423] : memref<64x32xf32, #tpu.memory_space<vmem>>, vector<8x32xf32>
    tpu.vector_store %arg16[%c32_422, %c0_423], %1957 {strides = array<i32>} : memref<64x32xf32, #tpu.memory_space<vmem>>, vector<8x32xf32>,
    %cst_424 = arith.constant dense<0.000000e+00> : vector<8x96xf32>
    %1959 = tpu.matmul %1957, %1790, %cst_424 {dimension_numbers = #tpu.dot_dimension_numbers<[1], [0], [0], [1], [0, 0, 1, 1], [], []>} : vector<8x32xf32>, vector<32x96xf32>, vector<8x96xf32> -> vector<8x96xf32>
    %1960 = vector.extract_strided_slice %1959 {offsets = [0, 0], sizes = [8, 32], strides = [1, 1]} : vector<8x96xf32> to vector<8x32xf32>
    %1961 = vector.extract_strided_slice %1791 {offsets = [0, 0], sizes = [1, 32], strides = [1, 1]} : vector<1x96xf32> to vector<1x32xf32>
    %1962 = vector.broadcast %1961 : vector<1x32xf32> to vector<8x32xf32>
    %1963 = arith.addf %1960, %1962 : vector<8x32xf32>
    %1964 = arith.negf %1963 : vector<8x32xf32>
    %1965 = math.exp %1964 : vector<8x32xf32>
    %cst_425 = arith.constant 1.000000e+00 : f32
    %1966 = vector.broadcast %cst_425 : f32 to vector<8x32xf32>
    %1967 = arith.addf %1966, %1965 : vector<8x32xf32>
    %1968 = arith.divf %1966, %1967 : vector<8x32xf32>
    %1969 = vector.extract_strided_slice %1959 {offsets = [0, 32], sizes = [8, 32], strides = [1, 1]} : vector<8x96xf32> to vector<8x32xf32>
    %1970 = vector.extract_strided_slice %1791 {offsets = [0, 32], sizes = [1, 32], strides = [1, 1]} : vector<1x96xf32> to vector<1x32xf32>
    %1971 = vector.broadcast %1970 : vector<1x32xf32> to vector<8x32xf32>
    %1972 = arith.addf %1969, %1971 : vector<8x32xf32>
    %1973 = arith.negf %1972 : vector<8x32xf32>
    %1974 = math.exp %1973 : vector<8x32xf32>
    %cst_426 = arith.constant 1.000000e+00 : f32
    %1975 = vector.broadcast %cst_426 : f32 to vector<8x32xf32>
    %1976 = arith.addf %1975, %1974 : vector<8x32xf32>
    %1977 = arith.divf %1975, %1976 : vector<8x32xf32>
    %1978 = vector.extract_strided_slice %1791 {offsets = [0, 64], sizes = [1, 32], strides = [1, 1]} : vector<1x96xf32> to vector<1x32xf32>
    %1979 = vector.extract_strided_slice %1959 {offsets = [0, 64], sizes = [8, 32], strides = [1, 1]} : vector<8x96xf32> to vector<8x32xf32>
    %1980 = vector.broadcast %1792 : vector<1x32xf32> to vector<8x32xf32>
    %1981 = arith.addf %1979, %1980 : vector<8x32xf32>
    %1982 = arith.mulf %1968, %1981 : vector<8x32xf32>
    %1983 = vector.broadcast %1978 : vector<1x32xf32> to vector<8x32xf32>
    %1984 = arith.addf %1983, %1982 : vector<8x32xf32>
    %1985 = math.tanh %1984 : vector<8x32xf32>
    %cst_427 = arith.constant 1.000000e+00 : f32
    %1986 = vector.broadcast %cst_427 : f32 to vector<8x32xf32>
    %1987 = arith.subf %1986, %1977 : vector<8x32xf32>
    %1988 = arith.mulf %1987, %1985 : vector<8x32xf32>
    %1989 = arith.mulf %1977, %1957 : vector<8x32xf32>
    %1990 = arith.addf %1988, %1989 : vector<8x32xf32>
    %c40_428 = arith.constant 40 : index
    %c0_429 = arith.constant 0 : index
    %1991 = vector.load %arg16[%c40_428, %c0_429] : memref<64x32xf32, #tpu.memory_space<vmem>>, vector<8x32xf32>
    tpu.vector_store %arg16[%c40_428, %c0_429], %1990 {strides = array<i32>} : memref<64x32xf32, #tpu.memory_space<vmem>>, vector<8x32xf32>,
    %cst_430 = arith.constant dense<0.000000e+00> : vector<8x96xf32>
    %1992 = tpu.matmul %1990, %1790, %cst_430 {dimension_numbers = #tpu.dot_dimension_numbers<[1], [0], [0], [1], [0, 0, 1, 1], [], []>} : vector<8x32xf32>, vector<32x96xf32>, vector<8x96xf32> -> vector<8x96xf32>
    %1993 = vector.extract_strided_slice %1992 {offsets = [0, 0], sizes = [8, 32], strides = [1, 1]} : vector<8x96xf32> to vector<8x32xf32>
    %1994 = vector.extract_strided_slice %1791 {offsets = [0, 0], sizes = [1, 32], strides = [1, 1]} : vector<1x96xf32> to vector<1x32xf32>
    %1995 = vector.broadcast %1994 : vector<1x32xf32> to vector<8x32xf32>
    %1996 = arith.addf %1993, %1995 : vector<8x32xf32>
    %1997 = arith.negf %1996 : vector<8x32xf32>
    %1998 = math.exp %1997 : vector<8x32xf32>
    %cst_431 = arith.constant 1.000000e+00 : f32
    %1999 = vector.broadcast %cst_431 : f32 to vector<8x32xf32>
    %2000 = arith.addf %1999, %1998 : vector<8x32xf32>
    %2001 = arith.divf %1999, %2000 : vector<8x32xf32>
    %2002 = vector.extract_strided_slice %1992 {offsets = [0, 32], sizes = [8, 32], strides = [1, 1]} : vector<8x96xf32> to vector<8x32xf32>
    %2003 = vector.extract_strided_slice %1791 {offsets = [0, 32], sizes = [1, 32], strides = [1, 1]} : vector<1x96xf32> to vector<1x32xf32>
    %2004 = vector.broadcast %2003 : vector<1x32xf32> to vector<8x32xf32>
    %2005 = arith.addf %2002, %2004 : vector<8x32xf32>
    %2006 = arith.negf %2005 : vector<8x32xf32>
    %2007 = math.exp %2006 : vector<8x32xf32>
    %cst_432 = arith.constant 1.000000e+00 : f32
    %2008 = vector.broadcast %cst_432 : f32 to vector<8x32xf32>
    %2009 = arith.addf %2008, %2007 : vector<8x32xf32>
    %2010 = arith.divf %2008, %2009 : vector<8x32xf32>
    %2011 = vector.extract_strided_slice %1791 {offsets = [0, 64], sizes = [1, 32], strides = [1, 1]} : vector<1x96xf32> to vector<1x32xf32>
    %2012 = vector.extract_strided_slice %1992 {offsets = [0, 64], sizes = [8, 32], strides = [1, 1]} : vector<8x96xf32> to vector<8x32xf32>
    %2013 = vector.broadcast %1792 : vector<1x32xf32> to vector<8x32xf32>
    %2014 = arith.addf %2012, %2013 : vector<8x32xf32>
    %2015 = arith.mulf %2001, %2014 : vector<8x32xf32>
    %2016 = vector.broadcast %2011 : vector<1x32xf32> to vector<8x32xf32>
    %2017 = arith.addf %2016, %2015 : vector<8x32xf32>
    %2018 = math.tanh %2017 : vector<8x32xf32>
    %cst_433 = arith.constant 1.000000e+00 : f32
    %2019 = vector.broadcast %cst_433 : f32 to vector<8x32xf32>
    %2020 = arith.subf %2019, %2010 : vector<8x32xf32>
    %2021 = arith.mulf %2020, %2018 : vector<8x32xf32>
    %2022 = arith.mulf %2010, %1990 : vector<8x32xf32>
    %2023 = arith.addf %2021, %2022 : vector<8x32xf32>
    %c48_434 = arith.constant 48 : index
    %c0_435 = arith.constant 0 : index
    %2024 = vector.load %arg16[%c48_434, %c0_435] : memref<64x32xf32, #tpu.memory_space<vmem>>, vector<8x32xf32>
    tpu.vector_store %arg16[%c48_434, %c0_435], %2023 {strides = array<i32>} : memref<64x32xf32, #tpu.memory_space<vmem>>, vector<8x32xf32>,
    %cst_436 = arith.constant dense<0.000000e+00> : vector<8x96xf32>
    %2025 = tpu.matmul %2023, %1790, %cst_436 {dimension_numbers = #tpu.dot_dimension_numbers<[1], [0], [0], [1], [0, 0, 1, 1], [], []>} : vector<8x32xf32>, vector<32x96xf32>, vector<8x96xf32> -> vector<8x96xf32>
    %2026 = vector.extract_strided_slice %2025 {offsets = [0, 0], sizes = [8, 32], strides = [1, 1]} : vector<8x96xf32> to vector<8x32xf32>
    %2027 = vector.extract_strided_slice %1791 {offsets = [0, 0], sizes = [1, 32], strides = [1, 1]} : vector<1x96xf32> to vector<1x32xf32>
    %2028 = vector.broadcast %2027 : vector<1x32xf32> to vector<8x32xf32>
    %2029 = arith.addf %2026, %2028 : vector<8x32xf32>
    %2030 = arith.negf %2029 : vector<8x32xf32>
    %2031 = math.exp %2030 : vector<8x32xf32>
    %cst_437 = arith.constant 1.000000e+00 : f32
    %2032 = vector.broadcast %cst_437 : f32 to vector<8x32xf32>
    %2033 = arith.addf %2032, %2031 : vector<8x32xf32>
    %2034 = arith.divf %2032, %2033 : vector<8x32xf32>
    %2035 = vector.extract_strided_slice %2025 {offsets = [0, 32], sizes = [8, 32], strides = [1, 1]} : vector<8x96xf32> to vector<8x32xf32>
    %2036 = vector.extract_strided_slice %1791 {offsets = [0, 32], sizes = [1, 32], strides = [1, 1]} : vector<1x96xf32> to vector<1x32xf32>
    %2037 = vector.broadcast %2036 : vector<1x32xf32> to vector<8x32xf32>
    %2038 = arith.addf %2035, %2037 : vector<8x32xf32>
    %2039 = arith.negf %2038 : vector<8x32xf32>
    %2040 = math.exp %2039 : vector<8x32xf32>
    %cst_438 = arith.constant 1.000000e+00 : f32
    %2041 = vector.broadcast %cst_438 : f32 to vector<8x32xf32>
    %2042 = arith.addf %2041, %2040 : vector<8x32xf32>
    %2043 = arith.divf %2041, %2042 : vector<8x32xf32>
    %2044 = vector.extract_strided_slice %1791 {offsets = [0, 64], sizes = [1, 32], strides = [1, 1]} : vector<1x96xf32> to vector<1x32xf32>
    %2045 = vector.extract_strided_slice %2025 {offsets = [0, 64], sizes = [8, 32], strides = [1, 1]} : vector<8x96xf32> to vector<8x32xf32>
    %2046 = vector.broadcast %1792 : vector<1x32xf32> to vector<8x32xf32>
    %2047 = arith.addf %2045, %2046 : vector<8x32xf32>
    %2048 = arith.mulf %2034, %2047 : vector<8x32xf32>
    %2049 = vector.broadcast %2044 : vector<1x32xf32> to vector<8x32xf32>
    %2050 = arith.addf %2049, %2048 : vector<8x32xf32>
    %2051 = math.tanh %2050 : vector<8x32xf32>
    %cst_439 = arith.constant 1.000000e+00 : f32
    %2052 = vector.broadcast %cst_439 : f32 to vector<8x32xf32>
    %2053 = arith.subf %2052, %2043 : vector<8x32xf32>
    %2054 = arith.mulf %2053, %2051 : vector<8x32xf32>
    %2055 = arith.mulf %2043, %2023 : vector<8x32xf32>
    %2056 = arith.addf %2054, %2055 : vector<8x32xf32>
    %c56_440 = arith.constant 56 : index
    %c0_441 = arith.constant 0 : index
    %2057 = vector.load %arg16[%c56_440, %c0_441] : memref<64x32xf32, #tpu.memory_space<vmem>>, vector<8x32xf32>
    tpu.vector_store %arg16[%c56_440, %c0_441], %2056 {strides = array<i32>} : memref<64x32xf32, #tpu.memory_space<vmem>>, vector<8x32xf32>,
    %c0_442 = arith.constant 0 : index
    %c0_443 = arith.constant 0 : index
    %2058 = vector.load %arg16[%c0_442, %c0_443] : memref<64x32xf32, #tpu.memory_space<vmem>>, vector<64x32xf32>
    %c0_444 = arith.constant 0 : index
    %c0_445 = arith.constant 0 : index
    %2059 = vector.load %arg10[%c0_444, %c0_445] : memref<32x8xf32, #tpu.memory_space<vmem>>, vector<32x8xf32>
    %cst_446 = arith.constant dense<0.000000e+00> : vector<64x8xf32>
    %2060 = tpu.matmul %2058, %2059, %cst_446 {dimension_numbers = #tpu.dot_dimension_numbers<[1], [0], [0], [1], [0, 0, 1, 1], [], []>} : vector<64x32xf32>, vector<32x8xf32>, vector<64x8xf32> -> vector<64x8xf32>
    %c0_447 = arith.constant 0 : index
    %c0_448 = arith.constant 0 : index
    %2061 = vector.load %arg11[%c0_447, %c0_448] : memref<1x8xf32, #tpu.memory_space<vmem>>, vector<1x8xf32>
    %2062 = vector.broadcast %2061 : vector<1x8xf32> to vector<64x8xf32>
    %2063 = arith.addf %2060, %2062 : vector<64x8xf32>
    %c0_449 = arith.constant 0 : index
    %c0_450 = arith.constant 0 : index
    %2064 = vector.load %arg13[%c0_449, %c0_450] : memref<64x8xf32, #tpu.memory_space<vmem>>, vector<64x8xf32>
    tpu.vector_store %arg13[%c0_449, %c0_450], %2063 {strides = array<i32>} : memref<64x8xf32, #tpu.memory_space<vmem>>, vector<64x8xf32>,
    return
  }
  func.func @transform_0(%arg0: i32) -> (i32, i32) {
    %c0_i32 = arith.constant 0 : i32
    %c0_i32_0 = arith.constant 0 : i32
    %c0_i32_1 = arith.constant 0 : i32
    return %c0_i32, %c0_i32_0 : i32, i32
  }
  func.func @transform_1(%arg0: i32) -> (i32, i32) {
    %c0_i32 = arith.constant 0 : i32
    %c0_i32_0 = arith.constant 0 : i32
    %c0_i32_1 = arith.constant 0 : i32
    return %c0_i32, %c0_i32_0 : i32, i32
  }
  func.func @transform_2(%arg0: i32) -> (i32, i32, i32) {
    %c0_i32 = arith.constant 0 : i32
    %c0_i32_0 = arith.constant 0 : i32
    %c0_i32_1 = arith.constant 0 : i32
    %c0_i32_2 = arith.constant 0 : i32
    return %c0_i32, %c0_i32_0, %c0_i32_1 : i32, i32, i32
  }
  func.func @transform_3(%arg0: i32) -> (i32, i32, i32) {
    %c0_i32 = arith.constant 0 : i32
    %c0_i32_0 = arith.constant 0 : i32
    %c0_i32_1 = arith.constant 0 : i32
    %c0_i32_2 = arith.constant 0 : i32
    return %c0_i32, %c0_i32_0, %c0_i32_1 : i32, i32, i32
  }
  func.func @transform_4(%arg0: i32) -> (i32, i32, i32) {
    %c0_i32 = arith.constant 0 : i32
    %c0_i32_0 = arith.constant 0 : i32
    %c0_i32_1 = arith.constant 0 : i32
    %c0_i32_2 = arith.constant 0 : i32
    return %c0_i32, %c0_i32_0, %c0_i32_1 : i32, i32, i32
  }
  func.func @transform_5(%arg0: i32) -> (i32, i32, i32) {
    %c0_i32 = arith.constant 0 : i32
    %c0_i32_0 = arith.constant 0 : i32
    %c0_i32_1 = arith.constant 0 : i32
    %c0_i32_2 = arith.constant 0 : i32
    return %c0_i32, %c0_i32_0, %c0_i32_1 : i32, i32, i32
  }
  func.func @transform_6(%arg0: i32) -> (i32, i32) {
    %c0_i32 = arith.constant 0 : i32
    %c0_i32_0 = arith.constant 0 : i32
    %c0_i32_1 = arith.constant 0 : i32
    return %c0_i32, %c0_i32_0 : i32, i32
  }
  func.func @transform_7(%arg0: i32) -> (i32, i32) {
    %c0_i32 = arith.constant 0 : i32
    %c0_i32_0 = arith.constant 0 : i32
    %c0_i32_1 = arith.constant 0 : i32
    return %c0_i32, %c0_i32_0 : i32, i32
  }
  func.func @transform_8(%arg0: i32) -> (i32, i32) {
    %c0_i32 = arith.constant 0 : i32
    %c0_i32_0 = arith.constant 0 : i32
    %c0_i32_1 = arith.constant 0 : i32
    return %c0_i32, %c0_i32_0 : i32, i32
  }
  func.func @transform_9(%arg0: i32) -> (i32, i32) {
    %c0_i32 = arith.constant 0 : i32
    %c0_i32_0 = arith.constant 0 : i32
    %c0_i32_1 = arith.constant 0 : i32
    return %c0_i32, %c0_i32_0 : i32, i32
  }
  func.func @transform_10(%arg0: i32) -> (i32, i32) {
    %c0_i32 = arith.constant 0 : i32
    %c0_i32_0 = arith.constant 0 : i32
    %c0_i32_1 = arith.constant 0 : i32
    return %c0_i32, %c0_i32_0 : i32, i32
  }
  func.func @transform_11(%arg0: i32) -> (i32, i32) {
    %c0_i32 = arith.constant 0 : i32
    %c0_i32_0 = arith.constant 0 : i32
    %c0_i32_1 = arith.constant 0 : i32
    return %c0_i32, %c0_i32_0 : i32, i32
  }
  func.func @transform_12(%arg0: i32) -> (i32, i32) {
    %c0_i32 = arith.constant 0 : i32
    %c0_i32_0 = arith.constant 0 : i32
    %c0_i32_1 = arith.constant 0 : i32
    return %c0_i32, %c0_i32_0 : i32, i32
  }
}

</mosaic_0001>

<bundles_post_ra>
// kernel: tpu_custom_call.1
= control target key start
LH: loop header
LB: loop body
LE: loop exit
PB: predicated region body
PF: predicated region fallthrough
CT: control target
= control target key end

     0   :  { %18 = vsyncpa [#allocation6], 0  ;;  %s10022_s0 = inlined_call_operand.vmem [shape: f32[64,32], index: 0, kind: input, shape index: {}]   ;;  %s10023_s1 = inlined_call_operand.vmem [shape: f32[8,1], index: 1, kind: input, shape index: {}]   ;;  %s10024_s2 = inlined_call_operand.hbm [shape: f32[6,32,48], index: 2, kind: input, shape index: {}]   ;;  %s10025_s3 = inlined_call_operand.vmem [shape: f32[6,16,48], index: 3, kind: input, shape index: {}]   ;;  %s10026_s4 = inlined_call_operand.vmem [shape: f32[6,1,48], index: 4, kind: input, shape index: {}]   ;;  %s10027_s5 = inlined_call_operand.vmem [shape: f32[6,1,16], index: 5, kind: input, shape index: {}]   ;;  %s10028_s6 = inlined_call_operand.vmem [shape: f32[32,96], index: 6, kind: input, shape index: {}]   ;;  %s10029_s7 = inlined_call_operand.vmem [shape: f32[1,96], index: 7, kind: input, shape index: {}]   ;;  %s10030_s8 = inlined_call_operand.vmem [shape: f32[1,32], index: 8, kind: input, shape index: {}]   ;;  %s10031_s9 = inlined_call_operand.vmem [shape: f32[32,8], index: 9, kind: input, shape index: {}]   ;;  %s10032_s10 = inlined_call_operand.vmem [shape: f32[1,8], index: 10, kind: input, shape index: {}]   ;;  %s10033_s11 = inlined_call_operand.hbm [shape: f32[8,32], index: 11, kind: output, shape index: {0}]   ;;  %s10034_s12 = inlined_call_operand.vmem [shape: f32[64,8], index: 12, kind: output, shape index: {1}]  }
   0x1   :  { %19 = vsyncpa [#allocation7], 0  ;;  %s8428_s21 = smov [#allocation5]  }
   0x2   :  { %s29_s22 = sshll.u32 %s8428_s21, 4  ;;  %s30_s22 = int_to_ptr.vmem [resolvable:$true] %s29_s22 }
   0x3   :  { %s8392_s23 = scalar_lea.vmem %s30_s22, 3072  ;;  %p8397_p1 = scmp.lt.s32.totalorder %s30_s22, %s30_s22 }
   0x4   :  { %p8393_p0 = scmp.ne.s32.totalorder %s30_s22, %s8392_s23  ;;  %p8398_p2 = scmp.lt.s32.totalorder %s8392_s23, %s8392_s23 }
   0x6   :  { %p8399_p3 = por %p8398_p2, %p8397_p1 }
   0x8   :  { %p8400_p4 = pnand %p8399_p3, %p8393_p0 }
   0xa   :  { %8403 = shalt.err (!%p8400_p4)
}
   0xb   :  { %s8429_s24 = smov 128   ;;  %s8430_s25 = smov 8  }
   0xc   :  { %35 = dma.hbm_to_vmem [thread:$0]  %s10024_s2, 3072, %s30_s22, [#allocation6], %s8429_s24, %s8429_s24, %s8430_s25  }
   0xd   :  { %8424 = dma.done.wait [#allocation6], 3072  }
   0xe   :  { %8425 = vsyncadd [#allocation6], 4294964224  ;;  %v67_v0 = vld [vmem:[#allocation5 + $0x18] sm:$0xff]  ;;  %v66_v1 = vld [vmem:[#allocation5 + $0x10] sm:$0xff]  ;;  %vm78_vm0 = vcmask 261120   ;;  %v8431_v9 = vmov 0.0  }
   0xf   :  { %8024 = vmatprep.subr.mxu1 %v67_v0  ;;  %7460 = vmatprep.subr.mxu0 %v67_v0  ;;  %v8510_v2 = vld [vmem:[%s10022_s0 + $0x20] sm:$0xff]  ;;  %v65_v3 = vld [vmem:[#allocation5 + $0x8] sm:$0xff]  ;;  %v8527_v7 = vld [vmem:[%s10022_s0 + $0x30] sm:$0xff]  ;;  %s8432_s27 = smov 32   ;;  %vm8433_vm1 = vmmov 0   ;;  %s8434_s28 = smov 96  }
  0x10   :  { %8028 = vmatpush3.msra.mxu1 %v67_v0  ;;  %7461 = vmatpush3.msra.mxu0 %v67_v0  ;;  %v64_v4 = vld [vmem:[#allocation5] sm:$0xff]  ;;  %v8517_v5 = vld [vmem:[%s10022_s0 + $0x28] sm:$0xff]  ;;  %v8548_v11 = vld [vmem:[%s10022_s0 + $0x38] sm:$0xff]  ;;  %v8435_v30 = vmov 0   ;;  %s8436_s14 = smov 112   ;;  %vm208_vm4 = vcmask 130048  }
  0x11   :  { %8025 = vmatprep.subr.mxu1 %v66_v1  ;;  %7462 = vmatprep.subr.mxu0 %v66_v1  ;;  %v8522_v6 = vld [vmem:[%s10025_s3 + $0x8] sm:$0xff]  ;;  %v8532_v8 = vld [vmem:[%s10022_s0] sm:$0xff]  ;;  %v8634_v61 = vld [vmem:[%s10022_s0 + $0x10] sm:$0xff]  ;;  %s8437_s16 = smov 64  }
  0x12   :  { %8029 = vmatpush3.msra.mxu1 %v66_v1  ;;  %7474 = vmatprep.mubr.msk.f32.mxu1 %vm78_vm0, %v8510_v2  ;;  %v8540_v10 = vld [vmem:[%s10022_s0 + $0x8] sm:$0xff]  ;;  %v7005_v12 = vld [vmem:[%s10027_s5] ss:$0 sm:$0xff]  ;;  %v8639_v62 = vld [vmem:[%s10022_s0 + $0x18] sm:$0xff] }
  0x13   :  { %8026 = vmatprep.subr.mxu1 %v65_v3  ;;  %7463 = vmatpush3.msra.mxu0 %v66_v1  ;;  %v8558_v13 = vld [vmem:[%s10025_s3] sm:$0xff] }
  0x14   :  { %8030 = vmatpush3.msra.mxu1 %v65_v3  ;;  %7464 = vmatprep.subr.mxu0 %v65_v3  ;;  %v8597_v24 = vld [vmem:[%s10026_s4] ss:$0 sm:$0xff] }
  0x15   :  { %8027 = vmatprep.subr.mxu1 %v64_v4  ;;  %7465 = vmatpush3.msra.mxu0 %v65_v3  ;;  %v8605_v31 = vld [vmem:[%s10023_s1] sm:$0xff]  ;;  %s8438_s1 = smov [#allocation8]  }
  0x16   :  { %8031 = vmatpush3.msra.mxu1 %v64_v4  ;;  %7466 = vmatprep.subr.mxu0 %v64_v4  ;;  %vm317_vm2 = vcmp.gt.f32.partialorder %v8605_v31, 0.0  ;;  %vm428_vm5 = vcmp.gt.f32.partialorder %v8605_v31, 1.0  ;;  %vm539_vm7 = vcmp.gt.f32.partialorder %v8605_v31, 2.0  ;;  %vm650_vm9 = vcmp.gt.f32.partialorder %v8605_v31, 3.0 }
  0x17   :  { %7475 = vmatmul.mubr.msk.f32.vlgmr.msra.gmra.mxu1 %vm78_vm0, %v8517_v5  ;;  %7480 = vmatprep.subr.mxu1 %v8431_v9  ;;  %v318_v35 = vsel %vm317_vm2, 1, %v8435_v30  ;;  %v429_v55 = vsel %vm428_vm5, 1, %v8435_v30  ;;  %vm761_vm11 = vcmp.gt.f32.partialorder %v8605_v31, 4.0  ;;  %vm872_vm13 = vcmp.gt.f32.partialorder %v8605_v31, 5.0 }
  0x18   :  { %7481 = vmatpush3.msra.mxu1 %v8522_v6  ;;  %7477 = vmatprep.mubr.msk.f32.mxu1 %vm78_vm0, %v8527_v7  ;;  %vm983_vm15 = vcmp.gt.f32.partialorder %v8605_v31, 6.0  ;;  %vm1094_vm5 = vcmp.gt.f32.partialorder %v8605_v31, 7.0  ;;  %v8838_v31 = vld [vmem:[%s10026_s4 + $0x1] ss:$0 sm:$0xff] }
  0x19   :  { %7467 = vmatpush3.msra.mxu0 %v64_v4  ;;  %7468 = vmatprep.mubr.msk.f32.mxu0 %vm78_vm0, %v8532_v8 }
  0x1a   :  { %7482 = vmatprep.subr.mxu1 %v8431_v9  ;;  %7469 = vmatmul.mubr.msk.f32.vlgmr.msra.gmra.mxu0 %vm78_vm0, %v8540_v10 }
  0x1b   :  { %7478 = vmatmul.mubr.msk.f32.gmra.mxu1 %vm78_vm0, %v8548_v11  ;;  %294 = vrot.lane.b32.xlu0 %v7005_v12, %s8432_s27 }
  0x1c   :  { %7483 = vmatpush3.msra.mxu1 %v8558_v13  ;;  %7484 = vmatprep.mubr.msk.f32.mxu1 %vm8433_vm1, %v8431_v9 }
  0x1d   :  { %7487 = vmatprep.subr.mxu1 %v8431_v9  ;;  %7515 = vmatprep.subr.mxu0 %v8431_v9 }
  0x1e   :  { %7516 = vmatpush3.msra.mxu0 %v8522_v6  ;;  %8043 = vset.pattern.permute.xlu1 %v8435_v30 }
  0x1f   :  { %7485 = vmatmul.mubr.f32.vlgmr.msra.gmra.mxu1 %v8431_v9  ;;  %7517 = vmatprep.subr.mxu0 %v8431_v9 }
  0x20   :  { %7488 = vmatpush3.msra.mxu1 %v8522_v6  ;;  %7491 = vmatprep.mubr.msk.f32.mxu1 %vm8433_vm1, %v8431_v9 }
  0x21   :  { %7489 = vmatprep.subr.mxu1 %v8431_v9  ;;  %7518 = vmatpush3.msra.mxu0 %v8558_v13 }
  0x22   :  { %7490 = vmatpush3.msra.mxu1 %v8558_v13  ;;  %7529 = vmatprep.subr.mxu0 %v8431_v9 }
  0x23   :  { %7494 = vmatprep.subr.mxu1 %v8431_v9  ;;  %8044 = vset.pattern.permute.xlu0 %v8435_v30 }
  0x24   :  { %7471 = vmatprep.mubr.msk.f32.mxu0 %vm78_vm0, %v8634_v61 }
  0x25   :  { %7472 = vmatmul.mubr.msk.f32.gmra.mxu0 %vm78_vm0, %v8639_v62 }
  0x26   :  { %7519 = vmatprep.mubr.msk.f32.mxu0 %vm8433_vm1, %v8431_v9 }
  0x8d   :  { %v8590_v18 = vpop.permute.xlu0 %294 }
  0xd7   :  { %v8582_v14 = vpop.f32.mrf.mxu1 }
  0xd9   :  { %v8584_v15 = vpop.f32.mrf.mxu1 }
  0xda   :  { %v7470_v22 = vpop.f32.mrf.mxu0 }
  0xdb   :  { %v8586_v16 = vpop.f32.mrf.mxu1  ;;  %v175_v50 = vadd.f32 %v7470_v22, %v8597_v24 }
  0xdc   :  { %v169_v23 = vpop.f32.mrf.mxu0 }
  0xdd   :  { %v8588_v17 = vpop.f32.mrf.mxu1  ;;  %v170_v25 = vadd.f32 %v8597_v24, %v169_v23 }
  0xdf   :  { %v278_v19 = vpop.f32.mrf.mxu1 }
  0xe0   :  { %v297_v20 = vadd.f32 %v8590_v18, %v278_v19  ;;  %v282_v26 = vadd.f32 %v278_v19, %v170_v25 }
  0xe1   :  { %v7486_v21 = vpop.f32.mrf.mxu1 }
  0xe2   :  { %299 = vrot.lane.b32.xlu0 %v297_v20, %s8434_s28  ;;  %v7004_v27 = vmul.f32 -1.442695, %v282_v26  ;;  %v540_v26 = vsel %vm539_vm7, 1, %v8435_v30 }
  0xe4   :  { %8045 = vpow2.f32 %v7004_v27 }
  0xe5   :  { %v7473_v27 = vpop.f32.mrf.mxu0 }
  0xf1   :  { %v8046_v28 = vpop.eup %8045 }
  0xf2   :  { %v286_v29 = vadd.f32 1.0, %v8046_v28  ;;  %v179_v28 = vpop.f32.mrf.mxu0 }
  0xf4   :  { %8047 = vrcp.f32 %v286_v29  ;;  %v180_v29 = vadd.f32 %v8597_v24, %v179_v28 }
 0x101   :  { %v8048_v32 = vpop.eup %8047 }
 0x102   :  { %v309_v39 = vsub.f32 1.0, %v8048_v32  ;;  %v315_v43 = vmul.f32 0.0, %v8048_v32 }
 0x154   :  { %v300_v33 = vpop.permute.xlu0 %299 }
 0x155   :  { %v302_v34 = vmul.f32 %v8048_v32, %v300_v33 }
 0x157   :  { %304 = vrot.lane.b32.xlu1 %v302_v34, %s8432_s27 }
 0x15b   :  { %320 = vperm.xlu1 %8043, %v318_v35  }
 0x1c9   :  { %v305_v36 = vpop.permute.xlu1 %304 }
 0x1ca   :  { %v307_v37 = vadd.f32 %v305_v36, %v170_v25 }
 0x1cc   :  { %8049 = vtanh.f32 %v307_v37 }
 0x1d6   :  { %v8611_v40 = vpop.permute.xlu1 %320 }
 0x1d7   :  { %vm322_vm3 = vcmp.eq.s32.totalorder %v8611_v40, 1 }
 0x1d9   :  { %v8050_v38 = vpop.eup %8049 }
 0x1da   :  { %311 = vrot.lane.b32.xlu0 %v8050_v38, %s8436_s14 }
 0x24c   :  { %v312_v41 = vpop.permute.xlu0 %311 }
 0x24d   :  { %v314_v42 = vmul.f32 %v312_v41, %v309_v39 }
 0x24f   :  { %v316_v44 = vadd.f32 %v315_v43, %v314_v42 }
 0x251   :  { %v323_v45 = vsel %vm322_vm3, %v316_v44, 0.0 }
 0x252   :  { %325 = vrot.lane.b32.xlu1 %v323_v45, %s8436_s14 }
 0x2c4   :  { %v326_v46 = vpop.permute.xlu1 %325 }
 0x2c5   :  { %328 = vst.msk [vmem:[#allocation2] sm:$0xff] %vm208_vm4, %v326_v46  ;;  %7492 = vmatmul.mubr.msk.f32.vlgmr.msra.gmra.mxu1 %vm208_vm4, %v326_v46 }
 0x2c6   :  { %7495 = vmatpush3.msra.mxu1 %v8522_v6  ;;  %7498 = vmatprep.mubr.msk.f32.mxu1 %vm8433_vm1, %v8431_v9 }
 0x2c7   :  { %7496 = vmatprep.subr.mxu1 %v8431_v9 }
 0x2c8   :  { %7497 = vmatpush3.msra.mxu1 %v8558_v13 }
 0x2c9   :  { %7501 = vmatprep.subr.mxu1 %v8431_v9 }
 0x385   :  { %v397_v47 = vpop.f32.mrf.mxu1 }
 0x386   :  { %v408_v48 = vadd.f32 %v397_v47, %v8590_v18  ;;  %v401_v51 = vadd.f32 %v397_v47, %v175_v50 }
 0x387   :  { %v7493_v49 = vpop.f32.mrf.mxu1 }
 0x388   :  { %410 = vrot.lane.b32.xlu0 %v408_v48, %s8434_s28  ;;  %v7007_v52 = vmul.f32 -1.442695, %v401_v51 }
 0x38a   :  { %8051 = vpow2.f32 %v7007_v52 }
 0x38c   :  { %431 = vperm.xlu0 %8044, %v429_v55   ;;  %v185_v55 = vadd.f32 %v7473_v27, %v8597_v24 }
 0x397   :  { %v8052_v53 = vpop.eup %8051 }
 0x398   :  { %v405_v54 = vadd.f32 1.0, %v8052_v53 }
 0x39a   :  { %8053 = vrcp.f32 %v405_v54  ;;  %v651_v54 = vsel %vm650_vm9, 1, %v8435_v30  ;;  %vm1335_vm9 = vcmask 261248  }
 0x3a7   :  { %v8054_v56 = vpop.eup %8053 }
 0x3a8   :  { %v420_v0 = vsub.f32 1.0, %v8054_v56  ;;  %v426_v4 = vmul.f32 %v8054_v56, %v323_v45 }
 0x3fa   :  { %v411_v57 = vpop.permute.xlu0 %410 }
 0x3fb   :  { %v413_v58 = vmul.f32 %v8054_v56, %v411_v57 }
 0x3fd   :  { %415 = vrot.lane.b32.xlu1 %v413_v58, %s8432_s27 }
 0x407   :  { %v8648_v1 = vpop.permute.xlu0 %431 }
 0x408   :  { %vm433_vm6 = vcmp.eq.s32.totalorder %v8648_v1, 1 }
 0x46f   :  { %v416_v59 = vpop.permute.xlu1 %415 }
 0x470   :  { %v418_v60 = vadd.f32 %v416_v59, %v175_v50 }
 0x472   :  { %8055 = vtanh.f32 %v418_v60 }
 0x47f   :  { %v8056_v63 = vpop.eup %8055 }
 0x480   :  { %422 = vrot.lane.b32.xlu1 %v8056_v63, %s8436_s14 }
 0x4f2   :  { %v423_v3 = vpop.permute.xlu1 %422 }
 0x4f3   :  { %v425_v12 = vmul.f32 %v423_v3, %v420_v0 }
 0x4f5   :  { %v427_v19 = vadd.f32 %v426_v4, %v425_v12 }
 0x4f7   :  { %v434_v20 = vsel %vm433_vm6, %v427_v19, %v323_v45 }
 0x4f8   :  { %436 = vrot.lane.b32.xlu1 %v434_v20, %s8436_s14 }
 0x56a   :  { %v437_v21 = vpop.permute.xlu1 %436 }
 0x56b   :  { %439 = vst.msk [vmem:[#allocation2 + $0x8] sm:$0xff] %vm208_vm4, %v437_v21  ;;  %7499 = vmatmul.mubr.msk.f32.vlgmr.msra.gmra.mxu1 %vm208_vm4, %v437_v21 }
 0x56c   :  { %7502 = vmatpush3.msra.mxu1 %v8522_v6  ;;  %7505 = vmatprep.mubr.msk.f32.mxu1 %vm8433_vm1, %v8431_v9 }
 0x56d   :  { %7503 = vmatprep.subr.mxu1 %v8431_v9 }
 0x56e   :  { %7504 = vmatpush3.msra.mxu1 %v8558_v13 }
 0x56f   :  { %7508 = vmatprep.subr.mxu1 %v8431_v9 }
 0x62b   :  { %v508_v22 = vpop.f32.mrf.mxu1 }
 0x62c   :  { %v519_v23 = vadd.f32 %v508_v22, %v8590_v18  ;;  %v512_v32 = vadd.f32 %v508_v22, %v180_v29 }
 0x62d   :  { %v7500_v25 = vpop.f32.mrf.mxu1 }
 0x62e   :  { %521 = vrot.lane.b32.xlu0 %v519_v23, %s8434_s28  ;;  %v7009_v33 = vmul.f32 -1.442695, %v512_v32 }
 0x630   :  { %8057 = vpow2.f32 %v7009_v33  ;;  %v762_v33 = vsel %vm761_vm11, 1, %v8435_v30 }
 0x632   :  { %542 = vperm.xlu0 %8044, %v540_v26  }
 0x63d   :  { %v8058_v34 = vpop.eup %8057 }
 0x63e   :  { %v516_v35 = vadd.f32 1.0, %v8058_v34  ;;  %v190_v34 = vadd.f32 %v8597_v24, %v8584_v15 }
 0x640   :  { %8059 = vrcp.f32 %v516_v35 }
 0x64d   :  { %v8060_v36 = vpop.eup %8059 }
 0x64e   :  { %v531_v43 = vsub.f32 1.0, %v8060_v36  ;;  %v537_v46 = vmul.f32 %v8060_v36, %v434_v20 }
 0x6a0   :  { %v522_v37 = vpop.permute.xlu0 %521 }
 0x6a1   :  { %v524_v38 = vmul.f32 %v8060_v36, %v522_v37 }
 0x6a3   :  { %526 = vrot.lane.b32.xlu1 %v524_v38, %s8432_s27 }
 0x6ad   :  { %v8669_v45 = vpop.permute.xlu0 %542 }
 0x6ae   :  { %vm544_vm8 = vcmp.eq.s32.totalorder %v8669_v45, 1 }
 0x715   :  { %v527_v39 = vpop.permute.xlu1 %526 }
 0x716   :  { %v529_v41 = vadd.f32 %v527_v39, %v180_v29 }
 0x718   :  { %8061 = vtanh.f32 %v529_v41 }
 0x725   :  { %v8062_v42 = vpop.eup %8061 }
 0x726   :  { %533 = vrot.lane.b32.xlu1 %v8062_v42, %s8436_s14 }
 0x798   :  { %v534_v44 = vpop.permute.xlu1 %533 }
 0x799   :  { %v536_v47 = vmul.f32 %v534_v44, %v531_v43 }
 0x79b   :  { %v538_v48 = vadd.f32 %v537_v46, %v536_v47 }
 0x79d   :  { %v545_v49 = vsel %vm544_vm8, %v538_v48, %v434_v20 }
 0x79e   :  { %547 = vrot.lane.b32.xlu0 %v545_v49, %s8436_s14 }
 0x810   :  { %v548_v50 = vpop.permute.xlu0 %547 }
 0x811   :  { %550 = vst.msk [vmem:[#allocation2 + $0x10] sm:$0xff] %vm208_vm4, %v548_v50  ;;  %7506 = vmatmul.mubr.msk.f32.vlgmr.msra.gmra.mxu1 %vm208_vm4, %v548_v50 }
 0x812   :  { %7509 = vmatpush3.msra.mxu1 %v8522_v6  ;;  %7512 = vmatprep.mubr.msk.f32.mxu1 %vm8433_vm1, %v8431_v9 }
 0x813   :  { %7510 = vmatprep.subr.mxu1 %v8431_v9 }
 0x814   :  { %7511 = vmatpush3.msra.mxu1 %v8558_v13 }
 0x815   :  { %7522 = vmatprep.subr.mxu1 %v8431_v9 }
 0x8d1   :  { %v619_v51 = vpop.f32.mrf.mxu1 }
 0x8d2   :  { %v630_v52 = vadd.f32 %v619_v51, %v8590_v18  ;;  %v623_v56 = vadd.f32 %v619_v51, %v185_v55 }
 0x8d3   :  { %v7507_v53 = vpop.f32.mrf.mxu1 }
 0x8d4   :  { %632 = vrot.lane.b32.xlu1 %v630_v52, %s8434_s28  ;;  %v7011_v57 = vmul.f32 -1.442695, %v623_v56 }
 0x8d6   :  { %8063 = vpow2.f32 %v7011_v57  ;;  %v873_v57 = vsel %vm872_vm13, 1, %v8435_v30 }
 0x8d8   :  { %653 = vperm.xlu1 %8043, %v651_v54  }
 0x8e3   :  { %v8064_v58 = vpop.eup %8063 }
 0x8e4   :  { %v627_v59 = vadd.f32 1.0, %v8064_v58 }
 0x8e6   :  { %8065 = vrcp.f32 %v627_v59 }
 0x8f3   :  { %v8066_v60 = vpop.eup %8065 }
 0x8f4   :  { %v642_v19 = vsub.f32 1.0, %v8066_v60  ;;  %v648_v22 = vmul.f32 %v8066_v60, %v545_v49 }
 0x946   :  { %v633_v63 = vpop.permute.xlu1 %632 }
 0x947   :  { %v635_v0 = vmul.f32 %v8066_v60, %v633_v63 }
 0x949   :  { %637 = vrot.lane.b32.xlu0 %v635_v0, %s8432_s27 }
 0x953   :  { %v8690_v21 = vpop.permute.xlu1 %653 }
 0x954   :  { %vm655_vm10 = vcmp.eq.s32.totalorder %v8690_v21, 1 }
 0x9bb   :  { %v638_v3 = vpop.permute.xlu0 %637 }
 0x9bc   :  { %v640_v4 = vadd.f32 %v638_v3, %v185_v55 }
 0x9be   :  { %8067 = vtanh.f32 %v640_v4 }
 0x9cb   :  { %v8068_v12 = vpop.eup %8067 }
 0x9cc   :  { %644 = vrot.lane.b32.xlu0 %v8068_v12, %s8436_s14 }
 0xa3e   :  { %v645_v20 = vpop.permute.xlu0 %644 }
 0xa3f   :  { %v647_v23 = vmul.f32 %v645_v20, %v642_v19 }
 0xa41   :  { %v649_v25 = vadd.f32 %v648_v22, %v647_v23 }
 0xa43   :  { %v656_v26 = vsel %vm655_vm10, %v649_v25, %v545_v49 }
 0xa44   :  { %658 = vrot.lane.b32.xlu1 %v656_v26, %s8436_s14 }
 0xab6   :  { %v659_v27 = vpop.permute.xlu1 %658 }
 0xab7   :  { %661 = vst.msk [vmem:[#allocation2 + $0x18] sm:$0xff] %vm208_vm4, %v659_v27  ;;  %7513 = vmatmul.mubr.msk.f32.vlgmr.msra.gmra.mxu1 %vm208_vm4, %v659_v27 }
 0xab8   :  { %7523 = vmatpush3.msra.mxu1 %v8522_v6  ;;  %7526 = vmatprep.mubr.msk.f32.mxu1 %vm8433_vm1, %v8431_v9 }
 0xab9   :  { %7524 = vmatprep.subr.mxu1 %v8431_v9 }
 0xaba   :  { %7525 = vmatpush3.msra.mxu1 %v8558_v13 }
 0xb77   :  { %v730_v28 = vpop.f32.mrf.mxu1 }
 0xb78   :  { %v741_v29 = vadd.f32 %v730_v28, %v8590_v18  ;;  %v734_v35 = vadd.f32 %v730_v28, %v190_v34 }
 0xb79   :  { %v7514_v32 = vpop.f32.mrf.mxu1 }
 0xb7a   :  { %743 = vrot.lane.b32.xlu0 %v741_v29, %s8434_s28  ;;  %v7013_v36 = vmul.f32 -1.442695, %v734_v35  ;;  %v200_v35 = vadd.f32 %v8597_v24, %v8588_v17  ;;  %v1107_v17 = vld [vmem:[#allocation5 + $0x20] sm:$0xff] }
 0xb7c   :  { %8069 = vpow2.f32 %v7013_v36 }
 0xb7e   :  { %764 = vperm.xlu0 %8044, %v762_v33  }
 0xb89   :  { %v8070_v37 = vpop.eup %8069 }
 0xb8a   :  { %v738_v38 = vadd.f32 1.0, %v8070_v37 }
 0xb8c   :  { %8071 = vrcp.f32 %v738_v38 }
 0xb99   :  { %v8072_v39 = vpop.eup %8071 }
 0xb9a   :  { %v753_v47 = vsub.f32 1.0, %v8072_v39  ;;  %v759_v49 = vmul.f32 %v8072_v39, %v656_v26 }
 0xbec   :  { %v744_v41 = vpop.permute.xlu0 %743 }
 0xbed   :  { %v746_v42 = vmul.f32 %v8072_v39, %v744_v41 }
 0xbef   :  { %748 = vrot.lane.b32.xlu1 %v746_v42, %s8432_s27 }
 0xbf9   :  { %v8711_v15 = vpop.permute.xlu0 %764 }
 0xbfa   :  { %vm766_vm12 = vcmp.eq.s32.totalorder %v8711_v15, 1 }
 0xc61   :  { %v749_v43 = vpop.permute.xlu1 %748 }
 0xc62   :  { %v751_v44 = vadd.f32 %v749_v43, %v190_v34  ;;  %v984_v34 = vsel %vm983_vm15, 1, %v8435_v30 }
 0xc64   :  { %8073 = vtanh.f32 %v751_v44 }
 0xc71   :  { %v8074_v46 = vpop.eup %8073 }
 0xc72   :  { %755 = vrot.lane.b32.xlu1 %v8074_v46, %s8436_s14  ;;  %v1110_v46 = vld [vmem:[#allocation5 + $0x38] sm:$0xff] }
 0xc73   :  { %7536 = vmatprep.subr.mxu1 %v1110_v46 }
 0xce4   :  { %v756_v48 = vpop.permute.xlu1 %755 }
 0xce5   :  { %v758_v50 = vmul.f32 %v756_v48, %v753_v47  ;;  %v1109_v47 = vld [vmem:[#allocation5 + $0x30] sm:$0xff]  ;;  %v1108_v48 = vld [vmem:[#allocation5 + $0x28] sm:$0xff] }
 0xce7   :  { %v760_v51 = vadd.f32 %v759_v49, %v758_v50 }
 0xce9   :  { %v767_v52 = vsel %vm766_vm12, %v760_v51, %v656_v26 }
 0xcea   :  { %769 = vrot.lane.b32.xlu0 %v767_v52, %s8436_s14 }
 0xd5c   :  { %v770_v53 = vpop.permute.xlu0 %769 }
 0xd5d   :  { %772 = vst.msk [vmem:[#allocation2 + $0x20] sm:$0xff] %vm208_vm4, %v770_v53  ;;  %7520 = vmatmul.mubr.msk.f32.vlgmr.msra.gmra.mxu0 %vm208_vm4, %v770_v53 }
 0xd5e   :  { %7530 = vmatpush3.msra.mxu0 %v8522_v6  ;;  %7533 = vmatprep.mubr.msk.f32.mxu0 %vm8433_vm1, %v8431_v9  ;;  %v195_v6 = vadd.f32 %v8582_v14, %v8597_v24 }
 0xd5f   :  { %7531 = vmatprep.subr.mxu0 %v8431_v9 }
 0xd60   :  { %7532 = vmatpush3.msra.mxu0 %v8558_v13 }
 0xd61   :  { %7556 = vmatprep.subr.mxu0 %v8431_v9 }
 0xe1d   :  { %v841_v54 = vpop.f32.mrf.mxu0 }
 0xe1e   :  { %v852_v55 = vadd.f32 %v841_v54, %v8590_v18  ;;  %v845_v58 = vadd.f32 %v841_v54, %v195_v6 }
 0xe1f   :  { %v7521_v56 = vpop.f32.mrf.mxu0 }
 0xe20   :  { %854 = vrot.lane.b32.xlu1 %v852_v55, %s8434_s28  ;;  %v7015_v59 = vmul.f32 -1.442695, %v845_v58  ;;  %v1095_v58 = vsel %vm1094_vm5, 1, %v8435_v30 }
 0xe22   :  { %8075 = vpow2.f32 %v7015_v59 }
 0xe24   :  { %875 = vperm.xlu1 %8043, %v873_v57  }
 0xe2f   :  { %v8076_v13 = vpop.eup %8075 }
 0xe30   :  { %v849_v60 = vadd.f32 1.0, %v8076_v13 }
 0xe32   :  { %8077 = vrcp.f32 %v849_v60 }
 0xe3f   :  { %v8078_v63 = vpop.eup %8077 }
 0xe40   :  { %v864_v20 = vsub.f32 1.0, %v8078_v63  ;;  %v870_v23 = vmul.f32 %v8078_v63, %v767_v52 }
 0xe92   :  { %v855_v0 = vpop.permute.xlu1 %854 }
 0xe93   :  { %v857_v3 = vmul.f32 %v8078_v63, %v855_v0 }
 0xe95   :  { %859 = vrot.lane.b32.xlu0 %v857_v3, %s8432_s27 }
 0xe9f   :  { %v8733_v14 = vpop.permute.xlu1 %875 }
 0xea0   :  { %vm877_vm14 = vcmp.eq.s32.totalorder %v8733_v14, 1 }
 0xf07   :  { %v860_v4 = vpop.permute.xlu0 %859 }
 0xf08   :  { %v862_v12 = vadd.f32 %v860_v4, %v195_v6 }
 0xf0a   :  { %8079 = vtanh.f32 %v862_v12 }
 0xf17   :  { %v8080_v19 = vpop.eup %8079 }
 0xf18   :  { %866 = vrot.lane.b32.xlu0 %v8080_v19, %s8436_s14 }
 0xf8a   :  { %v867_v22 = vpop.permute.xlu0 %866 }
 0xf8b   :  { %v869_v25 = vmul.f32 %v867_v22, %v864_v20 }
 0xf8d   :  { %v871_v26 = vadd.f32 %v870_v23, %v869_v25 }
 0xf8f   :  { %v8738_v27 = vsel %vm877_vm14, %v871_v26, %v767_v52 }
 0xf90   :  { %880 = vrot.lane.b32.xlu1 %v8738_v27, %s8436_s14 }
0x1002   :  { %v881_v28 = vpop.permute.xlu1 %880 }
0x1003   :  { %883 = vst.msk [vmem:[#allocation2 + $0x28] sm:$0xff] %vm208_vm4, %v881_v28  ;;  %7527 = vmatmul.mubr.msk.f32.vlgmr.msra.gmra.mxu1 %vm208_vm4, %v881_v28 }
0x1004   :  { %7544 = vmatprep.mubr.msk.f32.mxu1 %vm78_vm0, %v8532_v8  ;;  %7537 = vmatpush3.msra.mxu1 %v1110_v46 }
0x1005   :  { %7538 = vmatprep.subr.mxu1 %v1109_v47 }
0x1006   :  { %7539 = vmatpush3.msra.mxu1 %v1109_v47 }
0x1007   :  { %7540 = vmatprep.subr.mxu1 %v1108_v48 }
0x1008   :  { %7541 = vmatpush3.msra.mxu1 %v1108_v48 }
0x1009   :  { %7542 = vmatprep.subr.mxu1 %v1107_v17 }
0x100a   :  { %7543 = vmatpush3.msra.mxu1 %v1107_v17 }
0x100b   :  { %7545 = vmatmul.mubr.msk.f32.vlgmr.msra.gmra.mxu1 %vm78_vm0, %v8540_v10  ;;  %7591 = vmatprep.subr.mxu1 %v8431_v9  ;;  %v8774_v10 = vld [vmem:[%s10025_s3 + $0x18] sm:$0xff] }
0x100c   :  { %7547 = vmatprep.mubr.msk.f32.mxu1 %vm78_vm0, %v8634_v61  ;;  %7592 = vmatpush3.msra.mxu1 %v8774_v10 }
0x100d   :  { %7593 = vmatprep.subr.mxu1 %v8431_v9 }
0x100f   :  { %7548 = vmatmul.mubr.msk.f32.gmra.mxu1 %vm78_vm0, %v8639_v62 }
0x1010   :  { %7550 = vmatprep.mubr.msk.f32.mxu1 %vm78_vm0, %v8510_v2  ;;  %v8780_v2 = vld [vmem:[%s10025_s3 + $0x10] sm:$0xff] }
0x1011   :  { %7594 = vmatpush3.msra.mxu1 %v8780_v2 }
0x1012   :  { %7605 = vmatprep.subr.mxu1 %v8431_v9 }
0x1013   :  { %7551 = vmatmul.mubr.msk.f32.gmra.mxu1 %vm78_vm0, %v8517_v5  ;;  %v7034_v5 = vld [vmem:[%s10027_s5 + $0x1] ss:$0 sm:$0xff] }
0x1014   :  { %7553 = vmatprep.mubr.msk.f32.mxu1 %vm78_vm0, %v8527_v7 }
0x1017   :  { %7554 = vmatmul.mubr.msk.f32.gmra.mxu1 %vm78_vm0, %v8548_v11 }
0x1018   :  { %7595 = vmatprep.mubr.msk.f32.mxu1 %vm8433_vm1, %v8431_v9 }
0x10c3   :  { %v952_v29 = vpop.f32.mrf.mxu1 }
0x10c4   :  { %v963_v32 = vadd.f32 %v952_v29, %v8590_v18  ;;  %v956_v36 = vadd.f32 %v952_v29, %v200_v35 }
0x10c5   :  { %v7528_v33 = vpop.f32.mrf.mxu1 }
0x10c6   :  { %965 = vrot.lane.b32.xlu0 %v963_v32, %s8434_s28  ;;  %v7017_v37 = vmul.f32 -1.442695, %v956_v36 }
0x10c8   :  { %8081 = vpow2.f32 %v7017_v37 }
0x10ca   :  { %986 = vperm.xlu0 %8044, %v984_v34  }
0x10cb   :  { %v8823_v59 = vpop.f32.mrf.mxu1 }
0x10cd   :  { %v8825_v13 = vpop.f32.mrf.mxu1 }
0x10cf   :  { %v8827_v60 = vpop.f32.mrf.mxu1 }
0x10d1   :  { %v8829_v63 = vpop.f32.mrf.mxu1 }
0x10d3   :  { %v8831_v0 = vpop.f32.mrf.mxu1 }
0x10d5   :  { %v8082_v38 = vpop.eup %8081  ;;  %v8833_v3 = vpop.f32.mrf.mxu1 }
0x10d6   :  { %v960_v39 = vadd.f32 1.0, %v8082_v38 }
0x10d7   :  { %v7555_v4 = vpop.f32.mrf.mxu1 }
0x10d8   :  { %8083 = vrcp.f32 %v960_v39  ;;  %v1226_v30 = vadd.f32 %v7555_v4, %v8838_v31 }
0x10e5   :  { %v8084_v8 = vpop.eup %8083 }
0x10e6   :  { %v975_v7 = vsub.f32 1.0, %v8084_v8  ;;  %v981_v62 = vmul.f32 %v8084_v8, %v8738_v27 }
0x1138   :  { %v966_v41 = vpop.permute.xlu0 %965 }
0x1139   :  { %v968_v42 = vmul.f32 %v8084_v8, %v966_v41 }
0x113b   :  { %970 = vrot.lane.b32.xlu1 %v968_v42, %s8432_s27 }
0x1145   :  { %v8789_v61 = vpop.permute.xlu0 %986 }
0x1146   :  { %vm988_vm2 = vcmp.eq.s32.totalorder %v8789_v61, 1 }
0x11ad   :  { %v971_v43 = vpop.permute.xlu1 %970 }
0x11ae   :  { %v973_v44 = vadd.f32 %v971_v43, %v200_v35  ;;  %v1220_v43 = vpop.f32.mrf.mxu1 }
0x11b0   :  { %8085 = vtanh.f32 %v973_v44  ;;  %v1221_v44 = vadd.f32 %v8838_v31, %v1220_v43 }
0x11bd   :  { %v8086_v24 = vpop.eup %8085 }
0x11be   :  { %977 = vrot.lane.b32.xlu1 %v8086_v24, %s8436_s14 }
0x11c2   :  { %1311 = vrot.lane.b32.xlu1 %v7034_v5, %s8432_s27 }
0x1230   :  { %v978_v11 = vpop.permute.xlu1 %977 }
0x1231   :  { %v980_v49 = vmul.f32 %v978_v11, %v975_v7 }
0x1233   :  { %v982_v50 = vadd.f32 %v981_v62, %v980_v49 }
0x1234   :  { %v8817_v55 = vpop.permute.xlu1 %1311 }
0x1235   :  { %v8796_v51 = vsel %vm988_vm2, %v982_v50, %v8738_v27 }
0x1236   :  { %991 = vrot.lane.b32.xlu0 %v8796_v51, %s8436_s14 }
0x12a8   :  { %v992_v52 = vpop.permute.xlu0 %991 }
0x12a9   :  { %994 = vst.msk [vmem:[#allocation2 + $0x30] sm:$0xff] %vm208_vm4, %v992_v52  ;;  %7534 = vmatmul.mubr.msk.f32.vlgmr.msra.gmra.mxu0 %vm208_vm4, %v992_v52 }
0x12aa   :  { %7557 = vmatpush3.msra.mxu0 %v8774_v10  ;;  %7560 = vmatprep.mubr.msk.f32.mxu0 %vm8433_vm1, %v8431_v9 }
0x12ab   :  { %7558 = vmatprep.subr.mxu0 %v8431_v9 }
0x12ac   :  { %7559 = vmatpush3.msra.mxu0 %v8780_v2 }
0x12ad   :  { %7561 = vmatmul.mubr.f32.vlgmr.msra.gmra.mxu0 %v8431_v9  ;;  %7563 = vmatprep.subr.mxu0 %v8431_v9 }
0x12ae   :  { %7564 = vmatpush3.msra.mxu0 %v8774_v10  ;;  %7567 = vmatprep.mubr.msk.f32.mxu0 %vm8433_vm1, %v8431_v9 }
0x12af   :  { %7565 = vmatprep.subr.mxu0 %v8431_v9 }
0x12b0   :  { %7566 = vmatpush3.msra.mxu0 %v8780_v2 }
0x12b1   :  { %7570 = vmatprep.subr.mxu0 %v8431_v9 }
0x1369   :  { %v8815_v53 = vpop.f32.mrf.mxu0 }
0x136b   :  { %v7535_v54 = vpop.f32.mrf.mxu0 }
0x136d   :  { %v1295_v56 = vpop.f32.mrf.mxu0 }
0x136e   :  { %v1314_v57 = vadd.f32 %v8817_v55, %v1295_v56  ;;  %v1299_v12 = vadd.f32 %v1295_v56, %v1226_v30 }
0x136f   :  { %v7562_v6 = vpop.f32.mrf.mxu0 }
0x1370   :  { %1316 = vrot.lane.b32.xlu0 %v1314_v57, %s8434_s28  ;;  %v7033_v19 = vmul.f32 -1.442695, %v1299_v12 }
0x1372   :  { %8087 = vpow2.f32 %v7033_v19  ;;  %v1216_v19 = vadd.f32 %v8831_v0, %v8838_v31 }
0x1374   :  { %1097 = vperm.xlu0 %8044, %v1095_v58  }
0x137f   :  { %v8088_v20 = vpop.eup %8087 }
0x1380   :  { %v1303_v22 = vadd.f32 1.0, %v8088_v20 }
0x1382   :  { %8089 = vrcp.f32 %v1303_v22 }
0x138f   :  { %v8090_v23 = vpop.eup %8089 }
0x1390   :  { %v1326_v32 = vsub.f32 1.0, %v8090_v23  ;;  %v1332_v35 = vmul.f32 0.0, %v8090_v23 }
0x13e2   :  { %v1317_v25 = vpop.permute.xlu0 %1316 }
0x13e3   :  { %v1319_v26 = vmul.f32 %v8090_v23, %v1317_v25 }
0x13e5   :  { %1321 = vrot.lane.b32.xlu1 %v1319_v26, %s8432_s27 }
0x13ef   :  { %v8843_v34 = vpop.permute.xlu0 %1097 }
0x13f0   :  { %vm1099_vm7 = vcmp.eq.s32.totalorder %v8843_v34, 1 }
0x1457   :  { %v1322_v27 = vpop.permute.xlu1 %1321 }
0x1458   :  { %v1324_v28 = vadd.f32 %v1322_v27, %v1226_v30 }
0x145a   :  { %8091 = vtanh.f32 %v1324_v28 }
0x1467   :  { %v8092_v29 = vpop.eup %8091 }
0x1468   :  { %1328 = vrot.lane.b32.xlu1 %v8092_v29, %s8436_s14 }
0x14da   :  { %v1329_v33 = vpop.permute.xlu1 %1328 }
0x14db   :  { %v1331_v36 = vmul.f32 %v1329_v33, %v1326_v32 }
0x14dd   :  { %v1333_v37 = vadd.f32 %v1332_v35, %v1331_v36 }
0x14df   :  { %v8848_v38 = vsel %vm1099_vm7, %v1333_v37, 0.0 }
0x14e0   :  { %1338 = vrot.lane.b32.xlu0 %v8848_v38, %s8436_s14 }
0x1552   :  { %v1339_v39 = vpop.permute.xlu0 %1338 }
0x1553   :  { %7568 = vmatmul.mubr.msk.f32.vlgmr.msra.gmra.mxu0 %vm208_vm4, %v1339_v39 }
0x1554   :  { %7571 = vmatpush3.msra.mxu0 %v8774_v10  ;;  %7574 = vmatprep.mubr.msk.f32.mxu0 %vm8433_vm1, %v8431_v9 }
0x1555   :  { %7572 = vmatprep.subr.mxu0 %v8431_v9 }
0x1556   :  { %7573 = vmatpush3.msra.mxu0 %v8780_v2 }
0x1557   :  { %7577 = vmatprep.subr.mxu0 %v8431_v9 }
0x1613   :  { %v1408_v8 = vpop.f32.mrf.mxu0 }
0x1614   :  { %v1419_v41 = vadd.f32 %v1408_v8, %v8817_v55  ;;  %v1412_v46 = vadd.f32 %v1408_v8, %v1221_v44 }
0x1615   :  { %v7569_v42 = vpop.f32.mrf.mxu0 }
0x1616   :  { %1421 = vrot.lane.b32.xlu1 %v1419_v41, %s8434_s28  ;;  %v7036_v47 = vmul.f32 -1.442695, %v1412_v46  ;;  %v1211_v46 = vadd.f32 %v8838_v31, %v8833_v3 }
0x1618   :  { %8093 = vpow2.f32 %v7036_v47 }
0x1625   :  { %v8094_v48 = vpop.eup %8093 }
0x1626   :  { %v1416_v17 = vadd.f32 1.0, %v8094_v48 }
0x1628   :  { %8095 = vrcp.f32 %v1416_v17 }
0x1635   :  { %v8096_v24 = vpop.eup %8095 }
0x1636   :  { %v1431_v50 = vsub.f32 1.0, %v8096_v24  ;;  %v1437_v54 = vmul.f32 %v8096_v24, %v8848_v38 }
0x1688   :  { %v1422_v5 = vpop.permute.xlu1 %1421 }
0x1689   :  { %v1424_v7 = vmul.f32 %v8096_v24, %v1422_v5 }
0x168b   :  { %1426 = vrot.lane.b32.xlu0 %v1424_v7, %s8432_s27 }
0x16fd   :  { %v1427_v11 = vpop.permute.xlu0 %1426 }
0x16fe   :  { %v1429_v62 = vadd.f32 %v1427_v11, %v1221_v44 }
0x1700   :  { %8097 = vtanh.f32 %v1429_v62 }
0x170d   :  { %v8098_v49 = vpop.eup %8097 }
0x170e   :  { %1433 = vrot.lane.b32.xlu1 %v8098_v49, %s8436_s14 }
0x1780   :  { %v1434_v52 = vpop.permute.xlu1 %1433 }
0x1781   :  { %v1436_v56 = vmul.f32 %v1434_v52, %v1431_v50 }
0x1783   :  { %v1438_v57 = vadd.f32 %v1437_v54, %v1436_v56 }
0x1785   :  { %v1439_v6 = vsel %vm988_vm2, %v1438_v57, %v8848_v38 }
0x1786   :  { %1442 = vrot.lane.b32.xlu0 %v1439_v6, %s8436_s14  ;;  %1440 = vst.msk [vmem:[#allocation2 + $0x30] sm:$0xff] %vm1335_vm9, %v1439_v6 }
0x17f8   :  { %v1443_v58 = vpop.permute.xlu0 %1442 }
0x17f9   :  { %7575 = vmatmul.mubr.msk.f32.vlgmr.msra.gmra.mxu0 %vm208_vm4, %v1443_v58 }
0x17fa   :  { %7578 = vmatpush3.msra.mxu0 %v8774_v10  ;;  %7581 = vmatprep.mubr.msk.f32.mxu0 %vm8433_vm1, %v8431_v9 }
0x17fb   :  { %7579 = vmatprep.subr.mxu0 %v8431_v9 }
0x17fc   :  { %7580 = vmatpush3.msra.mxu0 %v8780_v2 }
0x17fd   :  { %7584 = vmatprep.subr.mxu0 %v8431_v9 }
0x18b9   :  { %v1512_v4 = vpop.f32.mrf.mxu0 }
0x18ba   :  { %v1523_v30 = vadd.f32 %v1512_v4, %v8817_v55  ;;  %v1516_v20 = vadd.f32 %v1512_v4, %v1216_v19 }
0x18bb   :  { %v7576_v12 = vpop.f32.mrf.mxu0 }
0x18bc   :  { %1525 = vrot.lane.b32.xlu1 %v1523_v30, %s8434_s28  ;;  %v7038_v22 = vmul.f32 -1.442695, %v1516_v20 }
0x18be   :  { %8099 = vpow2.f32 %v7038_v22 }
0x18cb   :  { %v8100_v23 = vpop.eup %8099 }
0x18cc   :  { %v1520_v25 = vadd.f32 1.0, %v8100_v23 }
0x18ce   :  { %8101 = vrcp.f32 %v1520_v25 }
0x18db   :  { %v8102_v26 = vpop.eup %8101 }
0x18dc   :  { %v1535_v35 = vsub.f32 1.0, %v8102_v26  ;;  %v1541_v0 = vmul.f32 %v8102_v26, %v1439_v6 }
0x192e   :  { %v1526_v27 = vpop.permute.xlu1 %1525 }
0x192f   :  { %v1528_v28 = vmul.f32 %v8102_v26, %v1526_v27 }
0x1931   :  { %1530 = vrot.lane.b32.xlu0 %v1528_v28, %s8432_s27 }
0x19a3   :  { %v1531_v29 = vpop.permute.xlu0 %1530 }
0x19a4   :  { %v1533_v32 = vadd.f32 %v1531_v29, %v1216_v19  ;;  %v1206_v19 = vadd.f32 %v8827_v60, %v8838_v31 }
0x19a6   :  { %8103 = vtanh.f32 %v1533_v32 }
0x19b3   :  { %v8104_v33 = vpop.eup %8103 }
0x19b4   :  { %1537 = vrot.lane.b32.xlu1 %v8104_v33, %s8436_s14 }
0x1a26   :  { %v1538_v36 = vpop.permute.xlu1 %1537 }
0x1a27   :  { %v1540_v37 = vmul.f32 %v1538_v36, %v1535_v35 }
0x1a29   :  { %v1542_v39 = vadd.f32 %v1541_v0, %v1540_v37 }
0x1a2b   :  { %v1543_v8 = vsel %vm877_vm14, %v1542_v39, %v1439_v6 }
0x1a2c   :  { %1546 = vrot.lane.b32.xlu0 %v1543_v8, %s8436_s14  ;;  %1544 = vst.msk [vmem:[#allocation2 + $0x28] sm:$0xff] %vm1335_vm9, %v1543_v8 }
0x1a9e   :  { %v1547_v41 = vpop.permute.xlu0 %1546 }
0x1a9f   :  { %7582 = vmatmul.mubr.msk.f32.vlgmr.msra.gmra.mxu0 %vm208_vm4, %v1547_v41 }
0x1aa0   :  { %7585 = vmatpush3.msra.mxu0 %v8774_v10  ;;  %7588 = vmatprep.mubr.msk.f32.mxu0 %vm8433_vm1, %v8431_v9 }
0x1aa1   :  { %7586 = vmatprep.subr.mxu0 %v8431_v9 }
0x1aa2   :  { %7587 = vmatpush3.msra.mxu0 %v8780_v2 }
0x1aa3   :  { %7598 = vmatprep.subr.mxu0 %v8431_v9 }
0x1b5f   :  { %v1616_v42 = vpop.f32.mrf.mxu0 }
0x1b60   :  { %v1627_v43 = vadd.f32 %v1616_v42, %v8817_v55  ;;  %v1620_v47 = vadd.f32 %v1616_v42, %v1211_v46 }
0x1b61   :  { %v7583_v44 = vpop.f32.mrf.mxu0 }
0x1b62   :  { %1629 = vrot.lane.b32.xlu1 %v1627_v43, %s8434_s28  ;;  %v7040_v48 = vmul.f32 -1.442695, %v1620_v47  ;;  %v1201_v44 = vadd.f32 %v8838_v31, %v8829_v63 }
0x1b64   :  { %8105 = vpow2.f32 %v7040_v48 }
0x1b71   :  { %v8106_v17 = vpop.eup %8105 }
0x1b72   :  { %v1624_v24 = vadd.f32 1.0, %v8106_v17 }
0x1b74   :  { %8107 = vrcp.f32 %v1624_v24 }
0x1b81   :  { %v8108_v5 = vpop.eup %8107 }
0x1b82   :  { %v1639_v52 = vsub.f32 1.0, %v8108_v5  ;;  %v1645_v3 = vmul.f32 %v8108_v5, %v1543_v8 }
0x1bd4   :  { %v1630_v7 = vpop.permute.xlu1 %1629 }
0x1bd5   :  { %v1632_v11 = vmul.f32 %v8108_v5, %v1630_v7 }
0x1bd7   :  { %1634 = vrot.lane.b32.xlu0 %v1632_v11, %s8432_s27 }
0x1c49   :  { %v1635_v62 = vpop.permute.xlu0 %1634 }
0x1c4a   :  { %v1637_v49 = vadd.f32 %v1635_v62, %v1211_v46 }
0x1c4c   :  { %8109 = vtanh.f32 %v1637_v49 }
0x1c59   :  { %v8110_v50 = vpop.eup %8109 }
0x1c5a   :  { %1641 = vrot.lane.b32.xlu1 %v8110_v50, %s8436_s14 }
0x1ccc   :  { %v1642_v54 = vpop.permute.xlu1 %1641 }
0x1ccd   :  { %v1644_v56 = vmul.f32 %v1642_v54, %v1639_v52 }
0x1ccf   :  { %v1646_v57 = vadd.f32 %v1645_v3, %v1644_v56 }
0x1cd1   :  { %v1647_v6 = vsel %vm766_vm12, %v1646_v57, %v1543_v8 }
0x1cd2   :  { %1650 = vrot.lane.b32.xlu0 %v1647_v6, %s8436_s14  ;;  %1648 = vst.msk [vmem:[#allocation2 + $0x20] sm:$0xff] %vm1335_vm9, %v1647_v6 }
0x1d44   :  { %v1651_v58 = vpop.permute.xlu0 %1650 }
0x1d45   :  { %7589 = vmatmul.mubr.msk.f32.vlgmr.msra.gmra.mxu0 %vm208_vm4, %v1651_v58  ;;  %v1196_v58 = vadd.f32 %v8823_v59, %v8838_v31 }
0x1d46   :  { %7599 = vmatpush3.msra.mxu0 %v8774_v10  ;;  %7602 = vmatprep.mubr.msk.f32.mxu0 %vm8433_vm1, %v8431_v9 }
0x1d47   :  { %7600 = vmatprep.subr.mxu0 %v8431_v9 }
0x1d48   :  { %7601 = vmatpush3.msra.mxu0 %v8780_v2 }
0x1e05   :  { %v1720_v4 = vpop.f32.mrf.mxu0 }
0x1e06   :  { %v1731_v30 = vadd.f32 %v1720_v4, %v8817_v55  ;;  %v1724_v20 = vadd.f32 %v1720_v4, %v1206_v19 }
0x1e07   :  { %v7590_v12 = vpop.f32.mrf.mxu0 }
0x1e08   :  { %1733 = vrot.lane.b32.xlu1 %v1731_v30, %s8434_s28  ;;  %v7042_v22 = vmul.f32 -1.442695, %v1724_v20 }
0x1e0a   :  { %8111 = vpow2.f32 %v7042_v22 }
0x1e17   :  { %v8112_v23 = vpop.eup %8111 }
0x1e18   :  { %v1728_v25 = vadd.f32 1.0, %v8112_v23 }
0x1e1a   :  { %8113 = vrcp.f32 %v1728_v25 }
0x1e27   :  { %v8114_v26 = vpop.eup %8113 }
0x1e28   :  { %v1743_v35 = vsub.f32 1.0, %v8114_v26  ;;  %v1749_v60 = vmul.f32 %v8114_v26, %v1647_v6 }
0x1e7a   :  { %v1734_v27 = vpop.permute.xlu1 %1733 }
0x1e7b   :  { %v1736_v28 = vmul.f32 %v8114_v26, %v1734_v27 }
0x1e7d   :  { %1738 = vrot.lane.b32.xlu0 %v1736_v28, %s8432_s27 }
0x1eef   :  { %v1739_v29 = vpop.permute.xlu0 %1738 }
0x1ef0   :  { %v1741_v32 = vadd.f32 %v1739_v29, %v1206_v19 }
0x1ef2   :  { %8115 = vtanh.f32 %v1741_v32 }
0x1eff   :  { %v8116_v33 = vpop.eup %8115 }
0x1f00   :  { %1745 = vrot.lane.b32.xlu1 %v8116_v33, %s8436_s14 }
0x1f72   :  { %v1746_v36 = vpop.permute.xlu1 %1745 }
0x1f73   :  { %v1748_v0 = vmul.f32 %v1746_v36, %v1743_v35 }
0x1f75   :  { %v1750_v37 = vadd.f32 %v1749_v60, %v1748_v0 }
0x1f77   :  { %v1751_v39 = vsel %vm655_vm10, %v1750_v37, %v1647_v6 }
0x1f78   :  { %1754 = vrot.lane.b32.xlu0 %v1751_v39, %s8436_s14  ;;  %1752 = vst.msk [vmem:[#allocation2 + $0x18] sm:$0xff] %vm1335_vm9, %v1751_v39 }
0x1fea   :  { %v1755_v8 = vpop.permute.xlu0 %1754 }
0x1feb   :  { %7596 = vmatmul.mubr.msk.f32.vlgmr.msra.gmra.mxu1 %vm208_vm4, %v1755_v8 }
0x1fec   :  { %7606 = vmatpush3.msra.mxu1 %v8774_v10  ;;  %7609 = vmatprep.mubr.msk.f32.mxu1 %vm8433_vm1, %v8431_v9 }
0x1fed   :  { %7607 = vmatprep.subr.mxu1 %v8431_v9 }
0x1fee   :  { %7608 = vmatpush3.msra.mxu1 %v8780_v2 }
0x1fef   :  { %7632 = vmatprep.subr.mxu1 %v8431_v9 }
0x20ab   :  { %v1824_v41 = vpop.f32.mrf.mxu1 }
0x20ac   :  { %v1835_v42 = vadd.f32 %v1824_v41, %v8817_v55  ;;  %v1828_v46 = vadd.f32 %v1824_v41, %v1201_v44 }
0x20ad   :  { %v7597_v43 = vpop.f32.mrf.mxu1 }
0x20ae   :  { %1837 = vrot.lane.b32.xlu1 %v1835_v42, %s8434_s28  ;;  %v7044_v10 = vmul.f32 -1.442695, %v1828_v46 }
0x20b0   :  { %8117 = vpow2.f32 %v7044_v10 }
0x20bd   :  { %v8118_v47 = vpop.eup %8117 }
0x20be   :  { %v1832_v48 = vadd.f32 1.0, %v8118_v47 }
0x20c0   :  { %8119 = vrcp.f32 %v1832_v48  ;;  %v2077_v48 = vld [vmem:[#allocation5 + $0x58] sm:$0xff] }
0x20c1   :  { %7612 = vmatprep.subr.mxu0 %v2077_v48 }
0x20cd   :  { %v8120_v17 = vpop.eup %8119 }
0x20ce   :  { %v1847_v62 = vsub.f32 1.0, %v8120_v17  ;;  %v1853_v63 = vmul.f32 %v8120_v17, %v1751_v39 }
0x2120   :  { %v1838_v24 = vpop.permute.xlu1 %1837 }
0x2121   :  { %v1840_v2 = vmul.f32 %v8120_v17, %v1838_v24  ;;  %v2076_v17 = vld [vmem:[#allocation5 + $0x50] sm:$0xff]  ;;  %v7063_v24 = vld [vmem:[%s10027_s5 + $0x2] ss:$0 sm:$0xff] }
0x2123   :  { %1842 = vrot.lane.b32.xlu0 %v1840_v2, %s8432_s27  ;;  %v2075_v2 = vld [vmem:[#allocation5 + $0x48] sm:$0xff] }
0x2195   :  { %v1843_v5 = vpop.permute.xlu0 %1842 }
0x2196   :  { %v1845_v7 = vadd.f32 %v1843_v5, %v1201_v44  ;;  %v2074_v5 = vld [vmem:[#allocation5 + $0x40] sm:$0xff] }
0x2198   :  { %8121 = vtanh.f32 %v1845_v7 }
0x21a5   :  { %v8122_v11 = vpop.eup %8121 }
0x21a6   :  { %1849 = vrot.lane.b32.xlu1 %v8122_v11, %s8436_s14 }
0x2218   :  { %v1850_v49 = vpop.permute.xlu1 %1849 }
0x2219   :  { %v1852_v50 = vmul.f32 %v1850_v49, %v1847_v62 }
0x221b   :  { %v1854_v52 = vadd.f32 %v1853_v63, %v1852_v50 }
0x221d   :  { %v1855_v54 = vsel %vm544_vm8, %v1854_v52, %v1751_v39  ;;  %v1191_v39 = vadd.f32 %v8838_v31, %v8825_v13  ;;  %v8968_v13 = vld [vmem:[%s10025_s3 + $0x20] sm:$0xff] }
0x221e   :  { %1858 = vrot.lane.b32.xlu0 %v1855_v54, %s8436_s14  ;;  %1856 = vst.msk [vmem:[#allocation2 + $0x10] sm:$0xff] %vm1335_vm9, %v1855_v54 }
0x2290   :  { %v1859_v3 = vpop.permute.xlu0 %1858 }
0x2291   :  { %7603 = vmatmul.mubr.msk.f32.vlgmr.msra.gmra.mxu0 %vm208_vm4, %v1859_v3 }
0x2292   :  { %7613 = vmatpush3.msra.mxu0 %v2077_v48 }
0x2293   :  { %7614 = vmatprep.subr.mxu0 %v2076_v17 }
0x2294   :  { %7615 = vmatpush3.msra.mxu0 %v2076_v17 }
0x2295   :  { %7616 = vmatprep.subr.mxu0 %v2075_v2 }
0x2296   :  { %7617 = vmatpush3.msra.mxu0 %v2075_v2 }
0x2297   :  { %7618 = vmatprep.subr.mxu0 %v2074_v5 }
0x2298   :  { %7619 = vmatpush3.msra.mxu0 %v2074_v5 }
0x2299   :  { %7667 = vmatprep.subr.mxu0 %v8431_v9 }
0x2351   :  { %v1928_v56 = vpop.f32.mrf.mxu0 }
0x2352   :  { %v1939_v57 = vadd.f32 %v1928_v56, %v8817_v55  ;;  %v1932_v4 = vadd.f32 %v1928_v56, %v1196_v58 }
0x2353   :  { %v7604_v6 = vpop.f32.mrf.mxu0 }
0x2354   :  { %1941 = vrot.lane.b32.xlu1 %v1939_v57, %s8434_s28  ;;  %v7046_v30 = vmul.f32 -1.442695, %v1932_v4  ;;  %v9004_v4 = vld [vmem:[#allocation2 + $0x10] sm:$0xff] }
0x2356   :  { %8123 = vpow2.f32 %v7046_v30  ;;  %v9010_v30 = vld [vmem:[#allocation2 + $0x18] sm:$0xff] }
0x2363   :  { %v8124_v12 = vpop.eup %8123 }
0x2364   :  { %v1936_v19 = vadd.f32 1.0, %v8124_v12  ;;  %v9015_v12 = vld [vmem:[#allocation2 + $0x20] sm:$0xff] }
0x2366   :  { %8125 = vrcp.f32 %v1936_v19  ;;  %v9020_v19 = vld [vmem:[#allocation2 + $0x28] sm:$0xff] }
0x2373   :  { %v8126_v20 = vpop.eup %8125 }
0x2374   :  { %v1951_v28 = vsub.f32 1.0, %v8126_v20  ;;  %v1957_v59 = vmul.f32 %v8126_v20, %v1855_v54 }
0x23c6   :  { %v1942_v22 = vpop.permute.xlu1 %1941 }
0x23c7   :  { %v1944_v23 = vmul.f32 %v8126_v20, %v1942_v22  ;;  %v9024_v20 = vld [vmem:[#allocation2 + $0x30] sm:$0xff] }
0x23c9   :  { %1946 = vrot.lane.b32.xlu0 %v1944_v23, %s8432_s27  ;;  %v9031_v23 = vld [vmem:[%s10026_s4 + $0x2] ss:$0 sm:$0xff] }
0x243b   :  { %v1947_v25 = vpop.permute.xlu0 %1946 }
0x243c   :  { %v1949_v26 = vadd.f32 %v1947_v25, %v1196_v58 }
0x243e   :  { %8127 = vtanh.f32 %v1949_v26 }
0x244b   :  { %v8128_v27 = vpop.eup %8127 }
0x244c   :  { %1953 = vrot.lane.b32.xlu1 %v8128_v27, %s8436_s14 }
0x24be   :  { %v1954_v29 = vpop.permute.xlu1 %1953 }
0x24bf   :  { %v1956_v32 = vmul.f32 %v1954_v29, %v1951_v28 }
0x24c1   :  { %v1958_v33 = vadd.f32 %v1957_v59, %v1956_v32 }
0x24c3   :  { %v8946_v35 = vsel %vm433_vm6, %v1958_v33, %v1855_v54 }
0x24c4   :  { %1962 = vrot.lane.b32.xlu0 %v8946_v35, %s8436_s14  ;;  %1960 = vst.msk [vmem:[#allocation2 + $0x8] sm:$0xff] %vm1335_vm9, %v8946_v35 }
0x24cb   :  { %v9000_v58 = vld [vmem:[#allocation2 + $0x8] sm:$0xff] }
0x2536   :  { %v1963_v36 = vpop.permute.xlu0 %1962 }
0x2537   :  { %7610 = vmatmul.mubr.msk.f32.vlgmr.msra.gmra.mxu1 %vm208_vm4, %v1963_v36 }
0x2538   :  { %7636 = vmatprep.mubr.msk.f32.mxu1 %vm8433_vm1, %v8431_v9 }
0x25f7   :  { %v2032_v60 = vpop.f32.mrf.mxu1 }
0x25f8   :  { %v2043_v0 = vadd.f32 %v2032_v60, %v8817_v55  ;;  %v2036_v8 = vadd.f32 %v2032_v60, %v1191_v39  ;;  %v8963_v55 = vld [vmem:[%s10025_s3 + $0x28] sm:$0xff] }
0x25f9   :  { %v7611_v37 = vpop.f32.mrf.mxu1  ;;  %7633 = vmatpush3.msra.mxu1 %v8963_v55 }
0x25fa   :  { %2045 = vrot.lane.b32.xlu1 %v2043_v0, %s8434_s28  ;;  %v7048_v41 = vmul.f32 -1.442695, %v2036_v8  ;;  %7634 = vmatprep.subr.mxu1 %v8431_v9 }
0x25fb   :  { %7635 = vmatpush3.msra.mxu1 %v8968_v13 }
0x25fc   :  { %8129 = vpow2.f32 %v7048_v41  ;;  %7637 = vmatmul.mubr.f32.vlgmr.msra.gmra.mxu1 %v8431_v9  ;;  %7639 = vmatprep.subr.mxu1 %v8431_v9 }
0x25fd   :  { %7640 = vmatpush3.msra.mxu1 %v8963_v55  ;;  %7643 = vmatprep.mubr.msk.f32.mxu1 %vm8433_vm1, %v8431_v9 }
0x25fe   :  { %7641 = vmatprep.subr.mxu1 %v8431_v9 }
0x25ff   :  { %7642 = vmatpush3.msra.mxu1 %v8968_v13 }
0x2600   :  { %7646 = vmatprep.subr.mxu1 %v8431_v9 }
0x2609   :  { %v8130_v42 = vpop.eup %8129 }
0x260a   :  { %v2040_v43 = vadd.f32 1.0, %v8130_v42 }
0x260c   :  { %8131 = vrcp.f32 %v2040_v43 }
0x2619   :  { %v8132_v44 = vpop.eup %8131 }
0x261a   :  { %v2055_v50 = vsub.f32 1.0, %v8132_v44  ;;  %v2061_v54 = vmul.f32 %v8132_v44, %v8946_v35 }
0x266c   :  { %v2046_v46 = vpop.permute.xlu1 %2045 }
0x266d   :  { %v2048_v10 = vmul.f32 %v8132_v44, %v2046_v46 }
0x266f   :  { %2050 = vrot.lane.b32.xlu0 %v2048_v10, %s8432_s27 }
0x2673   :  { %2302 = vrot.lane.b32.xlu0 %v7063_v24, %s8432_s27 }
0x26bc   :  { %v2286_v11 = vpop.f32.mrf.mxu1 }
0x26be   :  { %v7638_v62 = vpop.f32.mrf.mxu1 }
0x26e1   :  { %v2051_v31 = vpop.permute.xlu0 %2050 }
0x26e2   :  { %v2053_v47 = vadd.f32 %v2051_v31, %v1191_v39 }
0x26e4   :  { %8133 = vtanh.f32 %v2053_v47 }
0x26e5   :  { %v8987_v49 = vpop.permute.xlu0 %2302 }
0x26e6   :  { %v2305_v63 = vadd.f32 %v8987_v49, %v2286_v11 }
0x26f1   :  { %v8134_v7 = vpop.eup %8133 }
0x26f2   :  { %2057 = vrot.lane.b32.xlu1 %v8134_v7, %s8436_s14 }
0x26f6   :  { %2307 = vrot.lane.b32.xlu1 %v2305_v63, %s8434_s28 }
0x2764   :  { %v2058_v52 = vpop.permute.xlu1 %2057 }
0x2765   :  { %v2060_v3 = vmul.f32 %v2058_v52, %v2055_v50 }
0x2767   :  { %v2062_v56 = vadd.f32 %v2061_v54, %v2060_v3 }
0x2768   :  { %v2308_v32 = vpop.permute.xlu1 %2307 }
0x2769   :  { %v2063_v57 = vsel %vm322_vm3, %v2062_v56, %v8946_v35 }
0x276a   :  { %2064 = vst.msk [vmem:[#allocation2] sm:$0xff] %vm1335_vm9, %v2063_v57 }
0x2771   :  { %v8996_v6 = vld [vmem:[#allocation2] sm:$0xff] }
0x2772   :  { %7620 = vmatprep.mubr.msk.f32.mxu0 %vm78_vm0, %v8996_v6 }
0x2773   :  { %7621 = vmatmul.mubr.msk.f32.vlgmr.msra.gmra.mxu0 %vm78_vm0, %v9000_v58 }
0x2774   :  { %7623 = vmatprep.mubr.msk.f32.mxu0 %vm78_vm0, %v9004_v4  ;;  %7668 = vmatpush3.msra.mxu0 %v8963_v55 }
0x2775   :  { %7669 = vmatprep.subr.mxu0 %v8431_v9 }
0x2776   :  { %7670 = vmatpush3.msra.mxu0 %v8968_v13 }
0x2777   :  { %7624 = vmatmul.mubr.msk.f32.gmra.mxu0 %vm78_vm0, %v9010_v30  ;;  %7681 = vmatprep.subr.mxu0 %v8431_v9 }
0x2778   :  { %7626 = vmatprep.mubr.msk.f32.mxu0 %vm78_vm0, %v9015_v12 }
0x277b   :  { %7627 = vmatmul.mubr.msk.f32.gmra.mxu0 %vm78_vm0, %v9020_v19 }
0x277c   :  { %7629 = vmatprep.mubr.msk.f32.mxu0 %vm78_vm0, %v9024_v20 }
0x2833   :  { %v7622_v22 = vpop.f32.mrf.mxu0 }
0x2834   :  { %v2187_v47 = vadd.f32 %v7622_v22, %v9031_v23 }
0x2835   :  { %v2181_v25 = vpop.f32.mrf.mxu0 }
0x2836   :  { %v2182_v26 = vadd.f32 %v9031_v23, %v2181_v25 }
0x2838   :  { %v2290_v27 = vadd.f32 %v2286_v11, %v2182_v26 }
0x283a   :  { %v7062_v28 = vmul.f32 -1.442695, %v2290_v27 }
0x283c   :  { %8135 = vpow2.f32 %v7062_v28 }
0x2849   :  { %v8136_v29 = vpop.eup %8135 }
0x284a   :  { %v2294_v59 = vadd.f32 1.0, %v8136_v29  ;;  %v7625_v29 = vpop.f32.mrf.mxu0 }
0x284c   :  { %8137 = vrcp.f32 %v2294_v59  ;;  %v2191_v59 = vpop.f32.mrf.mxu0 }
0x2859   :  { %v8138_v33 = vpop.eup %8137 }
0x285a   :  { %v2310_v35 = vmul.f32 %v8138_v33, %v2308_v32  ;;  %v2317_v37 = vsub.f32 1.0, %v8138_v33  ;;  %v2323_v41 = vmul.f32 0.0, %v8138_v33  ;;  %v2192_v32 = vadd.f32 %v9031_v23, %v2191_v59 }
0x285c   :  { %2312 = vrot.lane.b32.xlu0 %v2310_v35, %s8432_s27 }
0x28ce   :  { %v2313_v36 = vpop.permute.xlu0 %2312 }
0x28cf   :  { %v2315_v60 = vadd.f32 %v2313_v36, %v2182_v26 }
0x28d1   :  { %8139 = vtanh.f32 %v2315_v60 }
0x28de   :  { %v8140_v0 = vpop.eup %8139 }
0x28df   :  { %2319 = vrot.lane.b32.xlu1 %v8140_v0, %s8436_s14 }
0x2951   :  { %v2320_v39 = vpop.permute.xlu1 %2319 }
0x2952   :  { %v2322_v8 = vmul.f32 %v2320_v39, %v2317_v37 }
0x2954   :  { %v2324_v42 = vadd.f32 %v2323_v41, %v2322_v8 }
0x2956   :  { %v2325_v43 = vsel %vm322_vm3, %v2324_v42, 0.0 }
0x2957   :  { %2327 = vrot.lane.b32.xlu0 %v2325_v43, %s8436_s14 }
0x29c9   :  { %v2328_v44 = vpop.permute.xlu0 %2327 }
0x29ca   :  { %2330 = vst.msk [vmem:[#allocation3] sm:$0xff] %vm208_vm4, %v2328_v44  ;;  %7644 = vmatmul.mubr.msk.f32.vlgmr.msra.gmra.mxu1 %vm208_vm4, %v2328_v44 }
0x29cb   :  { %7647 = vmatpush3.msra.mxu1 %v8963_v55  ;;  %7650 = vmatprep.mubr.msk.f32.mxu1 %vm8433_vm1, %v8431_v9 }
0x29cc   :  { %7648 = vmatprep.subr.mxu1 %v8431_v9 }
0x29cd   :  { %7649 = vmatpush3.msra.mxu1 %v8968_v13 }
0x29ce   :  { %7653 = vmatprep.subr.mxu1 %v8431_v9 }
0x2a8a   :  { %v2399_v46 = vpop.f32.mrf.mxu1 }
0x2a8b   :  { %v2410_v10 = vadd.f32 %v2399_v46, %v8987_v49  ;;  %v2403_v48 = vadd.f32 %v2399_v46, %v2187_v47 }
0x2a8c   :  { %v7645_v31 = vpop.f32.mrf.mxu1 }
0x2a8d   :  { %2412 = vrot.lane.b32.xlu1 %v2410_v10, %s8434_s28  ;;  %v7065_v17 = vmul.f32 -1.442695, %v2403_v48 }
0x2a8f   :  { %8141 = vpow2.f32 %v7065_v17 }
0x2a9c   :  { %v8142_v24 = vpop.eup %8141 }
0x2a9d   :  { %v2407_v2 = vadd.f32 1.0, %v8142_v24 }
0x2a9f   :  { %8143 = vrcp.f32 %v2407_v2 }
0x2aac   :  { %v8144_v5 = vpop.eup %8143 }
0x2aad   :  { %v2422_v52 = vsub.f32 1.0, %v8144_v5  ;;  %v2428_v3 = vmul.f32 %v8144_v5, %v2325_v43 }
0x2aff   :  { %v2413_v7 = vpop.permute.xlu1 %2412 }
0x2b00   :  { %v2415_v11 = vmul.f32 %v8144_v5, %v2413_v7  ;;  %v2197_v5 = vadd.f32 %v7625_v29, %v9031_v23 }
0x2b02   :  { %2417 = vrot.lane.b32.xlu0 %v2415_v11, %s8432_s27 }
0x2b74   :  { %v2418_v62 = vpop.permute.xlu0 %2417 }
0x2b75   :  { %v2420_v63 = vadd.f32 %v2418_v62, %v2187_v47 }
0x2b77   :  { %8145 = vtanh.f32 %v2420_v63 }
0x2b84   :  { %v8146_v50 = vpop.eup %8145 }
0x2b85   :  { %2424 = vrot.lane.b32.xlu1 %v8146_v50, %s8436_s14 }
0x2bf7   :  { %v2425_v54 = vpop.permute.xlu1 %2424 }
0x2bf8   :  { %v2427_v56 = vmul.f32 %v2425_v54, %v2422_v52 }
0x2bfa   :  { %v2429_v57 = vadd.f32 %v2428_v3, %v2427_v56 }
0x2bfc   :  { %v2430_v22 = vsel %vm433_vm6, %v2429_v57, %v2325_v43 }
0x2bfd   :  { %2432 = vrot.lane.b32.xlu0 %v2430_v22, %s8436_s14 }
0x2c6f   :  { %v2433_v25 = vpop.permute.xlu0 %2432 }
0x2c70   :  { %2435 = vst.msk [vmem:[#allocation3 + $0x8] sm:$0xff] %vm208_vm4, %v2433_v25  ;;  %7651 = vmatmul.mubr.msk.f32.vlgmr.msra.gmra.mxu1 %vm208_vm4, %v2433_v25  ;;  %v8381_v25 = vld [vmem:[%s10026_s4] ss:$0 sm:$0xff] }
0x2c71   :  { %7654 = vmatpush3.msra.mxu1 %v8963_v55  ;;  %7657 = vmatprep.mubr.msk.f32.mxu1 %vm8433_vm1, %v8431_v9 }
0x2c72   :  { %7655 = vmatprep.subr.mxu1 %v8431_v9 }
0x2c73   :  { %7656 = vmatpush3.msra.mxu1 %v8968_v13 }
0x2c74   :  { %7660 = vmatprep.subr.mxu1 %v8431_v9 }
0x2d30   :  { %v2504_v26 = vpop.f32.mrf.mxu1 }
0x2d31   :  { %v2515_v27 = vadd.f32 %v2504_v26, %v8987_v49  ;;  %v2508_v33 = vadd.f32 %v2504_v26, %v2192_v32  ;;  %v205_v26 = vadd.f32 %v8381_v25, %v8586_v16 }
0x2d32   :  { %v7652_v28 = vpop.f32.mrf.mxu1 }
0x2d33   :  { %2517 = vrot.lane.b32.xlu1 %v2515_v27, %s8434_s28  ;;  %v7067_v35 = vmul.f32 -1.442695, %v2508_v33  ;;  %v1067_v27 = vadd.f32 %v8815_v53, %v205_v26 }
0x2d35   :  { %8147 = vpow2.f32 %v7067_v35  ;;  %v7019_v28 = vmul.f32 -1.442695, %v1067_v27 }
0x2d42   :  { %v8148_v36 = vpop.eup %8147 }
0x2d43   :  { %v2512_v60 = vadd.f32 1.0, %v8148_v36 }
0x2d45   :  { %8149 = vrcp.f32 %v2512_v60 }
0x2d52   :  { %v8150_v0 = vpop.eup %8149 }
0x2d53   :  { %v2527_v43 = vsub.f32 1.0, %v8150_v0  ;;  %v2533_v46 = vmul.f32 %v8150_v0, %v2430_v22 }
0x2da5   :  { %v2518_v37 = vpop.permute.xlu1 %2517 }
0x2da6   :  { %v2520_v39 = vmul.f32 %v8150_v0, %v2518_v37 }
0x2da8   :  { %2522 = vrot.lane.b32.xlu0 %v2520_v39, %s8432_s27 }
0x2e1a   :  { %v2523_v8 = vpop.permute.xlu0 %2522 }
0x2e1b   :  { %v2525_v41 = vadd.f32 %v2523_v8, %v2192_v32 }
0x2e1d   :  { %8151 = vtanh.f32 %v2525_v41 }
0x2e2a   :  { %v8152_v42 = vpop.eup %8151 }
0x2e2b   :  { %2529 = vrot.lane.b32.xlu1 %v8152_v42, %s8436_s14 }
0x2e9d   :  { %v2530_v44 = vpop.permute.xlu1 %2529 }
0x2e9e   :  { %v2532_v10 = vmul.f32 %v2530_v44, %v2527_v43 }
0x2ea0   :  { %v2534_v31 = vadd.f32 %v2533_v46, %v2532_v10 }
0x2ea2   :  { %v2535_v47 = vsel %vm544_vm8, %v2534_v31, %v2430_v22  ;;  %v1074_v22 = vadd.f32 %v8815_v53, %v8590_v18 }
0x2ea3   :  { %2537 = vrot.lane.b32.xlu0 %v2535_v47, %s8436_s14 }
0x2f15   :  { %v2538_v48 = vpop.permute.xlu0 %2537 }
0x2f16   :  { %2540 = vst.msk [vmem:[#allocation3 + $0x10] sm:$0xff] %vm208_vm4, %v2538_v48  ;;  %7658 = vmatmul.mubr.msk.f32.vlgmr.msra.gmra.mxu1 %vm208_vm4, %v2538_v48 }
0x2f17   :  { %7661 = vmatpush3.msra.mxu1 %v8963_v55  ;;  %7664 = vmatprep.mubr.msk.f32.mxu1 %vm8433_vm1, %v8431_v9 }
0x2f18   :  { %7662 = vmatprep.subr.mxu1 %v8431_v9 }
0x2f19   :  { %7663 = vmatpush3.msra.mxu1 %v8968_v13 }
0x2f1a   :  { %7674 = vmatprep.subr.mxu1 %v8431_v9 }
0x2fd6   :  { %v2609_v17 = vpop.f32.mrf.mxu1 }
0x2fd7   :  { %v2620_v24 = vadd.f32 %v2609_v17, %v8987_v49  ;;  %v2613_v7 = vadd.f32 %v2609_v17, %v2197_v5 }
0x2fd8   :  { %v7659_v2 = vpop.f32.mrf.mxu1 }
0x2fd9   :  { %2622 = vrot.lane.b32.xlu1 %v2620_v24, %s8434_s28  ;;  %v7069_v11 = vmul.f32 -1.442695, %v2613_v7  ;;  %v7628_v2 = vpop.f32.mrf.mxu0 }
0x2fdb   :  { %8153 = vpow2.f32 %v7069_v11 }
0x2fe8   :  { %v8154_v62 = vpop.eup %8153 }
0x2fe9   :  { %v2617_v63 = vadd.f32 1.0, %v8154_v62 }
0x2feb   :  { %8155 = vrcp.f32 %v2617_v63 }
0x2ff8   :  { %v8156_v50 = vpop.eup %8155 }
0x2ff9   :  { %v2632_v32 = vsub.f32 1.0, %v8156_v50  ;;  %v2638_v35 = vmul.f32 %v8156_v50, %v2535_v47 }
0x304b   :  { %v2623_v52 = vpop.permute.xlu1 %2622 }
0x304c   :  { %v2625_v54 = vmul.f32 %v8156_v50, %v2623_v52 }
0x304e   :  { %2627 = vrot.lane.b32.xlu0 %v2625_v54, %s8432_s27 }
0x30c0   :  { %v2628_v3 = vpop.permute.xlu0 %2627 }
0x30c1   :  { %v2630_v56 = vadd.f32 %v2628_v3, %v2197_v5 }
0x30c3   :  { %8157 = vtanh.f32 %v2630_v56 }
0x30c4   :  { %8159 = vpow2.f32 %v7019_v28 }
0x30d0   :  { %v8158_v57 = vpop.eup %8157 }
0x30d1   :  { %2634 = vrot.lane.b32.xlu1 %v8158_v57, %s8436_s14  ;;  %v8160_v29 = vpop.eup %8159 }
0x30d2   :  { %v1071_v59 = vadd.f32 1.0, %v8160_v29 }
0x30d4   :  { %8161 = vrcp.f32 %v1071_v59 }
0x30d5   :  { %1076 = vrot.lane.b32.xlu1 %v1074_v22, %s8434_s28 }
0x30e1   :  { %v8162_v60 = vpop.eup %8161 }
0x30e2   :  { %v1086_v42 = vsub.f32 1.0, %v8162_v60  ;;  %v1092_v44 = vmul.f32 %v8162_v60, %v8796_v51 }
0x3143   :  { %v2635_v33 = vpop.permute.xlu1 %2634 }
0x3144   :  { %v2637_v36 = vmul.f32 %v2635_v33, %v2632_v32 }
0x3146   :  { %v2639_v18 = vadd.f32 %v2638_v35, %v2637_v36 }
0x3147   :  { %v1077_v0 = vpop.permute.xlu1 %1076 }
0x3148   :  { %v1079_v37 = vmul.f32 %v8162_v60, %v1077_v0  ;;  %v2640_v39 = vsel %vm655_vm10, %v2639_v18, %v2535_v47 }
0x3149   :  { %2642 = vrot.lane.b32.xlu0 %v2640_v39, %s8436_s14 }
0x314a   :  { %1081 = vrot.lane.b32.xlu1 %v1079_v37, %s8432_s27 }
0x31bb   :  { %v2643_v16 = vpop.permute.xlu0 %2642 }
0x31bc   :  { %2645 = vst.msk [vmem:[#allocation3 + $0x18] sm:$0xff] %vm208_vm4, %v2643_v16  ;;  %7665 = vmatmul.mubr.msk.f32.vlgmr.msra.gmra.mxu1 %vm208_vm4, %v2643_v16  ;;  %v1082_v53 = vpop.permute.xlu1 %1081 }
0x31bd   :  { %v1084_v8 = vadd.f32 %v1082_v53, %v205_v26  ;;  %7675 = vmatpush3.msra.mxu1 %v8963_v55  ;;  %7678 = vmatprep.mubr.msk.f32.mxu1 %vm8433_vm1, %v8431_v9 }
0x31be   :  { %7676 = vmatprep.subr.mxu1 %v8431_v9 }
0x31bf   :  { %8163 = vtanh.f32 %v1084_v8  ;;  %7677 = vmatpush3.msra.mxu1 %v8968_v13 }
0x31cc   :  { %v8164_v41 = vpop.eup %8163 }
0x31cd   :  { %1088 = vrot.lane.b32.xlu1 %v8164_v41, %s8436_s14 }
0x323f   :  { %v1089_v43 = vpop.permute.xlu1 %1088 }
0x3240   :  { %v1091_v46 = vmul.f32 %v1089_v43, %v1086_v42  ;;  %v3070_v42 = vld [vmem:[#allocation5 + $0x78] sm:$0xff] }
0x3241   :  { %7688 = vmatprep.subr.mxu1 %v3070_v42 }
0x3242   :  { %v1093_v10 = vadd.f32 %v1092_v44, %v1091_v46 }
0x3244   :  { %v1100_v31 = vsel %vm1099_vm7, %v1093_v10, %v8796_v51  ;;  %v2201_v51 = vpop.f32.mrf.mxu0 }
0x3245   :  { %1102 = vrot.lane.b32.xlu1 %v1100_v31, %s8436_s14  ;;  %v2202_v7 = vadd.f32 %v9031_v23, %v2201_v51  ;;  %v3067_v51 = vld [vmem:[#allocation5 + $0x60] sm:$0xff] }
0x327c   :  { %v2714_v47 = vpop.f32.mrf.mxu1 }
0x327d   :  { %v2725_v48 = vadd.f32 %v2714_v47, %v8987_v49  ;;  %v2718_v11 = vadd.f32 %v2714_v47, %v2202_v7 }
0x327e   :  { %v7666_v17 = vpop.f32.mrf.mxu1 }
0x327f   :  { %2727 = vrot.lane.b32.xlu0 %v2725_v48, %s8434_s28  ;;  %v7071_v62 = vmul.f32 -1.442695, %v2718_v11 }
0x3281   :  { %8165 = vpow2.f32 %v7071_v62 }
0x328e   :  { %v8166_v63 = vpop.eup %8165 }
0x328f   :  { %v2722_v50 = vadd.f32 1.0, %v8166_v63 }
0x3291   :  { %8167 = vrcp.f32 %v2722_v50 }
0x329e   :  { %v8168_v52 = vpop.eup %8167 }
0x329f   :  { %v2737_v22 = vsub.f32 1.0, %v8168_v52  ;;  %v2743_v26 = vmul.f32 %v8168_v52, %v2640_v39 }
0x32b7   :  { %v1103_v24 = vpop.permute.xlu1 %1102 }
0x32b8   :  { %1105 = vst.msk [vmem:[#allocation2 + $0x38] sm:$0xff] %vm208_vm4, %v1103_v24  ;;  %v3069_v24 = vld [vmem:[#allocation5 + $0x70] sm:$0xff] }
0x32b9   :  { %1336 = vst.msk [vmem:[#allocation2 + $0x38] sm:$0xff] %vm1335_vm9, %v8848_v38 }
0x32c0   :  { %v9114_v5 = vld [vmem:[#allocation2 + $0x38] sm:$0xff] }
0x32c1   :  { %7630 = vmatmul.mubr.msk.f32.gmra.mxu0 %vm78_vm0, %v9114_v5 }
0x32c2   :  { %7671 = vmatprep.mubr.msk.f32.mxu0 %vm8433_vm1, %v8431_v9 }
0x32f1   :  { %v2728_v38 = vpop.permute.xlu0 %2727 }
0x32f2   :  { %v2730_v54 = vmul.f32 %v8168_v52, %v2728_v38 }
0x32f4   :  { %2732 = vrot.lane.b32.xlu0 %v2730_v54, %s8432_s27 }
0x3366   :  { %v2733_v3 = vpop.permute.xlu0 %2732 }
0x3367   :  { %v2735_v56 = vadd.f32 %v2733_v3, %v2202_v7 }
0x3369   :  { %8169 = vtanh.f32 %v2735_v56 }
0x3376   :  { %v8170_v57 = vpop.eup %8169 }
0x3377   :  { %2739 = vrot.lane.b32.xlu0 %v8170_v57, %s8436_s14 }
0x3381   :  { %v9134_v32 = vpop.f32.mrf.mxu0 }
0x3383   :  { %v9136_v33 = vpop.f32.mrf.mxu0 }
0x3384   :  { %v2212_v3 = vadd.f32 %v9031_v23, %v9136_v33  ;;  %v9208_v33 = vld [vmem:[%s10025_s3 + $0x30] sm:$0xff] }
0x33e9   :  { %v2740_v25 = vpop.permute.xlu0 %2739 }
0x33ea   :  { %v2742_v27 = vmul.f32 %v2740_v25, %v2737_v22 }
0x33ec   :  { %v2744_v28 = vadd.f32 %v2743_v26, %v2742_v27 }
0x33ee   :  { %v2745_v29 = vsel %vm766_vm12, %v2744_v28, %v2640_v39 }
0x33ef   :  { %2747 = vrot.lane.b32.xlu0 %v2745_v29, %s8436_s14 }
0x3461   :  { %v2748_v59 = vpop.permute.xlu0 %2747 }
0x3462   :  { %2750 = vst.msk [vmem:[#allocation3 + $0x20] sm:$0xff] %vm208_vm4, %v2748_v59  ;;  %7672 = vmatmul.mubr.msk.f32.vlgmr.msra.gmra.mxu0 %vm208_vm4, %v2748_v59 }
0x3463   :  { %7682 = vmatpush3.msra.mxu0 %v8963_v55  ;;  %7685 = vmatprep.mubr.msk.f32.mxu0 %vm8433_vm1, %v8431_v9  ;;  %v2207_v55 = vadd.f32 %v7628_v2, %v9031_v23  ;;  %v3068_v2 = vld [vmem:[#allocation5 + $0x68] sm:$0xff]  ;;  %v9202_v23 = vld [vmem:[%s10025_s3 + $0x38] sm:$0xff] }
0x3464   :  { %7683 = vmatprep.subr.mxu0 %v8431_v9 }
0x3465   :  { %7684 = vmatpush3.msra.mxu0 %v8968_v13 }
0x3466   :  { %7708 = vmatprep.subr.mxu0 %v8431_v9 }
0x3522   :  { %v2819_v35 = vpop.f32.mrf.mxu0 }
0x3523   :  { %v2830_v36 = vadd.f32 %v2819_v35, %v8987_v49  ;;  %v2823_v60 = vadd.f32 %v2819_v35, %v2207_v55 }
0x3524   :  { %v7673_v18 = vpop.f32.mrf.mxu0 }
0x3525   :  { %2832 = vrot.lane.b32.xlu1 %v2830_v36, %s8434_s28  ;;  %v7073_v0 = vmul.f32 -1.442695, %v2823_v60  ;;  %v7092_v36 = vld [vmem:[%s10027_s5 + $0x3] ss:$0 sm:$0xff] }
0x3527   :  { %8171 = vpow2.f32 %v7073_v0 }
0x3534   :  { %v8172_v37 = vpop.eup %8171 }
0x3535   :  { %v2827_v39 = vadd.f32 1.0, %v8172_v37 }
0x3537   :  { %8173 = vrcp.f32 %v2827_v39 }
0x3544   :  { %v8174_v13 = vpop.eup %8173 }
0x3545   :  { %v2842_v44 = vsub.f32 1.0, %v8174_v13  ;;  %v2848_v10 = vmul.f32 %v8174_v13, %v2745_v29 }
0x3597   :  { %v2833_v16 = vpop.permute.xlu1 %2832 }
0x3598   :  { %v2835_v53 = vmul.f32 %v8174_v13, %v2833_v16 }
0x359a   :  { %2837 = vrot.lane.b32.xlu0 %v2835_v53, %s8432_s27 }
0x360c   :  { %v2838_v8 = vpop.permute.xlu0 %2837 }
0x360d   :  { %v2840_v41 = vadd.f32 %v2838_v8, %v2207_v55 }
0x360f   :  { %8175 = vtanh.f32 %v2840_v41 }
0x361c   :  { %v8176_v43 = vpop.eup %8175 }
0x361d   :  { %2844 = vrot.lane.b32.xlu1 %v8176_v43, %s8436_s14 }
0x368f   :  { %v2845_v46 = vpop.permute.xlu1 %2844 }
0x3690   :  { %v2847_v31 = vmul.f32 %v2845_v46, %v2842_v44 }
0x3692   :  { %v2849_v47 = vadd.f32 %v2848_v10, %v2847_v31 }
0x3694   :  { %v9145_v48 = vsel %vm877_vm14, %v2849_v47, %v2745_v29 }
0x3695   :  { %2852 = vrot.lane.b32.xlu0 %v9145_v48, %s8436_s14 }
0x3707   :  { %v2853_v17 = vpop.permute.xlu0 %2852 }
0x3708   :  { %2855 = vst.msk [vmem:[#allocation3 + $0x28] sm:$0xff] %vm208_vm4, %v2853_v17  ;;  %7679 = vmatmul.mubr.msk.f32.vlgmr.msra.gmra.mxu1 %vm208_vm4, %v2853_v17 }
0x3709   :  { %7689 = vmatpush3.msra.mxu1 %v3070_v42  ;;  %7696 = vmatprep.mubr.msk.f32.mxu1 %vm78_vm0, %v8996_v6 }
0x370a   :  { %7690 = vmatprep.subr.mxu1 %v3069_v24 }
0x370b   :  { %7691 = vmatpush3.msra.mxu1 %v3069_v24 }
0x370c   :  { %7692 = vmatprep.subr.mxu1 %v3068_v2 }
0x370d   :  { %7693 = vmatpush3.msra.mxu1 %v3068_v2 }
0x370e   :  { %7694 = vmatprep.subr.mxu1 %v3067_v51 }
0x370f   :  { %7695 = vmatpush3.msra.mxu1 %v3067_v51 }
0x3710   :  { %7697 = vmatmul.mubr.msk.f32.vlgmr.msra.gmra.mxu1 %vm78_vm0, %v9000_v58  ;;  %7743 = vmatprep.subr.mxu1 %v8431_v9 }
0x3711   :  { %7699 = vmatprep.mubr.msk.f32.mxu1 %vm78_vm0, %v9004_v4  ;;  %7744 = vmatpush3.msra.mxu1 %v9202_v23 }
0x3712   :  { %7745 = vmatprep.subr.mxu1 %v8431_v9 }
0x3713   :  { %7746 = vmatpush3.msra.mxu1 %v9208_v33 }
0x3714   :  { %7700 = vmatmul.mubr.msk.f32.gmra.mxu1 %vm78_vm0, %v9010_v30  ;;  %v9175_v30 = vld [vmem:[%s10026_s4 + $0x3] ss:$0 sm:$0xff]  ;;  %7757 = vmatprep.subr.mxu1 %v8431_v9 }
0x3715   :  { %7702 = vmatprep.mubr.msk.f32.mxu1 %vm78_vm0, %v9015_v12 }
0x3718   :  { %7703 = vmatmul.mubr.msk.f32.gmra.mxu1 %vm78_vm0, %v9020_v19 }
0x3719   :  { %7705 = vmatprep.mubr.msk.f32.mxu1 %vm78_vm0, %v9024_v20 }
0x371c   :  { %7706 = vmatmul.mubr.msk.f32.gmra.mxu1 %vm78_vm0, %v9114_v5 }
0x371d   :  { %7747 = vmatprep.mubr.msk.f32.mxu1 %vm8433_vm1, %v8431_v9 }
0x37c8   :  { %v2924_v6 = vpop.f32.mrf.mxu1 }
0x37c9   :  { %v2935_v58 = vadd.f32 %v2924_v6, %v8987_v49  ;;  %v2928_v56 = vadd.f32 %v2924_v6, %v2212_v3 }
0x37ca   :  { %v7680_v4 = vpop.f32.mrf.mxu1 }
0x37cb   :  { %2937 = vrot.lane.b32.xlu1 %v2935_v58, %s8434_s28  ;;  %v7075_v57 = vmul.f32 -1.442695, %v2928_v56 }
0x37cd   :  { %8177 = vpow2.f32 %v7075_v57 }
0x37d0   :  { %v7698_v12 = vpop.f32.mrf.mxu1 }
0x37d1   :  { %v9178_v19 = vadd.f32 %v7698_v12, %v9175_v30 }
0x37d2   :  { %v3150_v20 = vpop.f32.mrf.mxu1 }
0x37d3   :  { %v9181_v5 = vadd.f32 %v9175_v30, %v3150_v20 }
0x37d4   :  { %v7701_v7 = vpop.f32.mrf.mxu1 }
0x37d5   :  { %v9184_v11 = vadd.f32 %v7701_v7, %v9175_v30 }
0x37d6   :  { %v3160_v62 = vpop.f32.mrf.mxu1 }
0x37d7   :  { %v9187_v63 = vadd.f32 %v9175_v30, %v3160_v62 }
0x37d8   :  { %v7704_v50 = vpop.f32.mrf.mxu1 }
0x37d9   :  { %v9190_v52 = vadd.f32 %v7704_v50, %v9175_v30 }
0x37da   :  { %v3170_v38 = vpop.f32.mrf.mxu1  ;;  %v8178_v22 = vpop.eup %8177 }
0x37db   :  { %v9193_v54 = vadd.f32 %v9175_v30, %v3170_v38  ;;  %v2932_v25 = vadd.f32 1.0, %v8178_v22 }
0x37dc   :  { %v7707_v44 = vpop.f32.mrf.mxu1 }
0x37dd   :  { %8179 = vrcp.f32 %v2932_v25  ;;  %v3186_v46 = vadd.f32 %v7707_v44, %v9175_v30 }
0x37de   :  { %v3180_v22 = vpop.f32.mrf.mxu1 }
0x37df   :  { %v3181_v25 = vadd.f32 %v9175_v30, %v3180_v22 }
0x37ea   :  { %v8180_v26 = vpop.eup %8179 }
0x37eb   :  { %v2947_v18 = vsub.f32 1.0, %v8180_v26  ;;  %v2953_v60 = vmul.f32 %v8180_v26, %v9145_v48 }
0x383d   :  { %v2938_v27 = vpop.permute.xlu1 %2937 }
0x383e   :  { %v2940_v28 = vmul.f32 %v8180_v26, %v2938_v27 }
0x3840   :  { %2942 = vrot.lane.b32.xlu0 %v2940_v28, %s8432_s27 }
0x38b2   :  { %v2943_v29 = vpop.permute.xlu0 %2942 }
0x38b3   :  { %v2945_v59 = vadd.f32 %v2943_v29, %v2212_v3 }
0x38b5   :  { %8181 = vtanh.f32 %v2945_v59 }
0x38c2   :  { %v8182_v35 = vpop.eup %8181 }
0x38c3   :  { %2949 = vrot.lane.b32.xlu1 %v8182_v35, %s8436_s14 }
0x38c7   :  { %3271 = vrot.lane.b32.xlu1 %v7092_v36, %s8432_s27 }
0x3935   :  { %v2950_v55 = vpop.permute.xlu1 %2949 }
0x3936   :  { %v2952_v0 = vmul.f32 %v2950_v55, %v2947_v18 }
0x3938   :  { %v2954_v37 = vadd.f32 %v2953_v60, %v2952_v0 }
0x3939   :  { %v9242_v8 = vpop.permute.xlu1 %3271 }
0x393a   :  { %v9221_v39 = vsel %vm988_vm2, %v2954_v37, %v9145_v48 }
0x393b   :  { %2957 = vrot.lane.b32.xlu0 %v9221_v39, %s8436_s14 }
0x39ad   :  { %v2958_v13 = vpop.permute.xlu0 %2957 }
0x39ae   :  { %2960 = vst.msk [vmem:[#allocation3 + $0x30] sm:$0xff] %vm208_vm4, %v2958_v13  ;;  %7686 = vmatmul.mubr.msk.f32.vlgmr.msra.gmra.mxu0 %vm208_vm4, %v2958_v13 }
0x39af   :  { %7709 = vmatpush3.msra.mxu0 %v9202_v23  ;;  %7712 = vmatprep.mubr.msk.f32.mxu0 %vm8433_vm1, %v8431_v9 }
0x39b0   :  { %7710 = vmatprep.subr.mxu0 %v8431_v9 }
0x39b1   :  { %7711 = vmatpush3.msra.mxu0 %v9208_v33 }
0x39b2   :  { %7713 = vmatmul.mubr.f32.vlgmr.msra.gmra.mxu0 %v8431_v9  ;;  %7715 = vmatprep.subr.mxu0 %v8431_v9 }
0x39b3   :  { %7716 = vmatpush3.msra.mxu0 %v9202_v23  ;;  %7719 = vmatprep.mubr.msk.f32.mxu0 %vm8433_vm1, %v8431_v9 }
0x39b4   :  { %7717 = vmatprep.subr.mxu0 %v8431_v9 }
0x39b5   :  { %7718 = vmatpush3.msra.mxu0 %v9208_v33 }
0x39b6   :  { %7722 = vmatprep.subr.mxu0 %v8431_v9 }
0x3a6e   :  { %v9240_v16 = vpop.f32.mrf.mxu0 }
0x3a70   :  { %v7687_v53 = vpop.f32.mrf.mxu0 }
0x3a72   :  { %v3255_v41 = vpop.f32.mrf.mxu0 }
0x3a73   :  { %v3274_v42 = vadd.f32 %v9242_v8, %v3255_v41  ;;  %v3259_v10 = vadd.f32 %v3255_v41, %v3186_v46 }
0x3a74   :  { %v7714_v43 = vpop.f32.mrf.mxu0 }
0x3a75   :  { %3276 = vrot.lane.b32.xlu0 %v3274_v42, %s8434_s28  ;;  %v7091_v31 = vmul.f32 -1.442695, %v3259_v10 }
0x3a77   :  { %8183 = vpow2.f32 %v7091_v31 }
0x3a84   :  { %v8184_v47 = vpop.eup %8183 }
0x3a85   :  { %v3263_v48 = vadd.f32 1.0, %v8184_v47 }
0x3a87   :  { %8185 = vrcp.f32 %v3263_v48 }
0x3a94   :  { %v8186_v17 = vpop.eup %8185 }
0x3a95   :  { %v3286_v4 = vsub.f32 1.0, %v8186_v17  ;;  %v3292_v20 = vmul.f32 0.0, %v8186_v17 }
0x3ae7   :  { %v3277_v24 = vpop.permute.xlu0 %3276 }
0x3ae8   :  { %v3279_v2 = vmul.f32 %v8186_v17, %v3277_v24 }
0x3aea   :  { %3281 = vrot.lane.b32.xlu1 %v3279_v2, %s8432_s27 }
0x3b5c   :  { %v3282_v51 = vpop.permute.xlu1 %3281 }
0x3b5d   :  { %v3284_v6 = vadd.f32 %v3282_v51, %v3186_v46 }
0x3b5f   :  { %8187 = vtanh.f32 %v3284_v6 }
0x3b6c   :  { %v8188_v58 = vpop.eup %8187 }
0x3b6d   :  { %3288 = vrot.lane.b32.xlu0 %v8188_v58, %s8436_s14 }
0x3bdf   :  { %v3289_v12 = vpop.permute.xlu0 %3288 }
0x3be0   :  { %v3291_v7 = vmul.f32 %v3289_v12, %v3286_v4 }
0x3be2   :  { %v3293_v62 = vadd.f32 %v3292_v20, %v3291_v7 }
0x3be4   :  { %v9251_v50 = vsel %vm1099_vm7, %v3293_v62, 0.0 }
0x3be5   :  { %3297 = vrot.lane.b32.xlu1 %v9251_v50, %s8436_s14 }
0x3c57   :  { %v3298_v38 = vpop.permute.xlu1 %3297 }
0x3c58   :  { %7720 = vmatmul.mubr.msk.f32.vlgmr.msra.gmra.mxu0 %vm208_vm4, %v3298_v38 }
0x3c59   :  { %7723 = vmatpush3.msra.mxu0 %v9202_v23  ;;  %7726 = vmatprep.mubr.msk.f32.mxu0 %vm8433_vm1, %v8431_v9 }
0x3c5a   :  { %7724 = vmatprep.subr.mxu0 %v8431_v9 }
0x3c5b   :  { %7725 = vmatpush3.msra.mxu0 %v9208_v33 }
0x3c5c   :  { %7729 = vmatprep.subr.mxu0 %v8431_v9 }
0x3d18   :  { %v3367_v3 = vpop.f32.mrf.mxu0 }
0x3d19   :  { %v3378_v56 = vadd.f32 %v3367_v3, %v9242_v8  ;;  %v3371_v26 = vadd.f32 %v3367_v3, %v3181_v25 }
0x3d1a   :  { %v7721_v57 = vpop.f32.mrf.mxu0 }
0x3d1b   :  { %3380 = vrot.lane.b32.xlu0 %v3378_v56, %s8434_s28  ;;  %v7094_v27 = vmul.f32 -1.442695, %v3371_v26 }
0x3d1d   :  { %8189 = vpow2.f32 %v7094_v27 }
0x3d2a   :  { %v8190_v28 = vpop.eup %8189 }
0x3d2b   :  { %v3375_v29 = vadd.f32 1.0, %v8190_v28 }
0x3d2d   :  { %8191 = vrcp.f32 %v3375_v29 }
0x3d3a   :  { %v8192_v59 = vpop.eup %8191 }
0x3d3b   :  { %v3390_v0 = vsub.f32 1.0, %v8192_v59  ;;  %v3396_v30 = vmul.f32 %v8192_v59, %v9251_v50 }
0x3d8d   :  { %v3381_v35 = vpop.permute.xlu0 %3380 }
0x3d8e   :  { %v3383_v36 = vmul.f32 %v8192_v59, %v3381_v35 }
0x3d90   :  { %3385 = vrot.lane.b32.xlu1 %v3383_v36, %s8432_s27 }
0x3e02   :  { %v3386_v18 = vpop.permute.xlu1 %3385 }
0x3e03   :  { %v3388_v55 = vadd.f32 %v3386_v18, %v3181_v25 }
0x3e05   :  { %8193 = vtanh.f32 %v3388_v55 }
0x3e12   :  { %v8194_v60 = vpop.eup %8193 }
0x3e13   :  { %3392 = vrot.lane.b32.xlu0 %v8194_v60, %s8436_s14 }
0x3e85   :  { %v3393_v37 = vpop.permute.xlu0 %3392 }
0x3e86   :  { %v3395_v13 = vmul.f32 %v3393_v37, %v3390_v0 }
0x3e88   :  { %v3397_v53 = vadd.f32 %v3396_v30, %v3395_v13 }
0x3e8a   :  { %v3398_v41 = vsel %vm988_vm2, %v3397_v53, %v9251_v50 }
0x3e8b   :  { %3401 = vrot.lane.b32.xlu1 %v3398_v41, %s8436_s14  ;;  %3399 = vst.msk [vmem:[#allocation3 + $0x30] sm:$0xff] %vm1335_vm9, %v3398_v41 }
0x3efd   :  { %v3402_v42 = vpop.permute.xlu1 %3401 }
0x3efe   :  { %7727 = vmatmul.mubr.msk.f32.vlgmr.msra.gmra.mxu0 %vm208_vm4, %v3402_v42 }
0x3eff   :  { %7730 = vmatpush3.msra.mxu0 %v9202_v23  ;;  %7733 = vmatprep.mubr.msk.f32.mxu0 %vm8433_vm1, %v8431_v9 }
0x3f00   :  { %7731 = vmatprep.subr.mxu0 %v8431_v9 }
0x3f01   :  { %7732 = vmatpush3.msra.mxu0 %v9208_v33 }
0x3f02   :  { %7736 = vmatprep.subr.mxu0 %v8431_v9 }
0x3fbe   :  { %v3471_v43 = vpop.f32.mrf.mxu0 }
0x3fbf   :  { %v3482_v44 = vadd.f32 %v3471_v43, %v9242_v8  ;;  %v3475_v10 = vadd.f32 %v3471_v43, %v9190_v52 }
0x3fc0   :  { %v7728_v46 = vpop.f32.mrf.mxu0 }
0x3fc1   :  { %3484 = vrot.lane.b32.xlu0 %v3482_v44, %s8434_s28  ;;  %v7096_v31 = vmul.f32 -1.442695, %v3475_v10 }
0x3fc3   :  { %8195 = vpow2.f32 %v7096_v31 }
0x3fd0   :  { %v8196_v47 = vpop.eup %8195 }
0x3fd1   :  { %v3479_v48 = vadd.f32 1.0, %v8196_v47 }
0x3fd3   :  { %8197 = vrcp.f32 %v3479_v48 }
0x3fe0   :  { %v8198_v17 = vpop.eup %8197 }
0x3fe1   :  { %v3494_v4 = vsub.f32 1.0, %v8198_v17  ;;  %v3500_v20 = vmul.f32 %v8198_v17, %v3398_v41 }
0x4033   :  { %v3485_v24 = vpop.permute.xlu0 %3484 }
0x4034   :  { %v3487_v2 = vmul.f32 %v8198_v17, %v3485_v24 }
0x4036   :  { %3489 = vrot.lane.b32.xlu1 %v3487_v2, %s8432_s27 }
0x40a8   :  { %v3490_v51 = vpop.permute.xlu1 %3489 }
0x40a9   :  { %v3492_v6 = vadd.f32 %v3490_v51, %v9190_v52 }
0x40ab   :  { %8199 = vtanh.f32 %v3492_v6 }
0x40b8   :  { %v8200_v58 = vpop.eup %8199 }
0x40b9   :  { %3496 = vrot.lane.b32.xlu0 %v8200_v58, %s8436_s14 }
0x412b   :  { %v3497_v12 = vpop.permute.xlu0 %3496 }
0x412c   :  { %v3499_v7 = vmul.f32 %v3497_v12, %v3494_v4 }
0x412e   :  { %v3501_v62 = vadd.f32 %v3500_v20, %v3499_v7 }
0x4130   :  { %v3502_v38 = vsel %vm877_vm14, %v3501_v62, %v3398_v41 }
0x4131   :  { %3505 = vrot.lane.b32.xlu1 %v3502_v38, %s8436_s14  ;;  %3503 = vst.msk [vmem:[#allocation3 + $0x28] sm:$0xff] %vm1335_vm9, %v3502_v38 }
0x41a3   :  { %v3506_v3 = vpop.permute.xlu1 %3505 }
0x41a4   :  { %7734 = vmatmul.mubr.msk.f32.vlgmr.msra.gmra.mxu0 %vm208_vm4, %v3506_v3 }
0x41a5   :  { %7737 = vmatpush3.msra.mxu0 %v9202_v23  ;;  %7740 = vmatprep.mubr.msk.f32.mxu0 %vm8433_vm1, %v8431_v9 }
0x41a6   :  { %7738 = vmatprep.subr.mxu0 %v8431_v9 }
0x41a7   :  { %7739 = vmatpush3.msra.mxu0 %v9208_v33 }
0x41a8   :  { %7750 = vmatprep.subr.mxu0 %v8431_v9 }
0x4264   :  { %v3575_v52 = vpop.f32.mrf.mxu0 }
0x4265   :  { %v3586_v56 = vadd.f32 %v3575_v52, %v9242_v8  ;;  %v3579_v22 = vadd.f32 %v3575_v52, %v9193_v54 }
0x4266   :  { %v7735_v57 = vpop.f32.mrf.mxu0 }
0x4267   :  { %3588 = vrot.lane.b32.xlu0 %v3586_v56, %s8434_s28  ;;  %v7098_v25 = vmul.f32 -1.442695, %v3579_v22 }
0x4269   :  { %8201 = vpow2.f32 %v7098_v25 }
0x4276   :  { %v8202_v26 = vpop.eup %8201 }
0x4277   :  { %v3583_v27 = vadd.f32 1.0, %v8202_v26 }
0x4279   :  { %8203 = vrcp.f32 %v3583_v27 }
0x4286   :  { %v8204_v28 = vpop.eup %8203 }
0x4287   :  { %v3598_v55 = vsub.f32 1.0, %v8204_v28  ;;  %v3604_v0 = vmul.f32 %v8204_v28, %v3502_v38 }
0x42d9   :  { %v3589_v29 = vpop.permute.xlu0 %3588 }
0x42da   :  { %v3591_v59 = vmul.f32 %v8204_v28, %v3589_v29 }
0x42dc   :  { %3593 = vrot.lane.b32.xlu1 %v3591_v59, %s8432_s27 }
0x434e   :  { %v3594_v35 = vpop.permute.xlu1 %3593 }
0x434f   :  { %v3596_v36 = vadd.f32 %v3594_v35, %v9193_v54 }
0x4351   :  { %8205 = vtanh.f32 %v3596_v36 }
0x435e   :  { %v8206_v18 = vpop.eup %8205 }
0x435f   :  { %3600 = vrot.lane.b32.xlu0 %v8206_v18, %s8436_s14 }
0x43d1   :  { %v3601_v60 = vpop.permute.xlu0 %3600 }
0x43d2   :  { %v3603_v37 = vmul.f32 %v3601_v60, %v3598_v55 }
0x43d4   :  { %v3605_v30 = vadd.f32 %v3604_v0, %v3603_v37 }
0x43d6   :  { %v3606_v13 = vsel %vm766_vm12, %v3605_v30, %v3502_v38 }
0x43d7   :  { %3609 = vrot.lane.b32.xlu1 %v3606_v13, %s8436_s14  ;;  %3607 = vst.msk [vmem:[#allocation3 + $0x20] sm:$0xff] %vm1335_vm9, %v3606_v13 }
0x4449   :  { %v3610_v53 = vpop.permute.xlu1 %3609 }
0x444a   :  { %7741 = vmatmul.mubr.msk.f32.vlgmr.msra.gmra.mxu0 %vm208_vm4, %v3610_v53 }
0x444b   :  { %7751 = vmatpush3.msra.mxu0 %v9202_v23  ;;  %7754 = vmatprep.mubr.msk.f32.mxu0 %vm8433_vm1, %v8431_v9 }
0x444c   :  { %7752 = vmatprep.subr.mxu0 %v8431_v9 }
0x444d   :  { %7753 = vmatpush3.msra.mxu0 %v9208_v33 }
0x450a   :  { %v3679_v54 = vpop.f32.mrf.mxu0 }
0x450b   :  { %v3690_v41 = vadd.f32 %v3679_v54, %v9242_v8  ;;  %v3683_v43 = vadd.f32 %v3679_v54, %v9184_v11 }
0x450c   :  { %v7742_v42 = vpop.f32.mrf.mxu0 }
0x450d   :  { %3692 = vrot.lane.b32.xlu0 %v3690_v41, %s8434_s28  ;;  %v7100_v44 = vmul.f32 -1.442695, %v3683_v43 }
0x450f   :  { %8207 = vpow2.f32 %v7100_v44 }
0x451c   :  { %v8208_v46 = vpop.eup %8207 }
0x451d   :  { %v3687_v10 = vadd.f32 1.0, %v8208_v46 }
0x451f   :  { %8209 = vrcp.f32 %v3687_v10 }
0x452c   :  { %v8210_v31 = vpop.eup %8209 }
0x452d   :  { %v3702_v51 = vsub.f32 1.0, %v8210_v31  ;;  %v3708_v58 = vmul.f32 %v8210_v31, %v3606_v13 }
0x457f   :  { %v3693_v47 = vpop.permute.xlu0 %3692 }
0x4580   :  { %v3695_v48 = vmul.f32 %v8210_v31, %v3693_v47 }
0x4582   :  { %3697 = vrot.lane.b32.xlu1 %v3695_v48, %s8432_s27 }
0x45f4   :  { %v3698_v17 = vpop.permute.xlu1 %3697 }
0x45f5   :  { %v3700_v24 = vadd.f32 %v3698_v17, %v9184_v11 }
0x45f7   :  { %8211 = vtanh.f32 %v3700_v24 }
0x4604   :  { %v8212_v2 = vpop.eup %8211 }
0x4605   :  { %3704 = vrot.lane.b32.xlu0 %v8212_v2, %s8436_s14 }
0x4677   :  { %v3705_v6 = vpop.permute.xlu0 %3704 }
0x4678   :  { %v3707_v4 = vmul.f32 %v3705_v6, %v3702_v51 }
0x467a   :  { %v3709_v12 = vadd.f32 %v3708_v58, %v3707_v4 }
0x467c   :  { %v3710_v20 = vsel %vm655_vm10, %v3709_v12, %v3606_v13 }
0x467d   :  { %3713 = vrot.lane.b32.xlu1 %v3710_v20, %s8436_s14  ;;  %3711 = vst.msk [vmem:[#allocation3 + $0x18] sm:$0xff] %vm1335_vm9, %v3710_v20 }
0x46ef   :  { %v3714_v7 = vpop.permute.xlu1 %3713 }
0x46f0   :  { %7748 = vmatmul.mubr.msk.f32.vlgmr.msra.gmra.mxu1 %vm208_vm4, %v3714_v7 }
0x46f1   :  { %7758 = vmatpush3.msra.mxu1 %v9202_v23  ;;  %7761 = vmatprep.mubr.msk.f32.mxu1 %vm8433_vm1, %v8431_v9 }
0x46f2   :  { %7759 = vmatprep.subr.mxu1 %v8431_v9 }
0x46f3   :  { %7760 = vmatpush3.msra.mxu1 %v9208_v33 }
0x46f4   :  { %7784 = vmatprep.subr.mxu1 %v8431_v9 }
0x47b0   :  { %v3783_v11 = vpop.f32.mrf.mxu1 }
0x47b1   :  { %v3794_v62 = vadd.f32 %v3783_v11, %v9242_v8  ;;  %v3787_v3 = vadd.f32 %v3783_v11, %v9187_v63 }
0x47b2   :  { %v7749_v38 = vpop.f32.mrf.mxu1 }
0x47b3   :  { %3796 = vrot.lane.b32.xlu0 %v3794_v62, %s8434_s28  ;;  %v7102_v52 = vmul.f32 -1.442695, %v3787_v3  ;;  %v9365_v38 = vld [vmem:[%s10025_s3 + $0x48] sm:$0xff] }
0x47b5   :  { %8213 = vpow2.f32 %v7102_v52 }
0x47c2   :  { %v8214_v23 = vpop.eup %8213 }
0x47c3   :  { %v3791_v56 = vadd.f32 1.0, %v8214_v23  ;;  %v4036_v23 = vld [vmem:[#allocation5 + $0x98] sm:$0xff] }
0x47c4   :  { %7764 = vmatprep.subr.mxu0 %v4036_v23 }
0x47c5   :  { %8215 = vrcp.f32 %v3791_v56  ;;  %v4035_v56 = vld [vmem:[#allocation5 + $0x90] sm:$0xff] }
0x47d2   :  { %v8216_v57 = vpop.eup %8215 }
0x47d3   :  { %v3806_v28 = vsub.f32 1.0, %v8216_v57  ;;  %v3812_v59 = vmul.f32 %v8216_v57, %v3710_v20 }
0x4825   :  { %v3797_v22 = vpop.permute.xlu0 %3796 }
0x4826   :  { %v3799_v25 = vmul.f32 %v8216_v57, %v3797_v22  ;;  %v7121_v57 = vld [vmem:[%s10027_s5 + $0x4] ss:$0 sm:$0xff]  ;;  %v4034_v22 = vld [vmem:[#allocation5 + $0x88] sm:$0xff] }
0x4828   :  { %3801 = vrot.lane.b32.xlu1 %v3799_v25, %s8432_s27  ;;  %v4033_v25 = vld [vmem:[#allocation5 + $0x80] sm:$0xff] }
0x489a   :  { %v3802_v33 = vpop.permute.xlu1 %3801 }
0x489b   :  { %v3804_v26 = vadd.f32 %v3802_v33, %v9187_v63 }
0x489d   :  { %8217 = vtanh.f32 %v3804_v26 }
0x48aa   :  { %v8218_v27 = vpop.eup %8217 }
0x48ab   :  { %3808 = vrot.lane.b32.xlu0 %v8218_v27, %s8436_s14 }
0x491d   :  { %v3809_v29 = vpop.permute.xlu0 %3808 }
0x491e   :  { %v3811_v35 = vmul.f32 %v3809_v29, %v3806_v28 }
0x4920   :  { %v3813_v36 = vadd.f32 %v3812_v59, %v3811_v35 }
0x4922   :  { %v3814_v18 = vsel %vm544_vm8, %v3813_v36, %v3710_v20 }
0x4923   :  { %3817 = vrot.lane.b32.xlu1 %v3814_v18, %s8436_s14  ;;  %3815 = vst.msk [vmem:[#allocation3 + $0x10] sm:$0xff] %vm1335_vm9, %v3814_v18 }
0x4995   :  { %v3818_v55 = vpop.permute.xlu1 %3817 }
0x4996   :  { %7755 = vmatmul.mubr.msk.f32.vlgmr.msra.gmra.mxu0 %vm208_vm4, %v3818_v55 }
0x4997   :  { %7765 = vmatpush3.msra.mxu0 %v4036_v23 }
0x4998   :  { %7766 = vmatprep.subr.mxu0 %v4035_v56 }
0x4999   :  { %7767 = vmatpush3.msra.mxu0 %v4035_v56 }
0x499a   :  { %7768 = vmatprep.subr.mxu0 %v4034_v22 }
0x499b   :  { %7769 = vmatpush3.msra.mxu0 %v4034_v22 }
0x499c   :  { %7770 = vmatprep.subr.mxu0 %v4033_v25 }
0x499d   :  { %7771 = vmatpush3.msra.mxu0 %v4033_v25 }
0x499e   :  { %7819 = vmatprep.subr.mxu0 %v8431_v9 }
0x4a56   :  { %v3887_v63 = vpop.f32.mrf.mxu0 }
0x4a57   :  { %v3898_v60 = vadd.f32 %v3887_v63, %v9242_v8  ;;  %v3891_v37 = vadd.f32 %v3887_v63, %v9178_v19 }
0x4a58   :  { %v7756_v0 = vpop.f32.mrf.mxu0 }
0x4a59   :  { %3900 = vrot.lane.b32.xlu0 %v3898_v60, %s8434_s28  ;;  %v7104_v30 = vmul.f32 -1.442695, %v3891_v37  ;;  %v9407_v0 = vld [vmem:[#allocation3 + $0x10] sm:$0xff]  ;;  %v9413_v37 = vld [vmem:[#allocation3 + $0x18] sm:$0xff] }
0x4a5b   :  { %8219 = vpow2.f32 %v7104_v30  ;;  %v9418_v30 = vld [vmem:[#allocation3 + $0x20] sm:$0xff] }
0x4a68   :  { %v8220_v13 = vpop.eup %8219 }
0x4a69   :  { %v3895_v53 = vadd.f32 1.0, %v8220_v13  ;;  %v9423_v13 = vld [vmem:[#allocation3 + $0x28] sm:$0xff] }
0x4a6b   :  { %8221 = vrcp.f32 %v3895_v53  ;;  %v9427_v53 = vld [vmem:[#allocation3 + $0x30] sm:$0xff] }
0x4a78   :  { %v8222_v54 = vpop.eup %8221 }
0x4a79   :  { %v3910_v10 = vsub.f32 1.0, %v8222_v54  ;;  %v3916_v47 = vmul.f32 %v8222_v54, %v3814_v18 }
0x4acb   :  { %v3901_v41 = vpop.permute.xlu0 %3900 }
0x4acc   :  { %v3903_v42 = vmul.f32 %v8222_v54, %v3901_v41  ;;  %v9434_v41 = vld [vmem:[%s10026_s4 + $0x4] ss:$0 sm:$0xff] }
0x4ace   :  { %3905 = vrot.lane.b32.xlu1 %v3903_v42, %s8432_s27 }
0x4b40   :  { %v3906_v43 = vpop.permute.xlu1 %3905 }
0x4b41   :  { %v3908_v44 = vadd.f32 %v3906_v43, %v9178_v19 }
0x4b43   :  { %8223 = vtanh.f32 %v3908_v44 }
0x4b50   :  { %v8224_v46 = vpop.eup %8223 }
0x4b51   :  { %3912 = vrot.lane.b32.xlu0 %v8224_v46, %s8436_s14 }
0x4bc3   :  { %v3913_v31 = vpop.permute.xlu0 %3912 }
0x4bc4   :  { %v3915_v48 = vmul.f32 %v3913_v31, %v3910_v10 }
0x4bc6   :  { %v3917_v17 = vadd.f32 %v3916_v47, %v3915_v48 }
0x4bc8   :  { %v9349_v24 = vsel %vm433_vm6, %v3917_v17, %v3814_v18 }
0x4bc9   :  { %3921 = vrot.lane.b32.xlu1 %v9349_v24, %s8436_s14  ;;  %3919 = vst.msk [vmem:[#allocation3 + $0x8] sm:$0xff] %vm1335_vm9, %v9349_v24 }
0x4bd0   :  { %v9403_v60 = vld [vmem:[#allocation3 + $0x8] sm:$0xff] }
0x4c3b   :  { %v3922_v19 = vpop.permute.xlu1 %3921 }
0x4c3c   :  { %7762 = vmatmul.mubr.msk.f32.vlgmr.msra.gmra.mxu1 %vm208_vm4, %v3922_v19 }
0x4c3d   :  { %7788 = vmatprep.mubr.msk.f32.mxu1 %vm8433_vm1, %v8431_v9  ;;  %7785 = vmatpush3.msra.mxu1 %v9365_v38 }
0x4c3e   :  { %7786 = vmatprep.subr.mxu1 %v8431_v9 }
0x4cfc   :  { %v3991_v2 = vpop.f32.mrf.mxu1 }
0x4cfd   :  { %v4002_v51 = vadd.f32 %v3991_v2, %v9242_v8  ;;  %v3995_v58 = vadd.f32 %v3991_v2, %v9181_v5  ;;  %v9370_v8 = vld [vmem:[%s10025_s3 + $0x40] sm:$0xff] }
0x4cfe   :  { %v7763_v6 = vpop.f32.mrf.mxu1  ;;  %7787 = vmatpush3.msra.mxu1 %v9370_v8 }
0x4cff   :  { %4004 = vrot.lane.b32.xlu0 %v4002_v51, %s8434_s28  ;;  %v7106_v4 = vmul.f32 -1.442695, %v3995_v58  ;;  %7789 = vmatmul.mubr.f32.vlgmr.msra.gmra.mxu1 %v8431_v9 }
0x4d00   :  { %7791 = vmatprep.subr.mxu1 %v8431_v9  ;;  %7795 = vmatprep.mubr.msk.f32.mxu1 %vm8433_vm1, %v8431_v9 }
0x4d01   :  { %8225 = vpow2.f32 %v7106_v4  ;;  %7792 = vmatpush3.msra.mxu1 %v9365_v38 }
0x4d02   :  { %7793 = vmatprep.subr.mxu1 %v8431_v9 }
0x4d03   :  { %7794 = vmatpush3.msra.mxu1 %v9370_v8 }
0x4d04   :  { %7798 = vmatprep.subr.mxu1 %v8431_v9 }
0x4d0e   :  { %v8226_v12 = vpop.eup %8225 }
0x4d0f   :  { %v3999_v20 = vadd.f32 1.0, %v8226_v12 }
0x4d11   :  { %8227 = vrcp.f32 %v3999_v20 }
0x4d1e   :  { %v8228_v7 = vpop.eup %8227 }
0x4d1f   :  { %v4014_v29 = vsub.f32 1.0, %v8228_v7  ;;  %v4020_v35 = vmul.f32 %v8228_v7, %v9349_v24 }
0x4d71   :  { %v4005_v11 = vpop.permute.xlu0 %4004 }
0x4d72   :  { %v4007_v62 = vmul.f32 %v8228_v7, %v4005_v11 }
0x4d74   :  { %4009 = vrot.lane.b32.xlu1 %v4007_v62, %s8432_s27 }
0x4d78   :  { %4261 = vrot.lane.b32.xlu1 %v7121_v57, %s8432_s27 }
0x4de6   :  { %v4010_v3 = vpop.permute.xlu1 %4009 }
0x4de7   :  { %v4012_v52 = vadd.f32 %v4010_v3, %v9181_v5  ;;  %v4245_v5 = vpop.f32.mrf.mxu1 }
0x4de9   :  { %8229 = vtanh.f32 %v4012_v52  ;;  %v7790_v26 = vpop.f32.mrf.mxu1 }
0x4dea   :  { %v9390_v27 = vpop.permute.xlu1 %4261 }
0x4deb   :  { %v4264_v28 = vadd.f32 %v9390_v27, %v4245_v5 }
0x4df6   :  { %v8230_v33 = vpop.eup %8229 }
0x4df7   :  { %4016 = vrot.lane.b32.xlu0 %v8230_v33, %s8436_s14 }
0x4dfb   :  { %4266 = vrot.lane.b32.xlu0 %v4264_v28, %s8434_s28 }
0x4e69   :  { %v4017_v59 = vpop.permute.xlu0 %4016 }
0x4e6a   :  { %v4019_v36 = vmul.f32 %v4017_v59, %v4014_v29 }
0x4e6c   :  { %v4021_v18 = vadd.f32 %v4020_v35, %v4019_v36 }
0x4e6d   :  { %v4267_v47 = vpop.permute.xlu0 %4266 }
0x4e6e   :  { %v4022_v55 = vsel %vm322_vm3, %v4021_v18, %v9349_v24 }
0x4e6f   :  { %4023 = vst.msk [vmem:[#allocation3] sm:$0xff] %vm1335_vm9, %v4022_v55 }
0x4e76   :  { %v9399_v63 = vld [vmem:[#allocation3] sm:$0xff] }
0x4e77   :  { %7772 = vmatprep.mubr.msk.f32.mxu0 %vm78_vm0, %v9399_v63 }
0x4e78   :  { %7773 = vmatmul.mubr.msk.f32.vlgmr.msra.gmra.mxu0 %vm78_vm0, %v9403_v60 }
0x4e79   :  { %7775 = vmatprep.mubr.msk.f32.mxu0 %vm78_vm0, %v9407_v0  ;;  %7820 = vmatpush3.msra.mxu0 %v9365_v38 }
0x4e7a   :  { %7821 = vmatprep.subr.mxu0 %v8431_v9 }
0x4e7b   :  { %7822 = vmatpush3.msra.mxu0 %v9370_v8 }
0x4e7c   :  { %7776 = vmatmul.mubr.msk.f32.gmra.mxu0 %vm78_vm0, %v9413_v37  ;;  %7833 = vmatprep.subr.mxu0 %v8431_v9 }
0x4e7d   :  { %7778 = vmatprep.mubr.msk.f32.mxu0 %vm78_vm0, %v9418_v30 }
0x4e80   :  { %7779 = vmatmul.mubr.msk.f32.gmra.mxu0 %vm78_vm0, %v9423_v13 }
0x4e81   :  { %7781 = vmatprep.mubr.msk.f32.mxu0 %vm78_vm0, %v9427_v53 }
0x4f38   :  { %v7774_v54 = vpop.f32.mrf.mxu0 }
0x4f39   :  { %v4146_v52 = vadd.f32 %v7774_v54, %v9434_v41 }
0x4f3a   :  { %v4140_v42 = vpop.f32.mrf.mxu0 }
0x4f3b   :  { %v4141_v43 = vadd.f32 %v9434_v41, %v4140_v42 }
0x4f3d   :  { %v4249_v44 = vadd.f32 %v4245_v5, %v4141_v43 }
0x4f3f   :  { %v7120_v46 = vmul.f32 -1.442695, %v4249_v44 }
0x4f41   :  { %8231 = vpow2.f32 %v7120_v46 }
0x4f4e   :  { %v8232_v10 = vpop.eup %8231 }
0x4f4f   :  { %v4253_v31 = vadd.f32 1.0, %v8232_v10  ;;  %v7777_v10 = vpop.f32.mrf.mxu0 }
0x4f51   :  { %8233 = vrcp.f32 %v4253_v31  ;;  %v4150_v31 = vpop.f32.mrf.mxu0 }
0x4f5e   :  { %v8234_v48 = vpop.eup %8233 }
0x4f5f   :  { %v4269_v17 = vmul.f32 %v8234_v48, %v4267_v47  ;;  %v4276_v51 = vsub.f32 1.0, %v8234_v48  ;;  %v4282_v58 = vmul.f32 0.0, %v8234_v48  ;;  %v4151_v47 = vadd.f32 %v9434_v41, %v4150_v31 }
0x4f61   :  { %4271 = vrot.lane.b32.xlu1 %v4269_v17, %s8432_s27 }
0x4fd3   :  { %v4272_v24 = vpop.permute.xlu1 %4271 }
0x4fd4   :  { %v4274_v19 = vadd.f32 %v4272_v24, %v4141_v43 }
0x4fd6   :  { %8235 = vtanh.f32 %v4274_v19 }
0x4fe3   :  { %v8236_v2 = vpop.eup %8235 }
0x4fe4   :  { %4278 = vrot.lane.b32.xlu0 %v8236_v2, %s8436_s14 }
0x5056   :  { %v4279_v6 = vpop.permute.xlu0 %4278 }
0x5057   :  { %v4281_v4 = vmul.f32 %v4279_v6, %v4276_v51 }
0x5059   :  { %v4283_v12 = vadd.f32 %v4282_v58, %v4281_v4 }
0x505b   :  { %v4284_v20 = vsel %vm322_vm3, %v4283_v12, 0.0 }
0x505c   :  { %4286 = vrot.lane.b32.xlu1 %v4284_v20, %s8436_s14 }
0x50ce   :  { %v4287_v7 = vpop.permute.xlu1 %4286 }
0x50cf   :  { %7796 = vmatmul.mubr.msk.f32.vlgmr.msra.gmra.mxu1 %vm208_vm4, %v4287_v7 }
0x50d0   :  { %7799 = vmatpush3.msra.mxu1 %v9365_v38  ;;  %7802 = vmatprep.mubr.msk.f32.mxu1 %vm8433_vm1, %v8431_v9 }
0x50d1   :  { %7800 = vmatprep.subr.mxu1 %v8431_v9 }
0x50d2   :  { %7801 = vmatpush3.msra.mxu1 %v9370_v8 }
0x50d3   :  { %7805 = vmatprep.subr.mxu1 %v8431_v9 }
0x518f   :  { %v4356_v11 = vpop.f32.mrf.mxu1 }
0x5190   :  { %v4367_v62 = vadd.f32 %v4356_v11, %v9390_v27  ;;  %v4360_v23 = vadd.f32 %v4356_v11, %v4146_v52 }
0x5191   :  { %v7797_v3 = vpop.f32.mrf.mxu1 }
0x5192   :  { %4369 = vrot.lane.b32.xlu0 %v4367_v62, %s8434_s28  ;;  %v7123_v56 = vmul.f32 -1.442695, %v4360_v23 }
0x5194   :  { %8237 = vpow2.f32 %v7123_v56 }
0x51a1   :  { %v8238_v57 = vpop.eup %8237 }
0x51a2   :  { %v4364_v22 = vadd.f32 1.0, %v8238_v57 }
0x51a4   :  { %8239 = vrcp.f32 %v4364_v22 }
0x51b1   :  { %v8240_v25 = vpop.eup %8239 }
0x51b2   :  { %v4379_v59 = vsub.f32 1.0, %v8240_v25  ;;  %v4385_v36 = vmul.f32 %v8240_v25, %v4284_v20 }
0x5204   :  { %v4370_v33 = vpop.permute.xlu0 %4369 }
0x5205   :  { %v4372_v5 = vmul.f32 %v8240_v25, %v4370_v33  ;;  %v4156_v25 = vadd.f32 %v7777_v10, %v9434_v41 }
0x5207   :  { %4374 = vrot.lane.b32.xlu1 %v4372_v5, %s8432_s27 }
0x5279   :  { %v4375_v26 = vpop.permute.xlu1 %4374 }
0x527a   :  { %v4377_v28 = vadd.f32 %v4375_v26, %v4146_v52 }
0x527c   :  { %8241 = vtanh.f32 %v4377_v28 }
0x5289   :  { %v8242_v29 = vpop.eup %8241 }
0x528a   :  { %4381 = vrot.lane.b32.xlu0 %v8242_v29, %s8436_s14 }
0x52fc   :  { %v4382_v35 = vpop.permute.xlu0 %4381 }
0x52fd   :  { %v4384_v18 = vmul.f32 %v4382_v35, %v4379_v59 }
0x52ff   :  { %v4386_v55 = vadd.f32 %v4385_v36, %v4384_v18 }
0x5301   :  { %v4387_v54 = vsel %vm433_vm6, %v4386_v55, %v4284_v20 }
0x5302   :  { %4389 = vrot.lane.b32.xlu1 %v4387_v54, %s8436_s14 }
0x5374   :  { %v4390_v42 = vpop.permute.xlu1 %4389 }
0x5375   :  { %7803 = vmatmul.mubr.msk.f32.vlgmr.msra.gmra.mxu1 %vm208_vm4, %v4390_v42  ;;  %v8382_v42 = vld [vmem:[%s10026_s4 + $0x2] ss:$0 sm:$0xff] }
0x5376   :  { %7806 = vmatpush3.msra.mxu1 %v9365_v38  ;;  %7809 = vmatprep.mubr.msk.f32.mxu1 %vm8433_vm1, %v8431_v9 }
0x5377   :  { %7807 = vmatprep.subr.mxu1 %v8431_v9 }
0x5378   :  { %7808 = vmatpush3.msra.mxu1 %v9370_v8 }
0x5379   :  { %7812 = vmatprep.subr.mxu1 %v8431_v9 }
0x5435   :  { %v4459_v43 = vpop.f32.mrf.mxu1 }
0x5436   :  { %v4470_v44 = vadd.f32 %v4459_v43, %v9390_v27  ;;  %v4463_v48 = vadd.f32 %v4459_v43, %v4151_v47  ;;  %v2217_v43 = vadd.f32 %v8382_v42, %v9134_v32 }
0x5437   :  { %v7804_v46 = vpop.f32.mrf.mxu1 }
0x5438   :  { %4472 = vrot.lane.b32.xlu0 %v4470_v44, %s8434_s28  ;;  %v7125_v17 = vmul.f32 -1.442695, %v4463_v48  ;;  %v3033_v44 = vadd.f32 %v9240_v16, %v2217_v43 }
0x543a   :  { %8243 = vpow2.f32 %v7125_v17  ;;  %v7077_v46 = vmul.f32 -1.442695, %v3033_v44 }
0x5447   :  { %v8244_v24 = vpop.eup %8243 }
0x5448   :  { %v4467_v19 = vadd.f32 1.0, %v8244_v24 }
0x544a   :  { %8245 = vrcp.f32 %v4467_v19 }
0x5457   :  { %v8246_v2 = vpop.eup %8245 }
0x5458   :  { %v4482_v20 = vsub.f32 1.0, %v8246_v2  ;;  %v4488_v11 = vmul.f32 %v8246_v2, %v4387_v54 }
0x54aa   :  { %v4473_v51 = vpop.permute.xlu0 %4472 }
0x54ab   :  { %v4475_v6 = vmul.f32 %v8246_v2, %v4473_v51 }
0x54ad   :  { %4477 = vrot.lane.b32.xlu1 %v4475_v6, %s8432_s27 }
0x551f   :  { %v4478_v58 = vpop.permute.xlu1 %4477 }
0x5520   :  { %v4480_v4 = vadd.f32 %v4478_v58, %v4151_v47 }
0x5522   :  { %8247 = vtanh.f32 %v4480_v4 }
0x552f   :  { %v8248_v12 = vpop.eup %8247 }
0x5530   :  { %4484 = vrot.lane.b32.xlu0 %v8248_v12, %s8436_s14 }
0x55a2   :  { %v4485_v7 = vpop.permute.xlu0 %4484 }
0x55a3   :  { %v4487_v62 = vmul.f32 %v4485_v7, %v4482_v20 }
0x55a5   :  { %v4489_v3 = vadd.f32 %v4488_v11, %v4487_v62 }
0x55a7   :  { %v4490_v52 = vsel %vm544_vm8, %v4489_v3, %v4387_v54  ;;  %v3040_v54 = vadd.f32 %v9240_v16, %v8987_v49 }
0x55a8   :  { %4492 = vrot.lane.b32.xlu1 %v4490_v52, %s8436_s14 }
0x561a   :  { %v4493_v23 = vpop.permute.xlu1 %4492 }
0x561b   :  { %7810 = vmatmul.mubr.msk.f32.vlgmr.msra.gmra.mxu1 %vm208_vm4, %v4493_v23 }
0x561c   :  { %7813 = vmatpush3.msra.mxu1 %v9365_v38  ;;  %7816 = vmatprep.mubr.msk.f32.mxu1 %vm8433_vm1, %v8431_v9 }
0x561d   :  { %7814 = vmatprep.subr.mxu1 %v8431_v9 }
0x561e   :  { %7815 = vmatpush3.msra.mxu1 %v9370_v8 }
0x561f   :  { %7826 = vmatprep.subr.mxu1 %v8431_v9 }
0x56db   :  { %v4562_v56 = vpop.f32.mrf.mxu1 }
0x56dc   :  { %v4573_v57 = vadd.f32 %v4562_v56, %v9390_v27  ;;  %v4566_v33 = vadd.f32 %v4562_v56, %v4156_v25 }
0x56dd   :  { %v7811_v22 = vpop.f32.mrf.mxu1 }
0x56de   :  { %4575 = vrot.lane.b32.xlu0 %v4573_v57, %s8434_s28  ;;  %v7127_v5 = vmul.f32 -1.442695, %v4566_v33  ;;  %v7780_v22 = vpop.f32.mrf.mxu0 }
0x56e0   :  { %8249 = vpow2.f32 %v7127_v5 }
0x56ed   :  { %v8250_v26 = vpop.eup %8249 }
0x56ee   :  { %v4570_v28 = vadd.f32 1.0, %v8250_v26 }
0x56f0   :  { %8251 = vrcp.f32 %v4570_v28 }
0x56fd   :  { %v8252_v29 = vpop.eup %8251 }
0x56fe   :  { %v4585_v47 = vsub.f32 1.0, %v8252_v29  ;;  %v4591_v17 = vmul.f32 %v8252_v29, %v4490_v52 }
0x5750   :  { %v4576_v59 = vpop.permute.xlu0 %4575 }
0x5751   :  { %v4578_v35 = vmul.f32 %v8252_v29, %v4576_v59 }
0x5753   :  { %4580 = vrot.lane.b32.xlu1 %v4578_v35, %s8432_s27 }
0x57c5   :  { %v4581_v36 = vpop.permute.xlu1 %4580 }
0x57c6   :  { %v4583_v18 = vadd.f32 %v4581_v36, %v4156_v25 }
0x57c8   :  { %8253 = vtanh.f32 %v4583_v18 }
0x57c9   :  { %8255 = vpow2.f32 %v7077_v46 }
0x57d5   :  { %v8254_v55 = vpop.eup %8253 }
0x57d6   :  { %4587 = vrot.lane.b32.xlu0 %v8254_v55, %s8436_s14  ;;  %v8256_v10 = vpop.eup %8255 }
0x57d7   :  { %v3037_v31 = vadd.f32 1.0, %v8256_v10 }
0x57d9   :  { %8257 = vrcp.f32 %v3037_v31 }
0x57da   :  { %3042 = vrot.lane.b32.xlu0 %v3040_v54, %s8434_s28 }
0x57e6   :  { %v8258_v19 = vpop.eup %8257 }
0x57e7   :  { %v3052_v12 = vsub.f32 1.0, %v8258_v19  ;;  %v3058_v7 = vmul.f32 %v8258_v19, %v9221_v39 }
0x5848   :  { %v4588_v48 = vpop.permute.xlu0 %4587 }
0x5849   :  { %v4590_v24 = vmul.f32 %v4588_v48, %v4585_v47 }
0x584b   :  { %v4592_v49 = vadd.f32 %v4591_v17, %v4590_v24 }
0x584c   :  { %v3043_v2 = vpop.permute.xlu0 %3042 }
0x584d   :  { %v3045_v51 = vmul.f32 %v8258_v19, %v3043_v2  ;;  %v4593_v6 = vsel %vm655_vm10, %v4592_v49, %v4490_v52 }
0x584e   :  { %4595 = vrot.lane.b32.xlu1 %v4593_v6, %s8436_s14 }
0x584f   :  { %3047 = vrot.lane.b32.xlu0 %v3045_v51, %s8432_s27 }
0x58c0   :  { %v4596_v32 = vpop.permute.xlu1 %4595 }
0x58c1   :  { %7817 = vmatmul.mubr.msk.f32.vlgmr.msra.gmra.mxu1 %vm208_vm4, %v4596_v32  ;;  %v3048_v16 = vpop.permute.xlu0 %3047 }
0x58c2   :  { %v3050_v58 = vadd.f32 %v3048_v16, %v2217_v43  ;;  %7827 = vmatpush3.msra.mxu1 %v9365_v38  ;;  %7830 = vmatprep.mubr.msk.f32.mxu1 %vm8433_vm1, %v8431_v9 }
0x58c3   :  { %7828 = vmatprep.subr.mxu1 %v8431_v9 }
0x58c4   :  { %8259 = vtanh.f32 %v3050_v58  ;;  %7829 = vmatpush3.msra.mxu1 %v9370_v8 }
0x58d1   :  { %v8260_v4 = vpop.eup %8259 }
0x58d2   :  { %3054 = vrot.lane.b32.xlu0 %v8260_v4, %s8436_s14 }
0x5944   :  { %v3055_v20 = vpop.permute.xlu0 %3054 }
0x5945   :  { %v3057_v11 = vmul.f32 %v3055_v20, %v3052_v12  ;;  %v5010_v12 = vld [vmem:[#allocation5 + $0xb8] sm:$0xff] }
0x5946   :  { %7840 = vmatprep.subr.mxu1 %v5010_v12 }
0x5947   :  { %v3059_v62 = vadd.f32 %v3058_v7, %v3057_v11 }
0x5949   :  { %v3060_v3 = vsel %vm1099_vm7, %v3059_v62, %v9221_v39  ;;  %v4160_v39 = vpop.f32.mrf.mxu0 }
0x594a   :  { %3062 = vrot.lane.b32.xlu0 %v3060_v3, %s8436_s14  ;;  %v4161_v33 = vadd.f32 %v9434_v41, %v4160_v39  ;;  %v5007_v39 = vld [vmem:[#allocation5 + $0xa0] sm:$0xff] }
0x5981   :  { %v4665_v52 = vpop.f32.mrf.mxu1 }
0x5982   :  { %v4676_v23 = vadd.f32 %v4665_v52, %v9390_v27  ;;  %v4669_v5 = vadd.f32 %v4665_v52, %v4161_v33 }
0x5983   :  { %v7818_v56 = vpop.f32.mrf.mxu1 }
0x5984   :  { %4678 = vrot.lane.b32.xlu1 %v4676_v23, %s8434_s28  ;;  %v7129_v26 = vmul.f32 -1.442695, %v4669_v5 }
0x5986   :  { %8261 = vpow2.f32 %v7129_v26 }
0x5993   :  { %v8262_v28 = vpop.eup %8261 }
0x5994   :  { %v4673_v29 = vadd.f32 1.0, %v8262_v28 }
0x5996   :  { %8263 = vrcp.f32 %v4673_v29 }
0x59a3   :  { %v8264_v59 = vpop.eup %8263 }
0x59a4   :  { %v4688_v54 = vsub.f32 1.0, %v8264_v59  ;;  %v4694_v43 = vmul.f32 %v8264_v59, %v4593_v6 }
0x59bc   :  { %v3063_v57 = vpop.permute.xlu0 %3062 }
0x59bd   :  { %3065 = vst.msk [vmem:[#allocation3 + $0x38] sm:$0xff] %vm208_vm4, %v3063_v57  ;;  %v5009_v57 = vld [vmem:[#allocation5 + $0xb0] sm:$0xff] }
0x59be   :  { %3295 = vst.msk [vmem:[#allocation3 + $0x38] sm:$0xff] %vm1335_vm9, %v9251_v50 }
0x59c5   :  { %v9513_v25 = vld [vmem:[#allocation3 + $0x38] sm:$0xff] }
0x59c6   :  { %7782 = vmatmul.mubr.msk.f32.gmra.mxu0 %vm78_vm0, %v9513_v25 }
0x59c7   :  { %7823 = vmatprep.mubr.msk.f32.mxu0 %vm8433_vm1, %v8431_v9 }
0x59f6   :  { %v4679_v50 = vpop.permute.xlu1 %4678 }
0x59f7   :  { %v4681_v35 = vmul.f32 %v8264_v59, %v4679_v50 }
0x59f9   :  { %4683 = vrot.lane.b32.xlu1 %v4681_v35, %s8432_s27 }
0x5a6b   :  { %v4684_v36 = vpop.permute.xlu1 %4683 }
0x5a6c   :  { %v4686_v18 = vadd.f32 %v4684_v36, %v4161_v33 }
0x5a6e   :  { %8265 = vtanh.f32 %v4686_v18 }
0x5a7b   :  { %v8266_v55 = vpop.eup %8265 }
0x5a7c   :  { %4690 = vrot.lane.b32.xlu1 %v8266_v55, %s8436_s14 }
0x5a86   :  { %v9532_v47 = vpop.f32.mrf.mxu0 }
0x5a88   :  { %v9534_v48 = vpop.f32.mrf.mxu0 }
0x5a89   :  { %v4171_v36 = vadd.f32 %v9434_v41, %v9534_v48  ;;  %v9605_v48 = vld [vmem:[%s10025_s3 + $0x50] sm:$0xff] }
0x5aee   :  { %v4691_v42 = vpop.permute.xlu1 %4690 }
0x5aef   :  { %v4693_v44 = vmul.f32 %v4691_v42, %v4688_v54 }
0x5af1   :  { %v4695_v46 = vadd.f32 %v4694_v43, %v4693_v44 }
0x5af3   :  { %v4696_v10 = vsel %vm766_vm12, %v4695_v46, %v4593_v6 }
0x5af4   :  { %4698 = vrot.lane.b32.xlu1 %v4696_v10, %s8436_s14 }
0x5b66   :  { %v4699_v31 = vpop.permute.xlu1 %4698 }
0x5b67   :  { %7824 = vmatmul.mubr.msk.f32.vlgmr.msra.gmra.mxu0 %vm208_vm4, %v4699_v31 }
0x5b68   :  { %7834 = vmatpush3.msra.mxu0 %v9365_v38  ;;  %7837 = vmatprep.mubr.msk.f32.mxu0 %vm8433_vm1, %v8431_v9  ;;  %v4166_v38 = vadd.f32 %v7780_v22, %v9434_v41  ;;  %v5008_v22 = vld [vmem:[#allocation5 + $0xa8] sm:$0xff]  ;;  %v9599_v41 = vld [vmem:[%s10025_s3 + $0x58] sm:$0xff] }
0x5b69   :  { %7835 = vmatprep.subr.mxu0 %v8431_v9 }
0x5b6a   :  { %7836 = vmatpush3.msra.mxu0 %v9370_v8 }
0x5b6b   :  { %7860 = vmatprep.subr.mxu0 %v8431_v9 }
0x5c27   :  { %v4768_v17 = vpop.f32.mrf.mxu0 }
0x5c28   :  { %v4779_v24 = vadd.f32 %v4768_v17, %v9390_v27  ;;  %v4772_v19 = vadd.f32 %v4768_v17, %v4166_v38 }
0x5c29   :  { %v7825_v49 = vpop.f32.mrf.mxu0 }
0x5c2a   :  { %4781 = vrot.lane.b32.xlu0 %v4779_v24, %s8434_s28  ;;  %v7131_v2 = vmul.f32 -1.442695, %v4772_v19  ;;  %v7150_v24 = vld [vmem:[%s10027_s5 + $0x5] ss:$0 sm:$0xff] }
0x5c2c   :  { %8267 = vpow2.f32 %v7131_v2 }
0x5c39   :  { %v8268_v51 = vpop.eup %8267 }
0x5c3a   :  { %v4776_v6 = vadd.f32 1.0, %v8268_v51 }
0x5c3c   :  { %8269 = vrcp.f32 %v4776_v6 }
0x5c49   :  { %v8270_v8 = vpop.eup %8269 }
0x5c4a   :  { %v4791_v7 = vsub.f32 1.0, %v8270_v8  ;;  %v4797_v62 = vmul.f32 %v8270_v8, %v4696_v10 }
0x5c9c   :  { %v4782_v32 = vpop.permute.xlu0 %4781 }
0x5c9d   :  { %v4784_v16 = vmul.f32 %v8270_v8, %v4782_v32 }
0x5c9f   :  { %4786 = vrot.lane.b32.xlu1 %v4784_v16, %s8432_s27 }
0x5d11   :  { %v4787_v58 = vpop.permute.xlu1 %4786 }
0x5d12   :  { %v4789_v4 = vadd.f32 %v4787_v58, %v4166_v38 }
0x5d14   :  { %8271 = vtanh.f32 %v4789_v4 }
0x5d21   :  { %v8272_v20 = vpop.eup %8271 }
0x5d22   :  { %4793 = vrot.lane.b32.xlu0 %v8272_v20, %s8436_s14 }
0x5d94   :  { %v4794_v11 = vpop.permute.xlu0 %4793 }
0x5d95   :  { %v4796_v3 = vmul.f32 %v4794_v11, %v4791_v7 }
0x5d97   :  { %v4798_v52 = vadd.f32 %v4797_v62, %v4796_v3 }
0x5d99   :  { %v9543_v23 = vsel %vm877_vm14, %v4798_v52, %v4696_v10 }
0x5d9a   :  { %4801 = vrot.lane.b32.xlu1 %v9543_v23, %s8436_s14 }
0x5e0c   :  { %v4802_v56 = vpop.permute.xlu1 %4801 }
0x5e0d   :  { %7831 = vmatmul.mubr.msk.f32.vlgmr.msra.gmra.mxu1 %vm208_vm4, %v4802_v56 }
0x5e0e   :  { %7841 = vmatpush3.msra.mxu1 %v5010_v12  ;;  %7848 = vmatprep.mubr.msk.f32.mxu1 %vm78_vm0, %v9399_v63 }
0x5e0f   :  { %7842 = vmatprep.subr.mxu1 %v5009_v57 }
0x5e10   :  { %7843 = vmatpush3.msra.mxu1 %v5009_v57 }
0x5e11   :  { %7844 = vmatprep.subr.mxu1 %v5008_v22 }
0x5e12   :  { %7845 = vmatpush3.msra.mxu1 %v5008_v22 }
0x5e13   :  { %7846 = vmatprep.subr.mxu1 %v5007_v39 }
0x5e14   :  { %7847 = vmatpush3.msra.mxu1 %v5007_v39 }
0x5e15   :  { %7849 = vmatmul.mubr.msk.f32.vlgmr.msra.gmra.mxu1 %vm78_vm0, %v9403_v60  ;;  %7895 = vmatprep.subr.mxu1 %v8431_v9 }
0x5e16   :  { %7851 = vmatprep.mubr.msk.f32.mxu1 %vm78_vm0, %v9407_v0  ;;  %7896 = vmatpush3.msra.mxu1 %v9599_v41 }
0x5e17   :  { %7897 = vmatprep.subr.mxu1 %v8431_v9 }
0x5e18   :  { %7898 = vmatpush3.msra.mxu1 %v9605_v48 }
0x5e19   :  { %7852 = vmatmul.mubr.msk.f32.gmra.mxu1 %vm78_vm0, %v9413_v37  ;;  %v9572_v37 = vld [vmem:[%s10026_s4 + $0x5] ss:$0 sm:$0xff]  ;;  %7909 = vmatprep.subr.mxu1 %v8431_v9 }
0x5e1a   :  { %7854 = vmatprep.mubr.msk.f32.mxu1 %vm78_vm0, %v9418_v30 }
0x5e1d   :  { %7855 = vmatmul.mubr.msk.f32.gmra.mxu1 %vm78_vm0, %v9423_v13 }
0x5e1e   :  { %7857 = vmatprep.mubr.msk.f32.mxu1 %vm78_vm0, %v9427_v53 }
0x5e21   :  { %7858 = vmatmul.mubr.msk.f32.gmra.mxu1 %vm78_vm0, %v9513_v25 }
0x5e22   :  { %7899 = vmatprep.mubr.msk.f32.mxu1 %vm8433_vm1, %v8431_v9 }
0x5ecd   :  { %v4871_v63 = vpop.f32.mrf.mxu1 }
0x5ece   :  { %v4882_v60 = vadd.f32 %v4871_v63, %v9390_v27  ;;  %v4875_v18 = vadd.f32 %v4871_v63, %v4171_v36 }
0x5ecf   :  { %v7832_v0 = vpop.f32.mrf.mxu1 }
0x5ed0   :  { %4884 = vrot.lane.b32.xlu0 %v4882_v60, %s8434_s28  ;;  %v7133_v55 = vmul.f32 -1.442695, %v4875_v18 }
0x5ed2   :  { %8273 = vpow2.f32 %v7133_v55 }
0x5ed5   :  { %v7850_v30 = vpop.f32.mrf.mxu1 }
0x5ed6   :  { %v9575_v13 = vadd.f32 %v7850_v30, %v9572_v37 }
0x5ed7   :  { %v5090_v53 = vpop.f32.mrf.mxu1 }
0x5ed8   :  { %v9578_v25 = vadd.f32 %v9572_v37, %v5090_v53 }
0x5ed9   :  { %v7853_v33 = vpop.f32.mrf.mxu1 }
0x5eda   :  { %v9581_v5 = vadd.f32 %v7853_v33, %v9572_v37 }
0x5edb   :  { %v5100_v26 = vpop.f32.mrf.mxu1 }
0x5edc   :  { %v9584_v28 = vadd.f32 %v9572_v37, %v5100_v26 }
0x5edd   :  { %v7856_v29 = vpop.f32.mrf.mxu1 }
0x5ede   :  { %v9587_v59 = vadd.f32 %v7856_v29, %v9572_v37 }
0x5edf   :  { %v5110_v50 = vpop.f32.mrf.mxu1  ;;  %v8274_v54 = vpop.eup %8273 }
0x5ee0   :  { %v9590_v35 = vadd.f32 %v9572_v37, %v5110_v50  ;;  %v4879_v42 = vadd.f32 1.0, %v8274_v54 }
0x5ee1   :  { %v7859_v7 = vpop.f32.mrf.mxu1 }
0x5ee2   :  { %8275 = vrcp.f32 %v4879_v42  ;;  %v5126_v11 = vadd.f32 %v7859_v7, %v9572_v37 }
0x5ee3   :  { %v5120_v54 = vpop.f32.mrf.mxu1 }
0x5ee4   :  { %v5121_v42 = vadd.f32 %v9572_v37, %v5120_v54 }
0x5eef   :  { %v8276_v43 = vpop.eup %8275 }
0x5ef0   :  { %v4894_v49 = vsub.f32 1.0, %v8276_v43  ;;  %v4900_v19 = vmul.f32 %v8276_v43, %v9543_v23 }
0x5f42   :  { %v4885_v44 = vpop.permute.xlu0 %4884 }
0x5f43   :  { %v4887_v46 = vmul.f32 %v8276_v43, %v4885_v44 }
0x5f45   :  { %4889 = vrot.lane.b32.xlu1 %v4887_v46, %s8432_s27 }
0x5fb7   :  { %v4890_v10 = vpop.permute.xlu1 %4889 }
0x5fb8   :  { %v4892_v31 = vadd.f32 %v4890_v10, %v4171_v36 }
0x5fba   :  { %8277 = vtanh.f32 %v4892_v31 }
0x5fc7   :  { %v8278_v17 = vpop.eup %8277 }
0x5fc8   :  { %4896 = vrot.lane.b32.xlu0 %v8278_v17, %s8436_s14 }
0x5fcc   :  { %5211 = vrot.lane.b32.xlu0 %v7150_v24, %s8432_s27 }
0x603a   :  { %v4897_v38 = vpop.permute.xlu0 %4896 }
0x603b   :  { %v4899_v2 = vmul.f32 %v4897_v38, %v4894_v49 }
0x603d   :  { %v4901_v51 = vadd.f32 %v4900_v19, %v4899_v2 }
0x603e   :  { %v9638_v58 = vpop.permute.xlu0 %5211 }
0x603f   :  { %v9618_v6 = vsel %vm988_vm2, %v4901_v51, %v9543_v23 }
0x6040   :  { %4904 = vrot.lane.b32.xlu1 %v9618_v6, %s8436_s14 }
0x60b2   :  { %v4905_v8 = vpop.permute.xlu1 %4904 }
0x60b3   :  { %7838 = vmatmul.mubr.msk.f32.vlgmr.msra.gmra.mxu0 %vm208_vm4, %v4905_v8 }
0x60b4   :  { %7861 = vmatpush3.msra.mxu0 %v9599_v41  ;;  %7864 = vmatprep.mubr.msk.f32.mxu0 %vm8433_vm1, %v8431_v9 }
0x60b5   :  { %7862 = vmatprep.subr.mxu0 %v8431_v9 }
0x60b6   :  { %7863 = vmatpush3.msra.mxu0 %v9605_v48 }
0x60b7   :  { %7865 = vmatmul.mubr.f32.vlgmr.msra.gmra.mxu0 %v8431_v9  ;;  %7867 = vmatprep.subr.mxu0 %v8431_v9 }
0x60b8   :  { %7868 = vmatpush3.msra.mxu0 %v9599_v41  ;;  %7871 = vmatprep.mubr.msk.f32.mxu0 %vm8433_vm1, %v8431_v9 }
0x60b9   :  { %7869 = vmatprep.subr.mxu0 %v8431_v9 }
0x60ba   :  { %7870 = vmatpush3.msra.mxu0 %v9605_v48 }
0x60bb   :  { %7874 = vmatprep.subr.mxu0 %v8431_v9 }
0x6173   :  { %v9636_v32 = vpop.f32.mrf.mxu0 }
0x6175   :  { %v7839_v16 = vpop.f32.mrf.mxu0 }
0x6177   :  { %v5195_v4 = vpop.f32.mrf.mxu0 }
0x6178   :  { %v5214_v12 = vadd.f32 %v9638_v58, %v5195_v4  ;;  %v5199_v62 = vadd.f32 %v5195_v4, %v5126_v11 }
0x6179   :  { %v7866_v20 = vpop.f32.mrf.mxu0 }
0x617a   :  { %5216 = vrot.lane.b32.xlu1 %v5214_v12, %s8434_s28  ;;  %v7149_v3 = vmul.f32 -1.442695, %v5199_v62 }
0x617c   :  { %8279 = vpow2.f32 %v7149_v3 }
0x6189   :  { %v8280_v52 = vpop.eup %8279 }
0x618a   :  { %v5203_v23 = vadd.f32 1.0, %v8280_v52 }
0x618c   :  { %8281 = vrcp.f32 %v5203_v23 }
0x6199   :  { %v8282_v56 = vpop.eup %8281 }
0x619a   :  { %v5226_v0 = vsub.f32 1.0, %v8282_v56  ;;  %v5232_v53 = vmul.f32 0.0, %v8282_v56 }
0x61ec   :  { %v5217_v57 = vpop.permute.xlu1 %5216 }
0x61ed   :  { %v5219_v22 = vmul.f32 %v8282_v56, %v5217_v57 }
0x61ef   :  { %5221 = vrot.lane.b32.xlu0 %v5219_v22, %s8432_s27 }
0x6261   :  { %v5222_v39 = vpop.permute.xlu0 %5221 }
0x6262   :  { %v5224_v63 = vadd.f32 %v5222_v39, %v5126_v11 }
0x6264   :  { %8283 = vtanh.f32 %v5224_v63 }
0x6271   :  { %v8284_v60 = vpop.eup %8283 }
0x6272   :  { %5228 = vrot.lane.b32.xlu1 %v8284_v60, %s8436_s14 }
0x62e4   :  { %v5229_v30 = vpop.permute.xlu1 %5228 }
0x62e5   :  { %v5231_v33 = vmul.f32 %v5229_v30, %v5226_v0 }
0x62e7   :  { %v5233_v26 = vadd.f32 %v5232_v53, %v5231_v33 }
0x62e9   :  { %v5234_v29 = vsel %vm1099_vm7, %v5233_v26, 0.0 }
0x62ea   :  { %5236 = vrot.lane.b32.xlu0 %v5234_v29, %s8436_s14 }
0x635c   :  { %v5237_v50 = vpop.permute.xlu0 %5236 }
0x635d   :  { %7872 = vmatmul.mubr.msk.f32.vlgmr.msra.gmra.mxu0 %vm208_vm4, %v5237_v50 }
0x635e   :  { %7875 = vmatpush3.msra.mxu0 %v9599_v41  ;;  %7878 = vmatprep.mubr.msk.f32.mxu0 %vm8433_vm1, %v8431_v9 }
0x635f   :  { %7876 = vmatprep.subr.mxu0 %v8431_v9 }
0x6360   :  { %7877 = vmatpush3.msra.mxu0 %v9605_v48 }
0x6361   :  { %7881 = vmatprep.subr.mxu0 %v8431_v9 }
0x641d   :  { %v5306_v36 = vpop.f32.mrf.mxu0 }
0x641e   :  { %v5317_v18 = vadd.f32 %v5306_v36, %v9638_v58  ;;  %v5310_v43 = vadd.f32 %v5306_v36, %v5121_v42 }
0x641f   :  { %v7873_v55 = vpop.f32.mrf.mxu0 }
0x6420   :  { %5319 = vrot.lane.b32.xlu1 %v5317_v18, %s8434_s28  ;;  %v7152_v44 = vmul.f32 -1.442695, %v5310_v43 }
0x6422   :  { %8285 = vpow2.f32 %v7152_v44 }
0x642f   :  { %v8286_v46 = vpop.eup %8285 }
0x6430   :  { %v5314_v10 = vadd.f32 1.0, %v8286_v46 }
0x6432   :  { %8287 = vrcp.f32 %v5314_v10 }
0x643f   :  { %v8288_v31 = vpop.eup %8287 }
0x6440   :  { %v5329_v2 = vsub.f32 1.0, %v8288_v31  ;;  %v5335_v37 = vmul.f32 %v8288_v31, %v5234_v29 }
0x6492   :  { %v5320_v17 = vpop.permute.xlu1 %5319 }
0x6493   :  { %v5322_v24 = vmul.f32 %v8288_v31, %v5320_v17 }
0x6495   :  { %5324 = vrot.lane.b32.xlu0 %v5322_v24, %s8432_s27 }
0x6507   :  { %v5325_v49 = vpop.permute.xlu0 %5324 }
0x6508   :  { %v5327_v38 = vadd.f32 %v5325_v49, %v5121_v42 }
0x650a   :  { %8289 = vtanh.f32 %v5327_v38 }
0x6517   :  { %v8290_v19 = vpop.eup %8289 }
0x6518   :  { %5331 = vrot.lane.b32.xlu1 %v8290_v19, %s8436_s14 }
0x658a   :  { %v5332_v51 = vpop.permute.xlu1 %5331 }
0x658b   :  { %v5334_v8 = vmul.f32 %v5332_v51, %v5329_v2 }
0x658d   :  { %v5336_v16 = vadd.f32 %v5335_v37, %v5334_v8 }
0x658f   :  { %v5337_v4 = vsel %vm988_vm2, %v5336_v16, %v5234_v29 }
0x6590   :  { %5339 = vrot.lane.b32.xlu0 %v5337_v4, %s8436_s14 }
0x6602   :  { %v5340_v12 = vpop.permute.xlu0 %5339 }
0x6603   :  { %7879 = vmatmul.mubr.msk.f32.vlgmr.msra.gmra.mxu0 %vm208_vm4, %v5340_v12 }
0x6604   :  { %7882 = vmatpush3.msra.mxu0 %v9599_v41  ;;  %7885 = vmatprep.mubr.msk.f32.mxu0 %vm8433_vm1, %v8431_v9 }
0x6605   :  { %7883 = vmatprep.subr.mxu0 %v8431_v9 }
0x6606   :  { %7884 = vmatpush3.msra.mxu0 %v9605_v48 }
0x6607   :  { %7888 = vmatprep.subr.mxu0 %v8431_v9 }
0x66c3   :  { %v5409_v20 = vpop.f32.mrf.mxu0 }
0x66c4   :  { %v5420_v61 = vadd.f32 %v5409_v20, %v9638_v58  ;;  %v5413_v11 = vadd.f32 %v5409_v20, %v9587_v59 }
0x66c5   :  { %v7880_v7 = vpop.f32.mrf.mxu0 }
0x66c6   :  { %5422 = vrot.lane.b32.xlu1 %v5420_v61, %s8434_s28  ;;  %v7154_v62 = vmul.f32 -1.442695, %v5413_v11 }
0x66c8   :  { %8291 = vpow2.f32 %v7154_v62 }
0x66d5   :  { %v8292_v3 = vpop.eup %8291 }
0x66d6   :  { %v5417_v52 = vadd.f32 1.0, %v8292_v3 }
0x66d8   :  { %8293 = vrcp.f32 %v5417_v52 }
0x66e5   :  { %v8294_v23 = vpop.eup %8293 }
0x66e6   :  { %v5432_v60 = vsub.f32 1.0, %v8294_v23  ;;  %v5438_v30 = vmul.f32 %v8294_v23, %v5337_v4 }
0x6738   :  { %v5423_v56 = vpop.permute.xlu1 %5422 }
0x6739   :  { %v5425_v57 = vmul.f32 %v8294_v23, %v5423_v56 }
0x673b   :  { %5427 = vrot.lane.b32.xlu0 %v5425_v57, %s8432_s27 }
0x67ad   :  { %v5428_v22 = vpop.permute.xlu0 %5427 }
0x67ae   :  { %v5430_v39 = vadd.f32 %v5428_v22, %v9587_v59 }
0x67b0   :  { %8295 = vtanh.f32 %v5430_v39 }
0x67bd   :  { %v8296_v63 = vpop.eup %8295 }
0x67be   :  { %5434 = vrot.lane.b32.xlu1 %v8296_v63, %s8436_s14 }
0x6830   :  { %v5435_v0 = vpop.permute.xlu1 %5434 }
0x6831   :  { %v5437_v53 = vmul.f32 %v5435_v0, %v5432_v60 }
0x6833   :  { %v5439_v33 = vadd.f32 %v5438_v30, %v5437_v53 }
0x6835   :  { %v5440_v26 = vsel %vm877_vm14, %v5439_v33, %v5337_v4 }
0x6836   :  { %5442 = vrot.lane.b32.xlu0 %v5440_v26, %s8436_s14 }
0x68a8   :  { %v5443_v29 = vpop.permute.xlu0 %5442 }
0x68a9   :  { %7886 = vmatmul.mubr.msk.f32.vlgmr.msra.gmra.mxu0 %vm208_vm4, %v5443_v29 }
0x68aa   :  { %7889 = vmatpush3.msra.mxu0 %v9599_v41  ;;  %7892 = vmatprep.mubr.msk.f32.mxu0 %vm8433_vm1, %v8431_v9 }
0x68ab   :  { %7890 = vmatprep.subr.mxu0 %v8431_v9 }
0x68ac   :  { %7891 = vmatpush3.msra.mxu0 %v9605_v48 }
0x68ad   :  { %7902 = vmatprep.subr.mxu0 %v8431_v9 }
0x6969   :  { %v5512_v59 = vpop.f32.mrf.mxu0 }
0x696a   :  { %v5523_v14 = vadd.f32 %v5512_v59, %v9638_v58  ;;  %v5516_v36 = vadd.f32 %v5512_v59, %v9590_v35 }
0x696b   :  { %v7887_v50 = vpop.f32.mrf.mxu0 }
0x696c   :  { %5525 = vrot.lane.b32.xlu1 %v5523_v14, %s8434_s28  ;;  %v7156_v18 = vmul.f32 -1.442695, %v5516_v36 }
0x696e   :  { %8297 = vpow2.f32 %v7156_v18 }
0x697b   :  { %v8298_v55 = vpop.eup %8297 }
0x697c   :  { %v5520_v54 = vadd.f32 1.0, %v8298_v55 }
0x697e   :  { %8299 = vrcp.f32 %v5520_v54 }
0x698b   :  { %v8300_v42 = vpop.eup %8299 }
0x698c   :  { %v5535_v17 = vsub.f32 1.0, %v8300_v42  ;;  %v5541_v49 = vmul.f32 %v8300_v42, %v5440_v26 }
0x69de   :  { %v5526_v43 = vpop.permute.xlu1 %5525 }
0x69df   :  { %v5528_v44 = vmul.f32 %v8300_v42, %v5526_v43 }
0x69e1   :  { %5530 = vrot.lane.b32.xlu0 %v5528_v44, %s8432_s27 }
0x6a53   :  { %v5531_v46 = vpop.permute.xlu0 %5530 }
0x6a54   :  { %v5533_v10 = vadd.f32 %v5531_v46, %v9590_v35 }
0x6a56   :  { %8301 = vtanh.f32 %v5533_v10 }
0x6a63   :  { %v8302_v31 = vpop.eup %8301 }
0x6a64   :  { %5537 = vrot.lane.b32.xlu1 %v8302_v31, %s8436_s14 }
0x6ad6   :  { %v5538_v24 = vpop.permute.xlu1 %5537 }
0x6ad7   :  { %v5540_v38 = vmul.f32 %v5538_v24, %v5535_v17 }
0x6ad9   :  { %v5542_v19 = vadd.f32 %v5541_v49, %v5540_v38 }
0x6adb   :  { %v5543_v2 = vsel %vm766_vm12, %v5542_v19, %v5440_v26 }
0x6adc   :  { %5545 = vrot.lane.b32.xlu0 %v5543_v2, %s8436_s14 }
0x6b4e   :  { %v5546_v51 = vpop.permute.xlu0 %5545 }
0x6b4f   :  { %7893 = vmatmul.mubr.msk.f32.vlgmr.msra.gmra.mxu0 %vm208_vm4, %v5546_v51 }
0x6b50   :  { %7903 = vmatpush3.msra.mxu0 %v9599_v41  ;;  %7906 = vmatprep.mubr.msk.f32.mxu0 %vm8433_vm1, %v8431_v9 }
0x6b51   :  { %7904 = vmatprep.subr.mxu0 %v8431_v9 }
0x6b52   :  { %7905 = vmatpush3.msra.mxu0 %v9605_v48 }
0x6b53   :  { %7916 = vmatprep.subr.mxu0 %v8431_v9 }
0x6c0f   :  { %v5615_v35 = vpop.f32.mrf.mxu0 }
0x6c10   :  { %v5626_v15 = vadd.f32 %v5615_v35, %v9638_v58  ;;  %v5619_v8 = vadd.f32 %v5615_v35, %v9581_v5  ;;  %v4985_v35 = vadd.f32 %v9636_v32, %v9390_v27 }
0x6c11   :  { %v7894_v37 = vpop.f32.mrf.mxu0 }
0x6c12   :  { %5628 = vrot.lane.b32.xlu1 %v5626_v15, %s8434_s28  ;;  %v7158_v16 = vmul.f32 -1.442695, %v5619_v8  ;;  %v8383_v15 = vld [vmem:[%s10026_s4 + $0x4] ss:$0 sm:$0xff] }
0x6c13   :  { %v4176_v37 = vadd.f32 %v8383_v15, %v9532_v47 }
0x6c14   :  { %8303 = vpow2.f32 %v7158_v16 }
0x6c15   :  { %v4978_v8 = vadd.f32 %v9636_v32, %v4176_v37 }
0x6c17   :  { %v7135_v16 = vmul.f32 -1.442695, %v4978_v8 }
0x6c21   :  { %v8304_v4 = vpop.eup %8303 }
0x6c22   :  { %v5623_v12 = vadd.f32 1.0, %v8304_v4 }
0x6c24   :  { %8305 = vrcp.f32 %v5623_v12 }
0x6c31   :  { %v8306_v20 = vpop.eup %8305 }
0x6c32   :  { %v5638_v52 = vsub.f32 1.0, %v8306_v20  ;;  %v5644_v56 = vmul.f32 %v8306_v20, %v5543_v2 }
0x6c84   :  { %v5629_v61 = vpop.permute.xlu1 %5628 }
0x6c85   :  { %v5631_v7 = vmul.f32 %v8306_v20, %v5629_v61 }
0x6c87   :  { %5633 = vrot.lane.b32.xlu0 %v5631_v7, %s8432_s27 }
0x6cf9   :  { %v5634_v11 = vpop.permute.xlu0 %5633 }
0x6cfa   :  { %v5636_v62 = vadd.f32 %v5634_v11, %v9581_v5 }
0x6cfc   :  { %8307 = vtanh.f32 %v5636_v62 }
0x6d09   :  { %v8308_v3 = vpop.eup %8307 }
0x6d0a   :  { %5640 = vrot.lane.b32.xlu1 %v8308_v3, %s8436_s14 }
0x6d7c   :  { %v5641_v23 = vpop.permute.xlu1 %5640 }
0x6d7d   :  { %v5643_v57 = vmul.f32 %v5641_v23, %v5638_v52 }
0x6d7f   :  { %v5645_v22 = vadd.f32 %v5644_v56, %v5643_v57 }
0x6d81   :  { %v5646_v39 = vsel %vm655_vm10, %v5645_v22, %v5543_v2 }
0x6d82   :  { %5648 = vrot.lane.b32.xlu0 %v5646_v39, %s8436_s14 }
0x6df4   :  { %v5649_v63 = vpop.permute.xlu0 %5648 }
0x6df5   :  { %7900 = vmatmul.mubr.msk.f32.vlgmr.msra.gmra.mxu1 %vm208_vm4, %v5649_v63 }
0x6df6   :  { %7910 = vmatpush3.msra.mxu1 %v9599_v41  ;;  %7913 = vmatprep.mubr.msk.f32.mxu1 %vm8433_vm1, %v8431_v9 }
0x6df7   :  { %7911 = vmatprep.subr.mxu1 %v8431_v9 }
0x6df8   :  { %7912 = vmatpush3.msra.mxu1 %v9605_v48 }
0x6df9   :  { %7927 = vmatprep.subr.mxu1 %v8431_v9 }
0x6eb5   :  { %v5718_v5 = vpop.f32.mrf.mxu1 }
0x6eb6   :  { %v5729_v21 = vadd.f32 %v5718_v5, %v9638_v58  ;;  %v5722_v0 = vadd.f32 %v5718_v5, %v9584_v28 }
0x6eb7   :  { %v7901_v60 = vpop.f32.mrf.mxu1 }
0x6eb8   :  { %5731 = vrot.lane.b32.xlu1 %v5729_v21, %s8434_s28  ;;  %v7160_v30 = vmul.f32 -1.442695, %v5722_v0 }
0x6eba   :  { %8309 = vpow2.f32 %v7160_v30 }
0x6ec7   :  { %v8310_v41 = vpop.eup %8309 }
0x6ec8   :  { %v5726_v53 = vadd.f32 1.0, %v8310_v41 }
0x6eca   :  { %8311 = vrcp.f32 %v5726_v53 }
0x6ed7   :  { %v8312_v33 = vpop.eup %8311 }
0x6ed8   :  { %v5741_v50 = vsub.f32 1.0, %v8312_v33  ;;  %v5747_v18 = vmul.f32 %v8312_v33, %v5646_v39 }
0x6f2a   :  { %v5732_v26 = vpop.permute.xlu1 %5731 }
0x6f2b   :  { %v5734_v29 = vmul.f32 %v8312_v33, %v5732_v26 }
0x6f2d   :  { %5736 = vrot.lane.b32.xlu0 %v5734_v29, %s8432_s27 }
0x6f9f   :  { %v5737_v48 = vpop.permute.xlu0 %5736 }
0x6fa0   :  { %v5739_v59 = vadd.f32 %v5737_v48, %v9584_v28 }
0x6fa2   :  { %8313 = vtanh.f32 %v5739_v59  ;;  %v9769_v59 = vld [vmem:[%s10028_s6 + $0x18] sm:$0xff] }
0x6faf   :  { %v8314_v14 = vpop.eup %8313 }
0x6fb0   :  { %5743 = vrot.lane.b32.xlu1 %v8314_v14, %s8436_s14  ;;  %v9774_v14 = vld [vmem:[%s10028_s6 + $0x10] sm:$0xff] }
0x7022   :  { %v5744_v36 = vpop.permute.xlu1 %5743 }
0x7023   :  { %v5746_v55 = vmul.f32 %v5744_v36, %v5741_v50  ;;  %v9791_v50 = vld [vmem:[%s10028_s6] sm:$0xff] }
0x7025   :  { %v5748_v54 = vadd.f32 %v5747_v18, %v5746_v55  ;;  %v7168_v18 = vld [vmem:[%s10030_s8] ss:$0 sm:$0xff] }
0x7027   :  { %v5749_v42 = vsel %vm544_vm8, %v5748_v54, %v5646_v39 }
0x7028   :  { %5751 = vrot.lane.b32.xlu0 %v5749_v42, %s8436_s14 }
0x709a   :  { %v5752_v43 = vpop.permute.xlu0 %5751 }
0x709b   :  { %7907 = vmatmul.mubr.msk.f32.vlgmr.msra.gmra.mxu0 %vm208_vm4, %v5752_v43 }
0x709c   :  { %7924 = vmatprep.mubr.msk.f32.mxu0 %vm8433_vm1, %v8431_v9  ;;  %7917 = vmatpush3.msra.mxu0 %v9769_v59 }
0x709d   :  { %7918 = vmatprep.subr.mxu0 %v8431_v9 }
0x709e   :  { %7919 = vmatpush3.msra.mxu0 %v9774_v14 }
0x709f   :  { %7920 = vmatprep.subr.mxu0 %v8431_v9 }
0x715b   :  { %v5821_v28 = vpop.f32.mrf.mxu0 }
0x715c   :  { %v5832_v44 = vadd.f32 %v5821_v28, %v9638_v58  ;;  %v5825_v10 = vadd.f32 %v5821_v28, %v9575_v13 }
0x715d   :  { %v7908_v46 = vpop.f32.mrf.mxu0 }
0x715e   :  { %5834 = vrot.lane.b32.xlu1 %v5832_v44, %s8434_s28  ;;  %v7162_v31 = vmul.f32 -1.442695, %v5825_v10 }
0x7160   :  { %8315 = vpow2.f32 %v7162_v31 }
0x716d   :  { %v8316_v45 = vpop.eup %8315 }
0x716e   :  { %v5829_v17 = vadd.f32 1.0, %v8316_v45 }
0x7170   :  { %8317 = vrcp.f32 %v5829_v17  ;;  %v9830_v17 = vld [vmem:[%s10029_s7] ss:$0 sm:$0xff] }
0x717d   :  { %v8318_v24 = vpop.eup %8317 }
0x717e   :  { %v5844_v12 = vsub.f32 1.0, %v8318_v24  ;;  %v5850_v61 = vmul.f32 %v8318_v24, %v5749_v42 }
0x71d0   :  { %v5835_v49 = vpop.permute.xlu1 %5834 }
0x71d1   :  { %v5837_v38 = vmul.f32 %v8318_v24, %v5835_v49 }
0x71d3   :  { %5839 = vrot.lane.b32.xlu0 %v5837_v38, %s8432_s27 }
0x7245   :  { %v5840_v19 = vpop.permute.xlu0 %5839 }
0x7246   :  { %v5842_v2 = vadd.f32 %v5840_v19, %v9575_v13 }
0x7248   :  { %8319 = vtanh.f32 %v5842_v2 }
0x7249   :  { %8321 = vpow2.f32 %v7135_v16 }
0x7255   :  { %v8320_v51 = vpop.eup %8319 }
0x7256   :  { %5846 = vrot.lane.b32.xlu1 %v8320_v51, %s8436_s14  ;;  %v8322_v13 = vpop.eup %8321 }
0x7257   :  { %v4982_v4 = vadd.f32 1.0, %v8322_v13 }
0x7259   :  { %8323 = vrcp.f32 %v4982_v4 }
0x725a   :  { %4987 = vrot.lane.b32.xlu1 %v4985_v35, %s8434_s28 }
0x7266   :  { %v8324_v11 = vpop.eup %8323 }
0x7267   :  { %v4997_v1 = vsub.f32 1.0, %v8324_v11  ;;  %v5003_v22 = vmul.f32 %v8324_v11, %v9618_v6 }
0x72c8   :  { %v5847_v20 = vpop.permute.xlu1 %5846 }
0x72c9   :  { %v5849_v7 = vmul.f32 %v5847_v20, %v5844_v12 }
0x72cb   :  { %v5851_v27 = vadd.f32 %v5850_v61, %v5849_v7 }
0x72cc   :  { %v4988_v62 = vpop.permute.xlu1 %4987 }
0x72cd   :  { %v4990_v3 = vmul.f32 %v8324_v11, %v4988_v62  ;;  %v9746_v52 = vsel %vm433_vm6, %v5851_v27, %v5749_v42 }
0x72ce   :  { %5854 = vrot.lane.b32.xlu0 %v9746_v52, %s8436_s14 }
0x72cf   :  { %4992 = vrot.lane.b32.xlu1 %v4990_v3, %s8432_s27 }
0x7340   :  { %v5855_v47 = vpop.permute.xlu0 %5854 }
0x7341   :  { %7914 = vmatmul.mubr.msk.f32.vlgmr.msra.gmra.mxu1 %vm208_vm4, %v5855_v47  ;;  %v4993_v32 = vpop.permute.xlu1 %4992 }
0x7342   :  { %v4995_v23 = vadd.f32 %v4993_v32, %v4176_v37  ;;  %7935 = vmatprep.mubr.msk.f32.mxu1 %vm8433_vm1, %v8431_v9  ;;  %7928 = vmatpush3.msra.mxu1 %v9769_v59 }
0x7343   :  { %7929 = vmatprep.subr.mxu1 %v8431_v9 }
0x7344   :  { %8325 = vtanh.f32 %v4995_v23  ;;  %7930 = vmatpush3.msra.mxu1 %v9774_v14 }
0x7345   :  { %7931 = vmatprep.subr.mxu1 %v8431_v9 }
0x7351   :  { %v8326_v56 = vpop.eup %8325 }
0x7352   :  { %4999 = vrot.lane.b32.xlu1 %v8326_v56, %s8436_s14 }
0x73c4   :  { %v5000_v57 = vpop.permute.xlu1 %4999 }
0x73c5   :  { %v5002_v39 = vmul.f32 %v5000_v57, %v4997_v1 }
0x73c7   :  { %v5004_v63 = vadd.f32 %v5003_v22, %v5002_v39 }
0x73c9   :  { %v5005_v5 = vsel %vm1099_vm7, %v5004_v63, %v9618_v6 }
0x73ca   :  { %5957 = vrot.lane.b32.xlu1 %v5005_v5, %s8436_s14 }
0x7401   :  { %v5924_v21 = vpop.f32.mrf.mxu1 }
0x7402   :  { %v5935_v60 = vadd.f32 %v5924_v21, %v9638_v58  ;;  %v5928_v41 = vadd.f32 %v5924_v21, %v9578_v25 }
0x7403   :  { %v7915_v0 = vpop.f32.mrf.mxu1 }
0x7404   :  { %5937 = vrot.lane.b32.xlu0 %v5935_v60, %s8434_s28  ;;  %v7164_v53 = vmul.f32 -1.442695, %v5928_v41 }
0x7406   :  { %8327 = vpow2.f32 %v7164_v53 }
0x7413   :  { %v8328_v33 = vpop.eup %8327 }
0x7414   :  { %v5932_v26 = vadd.f32 1.0, %v8328_v33 }
0x7416   :  { %8329 = vrcp.f32 %v5932_v26 }
0x7423   :  { %v8330_v34 = vpop.eup %8329 }
0x7424   :  { %v5947_v55 = vsub.f32 1.0, %v8330_v34  ;;  %v5953_v42 = vmul.f32 %v8330_v34, %v9746_v52 }
0x743c   :  { %v5958_v30 = vpop.permute.xlu1 %5957 }
0x743d   :  { %5960 = vst.msk [vmem:[#allocation8] sm:$0xff] %vm208_vm4, %v5958_v30 }
0x7476   :  { %v5938_v6 = vpop.permute.xlu0 %5937 }
0x7477   :  { %v5940_v29 = vmul.f32 %v8330_v34, %v5938_v6 }
0x7479   :  { %5942 = vrot.lane.b32.xlu0 %v5940_v29, %s8432_s27 }
0x74eb   :  { %v5943_v48 = vpop.permute.xlu0 %5942 }
0x74ec   :  { %v5945_v58 = vadd.f32 %v5943_v48, %v9578_v25  ;;  %v9782_v25 = vld [vmem:[%s10028_s6 + $0x8] sm:$0xff]  ;;  %s6982_s6 = sshll.u32 %s8438_s1, 4  ;;  %s6983_s6 = int_to_ptr.vmem [resolvable:$true] %s6982_s6 }
0x74ed   :  { %7921 = vmatpush3.msra.mxu0 %v9782_v25  ;;  %7932 = vmatpush3.msra.mxu1 %v9782_v25  ;;  %s8404_s15 = scalar_lea.vmem %s6983_s6, 128  ;;  %p8409_p6 = scmp.lt.s32.totalorder %s6983_s6, %s6983_s6 }
0x74ee   :  { %8331 = vtanh.f32 %v5945_v58  ;;  %7922 = vmatprep.subr.mxu0 %v8431_v9  ;;  %7933 = vmatprep.subr.mxu1 %v8431_v9  ;;  %p8405_p5 = scmp.ne.s32.totalorder %s6983_s6, %s8404_s15  ;;  %p8410_p7 = scmp.lt.s32.totalorder %s8404_s15, %s8404_s15 }
0x74ef   :  { %7923 = vmatpush3.msra.mxu0 %v9791_v50  ;;  %7934 = vmatpush3.msra.mxu1 %v9791_v50 }
0x74f0   :  { %7938 = vmatprep.subr.mxu0 %v8431_v9  ;;  %7949 = vmatprep.subr.mxu1 %v8431_v9  ;;  %p8411_p8 = por %p8410_p7, %p8409_p6 }
0x74f2   :  { %p8412_p9 = pnand %p8411_p8, %p8405_p5 }
0x74fb   :  { %v8332_v36 = vpop.eup %8331 }
0x74fc   :  { %5949 = vrot.lane.b32.xlu0 %v8332_v36, %s8436_s14 }
0x7500   :  { %6060 = vrot.lane.b32.xlu0 %v7168_v18, %s8437_s16 }
0x756e   :  { %v5950_v54 = vpop.permute.xlu0 %5949 }
0x756f   :  { %v5952_v43 = vmul.f32 %v5950_v54, %v5947_v55 }
0x7571   :  { %v5954_v28 = vadd.f32 %v5953_v42, %v5952_v43 }
0x7572   :  { %v9823_v40 = vpop.permute.xlu0 %6060 }
0x7573   :  { %v5955_v44 = vsel %vm322_vm3, %v5954_v28, %v9746_v52 }
0x7574   :  { %5961 = vst.msk [vmem:[#allocation8] sm:$0xff] %vm1335_vm9, %v5955_v44 }
0x757b   :  { %v5968_v46 = vld [vmem:[#allocation8] sm:$0xff] }
0x757c   :  { %7925 = vmatmul.mubr.msk.f32.vlgmr.msra.gmra.mxu0 %vm78_vm0, %v5968_v46 }
0x757d   :  { %7939 = vmatpush3.msra.mxu0 %v9769_v59  ;;  %7946 = vmatprep.mubr.msk.f32.mxu0 %vm8433_vm1, %v8431_v9 }
0x757e   :  { %7940 = vmatprep.subr.mxu0 %v8431_v9 }
0x757f   :  { %7941 = vmatpush3.msra.mxu0 %v9774_v14 }
0x7580   :  { %7942 = vmatprep.subr.mxu0 %v8431_v9 }
0x7581   :  { %7943 = vmatpush3.msra.mxu0 %v9782_v25 }
0x7582   :  { %7944 = vmatprep.subr.mxu0 %v8431_v9 }
0x7583   :  { %7945 = vmatpush3.msra.mxu0 %v9791_v50 }
0x7584   :  { %7960 = vmatprep.subr.mxu0 %v8431_v9 }
0x763c   :  { %v6038_v10 = vpop.f32.mrf.mxu0 }
0x763d   :  { %v6063_v31 = vadd.f32 %v9823_v40, %v6038_v10  ;;  %v6048_v24 = vadd.f32 %v9830_v17, %v6038_v10 }
0x763e   :  { %v7926_v45 = vpop.f32.mrf.mxu0 }
0x763f   :  { %6065 = vrot.lane.b32.xlu1 %v6063_v31, %s8437_s16  ;;  %v7167_v49 = vmul.f32 -1.442695, %v6048_v24 }
0x7641   :  { %8333 = vpow2.f32 %v7167_v49 }
0x764e   :  { %v8334_v38 = vpop.eup %8333 }
0x764f   :  { %v6052_v19 = vadd.f32 1.0, %v8334_v38 }
0x7651   :  { %8335 = vrcp.f32 %v6052_v19 }
0x765e   :  { %v8336_v2 = vpop.eup %8335 }
0x765f   :  { %v6075_v13 = vsub.f32 1.0, %v8336_v2 }
0x76b1   :  { %v6066_v51 = vpop.permute.xlu1 %6065 }
0x76b2   :  { %v6068_v35 = vmul.f32 %v8336_v2, %v6066_v51 }
0x76b4   :  { %6070 = vrot.lane.b32.xlu0 %v6068_v35, %s8437_s16 }
0x76b8   :  { %6081 = vrot.lane.b32.xlu0 %v5968_v46, %s8432_s27 }
0x7726   :  { %v6071_v15 = vpop.permute.xlu0 %6070 }
0x7727   :  { %v6073_v37 = vadd.f32 %v9830_v17, %v6071_v15 }
0x7729   :  { %8337 = vtanh.f32 %v6073_v37 }
0x772a   :  { %v6082_v16 = vpop.permute.xlu0 %6081 }
0x772b   :  { %v6084_v12 = vmul.f32 %v8336_v2, %v6082_v16 }
0x7736   :  { %v8338_v8 = vpop.eup %8337 }
0x7737   :  { %6077 = vrot.lane.b32.xlu1 %v8338_v8, %s8434_s28 }
0x77a9   :  { %v6078_v4 = vpop.permute.xlu1 %6077 }
0x77aa   :  { %v6080_v20 = vmul.f32 %v6078_v4, %v6075_v13 }
0x77ac   :  { %v6085_v61 = vadd.f32 %v6084_v12, %v6080_v20 }
0x77ae   :  { %6087 = vrot.lane.b32.xlu1 %v6085_v61, %s8434_s28 }
0x7820   :  { %v6088_v7 = vpop.permute.xlu1 %6087 }
0x7821   :  { %6090 = vst.msk [vmem:[#allocation4] sm:$0xff] %vm78_vm0, %v6088_v7  ;;  %7936 = vmatmul.mubr.msk.f32.vlgmr.msra.gmra.mxu1 %vm78_vm0, %v6088_v7 }
0x7822   :  { %7950 = vmatpush3.msra.mxu1 %v9769_v59  ;;  %7957 = vmatprep.mubr.msk.f32.mxu1 %vm8433_vm1, %v8431_v9 }
0x7823   :  { %7951 = vmatprep.subr.mxu1 %v8431_v9 }
0x7824   :  { %7952 = vmatpush3.msra.mxu1 %v9774_v14 }
0x7825   :  { %7953 = vmatprep.subr.mxu1 %v8431_v9 }
0x7826   :  { %7954 = vmatpush3.msra.mxu1 %v9782_v25 }
0x7827   :  { %7955 = vmatprep.subr.mxu1 %v8431_v9 }
0x7828   :  { %7956 = vmatpush3.msra.mxu1 %v9791_v50 }
0x7829   :  { %7971 = vmatprep.subr.mxu1 %v8431_v9 }
0x78e1   :  { %v6159_v27 = vpop.f32.mrf.mxu1 }
0x78e2   :  { %v6170_v11 = vadd.f32 %v6159_v27, %v9823_v40  ;;  %v6163_v3 = vadd.f32 %v9830_v17, %v6159_v27 }
0x78e3   :  { %v7937_v62 = vpop.f32.mrf.mxu1 }
0x78e4   :  { %6172 = vrot.lane.b32.xlu0 %v6170_v11, %s8437_s16  ;;  %v7170_v52 = vmul.f32 -1.442695, %v6163_v3 }
0x78e6   :  { %8339 = vpow2.f32 %v7170_v52 }
0x78f3   :  { %v8340_v47 = vpop.eup %8339 }
0x78f4   :  { %v6167_v32 = vadd.f32 1.0, %v8340_v47 }
0x78f6   :  { %8341 = vrcp.f32 %v6167_v32 }
0x7903   :  { %v8342_v23 = vpop.eup %8341 }
0x7904   :  { %v6182_v63 = vsub.f32 1.0, %v8342_v23  ;;  %v6188_v21 = vmul.f32 %v8342_v23, %v6085_v61 }
0x7956   :  { %v6173_v56 = vpop.permute.xlu0 %6172 }
0x7957   :  { %v6175_v1 = vmul.f32 %v8342_v23, %v6173_v56 }
0x7959   :  { %6177 = vrot.lane.b32.xlu1 %v6175_v1, %s8437_s16 }
0x79cb   :  { %v6178_v57 = vpop.permute.xlu1 %6177 }
0x79cc   :  { %v6180_v22 = vadd.f32 %v9830_v17, %v6178_v57 }
0x79ce   :  { %8343 = vtanh.f32 %v6180_v22 }
0x79db   :  { %v8344_v39 = vpop.eup %8343 }
0x79dc   :  { %6184 = vrot.lane.b32.xlu0 %v8344_v39, %s8434_s28 }
0x7a4e   :  { %v6185_v5 = vpop.permute.xlu0 %6184 }
0x7a4f   :  { %v6187_v60 = vmul.f32 %v6185_v5, %v6182_v63 }
0x7a51   :  { %v6189_v0 = vadd.f32 %v6188_v21, %v6187_v60 }
0x7a53   :  { %6191 = vrot.lane.b32.xlu1 %v6189_v0, %s8434_s28 }
0x7ac5   :  { %v6192_v30 = vpop.permute.xlu1 %6191 }
0x7ac6   :  { %6194 = vst.msk [vmem:[#allocation4 + $0x8] sm:$0xff] %vm78_vm0, %v6192_v30  ;;  %7947 = vmatmul.mubr.msk.f32.vlgmr.msra.gmra.mxu0 %vm78_vm0, %v6192_v30 }
0x7ac7   :  { %7961 = vmatpush3.msra.mxu0 %v9769_v59  ;;  %7968 = vmatprep.mubr.msk.f32.mxu0 %vm8433_vm1, %v8431_v9 }
0x7ac8   :  { %7962 = vmatprep.subr.mxu0 %v8431_v9 }
0x7ac9   :  { %7963 = vmatpush3.msra.mxu0 %v9774_v14 }
0x7aca   :  { %7964 = vmatprep.subr.mxu0 %v8431_v9 }
0x7acb   :  { %7965 = vmatpush3.msra.mxu0 %v9782_v25 }
0x7acc   :  { %7966 = vmatprep.subr.mxu0 %v8431_v9 }
0x7acd   :  { %7967 = vmatpush3.msra.mxu0 %v9791_v50 }
0x7ace   :  { %7982 = vmatprep.subr.mxu0 %v8431_v9 }
0x7b86   :  { %v6263_v41 = vpop.f32.mrf.mxu0 }
0x7b87   :  { %v6274_v53 = vadd.f32 %v6263_v41, %v9823_v40  ;;  %v6267_v26 = vadd.f32 %v9830_v17, %v6263_v41 }
0x7b88   :  { %v7948_v33 = vpop.f32.mrf.mxu0 }
0x7b89   :  { %6276 = vrot.lane.b32.xlu0 %v6274_v53, %s8437_s16  ;;  %v7172_v34 = vmul.f32 -1.442695, %v6267_v26 }
0x7b8b   :  { %8345 = vpow2.f32 %v7172_v34 }
0x7b98   :  { %v8346_v6 = vpop.eup %8345 }
0x7b99   :  { %v6271_v29 = vadd.f32 1.0, %v8346_v6 }
0x7b9b   :  { %8347 = vrcp.f32 %v6271_v29 }
0x7ba8   :  { %v8348_v48 = vpop.eup %8347 }
0x7ba9   :  { %v6286_v42 = vsub.f32 1.0, %v8348_v48  ;;  %v6292_v28 = vmul.f32 %v8348_v48, %v6189_v0 }
0x7bfb   :  { %v6277_v58 = vpop.permute.xlu0 %6276 }
0x7bfc   :  { %v6279_v36 = vmul.f32 %v8348_v48, %v6277_v58  ;;  %v6830_v48 = vld [vmem:[%s10031_s9 + $0x18] sm:$0xff] }
0x7bfe   :  { %6281 = vrot.lane.b32.xlu1 %v6279_v36, %s8437_s16 }
0x7c70   :  { %v6282_v18 = vpop.permute.xlu1 %6281 }
0x7c71   :  { %v6284_v55 = vadd.f32 %v9830_v17, %v6282_v18 }
0x7c73   :  { %8349 = vtanh.f32 %v6284_v55 }
0x7c80   :  { %v8350_v54 = vpop.eup %8349 }
0x7c81   :  { %6288 = vrot.lane.b32.xlu0 %v8350_v54, %s8434_s28 }
0x7cf3   :  { %v6289_v43 = vpop.permute.xlu0 %6288 }
0x7cf4   :  { %v6291_v44 = vmul.f32 %v6289_v43, %v6286_v42 }
0x7cf6   :  { %v6293_v46 = vadd.f32 %v6292_v28, %v6291_v44  ;;  %v6829_v28 = vld [vmem:[%s10031_s9 + $0x10] sm:$0xff]  ;;  %v6819_v44 = vld [vmem:[#allocation4] sm:$0xff] }
0x7cf8   :  { %6295 = vrot.lane.b32.xlu1 %v6293_v46, %s8434_s28 }
0x7d6a   :  { %v6296_v10 = vpop.permute.xlu1 %6295 }
0x7d6b   :  { %6298 = vst.msk [vmem:[#allocation4 + $0x10] sm:$0xff] %vm78_vm0, %v6296_v10  ;;  %7958 = vmatmul.mubr.msk.f32.vlgmr.msra.gmra.mxu1 %vm78_vm0, %v6296_v10  ;;  %v6827_v10 = vld [vmem:[%s10031_s9] sm:$0xff] }
0x7d6c   :  { %7972 = vmatpush3.msra.mxu1 %v9769_v59  ;;  %7979 = vmatprep.mubr.msk.f32.mxu1 %vm8433_vm1, %v8431_v9 }
0x7d6d   :  { %7973 = vmatprep.subr.mxu1 %v8431_v9 }
0x7d6e   :  { %7974 = vmatpush3.msra.mxu1 %v9774_v14 }
0x7d6f   :  { %7975 = vmatprep.subr.mxu1 %v8431_v9 }
0x7d70   :  { %7976 = vmatpush3.msra.mxu1 %v9782_v25 }
0x7d71   :  { %7977 = vmatprep.subr.mxu1 %v8431_v9 }
0x7d72   :  { %7978 = vmatpush3.msra.mxu1 %v9791_v50 }
0x7d73   :  { %7993 = vmatprep.subr.mxu1 %v8431_v9 }
0x7e2b   :  { %v6367_v31 = vpop.f32.mrf.mxu1 }
0x7e2c   :  { %v6378_v45 = vadd.f32 %v6367_v31, %v9823_v40  ;;  %v6371_v49 = vadd.f32 %v9830_v17, %v6367_v31  ;;  %v6820_v31 = vld [vmem:[#allocation4 + $0x8] sm:$0xff] }
0x7e2d   :  { %v7959_v24 = vpop.f32.mrf.mxu1 }
0x7e2e   :  { %6380 = vrot.lane.b32.xlu0 %v6378_v45, %s8437_s16  ;;  %v7174_v38 = vmul.f32 -1.442695, %v6371_v49  ;;  %v6821_v45 = vld [vmem:[#allocation4 + $0x10] sm:$0xff] }
0x7e30   :  { %8351 = vpow2.f32 %v7174_v38 }
0x7e3d   :  { %v8352_v19 = vpop.eup %8351 }
0x7e3e   :  { %v6375_v2 = vadd.f32 1.0, %v8352_v19 }
0x7e40   :  { %8353 = vrcp.f32 %v6375_v2 }
0x7e4d   :  { %v8354_v51 = vpop.eup %8353 }
0x7e4e   :  { %v6390_v13 = vsub.f32 1.0, %v8354_v51  ;;  %v6396_v12 = vmul.f32 %v8354_v51, %v6293_v46  ;;  %v6828_v46 = vld [vmem:[%s10031_s9 + $0x8] sm:$0xff] }
0x7ea0   :  { %v6381_v35 = vpop.permute.xlu0 %6380 }
0x7ea1   :  { %v6383_v15 = vmul.f32 %v8354_v51, %v6381_v35  ;;  %v9959_v35 = vld [vmem:[%s10032_s10] ss:$0 sm:$0xff] }
0x7ea3   :  { %6385 = vrot.lane.b32.xlu1 %v6383_v15, %s8437_s16 }
0x7f15   :  { %v6386_v37 = vpop.permute.xlu1 %6385 }
0x7f16   :  { %v6388_v8 = vadd.f32 %v9830_v17, %v6386_v37 }
0x7f18   :  { %8355 = vtanh.f32 %v6388_v8 }
0x7f25   :  { %v8356_v16 = vpop.eup %8355 }
0x7f26   :  { %6392 = vrot.lane.b32.xlu0 %v8356_v16, %s8434_s28 }
0x7f98   :  { %v6393_v4 = vpop.permute.xlu0 %6392 }
0x7f99   :  { %v6395_v20 = vmul.f32 %v6393_v4, %v6390_v13 }
0x7f9b   :  { %v6397_v61 = vadd.f32 %v6396_v12, %v6395_v20 }
0x7f9d   :  { %6399 = vrot.lane.b32.xlu1 %v6397_v61, %s8434_s28 }
0x800f   :  { %v6400_v7 = vpop.permute.xlu1 %6399 }
0x8010   :  { %6402 = vst.msk [vmem:[#allocation4 + $0x18] sm:$0xff] %vm78_vm0, %v6400_v7  ;;  %7969 = vmatmul.mubr.msk.f32.vlgmr.msra.gmra.mxu0 %vm78_vm0, %v6400_v7 }
0x8011   :  { %7983 = vmatpush3.msra.mxu0 %v9769_v59  ;;  %7990 = vmatprep.mubr.msk.f32.mxu0 %vm8433_vm1, %v8431_v9 }
0x8012   :  { %7984 = vmatprep.subr.mxu0 %v8431_v9 }
0x8013   :  { %7985 = vmatpush3.msra.mxu0 %v9774_v14 }
0x8014   :  { %7986 = vmatprep.subr.mxu0 %v8431_v9 }
0x8015   :  { %7987 = vmatpush3.msra.mxu0 %v9782_v25 }
0x8016   :  { %7988 = vmatprep.subr.mxu0 %v8431_v9 }
0x8017   :  { %7989 = vmatpush3.msra.mxu0 %v9791_v50  ;;  %v6822_v24 = vld [vmem:[#allocation4 + $0x18] sm:$0xff] }
0x8018   :  { %8004 = vmatprep.subr.mxu0 %v6830_v48 }
0x80d0   :  { %v6471_v27 = vpop.f32.mrf.mxu0 }
0x80d1   :  { %v6482_v11 = vadd.f32 %v6471_v27, %v9823_v40  ;;  %v6475_v3 = vadd.f32 %v9830_v17, %v6471_v27 }
0x80d2   :  { %v7970_v62 = vpop.f32.mrf.mxu0 }
0x80d3   :  { %6484 = vrot.lane.b32.xlu0 %v6482_v11, %s8437_s16  ;;  %v7176_v52 = vmul.f32 -1.442695, %v6475_v3 }
0x80d5   :  { %8357 = vpow2.f32 %v7176_v52 }
0x80e2   :  { %v8358_v47 = vpop.eup %8357 }
0x80e3   :  { %v6479_v32 = vadd.f32 1.0, %v8358_v47 }
0x80e5   :  { %8359 = vrcp.f32 %v6479_v32 }
0x80f2   :  { %v8360_v23 = vpop.eup %8359 }
0x80f3   :  { %v6494_v63 = vsub.f32 1.0, %v8360_v23  ;;  %v6500_v21 = vmul.f32 %v8360_v23, %v6397_v61 }
0x8145   :  { %v6485_v56 = vpop.permute.xlu0 %6484 }
0x8146   :  { %v6487_v1 = vmul.f32 %v8360_v23, %v6485_v56 }
0x8148   :  { %6489 = vrot.lane.b32.xlu1 %v6487_v1, %s8437_s16 }
0x81ba   :  { %v6490_v57 = vpop.permute.xlu1 %6489 }
0x81bb   :  { %v6492_v22 = vadd.f32 %v9830_v17, %v6490_v57 }
0x81bd   :  { %8361 = vtanh.f32 %v6492_v22 }
0x81ca   :  { %v8362_v39 = vpop.eup %8361 }
0x81cb   :  { %6496 = vrot.lane.b32.xlu0 %v8362_v39, %s8434_s28 }
0x823d   :  { %v6497_v5 = vpop.permute.xlu0 %6496 }
0x823e   :  { %v6499_v60 = vmul.f32 %v6497_v5, %v6494_v63 }
0x8240   :  { %v6501_v0 = vadd.f32 %v6500_v21, %v6499_v60 }
0x8242   :  { %6503 = vrot.lane.b32.xlu1 %v6501_v0, %s8434_s28 }
0x82b4   :  { %v6504_v30 = vpop.permute.xlu1 %6503 }
0x82b5   :  { %6506 = vst.msk [vmem:[#allocation4 + $0x20] sm:$0xff] %vm78_vm0, %v6504_v30  ;;  %7980 = vmatmul.mubr.msk.f32.vlgmr.msra.gmra.mxu1 %vm78_vm0, %v6504_v30 }
0x82b6   :  { %7994 = vmatpush3.msra.mxu1 %v9769_v59  ;;  %8001 = vmatprep.mubr.msk.f32.mxu1 %vm8433_vm1, %v8431_v9  ;;  %vm6967_vm1 = vcmask 64512  }
0x82b7   :  { %7995 = vmatprep.subr.mxu1 %v8431_v9 }
0x82b8   :  { %7996 = vmatpush3.msra.mxu1 %v9774_v14 }
0x82b9   :  { %7997 = vmatprep.subr.mxu1 %v8431_v9 }
0x82ba   :  { %7998 = vmatpush3.msra.mxu1 %v9782_v25 }
0x82bb   :  { %7999 = vmatprep.subr.mxu1 %v8431_v9 }
0x82bc   :  { %8000 = vmatpush3.msra.mxu1 %v9791_v50  ;;  %v6823_v49 = vld [vmem:[#allocation4 + $0x20] sm:$0xff] }
0x8375   :  { %v6575_v41 = vpop.f32.mrf.mxu1 }
0x8376   :  { %v6586_v53 = vadd.f32 %v6575_v41, %v9823_v40  ;;  %v6579_v59 = vadd.f32 %v9830_v17, %v6575_v41 }
0x8377   :  { %v7981_v33 = vpop.f32.mrf.mxu1 }
0x8378   :  { %6588 = vrot.lane.b32.xlu0 %v6586_v53, %s8437_s16  ;;  %v7178_v26 = vmul.f32 -1.442695, %v6579_v59 }
0x837a   :  { %8363 = vpow2.f32 %v7178_v26 }
0x8387   :  { %v8364_v34 = vpop.eup %8363 }
0x8388   :  { %v6583_v14 = vadd.f32 1.0, %v8364_v34 }
0x838a   :  { %8365 = vrcp.f32 %v6583_v14 }
0x8397   :  { %v8366_v6 = vpop.eup %8365 }
0x8398   :  { %v6598_v36 = vsub.f32 1.0, %v8366_v6  ;;  %v6604_v55 = vmul.f32 %v8366_v6, %v6501_v0 }
0x83ea   :  { %v6589_v29 = vpop.permute.xlu0 %6588 }
0x83eb   :  { %v6591_v25 = vmul.f32 %v8366_v6, %v6589_v29 }
0x83ed   :  { %6593 = vrot.lane.b32.xlu1 %v6591_v25, %s8437_s16 }
0x845f   :  { %v6594_v9 = vpop.permute.xlu1 %6593 }
0x8460   :  { %v6596_v50 = vadd.f32 %v9830_v17, %v6594_v9 }
0x8462   :  { %8367 = vtanh.f32 %v6596_v50 }
0x846f   :  { %v8368_v58 = vpop.eup %8367 }
0x8470   :  { %6600 = vrot.lane.b32.xlu0 %v8368_v58, %s8434_s28 }
0x84e2   :  { %v6601_v18 = vpop.permute.xlu0 %6600 }
0x84e3   :  { %v6603_v54 = vmul.f32 %v6601_v18, %v6598_v36 }
0x84e5   :  { %v9933_v42 = vadd.f32 %v6604_v55, %v6603_v54 }
0x84e7   :  { %6607 = vrot.lane.b32.xlu1 %v9933_v42, %s8434_s28 }
0x8559   :  { %v6608_v43 = vpop.permute.xlu1 %6607 }
0x855a   :  { %6610 = vst.msk [vmem:[#allocation4 + $0x28] sm:$0xff] %vm78_vm0, %v6608_v43  ;;  %7991 = vmatmul.mubr.msk.f32.vlgmr.msra.gmra.mxu0 %vm78_vm0, %v6608_v43 }
0x855b   :  { %8005 = vmatpush3.msra.mxu0 %v6830_v48  ;;  %8012 = vmatprep.mubr.msk.f32.mxu0 %vm78_vm0, %v6819_v44 }
0x855c   :  { %8006 = vmatprep.subr.mxu0 %v6829_v28 }
0x855d   :  { %8007 = vmatpush3.msra.mxu0 %v6829_v28 }
0x855e   :  { %8008 = vmatprep.subr.mxu0 %v6828_v46 }
0x855f   :  { %8009 = vmatpush3.msra.mxu0 %v6828_v46 }
0x8560   :  { %8010 = vmatprep.subr.mxu0 %v6827_v10 }
0x8561   :  { %8011 = vmatpush3.msra.mxu0 %v6827_v10  ;;  %v6824_v38 = vld [vmem:[#allocation4 + $0x28] sm:$0xff] }
0x8562   :  { %8013 = vmatmul.mubr.msk.f32.vlgmr.msra.gmra.mxu0 %vm78_vm0, %v6820_v31 }
0x8563   :  { %8015 = vmatprep.mubr.msk.f32.mxu0 %vm78_vm0, %v6821_v45 }
0x8566   :  { %8016 = vmatmul.mubr.msk.f32.gmra.mxu0 %vm78_vm0, %v6822_v24 }
0x8567   :  { %8018 = vmatprep.mubr.msk.f32.mxu0 %vm78_vm0, %v6823_v49 }
0x856a   :  { %8019 = vmatmul.mubr.msk.f32.gmra.mxu0 %vm78_vm0, %v6824_v38 }
0x861a   :  { %v6679_v19 = vpop.f32.mrf.mxu0 }
0x861b   :  { %v6690_v2 = vadd.f32 %v6679_v19, %v9823_v40  ;;  %v6683_v62 = vadd.f32 %v9830_v17, %v6679_v19 }
0x861c   :  { %v7992_v51 = vpop.f32.mrf.mxu0 }
0x861d   :  { %6692 = vrot.lane.b32.xlu0 %v6690_v2, %s8437_s16  ;;  %v7180_v3 = vmul.f32 -1.442695, %v6683_v62 }
0x861f   :  { %8369 = vpow2.f32 %v7180_v3 }
0x8622   :  { %v8014_v15 = vpop.f32.mrf.mxu0 }
0x8623   :  { %v6934_v37 = vadd.f32 %v8014_v15, %v9959_v35 }
0x8624   :  { %v6928_v8 = vpop.f32.mrf.mxu0 }
0x8625   :  { %6969 = vst.msk [vmem:[%s10034_s12 + $0x8] sm:$0xff] %vm6967_vm1, %v6934_v37  ;;  %v6929_v16 = vadd.f32 %v9959_v35, %v6928_v8 }
0x8626   :  { %v8017_v13 = vpop.f32.mrf.mxu0 }
0x8627   :  { %6968 = vst.msk [vmem:[%s10034_s12] sm:$0xff] %vm6967_vm1, %v6929_v16  ;;  %v6944_v4 = vadd.f32 %v8017_v13, %v9959_v35 }
0x8628   :  { %v6938_v12 = vpop.f32.mrf.mxu0 }
0x8629   :  { %6971 = vst.msk [vmem:[%s10034_s12 + $0x18] sm:$0xff] %vm6967_vm1, %v6944_v4  ;;  %v6939_v20 = vadd.f32 %v9959_v35, %v6938_v12 }
0x862a   :  { %v8020_v61 = vpop.f32.mrf.mxu0 }
0x862b   :  { %6970 = vst.msk [vmem:[%s10034_s12 + $0x10] sm:$0xff] %vm6967_vm1, %v6939_v20  ;;  %v6954_v7 = vadd.f32 %v8020_v61, %v9959_v35 }
0x862c   :  { %v6948_v27 = vpop.f32.mrf.mxu0  ;;  %v8370_v52 = vpop.eup %8369 }
0x862d   :  { %6973 = vst.msk [vmem:[%s10034_s12 + $0x28] sm:$0xff] %vm6967_vm1, %v6954_v7  ;;  %v6949_v11 = vadd.f32 %v9959_v35, %v6948_v27  ;;  %v6687_v47 = vadd.f32 1.0, %v8370_v52 }
0x862f   :  { %6972 = vst.msk [vmem:[%s10034_s12 + $0x20] sm:$0xff] %vm6967_vm1, %v6949_v11  ;;  %8371 = vrcp.f32 %v6687_v47 }
0x863c   :  { %v8372_v32 = vpop.eup %8371 }
0x863d   :  { %v6702_v39 = vsub.f32 1.0, %v8372_v32  ;;  %v6708_v5 = vmul.f32 %v8372_v32, %v9933_v42 }
0x868f   :  { %v6693_v23 = vpop.permute.xlu0 %6692 }
0x8690   :  { %v6695_v56 = vmul.f32 %v8372_v32, %v6693_v23 }
0x8692   :  { %6697 = vrot.lane.b32.xlu1 %v6695_v56, %s8437_s16 }
0x8704   :  { %v6698_v1 = vpop.permute.xlu1 %6697 }
0x8705   :  { %v6700_v57 = vadd.f32 %v9830_v17, %v6698_v1 }
0x8707   :  { %8373 = vtanh.f32 %v6700_v57 }
0x8714   :  { %v8374_v22 = vpop.eup %8373 }
0x8715   :  { %6704 = vrot.lane.b32.xlu0 %v8374_v22, %s8434_s28 }
0x8787   :  { %v6705_v63 = vpop.permute.xlu0 %6704 }
0x8788   :  { %v6707_v21 = vmul.f32 %v6705_v63, %v6702_v39 }
0x878a   :  { %v6709_v60 = vadd.f32 %v6708_v5, %v6707_v21 }
0x878c   :  { %6711 = vrot.lane.b32.xlu1 %v6709_v60, %s8434_s28 }
0x87fe   :  { %v6712_v0 = vpop.permute.xlu1 %6711 }
0x87ff   :  { %6714 = vst.msk [vmem:[#allocation4 + $0x30] sm:$0xff] %vm78_vm0, %v6712_v0  ;;  %8002 = vmatmul.mubr.msk.f32.vlgmr.msra.gmra.mxu1 %vm78_vm0, %v6712_v0 }
0x8806   :  { %v6825_v30 = vld [vmem:[#allocation4 + $0x30] sm:$0xff] }
0x8807   :  { %8021 = vmatprep.mubr.msk.f32.mxu0 %vm78_vm0, %v6825_v30 }
0x88bf   :  { %v6783_v41 = vpop.f32.mrf.mxu1 }
0x88c0   :  { %v6794_v53 = vadd.f32 %v6783_v41, %v9823_v40  ;;  %v6787_v59 = vadd.f32 %v9830_v17, %v6783_v41 }
0x88c1   :  { %v8003_v33 = vpop.f32.mrf.mxu1 }
0x88c2   :  { %6796 = vrot.lane.b32.xlu0 %v6794_v53, %s8437_s16  ;;  %v7182_v26 = vmul.f32 -1.442695, %v6787_v59 }
0x88c4   :  { %8375 = vpow2.f32 %v7182_v26 }
0x88d1   :  { %v8376_v34 = vpop.eup %8375 }
0x88d2   :  { %v6791_v14 = vadd.f32 1.0, %v8376_v34 }
0x88d4   :  { %8377 = vrcp.f32 %v6791_v14 }
0x88e1   :  { %v8378_v6 = vpop.eup %8377 }
0x88e2   :  { %v6806_v48 = vsub.f32 1.0, %v8378_v6  ;;  %v6812_v36 = vmul.f32 %v8378_v6, %v6709_v60 }
0x8934   :  { %v6797_v29 = vpop.permute.xlu0 %6796 }
0x8935   :  { %v6799_v25 = vmul.f32 %v8378_v6, %v6797_v29 }
0x8937   :  { %6801 = vrot.lane.b32.xlu1 %v6799_v25, %s8437_s16 }
0x89a9   :  { %v6802_v9 = vpop.permute.xlu1 %6801 }
0x89aa   :  { %v6804_v50 = vadd.f32 %v9830_v17, %v6802_v9 }
0x89ac   :  { %8379 = vtanh.f32 %v6804_v50 }
0x89b9   :  { %v8380_v40 = vpop.eup %8379 }
0x89ba   :  { %6808 = vrot.lane.b32.xlu0 %v8380_v40, %s8434_s28 }
0x8a2c   :  { %v6809_v58 = vpop.permute.xlu0 %6808 }
0x8a2d   :  { %v6811_v18 = vmul.f32 %v6809_v58, %v6806_v48 }
0x8a2f   :  { %v6813_v55 = vadd.f32 %v6812_v36, %v6811_v18 }
0x8a31   :  { %6815 = vrot.lane.b32.xlu1 %v6813_v55, %s8434_s28 }
0x8aa3   :  { %v6816_v54 = vpop.permute.xlu1 %6815 }
0x8aa4   :  { %6818 = vst.msk [vmem:[#allocation4 + $0x38] sm:$0xff] %vm78_vm0, %v6816_v54 }
0x8aab   :  { %v6826_v42 = vld [vmem:[#allocation4 + $0x38] sm:$0xff] }
0x8aac   :  { %8022 = vmatmul.mubr.msk.f32.gmra.mxu0 %vm78_vm0, %v6826_v42 }
0x8aad   :  { %8415 = shalt.err (!%p8412_p9)
}
0x8aae   :  { %6985 = dma.vmem_to_hbm [thread:$0]  %s6983_s6, 128, %s10033_s11, [#allocation7]  }
0x8b6c   :  { %v8023_v17 = vpop.f32.mrf.mxu0 }
0x8b6d   :  { %v6964_v43 = vadd.f32 %v8023_v17, %v9959_v35 }
0x8b6e   :  { %v6958_v28 = vpop.f32.mrf.mxu0 }
0x8b6f   :  { %6975 = vst.msk [vmem:[%s10034_s12 + $0x38] sm:$0xff] %vm6967_vm1, %v6964_v43  ;;  %v6959_v44 = vadd.f32 %v9959_v35, %v6958_v28 }
0x8b71   :  { %6974 = vst.msk [vmem:[%s10034_s12 + $0x30] sm:$0xff] %vm6967_vm1, %v6959_v44 }
0x8b72   :  { %8426 = dma.done.wait [#allocation7], 128  }
0x8b73   :  { %8427 = vsyncadd [#allocation7], 4294967168 }
0x8b74   :  { %6993 = vsyncpa [#allocation6], 1 }
0x8b75   :  { %6994 = vsyncpa [#allocation7], 1 }

</bundles_post_ra>
